<compile_context>
chip_gen: v7x
topology: tpu7x:2x2x1
jax: 0.10.0
libtpu: 0.0.40
codegen_flags: <defaults>
</compile_context>

<pallas_src>
import functools

import jax
import jax.numpy as jnp
from jax import lax
from jax.experimental import pallas as pl
from jax.experimental.pallas import tpu as pltpu


# ----------------------------------------------------------------------------
# Pallas kernel: one Conv3DLSTMCell step for one batch element.
# Layouts (lane-fused, halos pre-padded in the wrapper):
#   x_ref  : (Tp, Hp, Wp*Cin)   Tp/Hp/Wp = T/H/W + 2*pad
#   h_ref  : (Tp, Hp, Wp*Ch)
#   c_ref  : (T,  H,  W*Ch)
#   outputs: (T,  H,  W*Ch)     lane layout w*Ch + c
# ----------------------------------------------------------------------------
def _cell_kernel(x_ref, h_ref, c_ref,
                 dwx_w_ref,   # (KT*KH*KW, W*Cin)  taps, BN scale folded, tiled over w
                 dwx_sh_ref,  # (1, W*Cin)         folded bias + BN shift
                 dwh_w_ref,   # (KT*KH*KW, W*Ch)
                 dwh_sh_ref,  # (1, W*Ch)
                 bxh_ref,     # (W*Cin + W*Ch, 4*W*Ch)  block-diag pointwise weight
                 pw_sh_ref,   # (1, 4*W*Ch)        folded pointwise bias + BN shift
                 h_out_ref, c_out_ref,
                 *, T, H, W, KT, KH, KW, Cin, Ch):
    WCin, WCh = W * Cin, W * Ch

    # ---- depthwise Conv3d (groups == channels) on the VPU.
    # Hoisted realignment: one shifted-slab load per (dh, dw); the dt loop
    # slices only the leading axis (free).  Accumulators start from tap 0.
    accx = None
    acch = None
    for dh in range(KH):
        for dw in range(KW):
            sx = x_ref[:, dh:dh + H, dw * Cin:dw * Cin + WCin].astype(jnp.float32)
            sh = h_ref[:, dh:dh + H, dw * Ch:dw * Ch + WCh].astype(jnp.float32)
            for dt in range(KT):
                tap = (dt * KH + dh) * KW + dw
                wx = dwx_w_ref[tap:tap + 1, :].reshape(1, 1, WCin)
                wh = dwh_w_ref[tap:tap + 1, :].reshape(1, 1, WCh)
                px = sx[dt:dt + T] * wx
                ph_ = sh[dt:dt + T] * wh
                accx = px if accx is None else accx + px
                acch = ph_ if acch is None else acch + ph_

    # conv bias + BN (shift only; scale already folded) + ReLU6
    yx = jnp.clip(accx + dwx_sh_ref[...].reshape(1, 1, WCin), 0.0, 6.0)
    yh = jnp.clip(acch + dwh_sh_ref[...].reshape(1, 1, WCh), 0.0, 6.0)

    # ---- pointwise 1x1x1 conv: single lane-dense MXU matmul, K = WCin + WCh.
    # (Block-diag, gate-major packed weight -> gate slices are aligned
    #  128-lane windows matching the c layout.)
    y = jnp.concatenate([yx.reshape(T * H, WCin), yh.reshape(T * H, WCh)],
                        axis=-1)
    z = jnp.dot(y, bxh_ref[...], preferred_element_type=jnp.float32)
    z = z + pw_sh_ref[...]

    # ---- LSTM gates: aligned (W*Ch)-lane slices matching the c layout.
    i_g = jax.nn.sigmoid(z[:, 0 * WCh:1 * WCh])
    f_g = jax.nn.sigmoid(z[:, 1 * WCh:2 * WCh])
    o_g = jax.nn.sigmoid(z[:, 2 * WCh:3 * WCh])
    g_g = jnp.tanh(z[:, 3 * WCh:4 * WCh])

    c_cur = c_ref[...].reshape(T * H, WCh).astype(jnp.float32)
    c_next = f_g * c_cur + i_g * g_g
    h_next = o_g * jnp.tanh(c_next)

    h_out_ref[...] = h_next.reshape(T, H, WCh).astype(h_out_ref.dtype)
    c_out_ref[...] = c_next.reshape(T, H, WCh).astype(c_out_ref.dtype)


# ----------------------------------------------------------------------------
# Wrapper: NCDHW <-> lane-fused glue (plus T/H/W halo pad) + pallas_call.
# ----------------------------------------------------------------------------
def conv3d_lstm_cell(input_tensor, cur_state, packed, kernel_size):
    """input_tensor: [B, Cin, T, H, W]; cur_state = (h_cur, c_cur) each
    [B, Ch, T, H, W] (PyTorch NCDHW). Returns (h_next, c_next) in NCDHW."""
    h_cur, c_cur = cur_state
    B, Cin, T, H, W = input_tensor.shape
    Ch = h_cur.shape[1]
    KT, KH, KW = kernel_size
    pt, ph, pw = KT // 2, KH // 2, KW // 2
    Tp, Hp, Wp = T + 2 * pt, H + 2 * ph, W + 2 * pw
    WCin, WCh = W * Cin, W * Ch
    K3 = KT * KH * KW

    def fuse(a, C, do_pad):
        a = a.transpose(0, 2, 3, 4, 1)                     # -> [B, T, H, W, C]
        if do_pad:
            a = jnp.pad(a, ((0, 0), (pt, pt), (ph, ph), (pw, pw), (0, 0)))
            return a.reshape(B, Tp, Hp, Wp * C)
        return a.reshape(B, T, H, W * C)

    xf = fuse(input_tensor, Cin, True)   # [B, Tp, Hp, Wp*Cin]
    hf = fuse(h_cur, Ch, True)           # [B, Tp, Hp, Wp*Ch]
    cf = fuse(c_cur, Ch, False)          # [B, T,  H,  W*Ch]

    kern = functools.partial(_cell_kernel, T=T, H=H, W=W,
                             KT=KT, KH=KH, KW=KW, Cin=Cin, Ch=Ch)
    blk = lambda b: (b, 0, 0, 0)
    rep = lambda b: (0, 0)

    h_f, c_f = pl.pallas_call(
        kern,
        out_shape=(jax.ShapeDtypeStruct((B, T, H, WCh), input_tensor.dtype),
                   jax.ShapeDtypeStruct((B, T, H, WCh), input_tensor.dtype)),
        grid_spec=pltpu.PrefetchScalarGridSpec(
            num_scalar_prefetch=0,
            grid=(B,),
            in_specs=[
                pl.BlockSpec((None, Tp, Hp, Wp * Cin), blk),
                pl.BlockSpec((None, Tp, Hp, Wp * Ch), blk),
                pl.BlockSpec((None, T, H, WCh), blk),
                pl.BlockSpec((K3, WCin), rep),
                pl.BlockSpec((1, WCin), rep),
                pl.BlockSpec((K3, WCh), rep),
                pl.BlockSpec((1, WCh), rep),
                pl.BlockSpec((WCin + WCh, 4 * WCh), rep),
                pl.BlockSpec((1, 4 * WCh), rep),
            ],
            out_specs=(pl.BlockSpec((None, T, H, WCh), blk),
                       pl.BlockSpec((None, T, H, WCh), blk)),
        ),
        compiler_params=pltpu.CompilerParams(
            dimension_semantics=("parallel",)),
    )(xf, hf, cf, packed["dwx_w"], packed["dwx_sh"], packed["dwh_w"],
      packed["dwh_sh"], packed["bxh"], packed["pw_sh"])

    def unfuse(a, C):
        return a.reshape(B, T, H, W, C).transpose(0, 4, 1, 2, 3)

    return unfuse(h_f, Ch), unfuse(c_f, Ch)


# ----------------------------------------------------------------------------
# Synthetic "PyTorch" parameters (raw) and host-side packing / BN folding.
# ----------------------------------------------------------------------------
def init_raw_params(key, in_ch, hid_ch, kernel_size):
    KT, KH, KW = kernel_size
    K3 = KT * KH * KW
    Ccomb = in_ch + hid_ch
    ks = jax.random.split(key, 12)
    return dict(
        dw_w=0.2 * jax.random.normal(ks[0], (K3, Ccomb), jnp.float32),
        dw_b=0.1 * jax.random.normal(ks[1], (Ccomb,), jnp.float32),
        bn1_g=1.0 + 0.1 * jax.random.normal(ks[2], (Ccomb,), jnp.float32),
        bn1_b=0.1 * jax.random.normal(ks[3], (Ccomb,), jnp.float32),
        bn1_m=0.05 * jax.random.normal(ks[4], (Ccomb,), jnp.float32),
        bn1_v=1.0 + 0.1 * jax.nn.softplus(
            jax.random.normal(ks[5], (Ccomb,), jnp.float32)),
        pw_w=jax.random.normal(ks[6], (Ccomb, 4 * hid_ch), jnp.float32)
             / jnp.sqrt(Ccomb),
        pw_b=0.1 * jax.random.normal(ks[7], (4 * hid_ch,), jnp.float32),
        bn2_g=1.0 + 0.1 * jax.random.normal(ks[8], (4 * hid_ch,), jnp.float32),
        bn2_b=0.1 * jax.random.normal(ks[9], (4 * hid_ch,), jnp.float32),
        bn2_m=0.05 * jax.random.normal(ks[10], (4 * hid_ch,), jnp.float32),
        bn2_v=1.0 + 0.1 * jax.nn.softplus(
            jax.random.normal(ks[11], (4 * hid_ch,), jnp.float32)),
    )


def pack_params(raw, Cin, Ch, W, kernel_size, eps=1e-5):
    """Fold BN (eval) into weights and pack for the lane-fused kernel layout."""
    s1 = raw["bn1_g"] / jnp.sqrt(raw["bn1_v"] + eps)                 # (Ccomb,)
    sh1 = (raw["dw_b"] - raw["bn1_m"]) * s1 + raw["bn1_b"]           # (Ccomb,)
    dw_fold = raw["dw_w"] * s1[None, :]                              # (K3, Ccomb)

    s2 = raw["bn2_g"] / jnp.sqrt(raw["bn2_v"] + eps)                 # (4Ch,)
    sh2 = (raw["pw_b"] - raw["bn2_m"]) * s2 + raw["bn2_b"]           # (4Ch,)
    pw_fold = raw["pw_w"] * s2[None, :]                              # (Ccomb, 4Ch)

    # depthwise taps: split x/h channel groups, tile over w -> lane w*C + c.
    dwx_w = jnp.tile(dw_fold[:, :Cin], (1, W))                       # (K3, W*Cin)
    dwh_w = jnp.tile(dw_fold[:, Cin:], (1, W))                       # (K3, W*Ch)
    dwx_sh = jnp.tile(sh1[:Cin], W).reshape(1, W * Cin)
    dwh_sh = jnp.tile(sh1[Cin:], W).reshape(1, W * Ch)

    # block-diagonal pointwise weights, gate-major output lanes, fused K axis:
    #   bxh[row, g*(W*Ch) + v*Ch + c], rows 0..W*Cin-1 for yx (w*Cin + c'),
    #   rows W*Cin.. for yh (w*Ch + c').
    eye_w = jnp.eye(W, dtype=jnp.float32)
    pwx_g = pw_fold[:Cin].reshape(Cin, 4, Ch)
    pwh_g = pw_fold[Cin:].reshape(Ch, 4, Ch)
    bx = jnp.einsum("wv,cgd->wcgvd", eye_w, pwx_g).reshape(W * Cin, 4 * W * Ch)
    bh = jnp.einsum("wv,cgd->wcgvd", eye_w, pwh_g).reshape(W * Ch, 4 * W * Ch)
    bxh = jnp.concatenate([bx, bh], axis=0)          # (W*Cin + W*Ch, 4*W*Ch)
    pw_sh = jnp.broadcast_to(sh2.reshape(4, 1, Ch),
                             (4, W, Ch)).reshape(1, 4 * W * Ch)
    return dict(dwx_w=dwx_w, dwx_sh=dwx_sh, dwh_w=dwh_w, dwh_sh=dwh_sh,
                bxh=bxh, pw_sh=pw_sh)


# ----------------------------------------------------------------------------
# Pure-JAX reference (original, unfolded parameterization).
# ----------------------------------------------------------------------------
def _ref_cell(input_tensor, cur_state, raw, kernel_size, eps=1e-5):
    h_cur, c_cur = cur_state
    KT, KH, KW = kernel_size
    Cin, Ch = input_tensor.shape[1], h_cur.shape[1]
    Ccomb = Cin + Ch
    comb = jnp.concatenate([input_tensor, h_cur], axis=1)            # NCDHW
    comb = comb.transpose(0, 2, 3, 4, 1)                             # NDHWC
    rhs = raw["dw_w"].reshape(KT, KH, KW, 1, Ccomb)
    y = lax.conv_general_dilated(
        comb, rhs, window_strides=(1, 1, 1),
        padding=((KT // 2,) * 2, (KH // 2,) * 2, (KW // 2,) * 2),
        dimension_numbers=("NDHWC", "DHWIO", "NDHWC"),
        feature_group_count=Ccomb,
        precision=lax.Precision.HIGHEST)
    y = y + raw["dw_b"]
    s1 = raw["bn1_g"] / jnp.sqrt(raw["bn1_v"] + eps)
    y = y * s1 + (raw["bn1_b"] - raw["bn1_m"] * s1)
    y = jnp.clip(y, 0.0, 6.0)
    z = jnp.einsum("bthwc,cd->bthwd", y, raw["pw_w"],
                   precision=lax.Precision.HIGHEST)
    z = z + raw["pw_b"]
    s2 = raw["bn2_g"] / jnp.sqrt(raw["bn2_v"] + eps)
    z = z * s2 + (raw["bn2_b"] - raw["bn2_m"] * s2)
    i_g = jax.nn.sigmoid(z[..., 0 * Ch:1 * Ch])
    f_g = jax.nn.sigmoid(z[..., 1 * Ch:2 * Ch])
    o_g = jax.nn.sigmoid(z[..., 2 * Ch:3 * Ch])
    g_g = jnp.tanh(z[..., 3 * Ch:4 * Ch])
    c_cur_l = c_cur.transpose(0, 2, 3, 4, 1)
    c_next = f_g * c_cur_l + i_g * g_g
    h_next = o_g * jnp.tanh(c_next)
    return h_next.transpose(0, 4, 1, 2, 3), c_next.transpose(0, 4, 1, 2, 3)


if __name__ == "__main__":
    key = jax.random.PRNGKey(0)
    B, Cin, Ch = 2, 8, 8
    T, H, W = 8, 8, 16          # W*Ch = 128 -> fully lane-dense blocks
    kernel_size = (3, 3, 3)

    k1, k2, k3, k4 = jax.random.split(key, 4)
    x = jax.random.normal(k1, (B, Cin, T, H, W), jnp.float32)
    h0 = jax.random.normal(k2, (B, Ch, T, H, W), jnp.float32)
    c0 = jax.random.normal(k3, (B, Ch, T, H, W), jnp.float32)

    raw = init_raw_params(k4, Cin, Ch, kernel_size)
    packed = pack_params(raw, Cin, Ch, W, kernel_size)

    h_next, c_next = conv3d_lstm_cell(x, (h0, c0), packed, kernel_size)
    h_next, c_next = jax.block_until_ready((h_next, c_next))

    # Correctness check vs pure-JAX reference (tolerance covers MXU
    # default-precision f32 matmul on TPU; observed error ~1e-3).
    h_ref, c_ref = _ref_cell(x, (h0, c0), raw, kernel_size)
    err_h = float(jnp.max(jnp.abs(h_next - h_ref)))
    err_c = float(jnp.max(jnp.abs(c_next - c_ref)))
    assert jnp.allclose(h_next, h_ref, atol=2e-2, rtol=2e-2), ("h", err_h)
    assert jnp.allclose(c_next, c_ref, atol=2e-2, rtol=2e-2), ("c", err_c)

    print("KERNEL_OK")
</pallas_src>

<mosaic_0001>
module attributes {stable_mosaic.version = 11 : i64} {
  func.func @_cell_kernel(%arg0: i32, %arg1: memref<1x10x10x144xf32, #tpu.memory_space<vmem>>, %arg2: memref<1x10x10x144xf32, #tpu.memory_space<vmem>>, %arg3: memref<1x8x8x128xf32, #tpu.memory_space<vmem>>, %arg4: memref<27x128xf32, #tpu.memory_space<vmem>>, %arg5: memref<1x128xf32, #tpu.memory_space<vmem>>, %arg6: memref<27x128xf32, #tpu.memory_space<vmem>>, %arg7: memref<1x128xf32, #tpu.memory_space<vmem>>, %arg8: memref<256x512xf32, #tpu.memory_space<vmem>>, %arg9: memref<1x512xf32, #tpu.memory_space<vmem>>, %arg10: memref<1x8x8x128xf32, #tpu.memory_space<vmem>>, %arg11: memref<1x8x8x128xf32, #tpu.memory_space<vmem>>) attributes {dimension_semantics = [#tpu.dimension_semantics<parallel>], iteration_bounds = array<i64: 2>, scalar_prefetch = 0 : i64, scratch_operands = 0 : i64, tpu.core_type = #tpu.core_type<tc>, window_params = [{transform_indices = @transform_0, window_bounds = array<i64: 1, 10, 10, 144>}, {transform_indices = @transform_1, window_bounds = array<i64: 1, 10, 10, 144>}, {transform_indices = @transform_2, window_bounds = array<i64: 1, 8, 8, 128>}, {pipeline_mode = #tpu.pipeline_mode<synchronous>, transform_indices = @transform_3, window_bounds = array<i64: 27, 128>}, {pipeline_mode = #tpu.pipeline_mode<synchronous>, transform_indices = @transform_4, window_bounds = array<i64: 1, 128>}, {pipeline_mode = #tpu.pipeline_mode<synchronous>, transform_indices = @transform_5, window_bounds = array<i64: 27, 128>}, {pipeline_mode = #tpu.pipeline_mode<synchronous>, transform_indices = @transform_6, window_bounds = array<i64: 1, 128>}, {pipeline_mode = #tpu.pipeline_mode<synchronous>, transform_indices = @transform_7, window_bounds = array<i64: 256, 512>}, {pipeline_mode = #tpu.pipeline_mode<synchronous>, transform_indices = @transform_8, window_bounds = array<i64: 1, 512>}, {transform_indices = @transform_9, window_bounds = array<i64: 1, 8, 8, 128>}, {transform_indices = @transform_10, window_bounds = array<i64: 1, 8, 8, 128>}]} {
    %c0 = arith.constant 0 : index
    %c0_0 = arith.constant 0 : index
    %c0_1 = arith.constant 0 : index
    %c0_2 = arith.constant 0 : index
    %0 = vector.load %arg1[%c0, %c0_0, %c0_1, %c0_2] : memref<1x10x10x144xf32, #tpu.memory_space<vmem>>, vector<1x10x8x128xf32>
    %1 = vector.shape_cast %0 : vector<1x10x8x128xf32> to vector<10x8x128xf32>
    %c0_3 = arith.constant 0 : index
    %c0_4 = arith.constant 0 : index
    %c0_5 = arith.constant 0 : index
    %c0_6 = arith.constant 0 : index
    %2 = vector.load %arg2[%c0_3, %c0_4, %c0_5, %c0_6] : memref<1x10x10x144xf32, #tpu.memory_space<vmem>>, vector<1x10x8x128xf32>
    %3 = vector.shape_cast %2 : vector<1x10x8x128xf32> to vector<10x8x128xf32>
    %c0_7 = arith.constant 0 : index
    %c0_8 = arith.constant 0 : index
    %4 = vector.load %arg4[%c0_7, %c0_8] : memref<27x128xf32, #tpu.memory_space<vmem>>, vector<1x128xf32>
    %5 = vector.shape_cast %4 : vector<1x128xf32> to vector<1x1x128xf32>
    %c0_9 = arith.constant 0 : index
    %c0_10 = arith.constant 0 : index
    %6 = vector.load %arg6[%c0_9, %c0_10] : memref<27x128xf32, #tpu.memory_space<vmem>>, vector<1x128xf32>
    %7 = vector.shape_cast %6 : vector<1x128xf32> to vector<1x1x128xf32>
    %8 = vector.extract_strided_slice %1 {offsets = [0, 0, 0], sizes = [8, 8, 128], strides = [1, 1, 1]} : vector<10x8x128xf32> to vector<8x8x128xf32>
    %9 = vector.broadcast %5 : vector<1x1x128xf32> to vector<8x8x128xf32>
    %10 = arith.mulf %8, %9 : vector<8x8x128xf32>
    %11 = vector.extract_strided_slice %3 {offsets = [0, 0, 0], sizes = [8, 8, 128], strides = [1, 1, 1]} : vector<10x8x128xf32> to vector<8x8x128xf32>
    %12 = vector.broadcast %7 : vector<1x1x128xf32> to vector<8x8x128xf32>
    %13 = arith.mulf %11, %12 : vector<8x8x128xf32>
    %c9 = arith.constant 9 : index
    %c0_11 = arith.constant 0 : index
    %14 = vector.load %arg4[%c9, %c0_11] : memref<27x128xf32, #tpu.memory_space<vmem>>, vector<1x128xf32>
    %15 = vector.shape_cast %14 : vector<1x128xf32> to vector<1x1x128xf32>
    %c9_12 = arith.constant 9 : index
    %c0_13 = arith.constant 0 : index
    %16 = vector.load %arg6[%c9_12, %c0_13] : memref<27x128xf32, #tpu.memory_space<vmem>>, vector<1x128xf32>
    %17 = vector.shape_cast %16 : vector<1x128xf32> to vector<1x1x128xf32>
    %18 = vector.extract_strided_slice %1 {offsets = [1, 0, 0], sizes = [8, 8, 128], strides = [1, 1, 1]} : vector<10x8x128xf32> to vector<8x8x128xf32>
    %19 = vector.broadcast %15 : vector<1x1x128xf32> to vector<8x8x128xf32>
    %20 = arith.mulf %18, %19 : vector<8x8x128xf32>
    %21 = vector.extract_strided_slice %3 {offsets = [1, 0, 0], sizes = [8, 8, 128], strides = [1, 1, 1]} : vector<10x8x128xf32> to vector<8x8x128xf32>
    %22 = vector.broadcast %17 : vector<1x1x128xf32> to vector<8x8x128xf32>
    %23 = arith.mulf %21, %22 : vector<8x8x128xf32>
    %24 = arith.addf %10, %20 : vector<8x8x128xf32>
    %25 = arith.addf %13, %23 : vector<8x8x128xf32>
    %c18 = arith.constant 18 : index
    %c0_14 = arith.constant 0 : index
    %26 = vector.load %arg4[%c18, %c0_14] : memref<27x128xf32, #tpu.memory_space<vmem>>, vector<1x128xf32>
    %27 = vector.shape_cast %26 : vector<1x128xf32> to vector<1x1x128xf32>
    %c18_15 = arith.constant 18 : index
    %c0_16 = arith.constant 0 : index
    %28 = vector.load %arg6[%c18_15, %c0_16] : memref<27x128xf32, #tpu.memory_space<vmem>>, vector<1x128xf32>
    %29 = vector.shape_cast %28 : vector<1x128xf32> to vector<1x1x128xf32>
    %30 = vector.extract_strided_slice %1 {offsets = [2, 0, 0], sizes = [8, 8, 128], strides = [1, 1, 1]} : vector<10x8x128xf32> to vector<8x8x128xf32>
    %31 = vector.broadcast %27 : vector<1x1x128xf32> to vector<8x8x128xf32>
    %32 = arith.mulf %30, %31 : vector<8x8x128xf32>
    %33 = vector.extract_strided_slice %3 {offsets = [2, 0, 0], sizes = [8, 8, 128], strides = [1, 1, 1]} : vector<10x8x128xf32> to vector<8x8x128xf32>
    %34 = vector.broadcast %29 : vector<1x1x128xf32> to vector<8x8x128xf32>
    %35 = arith.mulf %33, %34 : vector<8x8x128xf32>
    %36 = arith.addf %24, %32 : vector<8x8x128xf32>
    %37 = arith.addf %25, %35 : vector<8x8x128xf32>
    %c0_17 = arith.constant 0 : index
    %c0_18 = arith.constant 0 : index
    %c0_19 = arith.constant 0 : index
    %c8 = arith.constant 8 : index
    %38 = vector.load %arg1[%c0_17, %c0_18, %c0_19, %c8] : memref<1x10x10x144xf32, #tpu.memory_space<vmem>>, vector<1x10x8x128xf32>
    %39 = vector.shape_cast %38 : vector<1x10x8x128xf32> to vector<10x8x128xf32>
    %c0_20 = arith.constant 0 : index
    %c0_21 = arith.constant 0 : index
    %c0_22 = arith.constant 0 : index
    %c8_23 = arith.constant 8 : index
    %40 = vector.load %arg2[%c0_20, %c0_21, %c0_22, %c8_23] : memref<1x10x10x144xf32, #tpu.memory_space<vmem>>, vector<1x10x8x128xf32>
    %41 = vector.shape_cast %40 : vector<1x10x8x128xf32> to vector<10x8x128xf32>
    %c1 = arith.constant 1 : index
    %c0_24 = arith.constant 0 : index
    %42 = vector.load %arg4[%c1, %c0_24] : memref<27x128xf32, #tpu.memory_space<vmem>>, vector<1x128xf32>
    %43 = vector.shape_cast %42 : vector<1x128xf32> to vector<1x1x128xf32>
    %c1_25 = arith.constant 1 : index
    %c0_26 = arith.constant 0 : index
    %44 = vector.load %arg6[%c1_25, %c0_26] : memref<27x128xf32, #tpu.memory_space<vmem>>, vector<1x128xf32>
    %45 = vector.shape_cast %44 : vector<1x128xf32> to vector<1x1x128xf32>
    %46 = vector.extract_strided_slice %39 {offsets = [0, 0, 0], sizes = [8, 8, 128], strides = [1, 1, 1]} : vector<10x8x128xf32> to vector<8x8x128xf32>
    %47 = vector.broadcast %43 : vector<1x1x128xf32> to vector<8x8x128xf32>
    %48 = arith.mulf %46, %47 : vector<8x8x128xf32>
    %49 = vector.extract_strided_slice %41 {offsets = [0, 0, 0], sizes = [8, 8, 128], strides = [1, 1, 1]} : vector<10x8x128xf32> to vector<8x8x128xf32>
    %50 = vector.broadcast %45 : vector<1x1x128xf32> to vector<8x8x128xf32>
    %51 = arith.mulf %49, %50 : vector<8x8x128xf32>
    %52 = arith.addf %36, %48 : vector<8x8x128xf32>
    %53 = arith.addf %37, %51 : vector<8x8x128xf32>
    %c10 = arith.constant 10 : index
    %c0_27 = arith.constant 0 : index
    %54 = vector.load %arg4[%c10, %c0_27] : memref<27x128xf32, #tpu.memory_space<vmem>>, vector<1x128xf32>
    %55 = vector.shape_cast %54 : vector<1x128xf32> to vector<1x1x128xf32>
    %c10_28 = arith.constant 10 : index
    %c0_29 = arith.constant 0 : index
    %56 = vector.load %arg6[%c10_28, %c0_29] : memref<27x128xf32, #tpu.memory_space<vmem>>, vector<1x128xf32>
    %57 = vector.shape_cast %56 : vector<1x128xf32> to vector<1x1x128xf32>
    %58 = vector.extract_strided_slice %39 {offsets = [1, 0, 0], sizes = [8, 8, 128], strides = [1, 1, 1]} : vector<10x8x128xf32> to vector<8x8x128xf32>
    %59 = vector.broadcast %55 : vector<1x1x128xf32> to vector<8x8x128xf32>
    %60 = arith.mulf %58, %59 : vector<8x8x128xf32>
    %61 = vector.extract_strided_slice %41 {offsets = [1, 0, 0], sizes = [8, 8, 128], strides = [1, 1, 1]} : vector<10x8x128xf32> to vector<8x8x128xf32>
    %62 = vector.broadcast %57 : vector<1x1x128xf32> to vector<8x8x128xf32>
    %63 = arith.mulf %61, %62 : vector<8x8x128xf32>
    %64 = arith.addf %52, %60 : vector<8x8x128xf32>
    %65 = arith.addf %53, %63 : vector<8x8x128xf32>
    %c19 = arith.constant 19 : index
    %c0_30 = arith.constant 0 : index
    %66 = vector.load %arg4[%c19, %c0_30] : memref<27x128xf32, #tpu.memory_space<vmem>>, vector<1x128xf32>
    %67 = vector.shape_cast %66 : vector<1x128xf32> to vector<1x1x128xf32>
    %c19_31 = arith.constant 19 : index
    %c0_32 = arith.constant 0 : index
    %68 = vector.load %arg6[%c19_31, %c0_32] : memref<27x128xf32, #tpu.memory_space<vmem>>, vector<1x128xf32>
    %69 = vector.shape_cast %68 : vector<1x128xf32> to vector<1x1x128xf32>
    %70 = vector.extract_strided_slice %39 {offsets = [2, 0, 0], sizes = [8, 8, 128], strides = [1, 1, 1]} : vector<10x8x128xf32> to vector<8x8x128xf32>
    %71 = vector.broadcast %67 : vector<1x1x128xf32> to vector<8x8x128xf32>
    %72 = arith.mulf %70, %71 : vector<8x8x128xf32>
    %73 = vector.extract_strided_slice %41 {offsets = [2, 0, 0], sizes = [8, 8, 128], strides = [1, 1, 1]} : vector<10x8x128xf32> to vector<8x8x128xf32>
    %74 = vector.broadcast %69 : vector<1x1x128xf32> to vector<8x8x128xf32>
    %75 = arith.mulf %73, %74 : vector<8x8x128xf32>
    %76 = arith.addf %64, %72 : vector<8x8x128xf32>
    %77 = arith.addf %65, %75 : vector<8x8x128xf32>
    %c0_33 = arith.constant 0 : index
    %c0_34 = arith.constant 0 : index
    %c0_35 = arith.constant 0 : index
    %c16 = arith.constant 16 : index
    %78 = vector.load %arg1[%c0_33, %c0_34, %c0_35, %c16] : memref<1x10x10x144xf32, #tpu.memory_space<vmem>>, vector<1x10x8x128xf32>
    %79 = vector.shape_cast %78 : vector<1x10x8x128xf32> to vector<10x8x128xf32>
    %c0_36 = arith.constant 0 : index
    %c0_37 = arith.constant 0 : index
    %c0_38 = arith.constant 0 : index
    %c16_39 = arith.constant 16 : index
    %80 = vector.load %arg2[%c0_36, %c0_37, %c0_38, %c16_39] : memref<1x10x10x144xf32, #tpu.memory_space<vmem>>, vector<1x10x8x128xf32>
    %81 = vector.shape_cast %80 : vector<1x10x8x128xf32> to vector<10x8x128xf32>
    %c2 = arith.constant 2 : index
    %c0_40 = arith.constant 0 : index
    %82 = vector.load %arg4[%c2, %c0_40] : memref<27x128xf32, #tpu.memory_space<vmem>>, vector<1x128xf32>
    %83 = vector.shape_cast %82 : vector<1x128xf32> to vector<1x1x128xf32>
    %c2_41 = arith.constant 2 : index
    %c0_42 = arith.constant 0 : index
    %84 = vector.load %arg6[%c2_41, %c0_42] : memref<27x128xf32, #tpu.memory_space<vmem>>, vector<1x128xf32>
    %85 = vector.shape_cast %84 : vector<1x128xf32> to vector<1x1x128xf32>
    %86 = vector.extract_strided_slice %79 {offsets = [0, 0, 0], sizes = [8, 8, 128], strides = [1, 1, 1]} : vector<10x8x128xf32> to vector<8x8x128xf32>
    %87 = vector.broadcast %83 : vector<1x1x128xf32> to vector<8x8x128xf32>
    %88 = arith.mulf %86, %87 : vector<8x8x128xf32>
    %89 = vector.extract_strided_slice %81 {offsets = [0, 0, 0], sizes = [8, 8, 128], strides = [1, 1, 1]} : vector<10x8x128xf32> to vector<8x8x128xf32>
    %90 = vector.broadcast %85 : vector<1x1x128xf32> to vector<8x8x128xf32>
    %91 = arith.mulf %89, %90 : vector<8x8x128xf32>
    %92 = arith.addf %76, %88 : vector<8x8x128xf32>
    %93 = arith.addf %77, %91 : vector<8x8x128xf32>
    %c11 = arith.constant 11 : index
    %c0_43 = arith.constant 0 : index
    %94 = vector.load %arg4[%c11, %c0_43] : memref<27x128xf32, #tpu.memory_space<vmem>>, vector<1x128xf32>
    %95 = vector.shape_cast %94 : vector<1x128xf32> to vector<1x1x128xf32>
    %c11_44 = arith.constant 11 : index
    %c0_45 = arith.constant 0 : index
    %96 = vector.load %arg6[%c11_44, %c0_45] : memref<27x128xf32, #tpu.memory_space<vmem>>, vector<1x128xf32>
    %97 = vector.shape_cast %96 : vector<1x128xf32> to vector<1x1x128xf32>
    %98 = vector.extract_strided_slice %79 {offsets = [1, 0, 0], sizes = [8, 8, 128], strides = [1, 1, 1]} : vector<10x8x128xf32> to vector<8x8x128xf32>
    %99 = vector.broadcast %95 : vector<1x1x128xf32> to vector<8x8x128xf32>
    %100 = arith.mulf %98, %99 : vector<8x8x128xf32>
    %101 = vector.extract_strided_slice %81 {offsets = [1, 0, 0], sizes = [8, 8, 128], strides = [1, 1, 1]} : vector<10x8x128xf32> to vector<8x8x128xf32>
    %102 = vector.broadcast %97 : vector<1x1x128xf32> to vector<8x8x128xf32>
    %103 = arith.mulf %101, %102 : vector<8x8x128xf32>
    %104 = arith.addf %92, %100 : vector<8x8x128xf32>
    %105 = arith.addf %93, %103 : vector<8x8x128xf32>
    %c20 = arith.constant 20 : index
    %c0_46 = arith.constant 0 : index
    %106 = vector.load %arg4[%c20, %c0_46] : memref<27x128xf32, #tpu.memory_space<vmem>>, vector<1x128xf32>
    %107 = vector.shape_cast %106 : vector<1x128xf32> to vector<1x1x128xf32>
    %c20_47 = arith.constant 20 : index
    %c0_48 = arith.constant 0 : index
    %108 = vector.load %arg6[%c20_47, %c0_48] : memref<27x128xf32, #tpu.memory_space<vmem>>, vector<1x128xf32>
    %109 = vector.shape_cast %108 : vector<1x128xf32> to vector<1x1x128xf32>
    %110 = vector.extract_strided_slice %79 {offsets = [2, 0, 0], sizes = [8, 8, 128], strides = [1, 1, 1]} : vector<10x8x128xf32> to vector<8x8x128xf32>
    %111 = vector.broadcast %107 : vector<1x1x128xf32> to vector<8x8x128xf32>
    %112 = arith.mulf %110, %111 : vector<8x8x128xf32>
    %113 = vector.extract_strided_slice %81 {offsets = [2, 0, 0], sizes = [8, 8, 128], strides = [1, 1, 1]} : vector<10x8x128xf32> to vector<8x8x128xf32>
    %114 = vector.broadcast %109 : vector<1x1x128xf32> to vector<8x8x128xf32>
    %115 = arith.mulf %113, %114 : vector<8x8x128xf32>
    %116 = arith.addf %104, %112 : vector<8x8x128xf32>
    %117 = arith.addf %105, %115 : vector<8x8x128xf32>
    %c0_49 = arith.constant 0 : index
    %c0_50 = arith.constant 0 : index
    %c1_51 = arith.constant 1 : index
    %c0_52 = arith.constant 0 : index
    %118 = vector.load %arg1[%c0_49, %c0_50, %c1_51, %c0_52] : memref<1x10x10x144xf32, #tpu.memory_space<vmem>>, vector<1x10x8x128xf32>
    %119 = vector.shape_cast %118 : vector<1x10x8x128xf32> to vector<10x8x128xf32>
    %c0_53 = arith.constant 0 : index
    %c0_54 = arith.constant 0 : index
    %c1_55 = arith.constant 1 : index
    %c0_56 = arith.constant 0 : index
    %120 = vector.load %arg2[%c0_53, %c0_54, %c1_55, %c0_56] : memref<1x10x10x144xf32, #tpu.memory_space<vmem>>, vector<1x10x8x128xf32>
    %121 = vector.shape_cast %120 : vector<1x10x8x128xf32> to vector<10x8x128xf32>
    %c3 = arith.constant 3 : index
    %c0_57 = arith.constant 0 : index
    %122 = vector.load %arg4[%c3, %c0_57] : memref<27x128xf32, #tpu.memory_space<vmem>>, vector<1x128xf32>
    %123 = vector.shape_cast %122 : vector<1x128xf32> to vector<1x1x128xf32>
    %c3_58 = arith.constant 3 : index
    %c0_59 = arith.constant 0 : index
    %124 = vector.load %arg6[%c3_58, %c0_59] : memref<27x128xf32, #tpu.memory_space<vmem>>, vector<1x128xf32>
    %125 = vector.shape_cast %124 : vector<1x128xf32> to vector<1x1x128xf32>
    %126 = vector.extract_strided_slice %119 {offsets = [0, 0, 0], sizes = [8, 8, 128], strides = [1, 1, 1]} : vector<10x8x128xf32> to vector<8x8x128xf32>
    %127 = vector.broadcast %123 : vector<1x1x128xf32> to vector<8x8x128xf32>
    %128 = arith.mulf %126, %127 : vector<8x8x128xf32>
    %129 = vector.extract_strided_slice %121 {offsets = [0, 0, 0], sizes = [8, 8, 128], strides = [1, 1, 1]} : vector<10x8x128xf32> to vector<8x8x128xf32>
    %130 = vector.broadcast %125 : vector<1x1x128xf32> to vector<8x8x128xf32>
    %131 = arith.mulf %129, %130 : vector<8x8x128xf32>
    %132 = arith.addf %116, %128 : vector<8x8x128xf32>
    %133 = arith.addf %117, %131 : vector<8x8x128xf32>
    %c12 = arith.constant 12 : index
    %c0_60 = arith.constant 0 : index
    %134 = vector.load %arg4[%c12, %c0_60] : memref<27x128xf32, #tpu.memory_space<vmem>>, vector<1x128xf32>
    %135 = vector.shape_cast %134 : vector<1x128xf32> to vector<1x1x128xf32>
    %c12_61 = arith.constant 12 : index
    %c0_62 = arith.constant 0 : index
    %136 = vector.load %arg6[%c12_61, %c0_62] : memref<27x128xf32, #tpu.memory_space<vmem>>, vector<1x128xf32>
    %137 = vector.shape_cast %136 : vector<1x128xf32> to vector<1x1x128xf32>
    %138 = vector.extract_strided_slice %119 {offsets = [1, 0, 0], sizes = [8, 8, 128], strides = [1, 1, 1]} : vector<10x8x128xf32> to vector<8x8x128xf32>
    %139 = vector.broadcast %135 : vector<1x1x128xf32> to vector<8x8x128xf32>
    %140 = arith.mulf %138, %139 : vector<8x8x128xf32>
    %141 = vector.extract_strided_slice %121 {offsets = [1, 0, 0], sizes = [8, 8, 128], strides = [1, 1, 1]} : vector<10x8x128xf32> to vector<8x8x128xf32>
    %142 = vector.broadcast %137 : vector<1x1x128xf32> to vector<8x8x128xf32>
    %143 = arith.mulf %141, %142 : vector<8x8x128xf32>
    %144 = arith.addf %132, %140 : vector<8x8x128xf32>
    %145 = arith.addf %133, %143 : vector<8x8x128xf32>
    %c21 = arith.constant 21 : index
    %c0_63 = arith.constant 0 : index
    %146 = vector.load %arg4[%c21, %c0_63] : memref<27x128xf32, #tpu.memory_space<vmem>>, vector<1x128xf32>
    %147 = vector.shape_cast %146 : vector<1x128xf32> to vector<1x1x128xf32>
    %c21_64 = arith.constant 21 : index
    %c0_65 = arith.constant 0 : index
    %148 = vector.load %arg6[%c21_64, %c0_65] : memref<27x128xf32, #tpu.memory_space<vmem>>, vector<1x128xf32>
    %149 = vector.shape_cast %148 : vector<1x128xf32> to vector<1x1x128xf32>
    %150 = vector.extract_strided_slice %119 {offsets = [2, 0, 0], sizes = [8, 8, 128], strides = [1, 1, 1]} : vector<10x8x128xf32> to vector<8x8x128xf32>
    %151 = vector.broadcast %147 : vector<1x1x128xf32> to vector<8x8x128xf32>
    %152 = arith.mulf %150, %151 : vector<8x8x128xf32>
    %153 = vector.extract_strided_slice %121 {offsets = [2, 0, 0], sizes = [8, 8, 128], strides = [1, 1, 1]} : vector<10x8x128xf32> to vector<8x8x128xf32>
    %154 = vector.broadcast %149 : vector<1x1x128xf32> to vector<8x8x128xf32>
    %155 = arith.mulf %153, %154 : vector<8x8x128xf32>
    %156 = arith.addf %144, %152 : vector<8x8x128xf32>
    %157 = arith.addf %145, %155 : vector<8x8x128xf32>
    %c0_66 = arith.constant 0 : index
    %c0_67 = arith.constant 0 : index
    %c1_68 = arith.constant 1 : index
    %c8_69 = arith.constant 8 : index
    %158 = vector.load %arg1[%c0_66, %c0_67, %c1_68, %c8_69] : memref<1x10x10x144xf32, #tpu.memory_space<vmem>>, vector<1x10x8x128xf32>
    %159 = vector.shape_cast %158 : vector<1x10x8x128xf32> to vector<10x8x128xf32>
    %c0_70 = arith.constant 0 : index
    %c0_71 = arith.constant 0 : index
    %c1_72 = arith.constant 1 : index
    %c8_73 = arith.constant 8 : index
    %160 = vector.load %arg2[%c0_70, %c0_71, %c1_72, %c8_73] : memref<1x10x10x144xf32, #tpu.memory_space<vmem>>, vector<1x10x8x128xf32>
    %161 = vector.shape_cast %160 : vector<1x10x8x128xf32> to vector<10x8x128xf32>
    %c4 = arith.constant 4 : index
    %c0_74 = arith.constant 0 : index
    %162 = vector.load %arg4[%c4, %c0_74] : memref<27x128xf32, #tpu.memory_space<vmem>>, vector<1x128xf32>
    %163 = vector.shape_cast %162 : vector<1x128xf32> to vector<1x1x128xf32>
    %c4_75 = arith.constant 4 : index
    %c0_76 = arith.constant 0 : index
    %164 = vector.load %arg6[%c4_75, %c0_76] : memref<27x128xf32, #tpu.memory_space<vmem>>, vector<1x128xf32>
    %165 = vector.shape_cast %164 : vector<1x128xf32> to vector<1x1x128xf32>
    %166 = vector.extract_strided_slice %159 {offsets = [0, 0, 0], sizes = [8, 8, 128], strides = [1, 1, 1]} : vector<10x8x128xf32> to vector<8x8x128xf32>
    %167 = vector.broadcast %163 : vector<1x1x128xf32> to vector<8x8x128xf32>
    %168 = arith.mulf %166, %167 : vector<8x8x128xf32>
    %169 = vector.extract_strided_slice %161 {offsets = [0, 0, 0], sizes = [8, 8, 128], strides = [1, 1, 1]} : vector<10x8x128xf32> to vector<8x8x128xf32>
    %170 = vector.broadcast %165 : vector<1x1x128xf32> to vector<8x8x128xf32>
    %171 = arith.mulf %169, %170 : vector<8x8x128xf32>
    %172 = arith.addf %156, %168 : vector<8x8x128xf32>
    %173 = arith.addf %157, %171 : vector<8x8x128xf32>
    %c13 = arith.constant 13 : index
    %c0_77 = arith.constant 0 : index
    %174 = vector.load %arg4[%c13, %c0_77] : memref<27x128xf32, #tpu.memory_space<vmem>>, vector<1x128xf32>
    %175 = vector.shape_cast %174 : vector<1x128xf32> to vector<1x1x128xf32>
    %c13_78 = arith.constant 13 : index
    %c0_79 = arith.constant 0 : index
    %176 = vector.load %arg6[%c13_78, %c0_79] : memref<27x128xf32, #tpu.memory_space<vmem>>, vector<1x128xf32>
    %177 = vector.shape_cast %176 : vector<1x128xf32> to vector<1x1x128xf32>
    %178 = vector.extract_strided_slice %159 {offsets = [1, 0, 0], sizes = [8, 8, 128], strides = [1, 1, 1]} : vector<10x8x128xf32> to vector<8x8x128xf32>
    %179 = vector.broadcast %175 : vector<1x1x128xf32> to vector<8x8x128xf32>
    %180 = arith.mulf %178, %179 : vector<8x8x128xf32>
    %181 = vector.extract_strided_slice %161 {offsets = [1, 0, 0], sizes = [8, 8, 128], strides = [1, 1, 1]} : vector<10x8x128xf32> to vector<8x8x128xf32>
    %182 = vector.broadcast %177 : vector<1x1x128xf32> to vector<8x8x128xf32>
    %183 = arith.mulf %181, %182 : vector<8x8x128xf32>
    %184 = arith.addf %172, %180 : vector<8x8x128xf32>
    %185 = arith.addf %173, %183 : vector<8x8x128xf32>
    %c22 = arith.constant 22 : index
    %c0_80 = arith.constant 0 : index
    %186 = vector.load %arg4[%c22, %c0_80] : memref<27x128xf32, #tpu.memory_space<vmem>>, vector<1x128xf32>
    %187 = vector.shape_cast %186 : vector<1x128xf32> to vector<1x1x128xf32>
    %c22_81 = arith.constant 22 : index
    %c0_82 = arith.constant 0 : index
    %188 = vector.load %arg6[%c22_81, %c0_82] : memref<27x128xf32, #tpu.memory_space<vmem>>, vector<1x128xf32>
    %189 = vector.shape_cast %188 : vector<1x128xf32> to vector<1x1x128xf32>
    %190 = vector.extract_strided_slice %159 {offsets = [2, 0, 0], sizes = [8, 8, 128], strides = [1, 1, 1]} : vector<10x8x128xf32> to vector<8x8x128xf32>
    %191 = vector.broadcast %187 : vector<1x1x128xf32> to vector<8x8x128xf32>
    %192 = arith.mulf %190, %191 : vector<8x8x128xf32>
    %193 = vector.extract_strided_slice %161 {offsets = [2, 0, 0], sizes = [8, 8, 128], strides = [1, 1, 1]} : vector<10x8x128xf32> to vector<8x8x128xf32>
    %194 = vector.broadcast %189 : vector<1x1x128xf32> to vector<8x8x128xf32>
    %195 = arith.mulf %193, %194 : vector<8x8x128xf32>
    %196 = arith.addf %184, %192 : vector<8x8x128xf32>
    %197 = arith.addf %185, %195 : vector<8x8x128xf32>
    %c0_83 = arith.constant 0 : index
    %c0_84 = arith.constant 0 : index
    %c1_85 = arith.constant 1 : index
    %c16_86 = arith.constant 16 : index
    %198 = vector.load %arg1[%c0_83, %c0_84, %c1_85, %c16_86] : memref<1x10x10x144xf32, #tpu.memory_space<vmem>>, vector<1x10x8x128xf32>
    %199 = vector.shape_cast %198 : vector<1x10x8x128xf32> to vector<10x8x128xf32>
    %c0_87 = arith.constant 0 : index
    %c0_88 = arith.constant 0 : index
    %c1_89 = arith.constant 1 : index
    %c16_90 = arith.constant 16 : index
    %200 = vector.load %arg2[%c0_87, %c0_88, %c1_89, %c16_90] : memref<1x10x10x144xf32, #tpu.memory_space<vmem>>, vector<1x10x8x128xf32>
    %201 = vector.shape_cast %200 : vector<1x10x8x128xf32> to vector<10x8x128xf32>
    %c5 = arith.constant 5 : index
    %c0_91 = arith.constant 0 : index
    %202 = vector.load %arg4[%c5, %c0_91] : memref<27x128xf32, #tpu.memory_space<vmem>>, vector<1x128xf32>
    %203 = vector.shape_cast %202 : vector<1x128xf32> to vector<1x1x128xf32>
    %c5_92 = arith.constant 5 : index
    %c0_93 = arith.constant 0 : index
    %204 = vector.load %arg6[%c5_92, %c0_93] : memref<27x128xf32, #tpu.memory_space<vmem>>, vector<1x128xf32>
    %205 = vector.shape_cast %204 : vector<1x128xf32> to vector<1x1x128xf32>
    %206 = vector.extract_strided_slice %199 {offsets = [0, 0, 0], sizes = [8, 8, 128], strides = [1, 1, 1]} : vector<10x8x128xf32> to vector<8x8x128xf32>
    %207 = vector.broadcast %203 : vector<1x1x128xf32> to vector<8x8x128xf32>
    %208 = arith.mulf %206, %207 : vector<8x8x128xf32>
    %209 = vector.extract_strided_slice %201 {offsets = [0, 0, 0], sizes = [8, 8, 128], strides = [1, 1, 1]} : vector<10x8x128xf32> to vector<8x8x128xf32>
    %210 = vector.broadcast %205 : vector<1x1x128xf32> to vector<8x8x128xf32>
    %211 = arith.mulf %209, %210 : vector<8x8x128xf32>
    %212 = arith.addf %196, %208 : vector<8x8x128xf32>
    %213 = arith.addf %197, %211 : vector<8x8x128xf32>
    %c14 = arith.constant 14 : index
    %c0_94 = arith.constant 0 : index
    %214 = vector.load %arg4[%c14, %c0_94] : memref<27x128xf32, #tpu.memory_space<vmem>>, vector<1x128xf32>
    %215 = vector.shape_cast %214 : vector<1x128xf32> to vector<1x1x128xf32>
    %c14_95 = arith.constant 14 : index
    %c0_96 = arith.constant 0 : index
    %216 = vector.load %arg6[%c14_95, %c0_96] : memref<27x128xf32, #tpu.memory_space<vmem>>, vector<1x128xf32>
    %217 = vector.shape_cast %216 : vector<1x128xf32> to vector<1x1x128xf32>
    %218 = vector.extract_strided_slice %199 {offsets = [1, 0, 0], sizes = [8, 8, 128], strides = [1, 1, 1]} : vector<10x8x128xf32> to vector<8x8x128xf32>
    %219 = vector.broadcast %215 : vector<1x1x128xf32> to vector<8x8x128xf32>
    %220 = arith.mulf %218, %219 : vector<8x8x128xf32>
    %221 = vector.extract_strided_slice %201 {offsets = [1, 0, 0], sizes = [8, 8, 128], strides = [1, 1, 1]} : vector<10x8x128xf32> to vector<8x8x128xf32>
    %222 = vector.broadcast %217 : vector<1x1x128xf32> to vector<8x8x128xf32>
    %223 = arith.mulf %221, %222 : vector<8x8x128xf32>
    %224 = arith.addf %212, %220 : vector<8x8x128xf32>
    %225 = arith.addf %213, %223 : vector<8x8x128xf32>
    %c23 = arith.constant 23 : index
    %c0_97 = arith.constant 0 : index
    %226 = vector.load %arg4[%c23, %c0_97] : memref<27x128xf32, #tpu.memory_space<vmem>>, vector<1x128xf32>
    %227 = vector.shape_cast %226 : vector<1x128xf32> to vector<1x1x128xf32>
    %c23_98 = arith.constant 23 : index
    %c0_99 = arith.constant 0 : index
    %228 = vector.load %arg6[%c23_98, %c0_99] : memref<27x128xf32, #tpu.memory_space<vmem>>, vector<1x128xf32>
    %229 = vector.shape_cast %228 : vector<1x128xf32> to vector<1x1x128xf32>
    %230 = vector.extract_strided_slice %199 {offsets = [2, 0, 0], sizes = [8, 8, 128], strides = [1, 1, 1]} : vector<10x8x128xf32> to vector<8x8x128xf32>
    %231 = vector.broadcast %227 : vector<1x1x128xf32> to vector<8x8x128xf32>
    %232 = arith.mulf %230, %231 : vector<8x8x128xf32>
    %233 = vector.extract_strided_slice %201 {offsets = [2, 0, 0], sizes = [8, 8, 128], strides = [1, 1, 1]} : vector<10x8x128xf32> to vector<8x8x128xf32>
    %234 = vector.broadcast %229 : vector<1x1x128xf32> to vector<8x8x128xf32>
    %235 = arith.mulf %233, %234 : vector<8x8x128xf32>
    %236 = arith.addf %224, %232 : vector<8x8x128xf32>
    %237 = arith.addf %225, %235 : vector<8x8x128xf32>
    %c0_100 = arith.constant 0 : index
    %c0_101 = arith.constant 0 : index
    %c2_102 = arith.constant 2 : index
    %c0_103 = arith.constant 0 : index
    %238 = vector.load %arg1[%c0_100, %c0_101, %c2_102, %c0_103] : memref<1x10x10x144xf32, #tpu.memory_space<vmem>>, vector<1x10x8x128xf32>
    %239 = vector.shape_cast %238 : vector<1x10x8x128xf32> to vector<10x8x128xf32>
    %c0_104 = arith.constant 0 : index
    %c0_105 = arith.constant 0 : index
    %c2_106 = arith.constant 2 : index
    %c0_107 = arith.constant 0 : index
    %240 = vector.load %arg2[%c0_104, %c0_105, %c2_106, %c0_107] : memref<1x10x10x144xf32, #tpu.memory_space<vmem>>, vector<1x10x8x128xf32>
    %241 = vector.shape_cast %240 : vector<1x10x8x128xf32> to vector<10x8x128xf32>
    %c6 = arith.constant 6 : index
    %c0_108 = arith.constant 0 : index
    %242 = vector.load %arg4[%c6, %c0_108] : memref<27x128xf32, #tpu.memory_space<vmem>>, vector<1x128xf32>
    %243 = vector.shape_cast %242 : vector<1x128xf32> to vector<1x1x128xf32>
    %c6_109 = arith.constant 6 : index
    %c0_110 = arith.constant 0 : index
    %244 = vector.load %arg6[%c6_109, %c0_110] : memref<27x128xf32, #tpu.memory_space<vmem>>, vector<1x128xf32>
    %245 = vector.shape_cast %244 : vector<1x128xf32> to vector<1x1x128xf32>
    %246 = vector.extract_strided_slice %239 {offsets = [0, 0, 0], sizes = [8, 8, 128], strides = [1, 1, 1]} : vector<10x8x128xf32> to vector<8x8x128xf32>
    %247 = vector.broadcast %243 : vector<1x1x128xf32> to vector<8x8x128xf32>
    %248 = arith.mulf %246, %247 : vector<8x8x128xf32>
    %249 = vector.extract_strided_slice %241 {offsets = [0, 0, 0], sizes = [8, 8, 128], strides = [1, 1, 1]} : vector<10x8x128xf32> to vector<8x8x128xf32>
    %250 = vector.broadcast %245 : vector<1x1x128xf32> to vector<8x8x128xf32>
    %251 = arith.mulf %249, %250 : vector<8x8x128xf32>
    %252 = arith.addf %236, %248 : vector<8x8x128xf32>
    %253 = arith.addf %237, %251 : vector<8x8x128xf32>
    %c15 = arith.constant 15 : index
    %c0_111 = arith.constant 0 : index
    %254 = vector.load %arg4[%c15, %c0_111] : memref<27x128xf32, #tpu.memory_space<vmem>>, vector<1x128xf32>
    %255 = vector.shape_cast %254 : vector<1x128xf32> to vector<1x1x128xf32>
    %c15_112 = arith.constant 15 : index
    %c0_113 = arith.constant 0 : index
    %256 = vector.load %arg6[%c15_112, %c0_113] : memref<27x128xf32, #tpu.memory_space<vmem>>, vector<1x128xf32>
    %257 = vector.shape_cast %256 : vector<1x128xf32> to vector<1x1x128xf32>
    %258 = vector.extract_strided_slice %239 {offsets = [1, 0, 0], sizes = [8, 8, 128], strides = [1, 1, 1]} : vector<10x8x128xf32> to vector<8x8x128xf32>
    %259 = vector.broadcast %255 : vector<1x1x128xf32> to vector<8x8x128xf32>
    %260 = arith.mulf %258, %259 : vector<8x8x128xf32>
    %261 = vector.extract_strided_slice %241 {offsets = [1, 0, 0], sizes = [8, 8, 128], strides = [1, 1, 1]} : vector<10x8x128xf32> to vector<8x8x128xf32>
    %262 = vector.broadcast %257 : vector<1x1x128xf32> to vector<8x8x128xf32>
    %263 = arith.mulf %261, %262 : vector<8x8x128xf32>
    %264 = arith.addf %252, %260 : vector<8x8x128xf32>
    %265 = arith.addf %253, %263 : vector<8x8x128xf32>
    %c24 = arith.constant 24 : index
    %c0_114 = arith.constant 0 : index
    %266 = vector.load %arg4[%c24, %c0_114] : memref<27x128xf32, #tpu.memory_space<vmem>>, vector<1x128xf32>
    %267 = vector.shape_cast %266 : vector<1x128xf32> to vector<1x1x128xf32>
    %c24_115 = arith.constant 24 : index
    %c0_116 = arith.constant 0 : index
    %268 = vector.load %arg6[%c24_115, %c0_116] : memref<27x128xf32, #tpu.memory_space<vmem>>, vector<1x128xf32>
    %269 = vector.shape_cast %268 : vector<1x128xf32> to vector<1x1x128xf32>
    %270 = vector.extract_strided_slice %239 {offsets = [2, 0, 0], sizes = [8, 8, 128], strides = [1, 1, 1]} : vector<10x8x128xf32> to vector<8x8x128xf32>
    %271 = vector.broadcast %267 : vector<1x1x128xf32> to vector<8x8x128xf32>
    %272 = arith.mulf %270, %271 : vector<8x8x128xf32>
    %273 = vector.extract_strided_slice %241 {offsets = [2, 0, 0], sizes = [8, 8, 128], strides = [1, 1, 1]} : vector<10x8x128xf32> to vector<8x8x128xf32>
    %274 = vector.broadcast %269 : vector<1x1x128xf32> to vector<8x8x128xf32>
    %275 = arith.mulf %273, %274 : vector<8x8x128xf32>
    %276 = arith.addf %264, %272 : vector<8x8x128xf32>
    %277 = arith.addf %265, %275 : vector<8x8x128xf32>
    %c0_117 = arith.constant 0 : index
    %c0_118 = arith.constant 0 : index
    %c2_119 = arith.constant 2 : index
    %c8_120 = arith.constant 8 : index
    %278 = vector.load %arg1[%c0_117, %c0_118, %c2_119, %c8_120] : memref<1x10x10x144xf32, #tpu.memory_space<vmem>>, vector<1x10x8x128xf32>
    %279 = vector.shape_cast %278 : vector<1x10x8x128xf32> to vector<10x8x128xf32>
    %c0_121 = arith.constant 0 : index
    %c0_122 = arith.constant 0 : index
    %c2_123 = arith.constant 2 : index
    %c8_124 = arith.constant 8 : index
    %280 = vector.load %arg2[%c0_121, %c0_122, %c2_123, %c8_124] : memref<1x10x10x144xf32, #tpu.memory_space<vmem>>, vector<1x10x8x128xf32>
    %281 = vector.shape_cast %280 : vector<1x10x8x128xf32> to vector<10x8x128xf32>
    %c7 = arith.constant 7 : index
    %c0_125 = arith.constant 0 : index
    %282 = vector.load %arg4[%c7, %c0_125] : memref<27x128xf32, #tpu.memory_space<vmem>>, vector<1x128xf32>
    %283 = vector.shape_cast %282 : vector<1x128xf32> to vector<1x1x128xf32>
    %c7_126 = arith.constant 7 : index
    %c0_127 = arith.constant 0 : index
    %284 = vector.load %arg6[%c7_126, %c0_127] : memref<27x128xf32, #tpu.memory_space<vmem>>, vector<1x128xf32>
    %285 = vector.shape_cast %284 : vector<1x128xf32> to vector<1x1x128xf32>
    %286 = vector.extract_strided_slice %279 {offsets = [0, 0, 0], sizes = [8, 8, 128], strides = [1, 1, 1]} : vector<10x8x128xf32> to vector<8x8x128xf32>
    %287 = vector.broadcast %283 : vector<1x1x128xf32> to vector<8x8x128xf32>
    %288 = arith.mulf %286, %287 : vector<8x8x128xf32>
    %289 = vector.extract_strided_slice %281 {offsets = [0, 0, 0], sizes = [8, 8, 128], strides = [1, 1, 1]} : vector<10x8x128xf32> to vector<8x8x128xf32>
    %290 = vector.broadcast %285 : vector<1x1x128xf32> to vector<8x8x128xf32>
    %291 = arith.mulf %289, %290 : vector<8x8x128xf32>
    %292 = arith.addf %276, %288 : vector<8x8x128xf32>
    %293 = arith.addf %277, %291 : vector<8x8x128xf32>
    %c16_128 = arith.constant 16 : index
    %c0_129 = arith.constant 0 : index
    %294 = vector.load %arg4[%c16_128, %c0_129] : memref<27x128xf32, #tpu.memory_space<vmem>>, vector<1x128xf32>
    %295 = vector.shape_cast %294 : vector<1x128xf32> to vector<1x1x128xf32>
    %c16_130 = arith.constant 16 : index
    %c0_131 = arith.constant 0 : index
    %296 = vector.load %arg6[%c16_130, %c0_131] : memref<27x128xf32, #tpu.memory_space<vmem>>, vector<1x128xf32>
    %297 = vector.shape_cast %296 : vector<1x128xf32> to vector<1x1x128xf32>
    %298 = vector.extract_strided_slice %279 {offsets = [1, 0, 0], sizes = [8, 8, 128], strides = [1, 1, 1]} : vector<10x8x128xf32> to vector<8x8x128xf32>
    %299 = vector.broadcast %295 : vector<1x1x128xf32> to vector<8x8x128xf32>
    %300 = arith.mulf %298, %299 : vector<8x8x128xf32>
    %301 = vector.extract_strided_slice %281 {offsets = [1, 0, 0], sizes = [8, 8, 128], strides = [1, 1, 1]} : vector<10x8x128xf32> to vector<8x8x128xf32>
    %302 = vector.broadcast %297 : vector<1x1x128xf32> to vector<8x8x128xf32>
    %303 = arith.mulf %301, %302 : vector<8x8x128xf32>
    %304 = arith.addf %292, %300 : vector<8x8x128xf32>
    %305 = arith.addf %293, %303 : vector<8x8x128xf32>
    %c25 = arith.constant 25 : index
    %c0_132 = arith.constant 0 : index
    %306 = vector.load %arg4[%c25, %c0_132] : memref<27x128xf32, #tpu.memory_space<vmem>>, vector<1x128xf32>
    %307 = vector.shape_cast %306 : vector<1x128xf32> to vector<1x1x128xf32>
    %c25_133 = arith.constant 25 : index
    %c0_134 = arith.constant 0 : index
    %308 = vector.load %arg6[%c25_133, %c0_134] : memref<27x128xf32, #tpu.memory_space<vmem>>, vector<1x128xf32>
    %309 = vector.shape_cast %308 : vector<1x128xf32> to vector<1x1x128xf32>
    %310 = vector.extract_strided_slice %279 {offsets = [2, 0, 0], sizes = [8, 8, 128], strides = [1, 1, 1]} : vector<10x8x128xf32> to vector<8x8x128xf32>
    %311 = vector.broadcast %307 : vector<1x1x128xf32> to vector<8x8x128xf32>
    %312 = arith.mulf %310, %311 : vector<8x8x128xf32>
    %313 = vector.extract_strided_slice %281 {offsets = [2, 0, 0], sizes = [8, 8, 128], strides = [1, 1, 1]} : vector<10x8x128xf32> to vector<8x8x128xf32>
    %314 = vector.broadcast %309 : vector<1x1x128xf32> to vector<8x8x128xf32>
    %315 = arith.mulf %313, %314 : vector<8x8x128xf32>
    %316 = arith.addf %304, %312 : vector<8x8x128xf32>
    %317 = arith.addf %305, %315 : vector<8x8x128xf32>
    %c0_135 = arith.constant 0 : index
    %c0_136 = arith.constant 0 : index
    %c2_137 = arith.constant 2 : index
    %c16_138 = arith.constant 16 : index
    %318 = vector.load %arg1[%c0_135, %c0_136, %c2_137, %c16_138] : memref<1x10x10x144xf32, #tpu.memory_space<vmem>>, vector<1x10x8x128xf32>
    %319 = vector.shape_cast %318 : vector<1x10x8x128xf32> to vector<10x8x128xf32>
    %c0_139 = arith.constant 0 : index
    %c0_140 = arith.constant 0 : index
    %c2_141 = arith.constant 2 : index
    %c16_142 = arith.constant 16 : index
    %320 = vector.load %arg2[%c0_139, %c0_140, %c2_141, %c16_142] : memref<1x10x10x144xf32, #tpu.memory_space<vmem>>, vector<1x10x8x128xf32>
    %321 = vector.shape_cast %320 : vector<1x10x8x128xf32> to vector<10x8x128xf32>
    %c8_143 = arith.constant 8 : index
    %c0_144 = arith.constant 0 : index
    %322 = vector.load %arg4[%c8_143, %c0_144] : memref<27x128xf32, #tpu.memory_space<vmem>>, vector<1x128xf32>
    %323 = vector.shape_cast %322 : vector<1x128xf32> to vector<1x1x128xf32>
    %c8_145 = arith.constant 8 : index
    %c0_146 = arith.constant 0 : index
    %324 = vector.load %arg6[%c8_145, %c0_146] : memref<27x128xf32, #tpu.memory_space<vmem>>, vector<1x128xf32>
    %325 = vector.shape_cast %324 : vector<1x128xf32> to vector<1x1x128xf32>
    %326 = vector.extract_strided_slice %319 {offsets = [0, 0, 0], sizes = [8, 8, 128], strides = [1, 1, 1]} : vector<10x8x128xf32> to vector<8x8x128xf32>
    %327 = vector.broadcast %323 : vector<1x1x128xf32> to vector<8x8x128xf32>
    %328 = arith.mulf %326, %327 : vector<8x8x128xf32>
    %329 = vector.extract_strided_slice %321 {offsets = [0, 0, 0], sizes = [8, 8, 128], strides = [1, 1, 1]} : vector<10x8x128xf32> to vector<8x8x128xf32>
    %330 = vector.broadcast %325 : vector<1x1x128xf32> to vector<8x8x128xf32>
    %331 = arith.mulf %329, %330 : vector<8x8x128xf32>
    %332 = arith.addf %316, %328 : vector<8x8x128xf32>
    %333 = arith.addf %317, %331 : vector<8x8x128xf32>
    %c17 = arith.constant 17 : index
    %c0_147 = arith.constant 0 : index
    %334 = vector.load %arg4[%c17, %c0_147] : memref<27x128xf32, #tpu.memory_space<vmem>>, vector<1x128xf32>
    %335 = vector.shape_cast %334 : vector<1x128xf32> to vector<1x1x128xf32>
    %c17_148 = arith.constant 17 : index
    %c0_149 = arith.constant 0 : index
    %336 = vector.load %arg6[%c17_148, %c0_149] : memref<27x128xf32, #tpu.memory_space<vmem>>, vector<1x128xf32>
    %337 = vector.shape_cast %336 : vector<1x128xf32> to vector<1x1x128xf32>
    %338 = vector.extract_strided_slice %319 {offsets = [1, 0, 0], sizes = [8, 8, 128], strides = [1, 1, 1]} : vector<10x8x128xf32> to vector<8x8x128xf32>
    %339 = vector.broadcast %335 : vector<1x1x128xf32> to vector<8x8x128xf32>
    %340 = arith.mulf %338, %339 : vector<8x8x128xf32>
    %341 = vector.extract_strided_slice %321 {offsets = [1, 0, 0], sizes = [8, 8, 128], strides = [1, 1, 1]} : vector<10x8x128xf32> to vector<8x8x128xf32>
    %342 = vector.broadcast %337 : vector<1x1x128xf32> to vector<8x8x128xf32>
    %343 = arith.mulf %341, %342 : vector<8x8x128xf32>
    %344 = arith.addf %332, %340 : vector<8x8x128xf32>
    %345 = arith.addf %333, %343 : vector<8x8x128xf32>
    %c26 = arith.constant 26 : index
    %c0_150 = arith.constant 0 : index
    %346 = vector.load %arg4[%c26, %c0_150] : memref<27x128xf32, #tpu.memory_space<vmem>>, vector<1x128xf32>
    %347 = vector.shape_cast %346 : vector<1x128xf32> to vector<1x1x128xf32>
    %c26_151 = arith.constant 26 : index
    %c0_152 = arith.constant 0 : index
    %348 = vector.load %arg6[%c26_151, %c0_152] : memref<27x128xf32, #tpu.memory_space<vmem>>, vector<1x128xf32>
    %349 = vector.shape_cast %348 : vector<1x128xf32> to vector<1x1x128xf32>
    %350 = vector.extract_strided_slice %319 {offsets = [2, 0, 0], sizes = [8, 8, 128], strides = [1, 1, 1]} : vector<10x8x128xf32> to vector<8x8x128xf32>
    %351 = vector.broadcast %347 : vector<1x1x128xf32> to vector<8x8x128xf32>
    %352 = arith.mulf %350, %351 : vector<8x8x128xf32>
    %353 = vector.extract_strided_slice %321 {offsets = [2, 0, 0], sizes = [8, 8, 128], strides = [1, 1, 1]} : vector<10x8x128xf32> to vector<8x8x128xf32>
    %354 = vector.broadcast %349 : vector<1x1x128xf32> to vector<8x8x128xf32>
    %355 = arith.mulf %353, %354 : vector<8x8x128xf32>
    %356 = arith.addf %344, %352 : vector<8x8x128xf32>
    %357 = arith.addf %345, %355 : vector<8x8x128xf32>
    %c0_153 = arith.constant 0 : index
    %c0_154 = arith.constant 0 : index
    %358 = vector.load %arg5[%c0_153, %c0_154] : memref<1x128xf32, #tpu.memory_space<vmem>>, vector<1x128xf32>
    %359 = vector.shape_cast %358 : vector<1x128xf32> to vector<1x1x128xf32>
    %360 = vector.broadcast %359 : vector<1x1x128xf32> to vector<8x8x128xf32>
    %361 = arith.addf %356, %360 : vector<8x8x128xf32>
    %cst = arith.constant 0.000000e+00 : f32
    %cst_155 = arith.constant 6.000000e+00 : f32
    %362 = vector.broadcast %cst : f32 to vector<8x8x128xf32>
    %363 = arith.maximumf %362, %361 : vector<8x8x128xf32>
    %364 = vector.broadcast %cst_155 : f32 to vector<8x8x128xf32>
    %365 = arith.minimumf %364, %363 : vector<8x8x128xf32>
    %c0_156 = arith.constant 0 : index
    %c0_157 = arith.constant 0 : index
    %366 = vector.load %arg7[%c0_156, %c0_157] : memref<1x128xf32, #tpu.memory_space<vmem>>, vector<1x128xf32>
    %367 = vector.shape_cast %366 : vector<1x128xf32> to vector<1x1x128xf32>
    %368 = vector.broadcast %367 : vector<1x1x128xf32> to vector<8x8x128xf32>
    %369 = arith.addf %357, %368 : vector<8x8x128xf32>
    %cst_158 = arith.constant 0.000000e+00 : f32
    %cst_159 = arith.constant 6.000000e+00 : f32
    %370 = vector.broadcast %cst_158 : f32 to vector<8x8x128xf32>
    %371 = arith.maximumf %370, %369 : vector<8x8x128xf32>
    %372 = vector.broadcast %cst_159 : f32 to vector<8x8x128xf32>
    %373 = arith.minimumf %372, %371 : vector<8x8x128xf32>
    %374 = vector.shape_cast %365 : vector<8x8x128xf32> to vector<64x128xf32>
    %375 = vector.shape_cast %373 : vector<8x8x128xf32> to vector<64x128xf32>
    %376 = tpu.concatenate %374, %375 in 1 : vector<64x128xf32>, vector<64x128xf32> -> vector<64x256xf32>
    %c0_160 = arith.constant 0 : index
    %c0_161 = arith.constant 0 : index
    %377 = vector.load %arg8[%c0_160, %c0_161] : memref<256x512xf32, #tpu.memory_space<vmem>>, vector<256x512xf32>
    %cst_162 = arith.constant dense<0.000000e+00> : vector<64x512xf32>
    %378 = tpu.matmul %376, %377, %cst_162 {dimension_numbers = #tpu.dot_dimension_numbers<[1], [0], [0], [1], [0, 0, 1, 1], [], []>} : vector<64x256xf32>, vector<256x512xf32>, vector<64x512xf32> -> vector<64x512xf32>
    %c0_163 = arith.constant 0 : index
    %c0_164 = arith.constant 0 : index
    %379 = vector.load %arg9[%c0_163, %c0_164] : memref<1x512xf32, #tpu.memory_space<vmem>>, vector<1x512xf32>
    %380 = vector.broadcast %379 : vector<1x512xf32> to vector<64x512xf32>
    %381 = arith.addf %378, %380 : vector<64x512xf32>
    %382 = vector.extract_strided_slice %381 {offsets = [0, 0], sizes = [64, 128], strides = [1, 1]} : vector<64x512xf32> to vector<64x128xf32>
    %383 = arith.negf %382 : vector<64x128xf32>
    %384 = math.exp %383 : vector<64x128xf32>
    %cst_165 = arith.constant 1.000000e+00 : f32
    %385 = vector.broadcast %cst_165 : f32 to vector<64x128xf32>
    %386 = arith.addf %385, %384 : vector<64x128xf32>
    %387 = arith.divf %385, %386 : vector<64x128xf32>
    %388 = vector.extract_strided_slice %381 {offsets = [0, 128], sizes = [64, 128], strides = [1, 1]} : vector<64x512xf32> to vector<64x128xf32>
    %389 = arith.negf %388 : vector<64x128xf32>
    %390 = math.exp %389 : vector<64x128xf32>
    %cst_166 = arith.constant 1.000000e+00 : f32
    %391 = vector.broadcast %cst_166 : f32 to vector<64x128xf32>
    %392 = arith.addf %391, %390 : vector<64x128xf32>
    %393 = arith.divf %391, %392 : vector<64x128xf32>
    %394 = vector.extract_strided_slice %381 {offsets = [0, 256], sizes = [64, 128], strides = [1, 1]} : vector<64x512xf32> to vector<64x128xf32>
    %395 = arith.negf %394 : vector<64x128xf32>
    %396 = math.exp %395 : vector<64x128xf32>
    %cst_167 = arith.constant 1.000000e+00 : f32
    %397 = vector.broadcast %cst_167 : f32 to vector<64x128xf32>
    %398 = arith.addf %397, %396 : vector<64x128xf32>
    %399 = arith.divf %397, %398 : vector<64x128xf32>
    %400 = vector.extract_strided_slice %381 {offsets = [0, 384], sizes = [64, 128], strides = [1, 1]} : vector<64x512xf32> to vector<64x128xf32>
    %401 = math.tanh %400 : vector<64x128xf32>
    %c0_168 = arith.constant 0 : index
    %c0_169 = arith.constant 0 : index
    %c0_170 = arith.constant 0 : index
    %c0_171 = arith.constant 0 : index
    %402 = vector.load %arg3[%c0_168, %c0_169, %c0_170, %c0_171] : memref<1x8x8x128xf32, #tpu.memory_space<vmem>>, vector<1x8x8x128xf32>
    %403 = vector.shape_cast %402 : vector<1x8x8x128xf32> to vector<8x8x128xf32>
    %404 = vector.shape_cast %403 : vector<8x8x128xf32> to vector<64x128xf32>
    %405 = arith.mulf %393, %404 : vector<64x128xf32>
    %406 = arith.mulf %387, %401 : vector<64x128xf32>
    %407 = arith.addf %405, %406 : vector<64x128xf32>
    %408 = math.tanh %407 : vector<64x128xf32>
    %409 = arith.mulf %399, %408 : vector<64x128xf32>
    %410 = vector.shape_cast %409 : vector<64x128xf32> to vector<8x8x128xf32>
    %c0_172 = arith.constant 0 : index
    %c0_173 = arith.constant 0 : index
    %c0_174 = arith.constant 0 : index
    %c0_175 = arith.constant 0 : index
    %411 = vector.load %arg10[%c0_172, %c0_173, %c0_174, %c0_175] : memref<1x8x8x128xf32, #tpu.memory_space<vmem>>, vector<1x8x8x128xf32>
    %412 = vector.shape_cast %411 : vector<1x8x8x128xf32> to vector<8x8x128xf32>
    %413 = vector.shape_cast %410 : vector<8x8x128xf32> to vector<1x8x8x128xf32>
    tpu.vector_store %arg10[%c0_172, %c0_173, %c0_174, %c0_175], %413 {strides = array<i32>} : memref<1x8x8x128xf32, #tpu.memory_space<vmem>>, vector<1x8x8x128xf32>,
    %414 = vector.shape_cast %407 : vector<64x128xf32> to vector<8x8x128xf32>
    %c0_176 = arith.constant 0 : index
    %c0_177 = arith.constant 0 : index
    %c0_178 = arith.constant 0 : index
    %c0_179 = arith.constant 0 : index
    %415 = vector.load %arg11[%c0_176, %c0_177, %c0_178, %c0_179] : memref<1x8x8x128xf32, #tpu.memory_space<vmem>>, vector<1x8x8x128xf32>
    %416 = vector.shape_cast %415 : vector<1x8x8x128xf32> to vector<8x8x128xf32>
    %417 = vector.shape_cast %414 : vector<8x8x128xf32> to vector<1x8x8x128xf32>
    tpu.vector_store %arg11[%c0_176, %c0_177, %c0_178, %c0_179], %417 {strides = array<i32>} : memref<1x8x8x128xf32, #tpu.memory_space<vmem>>, vector<1x8x8x128xf32>,
    return
  }
  func.func @transform_0(%arg0: i32) -> (i32, i32, i32, i32) {
    %c0_i32 = arith.constant 0 : i32
    %c0_i32_0 = arith.constant 0 : i32
    %c0_i32_1 = arith.constant 0 : i32
    %c0_i32_2 = arith.constant 0 : i32
    return %arg0, %c0_i32, %c0_i32_0, %c0_i32_1 : i32, i32, i32, i32
  }
  func.func @transform_1(%arg0: i32) -> (i32, i32, i32, i32) {
    %c0_i32 = arith.constant 0 : i32
    %c0_i32_0 = arith.constant 0 : i32
    %c0_i32_1 = arith.constant 0 : i32
    %c0_i32_2 = arith.constant 0 : i32
    return %arg0, %c0_i32, %c0_i32_0, %c0_i32_1 : i32, i32, i32, i32
  }
  func.func @transform_2(%arg0: i32) -> (i32, i32, i32, i32) {
    %c0_i32 = arith.constant 0 : i32
    %c0_i32_0 = arith.constant 0 : i32
    %c0_i32_1 = arith.constant 0 : i32
    %c0_i32_2 = arith.constant 0 : i32
    return %arg0, %c0_i32, %c0_i32_0, %c0_i32_1 : i32, i32, i32, i32
  }
  func.func @transform_3(%arg0: i32) -> (i32, i32) {
    %c0_i32 = arith.constant 0 : i32
    %c0_i32_0 = arith.constant 0 : i32
    %c0_i32_1 = arith.constant 0 : i32
    return %c0_i32, %c0_i32_0 : i32, i32
  }
  func.func @transform_4(%arg0: i32) -> (i32, i32) {
    %c0_i32 = arith.constant 0 : i32
    %c0_i32_0 = arith.constant 0 : i32
    %c0_i32_1 = arith.constant 0 : i32
    return %c0_i32, %c0_i32_0 : i32, i32
  }
  func.func @transform_5(%arg0: i32) -> (i32, i32) {
    %c0_i32 = arith.constant 0 : i32
    %c0_i32_0 = arith.constant 0 : i32
    %c0_i32_1 = arith.constant 0 : i32
    return %c0_i32, %c0_i32_0 : i32, i32
  }
  func.func @transform_6(%arg0: i32) -> (i32, i32) {
    %c0_i32 = arith.constant 0 : i32
    %c0_i32_0 = arith.constant 0 : i32
    %c0_i32_1 = arith.constant 0 : i32
    return %c0_i32, %c0_i32_0 : i32, i32
  }
  func.func @transform_7(%arg0: i32) -> (i32, i32) {
    %c0_i32 = arith.constant 0 : i32
    %c0_i32_0 = arith.constant 0 : i32
    %c0_i32_1 = arith.constant 0 : i32
    return %c0_i32, %c0_i32_0 : i32, i32
  }
  func.func @transform_8(%arg0: i32) -> (i32, i32) {
    %c0_i32 = arith.constant 0 : i32
    %c0_i32_0 = arith.constant 0 : i32
    %c0_i32_1 = arith.constant 0 : i32
    return %c0_i32, %c0_i32_0 : i32, i32
  }
  func.func @transform_9(%arg0: i32) -> (i32, i32, i32, i32) {
    %c0_i32 = arith.constant 0 : i32
    %c0_i32_0 = arith.constant 0 : i32
    %c0_i32_1 = arith.constant 0 : i32
    %c0_i32_2 = arith.constant 0 : i32
    return %arg0, %c0_i32, %c0_i32_0, %c0_i32_1 : i32, i32, i32, i32
  }
  func.func @transform_10(%arg0: i32) -> (i32, i32, i32, i32) {
    %c0_i32 = arith.constant 0 : i32
    %c0_i32_0 = arith.constant 0 : i32
    %c0_i32_1 = arith.constant 0 : i32
    %c0_i32_2 = arith.constant 0 : i32
    return %arg0, %c0_i32, %c0_i32_0, %c0_i32_1 : i32, i32, i32, i32
  }
}

</mosaic_0001>

<bundles_post_ra>
// kernel: tpu_custom_call.1
= control target key start
LH: loop header
LB: loop body
LE: loop exit
PB: predicated region body
PF: predicated region fallthrough
CT: control target
= control target key end

     0   :  { %s16164_s0 = inlined_call_operand.vmem [shape: f32[2,10,10,144], index: 0, kind: input, shape index: {}]   ;;  %s16165_s1 = inlined_call_operand.vmem [shape: f32[2,10,10,144], index: 1, kind: input, shape index: {}]   ;;  %s16166_s2 = inlined_call_operand.vmem [shape: f32[2,8,8,128], index: 2, kind: input, shape index: {}]   ;;  %s16167_s3 = inlined_call_operand.vmem [shape: f32[27,128], index: 3, kind: input, shape index: {}]   ;;  %s16168_s4 = inlined_call_operand.vmem [shape: f32[1,128], index: 4, kind: input, shape index: {}]   ;;  %s16169_s5 = inlined_call_operand.vmem [shape: f32[27,128], index: 5, kind: input, shape index: {}]   ;;  %s16170_s6 = inlined_call_operand.vmem [shape: f32[1,128], index: 6, kind: input, shape index: {}]   ;;  %s16171_s7 = inlined_call_operand.vmem [shape: f32[256,512], index: 7, kind: input, shape index: {}]   ;;  %s16172_s8 = inlined_call_operand.vmem [shape: f32[1,512], index: 8, kind: input, shape index: {}]   ;;  %s16173_s9 = inlined_call_operand.hbm [shape: f32[2,8,8,128], index: 9, kind: output, shape index: {0}]   ;;  %s16174_s10 = inlined_call_operand.hbm [shape: f32[2,8,8,128], index: 10, kind: output, shape index: {1}]  }
   0x1   :  { %16302 = sst [smem:[#allocation231_spill]] %s16164_s0 }
   0x2   :  { %16303 = sst [smem:[#allocation232_spill]] %s16165_s1 }
   0x3   :  { %16304 = sst [smem:[#allocation233_spill]] %s16166_s2 }
   0x4   :  { %16 = vsyncpa [#allocation3], 0 }
   0x5   :  { %18 = vsyncpa [#allocation3 + $0x1], 0 }
   0x6   :  { %19 = vsyncpa [#allocation5], 0 }
   0x7   :  { %21 = vsyncpa [#allocation5 + $0x1], 0  ;;  %s8680_s13 = smov 0   ;;  %s8682_s14 = smov 0  }
   0x8   :  { %s8684_s15 = smov 0   ;;  %s8686_s16 = smov 0  }
   0x9 LB: > { %s8701_s17 = sadd.s32 4294967295, %s8616_s16   ;;  %s7866_s18 = sadd.s32 4294967294, %s8616_s16   ;;  %s8616_s16 = sphi %s8686_s16, %s17283_s16   ;;  %s8612_s15 = sphi %s8684_s15, %s17282_s15   ;;  %s8608_s14 = sphi %s8682_s14, %s17281_s14   ;;  %s8604_s13 = sphi %s8680_s13, %s17280_s13  }
   0xa   : > { %s8705_s19 = sadd.s32 1, %s8616_s16   ;;  %s238_s20 = sadd.s32 1, %s8612_s15 }
   0xb   : > { %s235_s21 = ssub.s32 %s8616_s16, %s8705_s19  ;;  %p248_p0 = scmp.ne.s32.totalorder %s8612_s15, %s8608_s14 }
   0xc   : > { %p236_p1 = scmp.eq.s32.totalorder %s235_s21, 0  ;;  %p249_p2 = scmp.eq.s32.totalorder %s8701_s17, 1 }
   0xd   : > { %p254_p3 = scmp.ne.s32.totalorder %s8608_s14, %s8604_s13  ;;  %p255_p4 = scmp.eq.s32.totalorder %s7866_s18, 1 }
   0xe   : > { %s8716_s22 = scalar_select %p236_p1, %s8612_s15, %s238_s20  }
   0xf   : > { %p8718_p5 = por %p249_p2, %p248_p0  ;;  %p8722_p6 = por %p255_p4, %p254_p3 }
  0x10   : > { %p7869_p7 = scmp.ge.s32.totalorder %s8616_s16, 1  ;;  %p341_p8 = scmp.lt.s32.totalorder %s8616_s16, 3 }
  0x12   : > { %p342_p9 = pnand %p7869_p7, %p341_p8 }
  0x14   : > { %345 = sbr.rel (%p342_p9) target bundleno = 2988 (0xbac), region = 56 }
  0x1b   : > { %v7882_v0 = vld [vmem:[%s16167_s3 + $0x1] ss:$0 sm:$0xff]  ;;  %s16241_s27 = smov 8   ;;  %v7885_v1 = vld [vmem:[%s16169_s5 + $0xa] ss:$0 sm:$0xff]  ;;  %p394_p10 = scmp.lt.s32.totalorder %s8701_s17, 1 }
  0x1c   : > { %566 = vrot.lane.b32.xlu0 %v7882_v0, %s16241_s27  ;;  %v7883_v2 = vld [vmem:[%s16169_s5 + $0x1] ss:$0 sm:$0xff]  ;;  %785 = vrot.lane.b32.xlu1 %v7885_v1, %s16241_s27  ;;  %v7884_v3 = vld [vmem:[%s16167_s3 + $0xa] ss:$0 sm:$0xff]  ;;  %s16307_s0 = sld [smem:[#allocation231_spill]]  ;;  %s16205_s29 = smov 120  }
  0x1d   : > { %s8746_s20 = scalar_select %p394_p10, %s8701_s17, 1  ;;  %v7876_v25 = vld [vmem:[%s16167_s3] ss:$0 sm:$0xff]  ;;  %v7878_v29 = vld [vmem:[%s16167_s3 + $0x9] ss:$0 sm:$0xff]  ;;  %vm657_vm0 = vcmask 982016  }
  0x1e   : > { %v7880_v30 = vld [vmem:[%s16167_s3 + $0x12] ss:$0 sm:$0xff]  ;;  %s16308_s1 = sld [smem:[#allocation232_spill]]  ;;  %s16207_s25 = smov 16   ;;  %vm1240_vm1 = vcmask 916480   ;;  %vm1823_vm2 = vcmask 1046528  }
  0x1f   : > { %s8095_s21 = smul.u32 320, %s8746_s20  ;;  %s16209_s26 = smov 112   ;;  %vm4490_vm3 = vcmask 1045504  }
  0x20   : > { %590 = vrot.lane.b32.xlu0 %v7883_v2, %s16241_s27  ;;  %s16738_s30 = smov 16   ;;  %s16746_s11 = smov 112  }
  0x21   : > { %s17277_s2 = sld [smem:[#allocation233_spill]]  ;;  %s8622_s18 = smov [#allocation4]  }
  0x22   : > { %s8754_s28 = scalar_lea.vmem %s16307_s0, %s8095_s21  ;;  %s15967_s0 = sand.u32 1, %s8608_s14  }
  0x23   : > { %v8757_v4 = vld [vmem:[%s8754_s28 + $0x20] sm:$0xff]  ;;  %v8772_v10 = vld [vmem:[%s8754_s28 + $0x8] sm:$0xff] }
  0x24   : > { %761 = vrot.lane.b32.xlu0 %v7884_v3, %s16241_s27  ;;  %v8760_v5 = vld [vmem:[%s8754_s28] sm:$0xff]  ;;  %v8784_v14 = vld [vmem:[%s8754_s28 + $0x28] sm:$0xff]  ;;  %s8854_s12 = scalar_lea.vmem %s16308_s1, %s8095_s21 }
  0x25   : > { %v8769_v9 = vld [vmem:[%s8754_s28 + $0x40] sm:$0xff]  ;;  %v8796_v18 = vld [vmem:[%s8754_s28 + $0x48] sm:$0xff] }
  0x26   : > { %v8781_v13 = vld [vmem:[%s8754_s28 + $0x60] sm:$0xff]  ;;  %v8808_v22 = vld [vmem:[%s8754_s28 + $0x68] sm:$0xff]  ;;  %v437_v32 = vmul.f32 %v7876_v25, %v8769_v9 }
  0x27   : > { %v8793_v17 = vld [vmem:[%s8754_s28 + $0x80] sm:$0xff]  ;;  %v8816_v24 = vld [vmem:[%s8754_s28 + $0x88] sm:$0xff]  ;;  %v463_v33 = vmul.f32 %v7878_v29, %v8781_v13  ;;  %v438_v35 = vmul.f32 %v7876_v25, %v8781_v13 }
  0x28   : > { %v8805_v21 = vld [vmem:[%s8754_s28 + $0xa0] sm:$0xff]  ;;  %v505_v34 = vmul.f32 %v7880_v30, %v8793_v17  ;;  %v464_v36 = vmul.f32 %v7878_v29, %v8793_v17  ;;  %v439_v40 = vmul.f32 %v7876_v25, %v8793_v17  ;;  %v8860_v47 = vld [vmem:[%s8754_s28 + $0xa8] sm:$0xff] }
  0x29   : > { %v8811_v23 = vld [vmem:[%s8754_s28 + $0xc0] sm:$0xff]  ;;  %v506_v37 = vmul.f32 %v7880_v30, %v8805_v21  ;;  %v483_v39 = vadd.f32 %v463_v33, %v437_v32  ;;  %v465_v41 = vmul.f32 %v7878_v29, %v8805_v21  ;;  %v440_v44 = vmul.f32 %v7876_v25, %v8805_v21  ;;  %v8894_v3 = vld [vmem:[%s8754_s28 + $0xc8] sm:$0xff] }
  0x2a   : > { %v8844_v38 = vld [vmem:[%s8754_s28 + $0xe0] sm:$0xff]  ;;  %v507_v42 = vmul.f32 %v7880_v30, %v8811_v23  ;;  %v484_v43 = vadd.f32 %v464_v36, %v438_v35  ;;  %v466_v45 = vmul.f32 %v7878_v29, %v8811_v23  ;;  %v441_v51 = vmul.f32 %v7876_v25, %v8811_v23  ;;  %v8939_v32 = vld [vmem:[%s8854_s12 + $0x8] sm:$0xff] }
  0x2b   : > { %v508_v46 = vmul.f32 %v7880_v30, %v8844_v38  ;;  %v8863_v48 = vld [vmem:[%s8754_s28 + $0x100] sm:$0xff]  ;;  %v8865_v49 = vadd.f32 %v505_v34, %v483_v39  ;;  %v485_v50 = vadd.f32 %v465_v41, %v439_v40  ;;  %v467_v52 = vmul.f32 %v7878_v29, %v8844_v38  ;;  %v8955_v40 = vld [vmem:[%s8854_s12 + $0x28] sm:$0xff] }
  0x2c   : > { %v8870_v53 = vld [vmem:[%s8754_s28 + $0x120] sm:$0xff]  ;;  %v8874_v54 = vadd.f32 %v506_v37, %v484_v43  ;;  %v486_v55 = vadd.f32 %v466_v45, %v440_v44  ;;  %v509_v56 = vmul.f32 %v7880_v30, %v8863_v48  ;;  %v442_v61 = vmul.f32 %v7876_v25, %v8844_v38 }
  0x2d   : > { %v8880_v58 = vld [vmem:[%s8854_s12] sm:$0xff]  ;;  %v8882_v59 = vadd.f32 %v507_v42, %v485_v50  ;;  %v487_v60 = vadd.f32 %v467_v52, %v441_v51  ;;  %v468_v62 = vmul.f32 %v7878_v29, %v8863_v48  ;;  %v510_v2 = vmul.f32 %v7880_v30, %v8870_v53  ;;  %v7879_v29 = vld [vmem:[%s16169_s5 + $0x9] ss:$0 sm:$0xff]  ;;  %v7881_v30 = vld [vmem:[%s16169_s5 + $0x12] ss:$0 sm:$0xff] }
  0x2e   : > { %v8890_v1 = vadd.f32 %v508_v46, %v486_v55  ;;  %v8920_v25 = vld [vmem:[%s8854_s12 + $0x40] sm:$0xff]  ;;  %v8973_v52 = vld [vmem:[%s8854_s12 + $0x48] sm:$0xff] }
  0x2f   : > { %v8952_v39 = vld [vmem:[%s8854_s12 + $0xa0] sm:$0xff] }
  0x30   : > { %16309 = vst [vmem:[#allocation8_spill] sm:$0xff] %v8890_v1  ;;  %v518_v44 = vmul.f32 %v7881_v30, %v8952_v39  ;;  %v8970_v51 = vld [vmem:[%s8854_s12 + $0xc0] sm:$0xff] }
  0x8e   : > { %v8762_v6 = vpop.permute.xlu0 %566 }
  0x8f   : > { %v571_v7 = vmul.f32 %v8762_v6, %v8757_v4  ;;  %v569_v8 = vmul.f32 %v8762_v6, %v8760_v5  ;;  %v573_v11 = vmul.f32 %v8762_v6, %v8769_v9  ;;  %v570_v12 = vmul.f32 %v8762_v6, %v8772_v10 }
  0x90   : > { %v575_v15 = vmul.f32 %v8762_v6, %v8781_v13  ;;  %v572_v16 = vmul.f32 %v8762_v6, %v8784_v14  ;;  %v577_v19 = vmul.f32 %v8762_v6, %v8793_v17  ;;  %v574_v20 = vmul.f32 %v8762_v6, %v8796_v18 }
  0x91   : > { %629 = vrot.lane.b32.xlu0 %v571_v7, %s16205_s29  ;;  %625 = vrot.lane.b32.xlu1 %v569_v8, %s16205_s29  ;;  %v579_v26 = vmul.f32 %v8762_v6, %v8805_v21  ;;  %v576_v27 = vmul.f32 %v8762_v6, %v8808_v22  ;;  %v581_v28 = vmul.f32 %v8762_v6, %v8811_v23 }
  0x92   : > { %v578_v31 = vmul.f32 %v8762_v6, %v8816_v24  ;;  %v8877_v57 = vpop.permute.xlu0 %590  ;;  %v583_v63 = vmul.f32 %v8762_v6, %v8844_v38  ;;  %v580_v0 = vmul.f32 %v8762_v6, %v8860_v47  ;;  %v8896_v7 = vadd.f32 %v509_v56, %v487_v60 }
  0x93   : > { %v488_v8 = vadd.f32 %v468_v62, %v442_v61  ;;  %v597_v37 = vmul.f32 %v8877_v57, %v8920_v25  ;;  %v596_v50 = vmul.f32 %v8877_v57, %v8955_v40  ;;  %v477_v60 = vmul.f32 %v7879_v29, %v8952_v39 }
  0x94   : > { %16310 = vst [vmem:[#allocation9_spill] sm:$0xff] %v8896_v7  ;;  %v519_v61 = vmul.f32 %v7881_v30, %v8970_v51 }
  0x95   : > { %633 = vrot.lane.b32.xlu0 %v573_v11, %s16205_s29  ;;  %627 = vrot.lane.b32.xlu1 %v570_v12, %s16205_s29  ;;  %v593_v11 = vmul.f32 %v8877_v57, %v8880_v58  ;;  %v8902_v12 = vadd.f32 %v510_v2, %v488_v8  ;;  %v8988_v2 = vld [vmem:[%s8854_s12 + $0xe0] sm:$0xff]  ;;  %v8991_v8 = vld [vmem:[%s8854_s12 + $0x68] sm:$0xff] }
  0x97   : > { %16311 = vst [vmem:[#allocation10_spill] sm:$0xff] %v8902_v12 }
  0x99   : > { %637 = vrot.lane.b32.xlu0 %v575_v15, %s16205_s29  ;;  %631 = vrot.lane.b32.xlu1 %v572_v16, %s16205_s29  ;;  %v582_v15 = vmul.f32 %v8762_v6, %v8894_v3  ;;  %v8907_v16 = vld [vmem:[%s8854_s12 + $0x20] sm:$0xff] }
  0x9d   : > { %641 = vrot.lane.b32.xlu0 %v577_v19, %s16205_s29  ;;  %635 = vrot.lane.b32.xlu1 %v574_v20, %s16205_s29  ;;  %v8912_v19 = vld [vmem:[%s16169_s5] ss:$0 sm:$0xff]  ;;  %v8915_v20 = vld [vmem:[%s8754_s28 + $0xe8] sm:$0xff] }
  0x9e   : > { %v449_v33 = vmul.f32 %v8912_v19, %v8920_v25 }
  0xa1   : > { %645 = vrot.lane.b32.xlu0 %v579_v26, %s16205_s29  ;;  %639 = vrot.lane.b32.xlu1 %v576_v27, %s16205_s29  ;;  %v8923_v26 = vld [vmem:[%s8854_s12 + $0x60] sm:$0xff]  ;;  %v595_v27 = vmul.f32 %v8877_v57, %v8907_v16 }
  0xa2   : > { %v475_v34 = vmul.f32 %v7879_v29, %v8923_v26  ;;  %v450_v42 = vmul.f32 %v8912_v19, %v8923_v26  ;;  %v599_v46 = vmul.f32 %v8877_v57, %v8923_v26 }
  0xa4   : > { %v491_v36 = vadd.f32 %v475_v34, %v449_v33  ;;  %v603_v34 = vmul.f32 %v8877_v57, %v8952_v39 }
  0xa5   : > { %649 = vrot.lane.b32.xlu0 %v581_v28, %s16205_s29  ;;  %643 = vrot.lane.b32.xlu1 %v578_v31, %s16205_s29  ;;  %v8928_v28 = vld [vmem:[%s8854_s12 + $0x80] sm:$0xff]  ;;  %v584_v31 = vmul.f32 %v8762_v6, %v8915_v20  ;;  %v594_v6 = vmul.f32 %v8877_v57, %v8939_v32 }
  0xa6   : > { %v517_v35 = vmul.f32 %v7881_v30, %v8928_v28  ;;  %v476_v43 = vmul.f32 %v7879_v29, %v8928_v28  ;;  %v451_v56 = vmul.f32 %v8912_v19, %v8928_v28 }
  0xa8   : > { %v8957_v41 = vadd.f32 %v517_v35, %v491_v36  ;;  %v492_v45 = vadd.f32 %v476_v43, %v450_v42  ;;  %v493_v62 = vadd.f32 %v477_v60, %v451_v56  ;;  %v600_v35 = vmul.f32 %v8877_v57, %v8991_v8  ;;  %v9006_v36 = vld [vmem:[%s8854_s12 + $0x100] sm:$0xff] }
  0xa9   : > { %653 = vrot.lane.b32.xlu0 %v583_v63, %s16205_s29  ;;  %647 = vrot.lane.b32.xlu1 %v580_v0, %s16205_s29  ;;  %v601_v63 = vmul.f32 %v8877_v57, %v8928_v28  ;;  %v598_v0 = vmul.f32 %v8877_v57, %v8973_v52  ;;  %v479_v42 = vmul.f32 %v7879_v29, %v8988_v2  ;;  %v9026_v60 = vld [vmem:[%s8854_s12 + $0x120] sm:$0xff] }
  0xaa   : > { %16312 = vst [vmem:[#allocation11_spill] sm:$0xff] %v8957_v41  ;;  %v8975_v55 = vadd.f32 %v518_v44, %v492_v45  ;;  %v521_v43 = vmul.f32 %v7881_v30, %v9006_v36  ;;  %v9015_v44 = vld [vmem:[%s8854_s12 + $0x88] sm:$0xff] }
  0xac   : > { %16313 = vst [vmem:[#allocation12_spill] sm:$0xff] %v8975_v55 }
  0xad   : > { %698 = vrot.lane.b32.xlu0 %v593_v11, %s16205_s29  ;;  %651 = vrot.lane.b32.xlu1 %v582_v15, %s16205_s29  ;;  %v8993_v11 = vadd.f32 %v519_v61, %v493_v62  ;;  %v452_v15 = vmul.f32 %v8912_v19, %v8952_v39  ;;  %v454_v61 = vmul.f32 %v8912_v19, %v8988_v2 }
  0xae   : > { %v480_v62 = vmul.f32 %v7879_v29, %v9006_v36 }
  0xaf   : > { %16314 = vst [vmem:[#allocation13_spill] sm:$0xff] %v8993_v11 }
  0xb1   : > { %702 = vrot.lane.b32.xlu0 %v595_v27, %s16205_s29  ;;  %655 = vrot.lane.b32.xlu1 %v584_v31, %s16205_s29  ;;  %v478_v27 = vmul.f32 %v7879_v29, %v8970_v51  ;;  %v520_v31 = vmul.f32 %v7881_v30, %v8988_v2 }
  0xb3   : > { %v494_v33 = vadd.f32 %v478_v27, %v452_v15  ;;  %v496_v15 = vadd.f32 %v480_v62, %v454_v61  ;;  %v762_v27 = vpop.permute.xlu0 %761 }
  0xb4   : > { %v764_v29 = vmul.f32 %v762_v27, %v8757_v4  ;;  %v769_v61 = vmul.f32 %v762_v27, %v8808_v22  ;;  %v774_v62 = vmul.f32 %v762_v27, %v8811_v23 }
  0xb5   : > { %706 = vrot.lane.b32.xlu0 %v597_v37, %s16205_s29  ;;  %700 = vrot.lane.b32.xlu1 %v594_v6, %s16205_s29  ;;  %v9008_v37 = vadd.f32 %v520_v31, %v494_v33  ;;  %v453_v6 = vmul.f32 %v8912_v19, %v8970_v51  ;;  %v607_v31 = vmul.f32 %v8877_v57, %v8988_v2 }
  0xb7   : > { %16315 = vst [vmem:[#allocation14_spill] sm:$0xff] %v9008_v37  ;;  %v495_v45 = vadd.f32 %v479_v42, %v453_v6  ;;  %v766_v6 = vmul.f32 %v762_v27, %v8769_v9 }
  0xb9   : > { %710 = vrot.lane.b32.xlu0 %v599_v46, %s16205_s29  ;;  %704 = vrot.lane.b32.xlu1 %v596_v50, %s16205_s29  ;;  %v605_v46 = vmul.f32 %v8877_v57, %v8970_v51  ;;  %v602_v50 = vmul.f32 %v8877_v57, %v9015_v44  ;;  %v9023_v56 = vadd.f32 %v521_v43, %v495_v45 }
  0xba   : > { %v768_v43 = vmul.f32 %v762_v27, %v8781_v13  ;;  %v765_v45 = vmul.f32 %v762_v27, %v8784_v14 }
  0xbb   : > { %16316 = vst [vmem:[#allocation15_spill] sm:$0xff] %v9023_v56 }
  0xbd   : > { %714 = vrot.lane.b32.xlu0 %v601_v63, %s16205_s29  ;;  %708 = vrot.lane.b32.xlu1 %v598_v0, %s16205_s29  ;;  %v9032_v63 = vld [vmem:[%s8854_s12 + $0xa8] sm:$0xff]  ;;  %v522_v0 = vmul.f32 %v7881_v30, %v9026_v60 }
  0xbe   : > { %v604_v33 = vmul.f32 %v8877_v57, %v9032_v63 }
  0xbf   : > { %v9041_v19 = vadd.f32 %v522_v0, %v496_v15  ;;  %v771_v0 = vmul.f32 %v762_v27, %v8816_v24  ;;  %v776_v15 = vmul.f32 %v762_v27, %v8844_v38 }
  0xc1   : > { %718 = vrot.lane.b32.xlu0 %v603_v34, %s16205_s29  ;;  %712 = vrot.lane.b32.xlu1 %v600_v35, %s16205_s29  ;;  %16317 = vst [vmem:[#allocation16_spill] sm:$0xff] %v9041_v19  ;;  %v9044_v34 = vld [vmem:[%s8854_s12 + $0xc8] sm:$0xff] }
  0xc2   : > { %v606_v30 = vmul.f32 %v8877_v57, %v9044_v34  ;;  %v9052_v35 = vld [vmem:[%s8854_s12 + $0xe8] sm:$0xff] }
  0xc3   : > { %v608_v42 = vmul.f32 %v8877_v57, %v9052_v35  ;;  %v772_v57 = vmul.f32 %v762_v27, %v8805_v21 }
  0xc5   : > { %722 = vrot.lane.b32.xlu0 %v605_v46, %s16205_s29  ;;  %716 = vrot.lane.b32.xlu1 %v602_v50, %s16205_s29  ;;  %v770_v46 = vmul.f32 %v762_v27, %v8793_v17  ;;  %v767_v50 = vmul.f32 %v762_v27, %v8796_v18 }
  0xc9   : > { %726 = vrot.lane.b32.xlu0 %v607_v31, %s16205_s29  ;;  %720 = vrot.lane.b32.xlu1 %v604_v33, %s16205_s29  ;;  %v773_v31 = vmul.f32 %v762_v27, %v8860_v47  ;;  %v786_v33 = vpop.permute.xlu1 %785 }
  0xcd   : > { %820 = vrot.lane.b32.xlu0 %v764_v29, %s16205_s29  ;;  %724 = vrot.lane.b32.xlu1 %v606_v30, %s16205_s29  ;;  %v778_v29 = vmul.f32 %v762_v27, %v8863_v48  ;;  %v775_v30 = vmul.f32 %v762_v27, %v8894_v3 }
  0xd1   : > { %824 = vrot.lane.b32.xlu0 %v766_v6, %s16205_s29  ;;  %728 = vrot.lane.b32.xlu1 %v608_v42, %s16205_s29  ;;  %v788_v6 = vmul.f32 %v786_v33, %v8907_v16  ;;  %v777_v42 = vmul.f32 %v762_v27, %v8915_v20 }
  0xd5   : > { %828 = vrot.lane.b32.xlu0 %v768_v43, %s16205_s29  ;;  %822 = vrot.lane.b32.xlu1 %v765_v45, %s16205_s29  ;;  %v9088_v43 = vld [vmem:[%s8754_s28 + $0x108] sm:$0xff]  ;;  %v790_v45 = vmul.f32 %v786_v33, %v8920_v25 }
  0xd9   : > { %832 = vrot.lane.b32.xlu0 %v770_v46, %s16205_s29  ;;  %826 = vrot.lane.b32.xlu1 %v767_v50, %s16205_s29  ;;  %v779_v46 = vmul.f32 %v762_v27, %v9088_v43  ;;  %v792_v50 = vmul.f32 %v786_v33, %v8923_v26  ;;  %v796_v27 = vmul.f32 %v786_v33, %v8952_v39 }
  0xdd   : > { %836 = vrot.lane.b32.xlu0 %v772_v57, %s16205_s29  ;;  %830 = vrot.lane.b32.xlu1 %v769_v61, %s16205_s29  ;;  %v789_v57 = vmul.f32 %v786_v33, %v8955_v40  ;;  %v794_v61 = vmul.f32 %v786_v33, %v8928_v28 }
  0xe1   : > { %840 = vrot.lane.b32.xlu0 %v774_v62, %s16205_s29  ;;  %834 = vrot.lane.b32.xlu1 %v771_v0, %s16205_s29  ;;  %v791_v62 = vmul.f32 %v786_v33, %v8973_v52  ;;  %v793_v0 = vmul.f32 %v786_v33, %v8991_v8 }
  0xe5   : > { %844 = vrot.lane.b32.xlu0 %v776_v15, %s16205_s29  ;;  %838 = vrot.lane.b32.xlu1 %v773_v31, %s16205_s29  ;;  %v798_v15 = vmul.f32 %v786_v33, %v8970_v51  ;;  %v795_v31 = vmul.f32 %v786_v33, %v9015_v44 }
  0xe9   : > { %848 = vrot.lane.b32.xlu0 %v778_v29, %s16205_s29  ;;  %842 = vrot.lane.b32.xlu1 %v775_v30, %s16205_s29 }
  0xed   : > { %892 = vrot.lane.b32.xlu0 %v788_v6, %s16205_s29  ;;  %846 = vrot.lane.b32.xlu1 %v777_v42, %s16205_s29  ;;  %v800_v6 = vmul.f32 %v786_v33, %v8988_v2  ;;  %v797_v42 = vmul.f32 %v786_v33, %v9032_v63 }
  0xf1   : > { %896 = vrot.lane.b32.xlu0 %v790_v45, %s16205_s29  ;;  %850 = vrot.lane.b32.xlu1 %v779_v46, %s16205_s29 }
  0xf5   : > { %900 = vrot.lane.b32.xlu0 %v792_v50, %s16205_s29  ;;  %894 = vrot.lane.b32.xlu1 %v789_v57, %s16205_s29  ;;  %v802_v50 = vmul.f32 %v786_v33, %v9006_v36  ;;  %v799_v57 = vmul.f32 %v786_v33, %v9044_v34 }
  0xf9   : > { %904 = vrot.lane.b32.xlu0 %v794_v61, %s16205_s29  ;;  %898 = vrot.lane.b32.xlu1 %v791_v62, %s16205_s29  ;;  %v7886_v61 = vld [vmem:[%s16167_s3 + $0x13] ss:$0 sm:$0xff] }
  0xfd   : > { %908 = vrot.lane.b32.xlu0 %v796_v27, %s16205_s29  ;;  %902 = vrot.lane.b32.xlu1 %v793_v0, %s16205_s29  ;;  %v801_v0 = vmul.f32 %v786_v33, %v9052_v35 }
 0x101   : > { %912 = vrot.lane.b32.xlu0 %v798_v15, %s16205_s29  ;;  %906 = vrot.lane.b32.xlu1 %v795_v31, %s16205_s29  ;;  %v9137_v15 = vld [vmem:[%s8854_s12 + $0x108] sm:$0xff] }
 0x103   : > { %v9112_v29 = vpop.permute.xlu0 %629  ;;  %v9114_v30 = vpop.permute.xlu1 %625 }
 0x104   : > { %16318 = vst [vmem:[#allocation17_spill] sm:$0xff] %v9112_v29  ;;  %16319 = vst [vmem:[#allocation18_spill] sm:$0xff] %v9114_v30 }
 0x105   : > { %916 = vrot.lane.b32.xlu0 %v800_v6, %s16205_s29  ;;  %910 = vrot.lane.b32.xlu1 %v797_v42, %s16205_s29  ;;  %v803_v42 = vmul.f32 %v786_v33, %v9137_v15 }
 0x107   : > { %v9120_v45 = vpop.permute.xlu0 %633  ;;  %v9122_v46 = vpop.permute.xlu1 %627 }
 0x108   : > { %16320 = vst [vmem:[#allocation19_spill] sm:$0xff] %v9122_v46 }
 0x109   : > { %920 = vrot.lane.b32.xlu0 %v802_v50, %s16205_s29  ;;  %914 = vrot.lane.b32.xlu1 %v799_v57, %s16205_s29  ;;  %v7887_v50 = vld [vmem:[%s16169_s5 + $0x13] ss:$0 sm:$0xff] }
 0x10b   : > { %v9131_v62 = vpop.permute.xlu0 %637  ;;  %v9133_v27 = vpop.permute.xlu1 %631 }
 0x10c   : > { %16321 = vst [vmem:[#allocation20_spill] sm:$0xff] %v9133_v27 }
 0x10d   : > { %955 = vrot.lane.b32.xlu0 %v7886_v61, %s16241_s27  ;;  %918 = vrot.lane.b32.xlu1 %v801_v0, %s16205_s29 }
 0x10f   : > { %v9141_v31 = vpop.permute.xlu0 %641  ;;  %v9143_v6 = vpop.permute.xlu1 %635 }
 0x111   : > { %922 = vrot.lane.b32.xlu1 %v803_v42, %s16205_s29 }
 0x113   : > { %v9150_v57 = vpop.permute.xlu0 %645  ;;  %v9152_v29 = vpop.permute.xlu1 %639 }
 0x115   : > { %979 = vrot.lane.b32.xlu1 %v7887_v50, %s16241_s27 }
 0x117   : > { %v9155_v61 = vpop.permute.xlu0 %649  ;;  %v9157_v0 = vpop.permute.xlu1 %643 }
 0x11b   : > { %v9159_v27 = vpop.permute.xlu0 %653  ;;  %v9161_v30 = vpop.permute.xlu1 %647 }
 0x11f   : > { %v9163_v33 = vpop.permute.xlu0 %698  ;;  %v9165_v42 = vpop.permute.xlu1 %651 }
 0x120   : > { %16322 = vst [vmem:[#allocation21_spill] sm:$0xff] %v9163_v33 }
 0x123   : > { %v9167_v46 = vpop.permute.xlu0 %702  ;;  %v9169_v19 = vpop.permute.xlu1 %655 }
 0x124   : > { %16323 = vst [vmem:[#allocation22_spill] sm:$0xff] %v9167_v46 }
 0x127   : > { %v9171_v56 = vpop.permute.xlu0 %706  ;;  %v9173_v37 = vpop.permute.xlu1 %700 }
 0x128   : > { %16324 = vst [vmem:[#allocation23_spill] sm:$0xff] %v9171_v56  ;;  %16325 = vst [vmem:[#allocation24_spill] sm:$0xff] %v9173_v37 }
 0x12b   : > { %v9175_v50 = vpop.permute.xlu0 %710  ;;  %v9177_v11 = vpop.permute.xlu1 %704 }
 0x12c   : > { %16326 = vst [vmem:[#allocation25_spill] sm:$0xff] %v9175_v50  ;;  %16327 = vst [vmem:[#allocation26_spill] sm:$0xff] %v9177_v11 }
 0x12f   : > { %v9179_v55 = vpop.permute.xlu0 %714  ;;  %v9181_v41 = vpop.permute.xlu1 %708 }
 0x130   : > { %16328 = vst [vmem:[#allocation27_spill] sm:$0xff] %v9179_v55  ;;  %16329 = vst [vmem:[#allocation28_spill] sm:$0xff] %v9181_v41 }
 0x133   : > { %v9183_v12 = vpop.permute.xlu0 %718  ;;  %v9185_v33 = vpop.permute.xlu1 %712 }
 0x134   : > { %16330 = vst [vmem:[#allocation29_spill] sm:$0xff] %v9183_v12  ;;  %16331 = vst [vmem:[#allocation30_spill] sm:$0xff] %v9185_v33 }
 0x137   : > { %v9187_v7 = vpop.permute.xlu0 %722  ;;  %v9189_v46 = vpop.permute.xlu1 %716 }
 0x138   : > { %16332 = vst [vmem:[#allocation31_spill] sm:$0xff] %v9187_v7  ;;  %16333 = vst [vmem:[#allocation32_spill] sm:$0xff] %v9189_v46 }
 0x13b   : > { %v9191_v1 = vpop.permute.xlu0 %726  ;;  %v9193_v56 = vpop.permute.xlu1 %720 }
 0x13c   : > { %16334 = vst [vmem:[#allocation33_spill] sm:$0xff] %v9191_v1  ;;  %16335 = vst [vmem:[#allocation34_spill] sm:$0xff] %v9193_v56 }
 0x13f   : > { %v9195_v37 = vpop.permute.xlu0 %820  ;;  %v9197_v50 = vpop.permute.xlu1 %724 }
 0x140   : > { %16336 = vst [vmem:[#allocation35_spill] sm:$0xff] %v9195_v37  ;;  %16337 = vst [vmem:[#allocation36_spill] sm:$0xff] %v9197_v50 }
 0x143   : > { %v9199_v11 = vpop.permute.xlu0 %824  ;;  %v9201_v55 = vpop.permute.xlu1 %728 }
 0x144   : > { %16338 = vst [vmem:[#allocation37_spill] sm:$0xff] %v9199_v11  ;;  %16339 = vst [vmem:[#allocation38_spill] sm:$0xff] %v9201_v55 }
 0x147   : > { %v9203_v41 = vpop.permute.xlu0 %828  ;;  %v9205_v12 = vpop.permute.xlu1 %822 }
 0x148   : > { %16340 = vst [vmem:[#allocation39_spill] sm:$0xff] %v9203_v41  ;;  %16341 = vst [vmem:[#allocation40_spill] sm:$0xff] %v9205_v12 }
 0x14b   : > { %v9207_v33 = vpop.permute.xlu0 %832  ;;  %v9209_v7 = vpop.permute.xlu1 %826 }
 0x14c   : > { %16342 = vst [vmem:[#allocation41_spill] sm:$0xff] %v9207_v33  ;;  %16343 = vst [vmem:[#allocation42_spill] sm:$0xff] %v9209_v7 }
 0x14f   : > { %v9211_v46 = vpop.permute.xlu0 %836  ;;  %v9213_v1 = vpop.permute.xlu1 %830 }
 0x150   : > { %16344 = vst [vmem:[#allocation43_spill] sm:$0xff] %v9211_v46  ;;  %16345 = vst [vmem:[#allocation44_spill] sm:$0xff] %v9213_v1 }
 0x153   : > { %v9215_v56 = vpop.permute.xlu0 %840  ;;  %v9217_v37 = vpop.permute.xlu1 %834 }
 0x154   : > { %16346 = vst [vmem:[#allocation45_spill] sm:$0xff] %v9215_v56  ;;  %16347 = vst [vmem:[#allocation46_spill] sm:$0xff] %v9217_v37 }
 0x157   : > { %v9219_v50 = vpop.permute.xlu0 %844  ;;  %v9221_v11 = vpop.permute.xlu1 %838 }
 0x158   : > { %16348 = vst [vmem:[#allocation47_spill] sm:$0xff] %v9219_v50  ;;  %16349 = vst [vmem:[#allocation48_spill] sm:$0xff] %v9221_v11 }
 0x15b   : > { %v9223_v55 = vpop.permute.xlu0 %848  ;;  %v9225_v41 = vpop.permute.xlu1 %842 }
 0x15c   : > { %16350 = vst [vmem:[#allocation49_spill] sm:$0xff] %v9223_v55  ;;  %16351 = vst [vmem:[#allocation50_spill] sm:$0xff] %v9225_v41 }
 0x15f   : > { %v9227_v12 = vpop.permute.xlu0 %892  ;;  %v9229_v33 = vpop.permute.xlu1 %846 }
 0x160   : > { %16352 = vst [vmem:[#allocation51_spill] sm:$0xff] %v9227_v12  ;;  %16353 = vst [vmem:[#allocation52_spill] sm:$0xff] %v9229_v33 }
 0x163   : > { %v9231_v7 = vpop.permute.xlu0 %896  ;;  %v9233_v46 = vpop.permute.xlu1 %850 }
 0x164   : > { %16354 = vst [vmem:[#allocation53_spill] sm:$0xff] %v9231_v7  ;;  %16355 = vst [vmem:[#allocation54_spill] sm:$0xff] %v9233_v46 }
 0x167   : > { %v9235_v1 = vpop.permute.xlu0 %900  ;;  %v9239_v37 = vpop.permute.xlu1 %894 }
 0x168   : > { %16356 = vst [vmem:[#allocation55_spill] sm:$0xff] %v9235_v1  ;;  %16358 = vst [vmem:[#allocation57_spill] sm:$0xff] %v9239_v37 }
 0x16b   : > { %v9237_v56 = vpop.permute.xlu0 %904  ;;  %v9243_v11 = vpop.permute.xlu1 %898 }
 0x16c   : > { %16357 = vst [vmem:[#allocation56_spill] sm:$0xff] %v9237_v56  ;;  %16360 = vst [vmem:[#allocation59_spill] sm:$0xff] %v9243_v11 }
 0x16f   : > { %v9241_v50 = vpop.permute.xlu0 %908  ;;  %v9249_v12 = vpop.permute.xlu1 %902 }
 0x170   : > { %16359 = vst [vmem:[#allocation58_spill] sm:$0xff] %v9241_v50  ;;  %16363 = vst [vmem:[#allocation62_spill] sm:$0xff] %v9249_v12 }
 0x173   : > { %v9245_v55 = vpop.permute.xlu0 %912  ;;  %v9253_v7 = vpop.permute.xlu1 %906 }
 0x174   : > { %16361 = vst [vmem:[#allocation60_spill] sm:$0xff] %v9245_v55  ;;  %16365 = vst [vmem:[#allocation64_spill] sm:$0xff] %v9253_v7  ;;  %v9290_v7 = vld [vmem:[%s8754_s28 + $0x128] sm:$0xff] }
 0x177   : > { %v9247_v41 = vpop.permute.xlu0 %916 }
 0x178   : > { %16362 = vst [vmem:[#allocation61_spill] sm:$0xff] %v9247_v41  ;;  %v9261_v41 = vpop.permute.xlu1 %910 }
 0x179   : > { %16366 = vst [vmem:[#allocation65_spill] sm:$0xff] %v9261_v41 }
 0x17b   : > { %v9251_v33 = vpop.permute.xlu0 %920 }
 0x17c   : > { %16364 = vst [vmem:[#allocation63_spill] sm:$0xff] %v9251_v33 }
 0x17f   : > { %v956_v46 = vpop.permute.xlu0 %955 }
 0x180   : > { %v958_v1 = vmul.f32 %v956_v46, %v8769_v9  ;;  %v959_v56 = vmul.f32 %v956_v46, %v8796_v18  ;;  %v960_v11 = vmul.f32 %v956_v46, %v8781_v13  ;;  %v961_v37 = vmul.f32 %v956_v46, %v8808_v22 }
 0x181   : > { %v962_v33 = vmul.f32 %v956_v46, %v8793_v17  ;;  %v963_v55 = vmul.f32 %v956_v46, %v8816_v24  ;;  %v965_v50 = vmul.f32 %v956_v46, %v8860_v47 }
 0x182   : > { %1014 = vrot.lane.b32.xlu0 %v958_v1, %s16205_s29  ;;  %1016 = vrot.lane.b32.xlu1 %v959_v56, %s16205_s29  ;;  %v9269_v1 = vpop.permute.xlu1 %914  ;;  %v964_v56 = vmul.f32 %v956_v46, %v8805_v21 }
 0x183   : > { %16367 = vst [vmem:[#allocation66_spill] sm:$0xff] %v9269_v1  ;;  %v971_v1 = vmul.f32 %v956_v46, %v9088_v43 }
 0x186   : > { %1018 = vrot.lane.b32.xlu0 %v960_v11, %s16205_s29  ;;  %1020 = vrot.lane.b32.xlu1 %v961_v37, %s16205_s29  ;;  %v966_v11 = vmul.f32 %v956_v46, %v8811_v23  ;;  %v967_v37 = vmul.f32 %v956_v46, %v8894_v3  ;;  %v9277_v41 = vpop.permute.xlu1 %918 }
 0x187   : > { %16368 = vst [vmem:[#allocation67_spill] sm:$0xff] %v9277_v41  ;;  %v973_v41 = vmul.f32 %v956_v46, %v9290_v7 }
 0x18a   : > { %1022 = vrot.lane.b32.xlu0 %v962_v33, %s16205_s29  ;;  %1024 = vrot.lane.b32.xlu1 %v963_v55, %s16205_s29  ;;  %v968_v55 = vmul.f32 %v956_v46, %v8844_v38  ;;  %v969_v33 = vmul.f32 %v956_v46, %v8915_v20 }
 0x18e   : > { %1026 = vrot.lane.b32.xlu0 %v964_v56, %s16205_s29  ;;  %1028 = vrot.lane.b32.xlu1 %v965_v50, %s16205_s29  ;;  %v9285_v56 = vpop.permute.xlu1 %922  ;;  %v970_v50 = vmul.f32 %v956_v46, %v8863_v48 }
 0x18f   : > { %16369 = vst [vmem:[#allocation68_spill] sm:$0xff] %v9285_v56 }
 0x192   : > { %1030 = vrot.lane.b32.xlu0 %v966_v11, %s16205_s29  ;;  %1032 = vrot.lane.b32.xlu1 %v967_v37, %s16205_s29  ;;  %v980_v11 = vpop.permute.xlu1 %979  ;;  %v972_v37 = vmul.f32 %v956_v46, %v8870_v53 }
 0x193   : > { %v987_v53 = vmul.f32 %v980_v11, %v9015_v44  ;;  %v989_v46 = vmul.f32 %v980_v11, %v9032_v63 }
 0x196   : > { %1034 = vrot.lane.b32.xlu0 %v968_v55, %s16205_s29  ;;  %1036 = vrot.lane.b32.xlu1 %v969_v33, %s16205_s29  ;;  %v983_v55 = vmul.f32 %v980_v11, %v8973_v52  ;;  %v982_v33 = vmul.f32 %v980_v11, %v8920_v25 }
 0x19a   : > { %1038 = vrot.lane.b32.xlu0 %v970_v50, %s16205_s29  ;;  %1040 = vrot.lane.b32.xlu1 %v971_v1, %s16205_s29  ;;  %v985_v50 = vmul.f32 %v980_v11, %v8991_v8  ;;  %v984_v1 = vmul.f32 %v980_v11, %v8923_v26 }
 0x19e   : > { %1042 = vrot.lane.b32.xlu0 %v972_v37, %s16205_s29  ;;  %1044 = vrot.lane.b32.xlu1 %v973_v41, %s16205_s29  ;;  %v986_v41 = vmul.f32 %v980_v11, %v8928_v28  ;;  %v988_v37 = vmul.f32 %v980_v11, %v8952_v39 }
 0x1a2   : > { %1088 = vrot.lane.b32.xlu1 %v983_v55, %s16205_s29  ;;  %1086 = vrot.lane.b32.xlu0 %v982_v33, %s16205_s29  ;;  %v991_v55 = vmul.f32 %v980_v11, %v9044_v34  ;;  %v990_v33 = vmul.f32 %v980_v11, %v8970_v51 }
 0x1a6   : > { %1092 = vrot.lane.b32.xlu1 %v985_v50, %s16205_s29  ;;  %1090 = vrot.lane.b32.xlu0 %v984_v1, %s16205_s29  ;;  %v993_v50 = vmul.f32 %v980_v11, %v9052_v35  ;;  %v992_v1 = vmul.f32 %v980_v11, %v8988_v2 }
 0x1aa   : > { %1096 = vrot.lane.b32.xlu1 %v987_v53, %s16205_s29  ;;  %1094 = vrot.lane.b32.xlu0 %v986_v41, %s16205_s29  ;;  %v995_v53 = vmul.f32 %v980_v11, %v9137_v15  ;;  %v994_v41 = vmul.f32 %v980_v11, %v9006_v36 }
 0x1ae   : > { %1100 = vrot.lane.b32.xlu1 %v989_v46, %s16205_s29  ;;  %1098 = vrot.lane.b32.xlu0 %v988_v37, %s16205_s29  ;;  %v9325_v46 = vld [vmem:[%s8854_s12 + $0x128] sm:$0xff] }
 0x1af   : > { %v997_v37 = vmul.f32 %v980_v11, %v9325_v46 }
 0x1b2   : > { %1104 = vrot.lane.b32.xlu1 %v991_v55, %s16205_s29  ;;  %1102 = vrot.lane.b32.xlu0 %v990_v33, %s16205_s29  ;;  %v996_v55 = vmul.f32 %v980_v11, %v9026_v60  ;;  %v7888_v33 = vld [vmem:[%s16167_s3 + $0x2] ss:$0 sm:$0xff] }
 0x1b6   : > { %1108 = vrot.lane.b32.xlu1 %v993_v50, %s16205_s29  ;;  %1106 = vrot.lane.b32.xlu0 %v992_v1, %s16205_s29  ;;  %v7889_v50 = vld [vmem:[%s16169_s5 + $0x2] ss:$0 sm:$0xff] }
 0x1ba   : > { %1112 = vrot.lane.b32.xlu1 %v995_v53, %s16205_s29  ;;  %1110 = vrot.lane.b32.xlu0 %v994_v41, %s16205_s29 }
 0x1be   : > { %1116 = vrot.lane.b32.xlu1 %v997_v37, %s16205_s29  ;;  %1114 = vrot.lane.b32.xlu0 %v996_v55, %s16205_s29 }
 0x1c2   : > { %1149 = vrot.lane.b32.xlu0 %v7888_v33, %s16207_s25  ;;  %1173 = vrot.lane.b32.xlu1 %v7889_v50, %s16207_s25 }
 0x1f4   : > { %v9341_v1 = vpop.permute.xlu0 %1014  ;;  %v9343_v60 = vpop.permute.xlu1 %1016 }
 0x1f5   : > { %16370 = vst [vmem:[#allocation69_spill] sm:$0xff] %v9341_v1  ;;  %16371 = vst [vmem:[#allocation70_spill] sm:$0xff] %v9343_v60 }
 0x1f8   : > { %v9345_v11 = vpop.permute.xlu0 %1018  ;;  %v9347_v53 = vpop.permute.xlu1 %1020 }
 0x1f9   : > { %16372 = vst [vmem:[#allocation71_spill] sm:$0xff] %v9345_v11  ;;  %16373 = vst [vmem:[#allocation72_spill] sm:$0xff] %v9347_v53 }
 0x1fc   : > { %v9349_v41 = vpop.permute.xlu0 %1022  ;;  %v9351_v37 = vpop.permute.xlu1 %1024 }
 0x1fd   : > { %16374 = vst [vmem:[#allocation73_spill] sm:$0xff] %v9349_v41  ;;  %16375 = vst [vmem:[#allocation74_spill] sm:$0xff] %v9351_v37 }
 0x200   : > { %v9353_v55 = vpop.permute.xlu0 %1026  ;;  %v9355_v56 = vpop.permute.xlu1 %1028 }
 0x201   : > { %16376 = vst [vmem:[#allocation75_spill] sm:$0xff] %v9353_v55  ;;  %16377 = vst [vmem:[#allocation76_spill] sm:$0xff] %v9355_v56 }
 0x204   : > { %v9357_v12 = vpop.permute.xlu0 %1030  ;;  %v9361_v50 = vpop.permute.xlu1 %1032 }
 0x205   : > { %16378 = vst [vmem:[#allocation77_spill] sm:$0xff] %v9357_v12  ;;  %16380 = vst [vmem:[#allocation79_spill] sm:$0xff] %v9361_v50 }
 0x208   : > { %v9359_v33 = vpop.permute.xlu0 %1034  ;;  %v9365_v60 = vpop.permute.xlu1 %1036 }
 0x209   : > { %16379 = vst [vmem:[#allocation78_spill] sm:$0xff] %v9359_v33  ;;  %16382 = vst [vmem:[#allocation81_spill] sm:$0xff] %v9365_v60 }
 0x20c   : > { %v9363_v1 = vpop.permute.xlu0 %1038  ;;  %v9371_v41 = vpop.permute.xlu1 %1040 }
 0x20d   : > { %16381 = vst [vmem:[#allocation80_spill] sm:$0xff] %v9363_v1  ;;  %16385 = vst [vmem:[#allocation84_spill] sm:$0xff] %v9371_v41 }
 0x210   : > { %v9367_v11 = vpop.permute.xlu0 %1042  ;;  %v9375_v55 = vpop.permute.xlu1 %1044 }
 0x211   : > { %16383 = vst [vmem:[#allocation82_spill] sm:$0xff] %v9367_v11  ;;  %16387 = vst [vmem:[#allocation86_spill] sm:$0xff] %v9375_v55 }
 0x214   : > { %v9369_v53 = vpop.permute.xlu0 %1086  ;;  %v9381_v33 = vpop.permute.xlu1 %1088 }
 0x215   : > { %16384 = vst [vmem:[#allocation83_spill] sm:$0xff] %v9369_v53  ;;  %16390 = vst [vmem:[#allocation89_spill] sm:$0xff] %v9381_v33 }
 0x218   : > { %v9373_v37 = vpop.permute.xlu0 %1090  ;;  %v9385_v1 = vpop.permute.xlu1 %1092 }
 0x219   : > { %16386 = vst [vmem:[#allocation85_spill] sm:$0xff] %v9373_v37  ;;  %16391 = vst [vmem:[#allocation90_spill] sm:$0xff] %v9385_v1 }
 0x21c   : > { %v9377_v56 = vpop.permute.xlu0 %1094  ;;  %v9391_v53 = vpop.permute.xlu1 %1096 }
 0x21d   : > { %16388 = vst [vmem:[#allocation87_spill] sm:$0xff] %v9377_v56 }
 0x220   : > { %v9379_v12 = vpop.permute.xlu0 %1098  ;;  %v9395_v37 = vpop.permute.xlu1 %1100 }
 0x221   : > { %16389 = vst [vmem:[#allocation88_spill] sm:$0xff] %v9379_v12 }
 0x224   : > { %v9383_v50 = vpop.permute.xlu0 %1102 }
 0x228   : > { %v9387_v60 = vpop.permute.xlu0 %1106 }
 0x229   : > { %16392 = vst [vmem:[#allocation91_spill] sm:$0xff] %v9387_v60 }
 0x22c   : > { %v9389_v11 = vpop.permute.xlu0 %1110 }
 0x22d   : > { %16393 = vst [vmem:[#allocation92_spill] sm:$0xff] %v9389_v11  ;;  %v9403_v11 = vpop.permute.xlu1 %1104 }
 0x230   : > { %v9393_v41 = vpop.permute.xlu0 %1114 }
 0x231   : > { %16394 = vst [vmem:[#allocation93_spill] sm:$0xff] %v9393_v41 }
 0x234   : > { %v1150_v55 = vpop.permute.xlu0 %1149 }
 0x235   : > { %v1153_v56 = vmul.f32 %v1150_v55, %v8772_v10  ;;  %v1152_v12 = vmul.f32 %v1150_v55, %v8760_v5  ;;  %v1155_v1 = vmul.f32 %v1150_v55, %v8784_v14  ;;  %v1154_v33 = vmul.f32 %v1150_v55, %v8757_v4  ;;  %v9411_v5 = vpop.permute.xlu1 %1108 }
 0x236   : > { %v1157_v41 = vmul.f32 %v1150_v55, %v8796_v18  ;;  %v1156_v10 = vmul.f32 %v1150_v55, %v8769_v9  ;;  %16395 = vst [vmem:[#allocation94_spill] sm:$0xff] %v9411_v5  ;;  %v1158_v4 = vmul.f32 %v1150_v55, %v8781_v13  ;;  %v1164_v60 = vmul.f32 %v1150_v55, %v8811_v23 }
 0x237   : > { %1210 = vrot.lane.b32.xlu1 %v1153_v56, %s16209_s26  ;;  %1208 = vrot.lane.b32.xlu0 %v1152_v12, %s16209_s26  ;;  %v1159_v12 = vmul.f32 %v1150_v55, %v8808_v22  ;;  %v1161_v56 = vmul.f32 %v1150_v55, %v8816_v24 }
 0x23b   : > { %1214 = vrot.lane.b32.xlu1 %v1155_v1, %s16209_s26  ;;  %1212 = vrot.lane.b32.xlu0 %v1154_v33, %s16209_s26  ;;  %v1160_v1 = vmul.f32 %v1150_v55, %v8793_v17  ;;  %v9419_v33 = vpop.permute.xlu1 %1112 }
 0x23c   : > { %16396 = vst [vmem:[#allocation95_spill] sm:$0xff] %v9419_v33  ;;  %v1166_v33 = vmul.f32 %v1150_v55, %v8844_v38 }
 0x23f   : > { %1218 = vrot.lane.b32.xlu1 %v1157_v41, %s16209_s26  ;;  %1216 = vrot.lane.b32.xlu0 %v1156_v10, %s16209_s26  ;;  %v1163_v41 = vmul.f32 %v1150_v55, %v8860_v47  ;;  %v1162_v10 = vmul.f32 %v1150_v55, %v8805_v21 }
 0x243   : > { %1222 = vrot.lane.b32.xlu1 %v1159_v12, %s16209_s26  ;;  %1220 = vrot.lane.b32.xlu0 %v1158_v4, %s16209_s26  ;;  %v9427_v12 = vpop.permute.xlu1 %1116  ;;  %v1165_v4 = vmul.f32 %v1150_v55, %v8894_v3 }
 0x244   : > { %16397 = vst [vmem:[#allocation96_spill] sm:$0xff] %v9427_v12 }
 0x247   : > { %1226 = vrot.lane.b32.xlu1 %v1161_v56, %s16209_s26  ;;  %1224 = vrot.lane.b32.xlu0 %v1160_v1, %s16209_s26  ;;  %v1174_v56 = vpop.permute.xlu1 %1173  ;;  %v1167_v1 = vmul.f32 %v1150_v55, %v8915_v20 }
 0x248   : > { %v1181_v55 = vmul.f32 %v1174_v56, %v8973_v52 }
 0x24b   : > { %1230 = vrot.lane.b32.xlu1 %v1163_v41, %s16209_s26  ;;  %1228 = vrot.lane.b32.xlu0 %v1162_v10, %s16209_s26  ;;  %v1177_v41 = vmul.f32 %v1174_v56, %v8939_v32  ;;  %v1176_v10 = vmul.f32 %v1174_v56, %v8880_v58  ;;  %v1183_v58 = vmul.f32 %v1174_v56, %v8991_v8 }
 0x24c   : > { %v1182_v32 = vmul.f32 %v1174_v56, %v8923_v26 }
 0x24f   : > { %1234 = vrot.lane.b32.xlu1 %v1165_v4, %s16209_s26  ;;  %1232 = vrot.lane.b32.xlu0 %v1164_v60, %s16209_s26  ;;  %v1179_v4 = vmul.f32 %v1174_v56, %v8955_v40  ;;  %v1178_v60 = vmul.f32 %v1174_v56, %v8907_v16 }
 0x253   : > { %1238 = vrot.lane.b32.xlu1 %v1167_v1, %s16209_s26  ;;  %1236 = vrot.lane.b32.xlu0 %v1166_v33, %s16209_s26  ;;  %v1180_v33 = vmul.f32 %v1174_v56, %v8920_v25  ;;  %v1185_v1 = vmul.f32 %v1174_v56, %v9015_v44 }
 0x257   : > { %1283 = vrot.lane.b32.xlu1 %v1177_v41, %s16209_s26  ;;  %1281 = vrot.lane.b32.xlu0 %v1176_v10, %s16209_s26  ;;  %v1184_v41 = vmul.f32 %v1174_v56, %v8928_v28  ;;  %v1187_v10 = vmul.f32 %v1174_v56, %v9032_v63 }
 0x25b   : > { %1287 = vrot.lane.b32.xlu1 %v1179_v4, %s16209_s26  ;;  %1285 = vrot.lane.b32.xlu0 %v1178_v60, %s16209_s26  ;;  %v1186_v4 = vmul.f32 %v1174_v56, %v8952_v39  ;;  %v1189_v60 = vmul.f32 %v1174_v56, %v9044_v34 }
 0x25f   : > { %1291 = vrot.lane.b32.xlu1 %v1181_v55, %s16209_s26  ;;  %1289 = vrot.lane.b32.xlu0 %v1180_v33, %s16209_s26  ;;  %v1188_v55 = vmul.f32 %v1174_v56, %v8970_v51  ;;  %v1191_v33 = vmul.f32 %v1174_v56, %v9052_v35 }
 0x263   : > { %1295 = vrot.lane.b32.xlu1 %v1183_v58, %s16209_s26  ;;  %1293 = vrot.lane.b32.xlu0 %v1182_v32, %s16209_s26  ;;  %v1190_v58 = vmul.f32 %v1174_v56, %v8988_v2  ;;  %v7890_v32 = vld [vmem:[%s16167_s3 + $0xb] ss:$0 sm:$0xff] }
 0x267   : > { %1299 = vrot.lane.b32.xlu1 %v1185_v1, %s16209_s26  ;;  %1297 = vrot.lane.b32.xlu0 %v1184_v41, %s16209_s26  ;;  %v7891_v1 = vld [vmem:[%s16169_s5 + $0xb] ss:$0 sm:$0xff] }
 0x26b   : > { %1303 = vrot.lane.b32.xlu1 %v1187_v10, %s16209_s26  ;;  %1301 = vrot.lane.b32.xlu0 %v1186_v4, %s16209_s26 }
 0x26f   : > { %1307 = vrot.lane.b32.xlu1 %v1189_v60, %s16209_s26  ;;  %1305 = vrot.lane.b32.xlu0 %v1188_v55, %s16209_s26 }
 0x273   : > { %1311 = vrot.lane.b32.xlu1 %v1191_v33, %s16209_s26  ;;  %1309 = vrot.lane.b32.xlu0 %v1190_v58, %s16209_s26 }
 0x277   : > { %1344 = vrot.lane.b32.xlu0 %v7890_v32, %s16207_s25  ;;  %1368 = vrot.lane.b32.xlu1 %v7891_v1, %s16207_s25 }
 0x2a9   : > { %v9477_v41 = vpop.permute.xlu0 %1208  ;;  %v9479_v10 = vpop.permute.xlu1 %1210 }
 0x2aa   : > { %16398 = vst [vmem:[#allocation97_spill] sm:$0xff] %v9477_v41  ;;  %16399 = vst [vmem:[#allocation98_spill] sm:$0xff] %v9479_v10 }
 0x2ad   : > { %v9481_v56 = vpop.permute.xlu0 %1212  ;;  %v9483_v4 = vpop.permute.xlu1 %1214 }
 0x2ae   : > { %16400 = vst [vmem:[#allocation99_spill] sm:$0xff] %v9481_v56  ;;  %16401 = vst [vmem:[#allocation100_spill] sm:$0xff] %v9483_v4 }
 0x2b1   : > { %v9485_v60 = vpop.permute.xlu0 %1216  ;;  %v9487_v55 = vpop.permute.xlu1 %1218 }
 0x2b2   : > { %16402 = vst [vmem:[#allocation101_spill] sm:$0xff] %v9485_v60  ;;  %16403 = vst [vmem:[#allocation102_spill] sm:$0xff] %v9487_v55 }
 0x2b5   : > { %v9489_v33 = vpop.permute.xlu0 %1220  ;;  %v9491_v58 = vpop.permute.xlu1 %1222 }
 0x2b6   : > { %16404 = vst [vmem:[#allocation103_spill] sm:$0xff] %v9489_v33  ;;  %16405 = vst [vmem:[#allocation104_spill] sm:$0xff] %v9491_v58 }
 0x2b9   : > { %v9493_v12 = vpop.permute.xlu0 %1224  ;;  %v9497_v1 = vpop.permute.xlu1 %1226 }
 0x2ba   : > { %16406 = vst [vmem:[#allocation105_spill] sm:$0xff] %v9493_v12  ;;  %16408 = vst [vmem:[#allocation107_spill] sm:$0xff] %v9497_v1 }
 0x2bd   : > { %v9495_v32 = vpop.permute.xlu0 %1228  ;;  %v9501_v10 = vpop.permute.xlu1 %1230 }
 0x2be   : > { %16407 = vst [vmem:[#allocation106_spill] sm:$0xff] %v9495_v32  ;;  %16410 = vst [vmem:[#allocation109_spill] sm:$0xff] %v9501_v10 }
 0x2c1   : > { %v9499_v41 = vpop.permute.xlu0 %1232  ;;  %v9507_v60 = vpop.permute.xlu1 %1234 }
 0x2c2   : > { %16409 = vst [vmem:[#allocation108_spill] sm:$0xff] %v9499_v41  ;;  %16413 = vst [vmem:[#allocation112_spill] sm:$0xff] %v9507_v60 }
 0x2c5   : > { %v9503_v56 = vpop.permute.xlu0 %1236  ;;  %v9511_v58 = vpop.permute.xlu1 %1238 }
 0x2c6   : > { %16411 = vst [vmem:[#allocation110_spill] sm:$0xff] %v9503_v56  ;;  %16415 = vst [vmem:[#allocation114_spill] sm:$0xff] %v9511_v58 }
 0x2c9   : > { %v9505_v4 = vpop.permute.xlu0 %1281  ;;  %v9517_v1 = vpop.permute.xlu1 %1283 }
 0x2ca   : > { %16412 = vst [vmem:[#allocation111_spill] sm:$0xff] %v9505_v4  ;;  %16418 = vst [vmem:[#allocation117_spill] sm:$0xff] %v9517_v1 }
 0x2cd   : > { %v9509_v33 = vpop.permute.xlu0 %1285  ;;  %v9521_v10 = vpop.permute.xlu1 %1287 }
 0x2ce   : > { %16414 = vst [vmem:[#allocation113_spill] sm:$0xff] %v9509_v33  ;;  %16419 = vst [vmem:[#allocation118_spill] sm:$0xff] %v9521_v10 }
 0x2d1   : > { %v9513_v12 = vpop.permute.xlu0 %1289  ;;  %v9527_v55 = vpop.permute.xlu1 %1291 }
 0x2d2   : > { %16416 = vst [vmem:[#allocation115_spill] sm:$0xff] %v9513_v12 }
 0x2d5   : > { %v9515_v32 = vpop.permute.xlu0 %1293  ;;  %v9531_v33 = vpop.permute.xlu1 %1295 }
 0x2d6   : > { %16417 = vst [vmem:[#allocation116_spill] sm:$0xff] %v9515_v32  ;;  %v8273_v32 = vld [vmem:[%s8754_s28 + $0x20] sm:$0xff] }
 0x2d9   : > { %v9519_v41 = vpop.permute.xlu0 %1297 }
 0x2dd   : > { %v9523_v56 = vpop.permute.xlu0 %1301 }
 0x2e1   : > { %v9525_v4 = vpop.permute.xlu0 %1305 }
 0x2e2   : > { %16420 = vst [vmem:[#allocation119_spill] sm:$0xff] %v9525_v4  ;;  %v9539_v4 = vpop.permute.xlu1 %1299 }
 0x2e5   : > { %v9529_v60 = vpop.permute.xlu0 %1309 }
 0x2e6   : > { %16421 = vst [vmem:[#allocation120_spill] sm:$0xff] %v9529_v60 }
 0x2e9   : > { %v1345_v58 = vpop.permute.xlu0 %1344 }
 0x2ea   : > { %v1348_v12 = vmul.f32 %v1345_v58, %v8784_v14  ;;  %v1347_v5 = vmul.f32 %v8273_v32, %v1345_v58  ;;  %v1350_v10 = vmul.f32 %v1345_v58, %v8796_v18  ;;  %v1349_v1 = vmul.f32 %v1345_v58, %v8769_v9 }
 0x2eb   : > { %v1352_v60 = vmul.f32 %v1345_v58, %v8808_v22  ;;  %v1351_v14 = vmul.f32 %v1345_v58, %v8781_v13  ;;  %v1354_v18 = vmul.f32 %v1345_v58, %v8816_v24  ;;  %v1353_v9 = vmul.f32 %v1345_v58, %v8793_v17 }
 0x2ec   : > { %1405 = vrot.lane.b32.xlu1 %v1348_v12, %s16209_s26  ;;  %1403 = vrot.lane.b32.xlu0 %v1347_v5, %s16209_s26  ;;  %v9547_v12 = vpop.permute.xlu1 %1303  ;;  %v1356_v5 = vmul.f32 %v1345_v58, %v8860_v47  ;;  %v1355_v22 = vmul.f32 %v1345_v58, %v8805_v21  ;;  %v1358_v13 = vmul.f32 %v1345_v58, %v8894_v3 }
 0x2ed   : > { %v1357_v24 = vmul.f32 %v1345_v58, %v8811_v23  ;;  %v1360_v47 = vmul.f32 %v1345_v58, %v8915_v20  ;;  %v1359_v21 = vmul.f32 %v1345_v58, %v8844_v38  ;;  %v1362_v32 = vmul.f32 %v1345_v58, %v9088_v43 }
 0x2ee   : > { %v1361_v3 = vmul.f32 %v1345_v58, %v8863_v48 }
 0x2f0   : > { %1409 = vrot.lane.b32.xlu1 %v1350_v10, %s16209_s26  ;;  %1407 = vrot.lane.b32.xlu0 %v1349_v1, %s16209_s26  ;;  %v9555_v10 = vpop.permute.xlu1 %1307 }
 0x2f4   : > { %1413 = vrot.lane.b32.xlu1 %v1352_v60, %s16209_s26  ;;  %1411 = vrot.lane.b32.xlu0 %v1351_v14, %s16209_s26  ;;  %v9563_v17 = vpop.permute.xlu1 %1311 }
 0x2f8   : > { %1417 = vrot.lane.b32.xlu1 %v1354_v18, %s16209_s26  ;;  %1415 = vrot.lane.b32.xlu0 %v1353_v9, %s16209_s26  ;;  %v1369_v60 = vpop.permute.xlu1 %1368 }
 0x2f9   : > { %v1372_v23 = vmul.f32 %v1369_v60, %v8955_v40  ;;  %v1371_v1 = vmul.f32 %v1369_v60, %v8907_v16  ;;  %v1374_v38 = vmul.f32 %v1369_v60, %v8973_v52  ;;  %v1373_v20 = vmul.f32 %v1369_v60, %v8920_v25 }
 0x2fa   : > { %v1376_v48 = vmul.f32 %v1369_v60, %v8991_v8  ;;  %v1375_v58 = vmul.f32 %v1369_v60, %v8923_v26  ;;  %v1378_v16 = vmul.f32 %v1369_v60, %v9015_v44  ;;  %v1377_v40 = vmul.f32 %v1369_v60, %v8928_v28 }
 0x2fb   : > { %v1380_v25 = vmul.f32 %v1369_v60, %v9032_v63  ;;  %v1379_v52 = vmul.f32 %v1369_v60, %v8952_v39  ;;  %v1382_v26 = vmul.f32 %v1369_v60, %v9044_v34  ;;  %v1381_v8 = vmul.f32 %v1369_v60, %v8970_v51  ;;  %v7892_v51 = vld [vmem:[%s16167_s3 + $0x14] ss:$0 sm:$0xff] }
 0x2fc   : > { %1421 = vrot.lane.b32.xlu1 %v1356_v5, %s16209_s26  ;;  %1419 = vrot.lane.b32.xlu0 %v1355_v22, %s16209_s26  ;;  %v1384_v28 = vmul.f32 %v1369_v60, %v9052_v35  ;;  %v1383_v44 = vmul.f32 %v1369_v60, %v8988_v2  ;;  %v1386_v39 = vmul.f32 %v1369_v60, %v9137_v15  ;;  %v7893_v2 = vld [vmem:[%s16169_s5 + $0x14] ss:$0 sm:$0xff] }
 0x2fd   : > { %v1385_v14 = vmul.f32 %v1369_v60, %v9006_v36 }
 0x300   : > { %1425 = vrot.lane.b32.xlu1 %v1358_v13, %s16209_s26  ;;  %1423 = vrot.lane.b32.xlu0 %v1357_v24, %s16209_s26 }
 0x304   : > { %1429 = vrot.lane.b32.xlu1 %v1360_v47, %s16209_s26  ;;  %1427 = vrot.lane.b32.xlu0 %v1359_v21, %s16209_s26 }
 0x308   : > { %1433 = vrot.lane.b32.xlu1 %v1362_v32, %s16209_s26  ;;  %1431 = vrot.lane.b32.xlu0 %v1361_v3, %s16209_s26 }
 0x30c   : > { %1477 = vrot.lane.b32.xlu1 %v1372_v23, %s16209_s26  ;;  %1475 = vrot.lane.b32.xlu0 %v1371_v1, %s16209_s26 }
 0x310   : > { %1481 = vrot.lane.b32.xlu1 %v1374_v38, %s16209_s26  ;;  %1479 = vrot.lane.b32.xlu0 %v1373_v20, %s16209_s26 }
 0x314   : > { %1485 = vrot.lane.b32.xlu1 %v1376_v48, %s16209_s26  ;;  %1483 = vrot.lane.b32.xlu0 %v1375_v58, %s16209_s26 }
 0x318   : > { %1489 = vrot.lane.b32.xlu1 %v1378_v16, %s16209_s26  ;;  %1487 = vrot.lane.b32.xlu0 %v1377_v40, %s16209_s26 }
 0x31c   : > { %1493 = vrot.lane.b32.xlu1 %v1380_v25, %s16209_s26  ;;  %1491 = vrot.lane.b32.xlu0 %v1379_v52, %s16209_s26 }
 0x320   : > { %1497 = vrot.lane.b32.xlu1 %v1382_v26, %s16209_s26  ;;  %1495 = vrot.lane.b32.xlu0 %v1381_v8, %s16209_s26 }
 0x324   : > { %1501 = vrot.lane.b32.xlu1 %v1384_v28, %s16209_s26  ;;  %1499 = vrot.lane.b32.xlu0 %v1383_v44, %s16209_s26 }
 0x328   : > { %1505 = vrot.lane.b32.xlu1 %v1386_v39, %s16209_s26  ;;  %1503 = vrot.lane.b32.xlu0 %v1385_v14, %s16209_s26 }
 0x32c   : > { %1538 = vrot.lane.b32.xlu0 %v7892_v51, %s16207_s25  ;;  %1562 = vrot.lane.b32.xlu1 %v7893_v2, %s16207_s25  ;;  %v8274_v2 = vld [vmem:[%s8754_s28 + $0x48] sm:$0xff] }
 0x35e   : > { %v9613_v18 = vpop.permute.xlu0 %1403  ;;  %v9615_v9 = vpop.permute.xlu1 %1405 }
 0x35f   : > { %16422 = vst [vmem:[#allocation121_spill] sm:$0xff] %v9613_v18  ;;  %16423 = vst [vmem:[#allocation122_spill] sm:$0xff] %v9615_v9 }
 0x362   : > { %v9617_v36 = vpop.permute.xlu0 %1407  ;;  %v9619_v5 = vpop.permute.xlu1 %1409 }
 0x363   : > { %16424 = vst [vmem:[#allocation123_spill] sm:$0xff] %v9617_v36  ;;  %16425 = vst [vmem:[#allocation124_spill] sm:$0xff] %v9619_v5  ;;  %v8277_v5 = vld [vmem:[%s8754_s28 + $0x60] sm:$0xff] }
 0x366   : > { %v9621_v22 = vpop.permute.xlu0 %1411  ;;  %v9623_v13 = vpop.permute.xlu1 %1413 }
 0x36a   : > { %v9625_v24 = vpop.permute.xlu0 %1415  ;;  %v9627_v47 = vpop.permute.xlu1 %1417 }
 0x36e   : > { %v9629_v21 = vpop.permute.xlu0 %1419  ;;  %v9633_v32 = vpop.permute.xlu1 %1421 }
 0x372   : > { %v9631_v60 = vpop.permute.xlu0 %1423  ;;  %v9637_v23 = vpop.permute.xlu1 %1425 }
 0x376   : > { %v9635_v3 = vpop.permute.xlu0 %1427  ;;  %v9643_v20 = vpop.permute.xlu1 %1429 }
 0x37a   : > { %v9639_v1 = vpop.permute.xlu0 %1431  ;;  %v9647_v58 = vpop.permute.xlu1 %1433 }
 0x37e   : > { %v9641_v38 = vpop.permute.xlu0 %1475  ;;  %v9653_v25 = vpop.permute.xlu1 %1477 }
 0x37f   : > { %16426 = vst [vmem:[#allocation125_spill] sm:$0xff] %v9641_v38  ;;  %16429 = vst [vmem:[#allocation128_spill] sm:$0xff] %v9653_v25  ;;  %v8275_v38 = vld [vmem:[%s8754_s28 + $0x40] sm:$0xff] }
 0x382   : > { %v9645_v48 = vpop.permute.xlu0 %1479  ;;  %v9657_v26 = vpop.permute.xlu1 %1481 }
 0x383   : > { %16427 = vst [vmem:[#allocation126_spill] sm:$0xff] %v9645_v48  ;;  %16431 = vst [vmem:[#allocation130_spill] sm:$0xff] %v9657_v26  ;;  %v8276_v26 = vld [vmem:[%s8754_s28 + $0x68] sm:$0xff] }
 0x386   : > { %v9649_v16 = vpop.permute.xlu0 %1483  ;;  %v9663_v44 = vpop.permute.xlu1 %1485 }
 0x38a   : > { %v9651_v40 = vpop.permute.xlu0 %1487  ;;  %v9667_v14 = vpop.permute.xlu1 %1489 }
 0x38b   : > { %16428 = vst [vmem:[#allocation127_spill] sm:$0xff] %v9651_v40  ;;  %16435 = vst [vmem:[#allocation134_spill] sm:$0xff] %v9667_v14  ;;  %v16492_v40 = vld [vmem:[#allocation78_spill] sm:$0xff]  ;;  %v16494_v14 = vld [vmem:[#allocation80_spill] sm:$0xff] }
 0x38e   : > { %v9655_v52 = vpop.permute.xlu0 %1491  ;;  %v9675_v9 = vpop.permute.xlu1 %1493 }
 0x38f   : > { %16430 = vst [vmem:[#allocation129_spill] sm:$0xff] %v9655_v52  ;;  %16436 = vst [vmem:[#allocation135_spill] sm:$0xff] %v9675_v9  ;;  %v16490_v9 = vld [vmem:[#allocation77_spill] sm:$0xff] }
 0x392   : > { %v9659_v8 = vpop.permute.xlu0 %1495 }
 0x393   : > { %16432 = vst [vmem:[#allocation131_spill] sm:$0xff] %v9659_v8 }
 0x396   : > { %v9661_v28 = vpop.permute.xlu0 %1499 }
 0x397   : > { %16433 = vst [vmem:[#allocation132_spill] sm:$0xff] %v9661_v28  ;;  %v8281_v28 = vld [vmem:[%s8754_s28 + $0xa0] sm:$0xff] }
 0x39a   : > { %v9665_v39 = vpop.permute.xlu0 %1503 }
 0x39b   : > { %16434 = vst [vmem:[#allocation133_spill] sm:$0xff] %v9665_v39  ;;  %v8279_v39 = vld [vmem:[%s8754_s28 + $0x80] sm:$0xff] }
 0x39e   : > { %v1539_v51 = vpop.permute.xlu0 %1538 }
 0x39f   : > { %v1542_v48 = vmul.f32 %v8274_v2, %v1539_v51  ;;  %v1541_v25 = vmul.f32 %v8275_v38, %v1539_v51  ;;  %v1544_v36 = vmul.f32 %v8276_v26, %v1539_v51  ;;  %v1543_v18 = vmul.f32 %v8277_v5, %v1539_v51  ;;  %v8278_v2 = vld [vmem:[%s8754_s28 + $0x88] sm:$0xff] }
 0x3a0   : > { %v1546_v38 = vmul.f32 %v8278_v2, %v1539_v51  ;;  %v8280_v5 = vld [vmem:[%s8754_s28 + $0xa8] sm:$0xff]  ;;  %v1547_v8 = vmul.f32 %v8281_v28, %v1539_v51 }
 0x3a1   : > { %1599 = vrot.lane.b32.xlu1 %v1542_v48, %s16209_s26  ;;  %1597 = vrot.lane.b32.xlu0 %v1541_v25, %s16209_s26  ;;  %v1545_v48 = vmul.f32 %v8279_v39, %v1539_v51  ;;  %v9683_v25 = vpop.permute.xlu1 %1497  ;;  %v1548_v26 = vmul.f32 %v8280_v5, %v1539_v51  ;;  %v8283_v39 = vld [vmem:[%s8754_s28 + $0xc0] sm:$0xff] }
 0x3a2   : > { %16437 = vst [vmem:[#allocation136_spill] sm:$0xff] %v9683_v25  ;;  %v1549_v2 = vmul.f32 %v8283_v39, %v1539_v51  ;;  %v8285_v25 = vld [vmem:[%s8754_s28 + $0xe0] sm:$0xff] }
 0x3a3   : > { %v1551_v28 = vmul.f32 %v8285_v25, %v1539_v51  ;;  %v1556_v25 = vmul.f32 %v1539_v51, %v9290_v7  ;;  %v8291_v7 = vld [vmem:[%s8854_s12 + $0x60] sm:$0xff] }
 0x3a5   : > { %1603 = vrot.lane.b32.xlu1 %v1544_v36, %s16209_s26  ;;  %1601 = vrot.lane.b32.xlu0 %v1543_v18, %s16209_s26  ;;  %v8282_v18 = vld [vmem:[%s8754_s28 + $0xc8] sm:$0xff] }
 0x3a6   : > { %v1550_v36 = vmul.f32 %v8282_v18, %v1539_v51  ;;  %v8286_v18 = vld [vmem:[%s8754_s28 + $0x100] sm:$0xff] }
 0x3a9   : > { %1607 = vrot.lane.b32.xlu1 %v1546_v38, %s16209_s26  ;;  %1605 = vrot.lane.b32.xlu0 %v1545_v48, %s16209_s26  ;;  %v9691_v38 = vpop.permute.xlu1 %1501  ;;  %v8284_v48 = vld [vmem:[%s8754_s28 + $0xe8] sm:$0xff] }
 0x3aa   : > { %16438 = vst [vmem:[#allocation137_spill] sm:$0xff] %v9691_v38  ;;  %v1552_v5 = vmul.f32 %v8284_v48, %v1539_v51  ;;  %v16471_v38 = vld [vmem:[#allocation54_spill] sm:$0xff] }
 0x3ad   : > { %1611 = vrot.lane.b32.xlu1 %v1548_v26, %s16209_s26  ;;  %1609 = vrot.lane.b32.xlu0 %v1547_v8, %s16209_s26  ;;  %v9699_v8 = vpop.permute.xlu1 %1505  ;;  %v1554_v26 = vmul.f32 %v1539_v51, %v9088_v43  ;;  %v8288_v43 = vld [vmem:[%s8854_s12 + $0x48] sm:$0xff] }
 0x3ae   : > { %16439 = vst [vmem:[#allocation138_spill] sm:$0xff] %v9699_v8 }
 0x3b1   : > { %1615 = vrot.lane.b32.xlu1 %v1550_v36, %s16209_s26  ;;  %1613 = vrot.lane.b32.xlu0 %v1549_v2, %s16209_s26  ;;  %v1553_v36 = vmul.f32 %v8286_v18, %v1539_v51  ;;  %v1563_v39 = vpop.permute.xlu1 %1562  ;;  %v8287_v2 = vld [vmem:[%s8754_s28 + $0x120] sm:$0xff] }
 0x3b2   : > { %v1555_v48 = vmul.f32 %v8287_v2, %v1539_v51  ;;  %v1567_v8 = vmul.f32 %v8291_v7, %v1563_v39  ;;  %v8292_v51 = vld [vmem:[%s8854_s12 + $0x88] sm:$0xff]  ;;  %v8293_v2 = vld [vmem:[%s8854_s12 + $0x80] sm:$0xff] }
 0x3b3   : > { %v8296_v7 = vld [vmem:[%s8854_s12 + $0xe0] sm:$0xff] }
 0x3b5   : > { %1619 = vrot.lane.b32.xlu1 %v1552_v5, %s16209_s26  ;;  %1617 = vrot.lane.b32.xlu0 %v1551_v28, %s16209_s26  ;;  %v1566_v5 = vmul.f32 %v8288_v43, %v1563_v39  ;;  %v8289_v28 = vld [vmem:[%s8854_s12 + $0x40] sm:$0xff]  ;;  %v1572_v43 = vmul.f32 %v1563_v39, %v9032_v63  ;;  %v1575_v63 = vmul.f32 %v8296_v7, %v1563_v39  ;;  %v16446_v7 = vld [vmem:[#allocation27_spill] sm:$0xff] }
 0x3b6   : > { %v1565_v18 = vmul.f32 %v8289_v28, %v1563_v39 }
 0x3b9   : > { %1623 = vrot.lane.b32.xlu1 %v1554_v26, %s16209_s26  ;;  %1621 = vrot.lane.b32.xlu0 %v1553_v36, %s16209_s26  ;;  %v8290_v26 = vld [vmem:[%s8854_s12 + $0x68] sm:$0xff] }
 0x3ba   : > { %v1568_v36 = vmul.f32 %v8290_v26, %v1563_v39 }
 0x3bd   : > { %1627 = vrot.lane.b32.xlu1 %v1556_v25, %s16209_s26  ;;  %1625 = vrot.lane.b32.xlu0 %v1555_v48, %s16209_s26  ;;  %v1570_v25 = vmul.f32 %v8292_v51, %v1563_v39  ;;  %v1569_v48 = vmul.f32 %v8293_v2, %v1563_v39  ;;  %v1578_v51 = vmul.f32 %v1563_v39, %v9137_v15  ;;  %v7901_v15 = vld [vmem:[%s16169_s5 + $0x4] ss:$0 sm:$0xff] }
 0x3c1   : > { %1671 = vrot.lane.b32.xlu1 %v1566_v5, %s16209_s26  ;;  %1669 = vrot.lane.b32.xlu0 %v1565_v18, %s16209_s26  ;;  %v8294_v5 = vld [vmem:[%s8854_s12 + $0xa0] sm:$0xff] }
 0x3c2   : > { %v1571_v28 = vmul.f32 %v8294_v5, %v1563_v39  ;;  %v8295_v18 = vld [vmem:[%s8854_s12 + $0xc0] sm:$0xff]  ;;  %v662_v5 = vsel %vm657_vm0, %v9141_v31, %v9157_v0 }
 0x3c3   : > { %v1573_v26 = vmul.f32 %v8295_v18, %v1563_v39  ;;  %v16441_v0 = vld [vmem:[#allocation28_spill] sm:$0xff] }
 0x3c5   : > { %1675 = vrot.lane.b32.xlu1 %v1568_v36, %s16209_s26  ;;  %1673 = vrot.lane.b32.xlu0 %v1567_v8, %s16209_s26  ;;  %v1574_v8 = vmul.f32 %v1563_v39, %v9044_v34  ;;  %v1576_v36 = vmul.f32 %v1563_v39, %v9052_v35  ;;  %v1580_v34 = vmul.f32 %v1563_v39, %v9325_v46  ;;  %v7900_v35 = vld [vmem:[%s16167_s3 + $0x4] ss:$0 sm:$0xff] }
 0x3c6   : > { %v660_v46 = vsel %vm657_vm0, %v9120_v45, %v9143_v6  ;;  %v664_v45 = vsel %vm657_vm0, %v9155_v61, %v9165_v42  ;;  %v16440_v6 = vld [vmem:[#allocation8_spill] sm:$0xff]  ;;  %v16447_v42 = vld [vmem:[#allocation34_spill] sm:$0xff] }
 0x3c9   : > { %1679 = vrot.lane.b32.xlu1 %v1570_v25, %s16209_s26  ;;  %1677 = vrot.lane.b32.xlu0 %v1569_v48, %s16209_s26  ;;  %v8297_v25 = vld [vmem:[%s8854_s12 + $0x100] sm:$0xff] }
 0x3ca   : > { %v1577_v2 = vmul.f32 %v8297_v25, %v1563_v39  ;;  %v8298_v48 = vld [vmem:[%s8854_s12 + $0x120] sm:$0xff]  ;;  %v16451_v25 = vld [vmem:[#allocation38_spill] sm:$0xff] }
 0x3cd   : > { %1683 = vrot.lane.b32.xlu1 %v1572_v43, %s16209_s26  ;;  %1681 = vrot.lane.b32.xlu0 %v1571_v28, %s16209_s26  ;;  %v1579_v43 = vmul.f32 %v8298_v48, %v1563_v39  ;;  %v661_v39 = vsel %vm657_vm0, %v9131_v62, %v9152_v29  ;;  %v663_v28 = vsel %vm657_vm0, %v9150_v57, %v9161_v30  ;;  %v16443_v57 = vld [vmem:[#allocation30_spill] sm:$0xff]  ;;  %v16453_v48 = vld [vmem:[#allocation9_spill] sm:$0xff] }
 0x3ce   : > { %v677_v18 = vadd.f32 %v661_v39, %v8874_v54  ;;  %v665_v29 = vsel %vm657_vm0, %v9159_v27, %v9169_v19  ;;  %v678_v62 = vadd.f32 %v662_v5, %v8882_v59  ;;  %v679_v31 = vadd.f32 %v663_v28, %v16440_v6  ;;  %v16449_v27 = vld [vmem:[#allocation36_spill] sm:$0xff]  ;;  %v16450_v59 = vld [vmem:[#allocation31_spill] sm:$0xff]  ;;  %v16457_v28 = vld [vmem:[#allocation46_spill] sm:$0xff] }
 0x3cf   : > { %v16456_v39 = vld [vmem:[#allocation39_spill] sm:$0xff]  ;;  %v16458_v6 = vld [vmem:[#allocation41_spill] sm:$0xff] }
 0x3d1   : > { %1687 = vrot.lane.b32.xlu1 %v1574_v8, %s16209_s26  ;;  %1685 = vrot.lane.b32.xlu0 %v1573_v26, %s16209_s26  ;;  %v676_v8 = vadd.f32 %v660_v46, %v8865_v49  ;;  %v16442_v26 = vld [vmem:[#allocation23_spill] sm:$0xff]  ;;  %v16444_v49 = vld [vmem:[#allocation25_spill] sm:$0xff]  ;;  %v16455_v46 = vld [vmem:[#allocation44_spill] sm:$0xff] }
 0x3d2   : > { %v732_v30 = vsel %vm657_vm0, %v16442_v26, %v16441_v0  ;;  %v733_v54 = vsel %vm657_vm0, %v16444_v49, %v16443_v57  ;;  %v854_v5 = vsel %vm657_vm0, %v16456_v39, %v16455_v46  ;;  %v855_v0 = vsel %vm657_vm0, %v16458_v6, %v16457_v28  ;;  %v16459_v26 = vld [vmem:[#allocation11_spill] sm:$0xff]  ;;  %v16460_v49 = vld [vmem:[#allocation12_spill] sm:$0xff] }
 0x3d3   : > { %v748_v57 = vadd.f32 %v732_v30, %v16459_v26  ;;  %v16468_v39 = vld [vmem:[#allocation16_spill] sm:$0xff]  ;;  %v870_v6 = vadd.f32 %v854_v5, %v676_v8  ;;  %v871_v30 = vadd.f32 %v855_v0, %v677_v18  ;;  %v16477_v8 = vld [vmem:[#allocation65_spill] sm:$0xff]  ;;  %v16478_v18 = vld [vmem:[#allocation58_spill] sm:$0xff] }
 0x3d4   : > { %v16469_v26 = vld [vmem:[#allocation52_spill] sm:$0xff]  ;;  %v928_v5 = vsel %vm657_vm0, %v16478_v18, %v16477_v8  ;;  %v16479_v0 = vld [vmem:[#allocation66_spill] sm:$0xff] }
 0x3d5   : > { %1691 = vrot.lane.b32.xlu1 %v1576_v36, %s16209_s26  ;;  %1689 = vrot.lane.b32.xlu0 %v1575_v63, %s16209_s26  ;;  %v16445_v36 = vld [vmem:[#allocation32_spill] sm:$0xff]  ;;  %v16448_v63 = vld [vmem:[#allocation29_spill] sm:$0xff] }
 0x3d6   : > { %v734_v61 = vsel %vm657_vm0, %v16446_v7, %v16445_v36  ;;  %v735_v19 = vsel %vm657_vm0, %v16448_v63, %v16447_v42  ;;  %v749_v36 = vadd.f32 %v733_v54, %v16460_v49  ;;  %v16461_v7 = vld [vmem:[#allocation48_spill] sm:$0xff]  ;;  %v16462_v42 = vld [vmem:[#allocation43_spill] sm:$0xff] }
 0x3d7   : > { %v856_v63 = vsel %vm657_vm0, %v16462_v42, %v16461_v7  ;;  %v16470_v54 = vld [vmem:[#allocation47_spill] sm:$0xff]  ;;  %v16472_v7 = vld [vmem:[#allocation49_spill] sm:$0xff] }
 0x3d8   : > { %v858_v49 = vsel %vm657_vm0, %v16470_v54, %v16469_v26  ;;  %v859_v42 = vsel %vm657_vm0, %v16472_v7, %v16471_v38  ;;  %v872_v52 = vadd.f32 %v856_v63, %v678_v62  ;;  %v16482_v38 = vld [vmem:[#allocation61_spill] sm:$0xff]  ;;  %v16484_v63 = vld [vmem:[#allocation63_spill] sm:$0xff]  ;;  %v16485_v7 = vld [vmem:[#allocation74_spill] sm:$0xff] }
 0x3d9   : > { %1695 = vrot.lane.b32.xlu1 %v1578_v51, %s16209_s26  ;;  %1693 = vrot.lane.b32.xlu0 %v1577_v2, %s16209_s26  ;;  %v736_v51 = vsel %vm657_vm0, %v16450_v59, %v16449_v27  ;;  %v16452_v2 = vld [vmem:[#allocation33_spill] sm:$0xff]  ;;  %v16463_v27 = vld [vmem:[#allocation50_spill] sm:$0xff] }
 0x3da   : > { %v16465_v59 = vld [vmem:[#allocation13_spill] sm:$0xff] }
 0x3dd   : > { %1699 = vrot.lane.b32.xlu1 %v1580_v34, %s16209_s26  ;;  %1697 = vrot.lane.b32.xlu0 %v1579_v43, %s16209_s26  ;;  %v737_v34 = vsel %vm657_vm0, %v16452_v2, %v16451_v25  ;;  %v680_v43 = vadd.f32 %v664_v45, %v16453_v48  ;;  %v16464_v45 = vld [vmem:[#allocation45_spill] sm:$0xff]  ;;  %v750_v25 = vadd.f32 %v734_v61, %v16465_v59  ;;  %v16466_v2 = vld [vmem:[#allocation14_spill] sm:$0xff]  ;;  %v16474_v61 = vld [vmem:[#allocation55_spill] sm:$0xff] }
 0x3de   : > { %v751_v48 = vadd.f32 %v735_v19, %v16466_v2  ;;  %v753_v28 = vadd.f32 %v737_v34, %v16468_v39  ;;  %v16475_v59 = vld [vmem:[#allocation64_spill] sm:$0xff]  ;;  %v16481_v39 = vld [vmem:[#allocation67_spill] sm:$0xff] }
 0x3df   : > { %v16480_v2 = vld [vmem:[#allocation60_spill] sm:$0xff]  ;;  %v930_v62 = vsel %vm657_vm0, %v16482_v38, %v16481_v39  ;;  %v874_v26 = vadd.f32 %v858_v49, %v680_v43  ;;  %v16491_v38 = vld [vmem:[#allocation81_spill] sm:$0xff]  ;;  %v944_v43 = vadd.f32 %v928_v5, %v750_v25 }
 0x3e0   : > { %v16498_v25 = vld [vmem:[#allocation88_spill] sm:$0xff] }
 0x3e1   : > { %2275 = vrot.lane.b32.xlu0 %v7900_v35, %s16241_s27  ;;  %2315 = vrot.lane.b32.xlu1 %v7901_v15, %s16241_s27  ;;  %v16454_v35 = vld [vmem:[#allocation10_spill] sm:$0xff]  ;;  %v16502_v5 = vld [vmem:[#allocation92_spill] sm:$0xff] }
 0x3e2   : > { %v681_v15 = vadd.f32 %v665_v29, %v16454_v35  ;;  %v857_v29 = vsel %vm657_vm0, %v16464_v45, %v16463_v27  ;;  %v16467_v35 = vld [vmem:[#allocation15_spill] sm:$0xff]  ;;  %v16473_v45 = vld [vmem:[#allocation62_spill] sm:$0xff] }
 0x3e3   : > { %v752_v46 = vadd.f32 %v736_v51, %v16467_v35  ;;  %v873_v27 = vadd.f32 %v857_v29, %v679_v31  ;;  %v926_v19 = vsel %vm657_vm0, %v16474_v61, %v16473_v45  ;;  %v16476_v51 = vld [vmem:[#allocation56_spill] sm:$0xff]  ;;  %v929_v35 = vsel %vm657_vm0, %v16480_v2, %v16479_v0  ;;  %v16486_v45 = vld [vmem:[#allocation73_spill] sm:$0xff]  ;;  %v16489_v2 = vld [vmem:[#allocation79_spill] sm:$0xff] }
 0x3e4   : > { %v927_v34 = vsel %vm657_vm0, %v16476_v51, %v16475_v59  ;;  %v16483_v31 = vld [vmem:[#allocation68_spill] sm:$0xff]  ;;  %v875_v54 = vadd.f32 %v859_v42, %v681_v15  ;;  %v1048_v61 = vsel %vm657_vm0, %v16486_v45, %v16485_v7  ;;  %v16488_v51 = vld [vmem:[#allocation75_spill] sm:$0xff]  ;;  %v942_v18 = vadd.f32 %v926_v19, %v748_v57  ;;  %v16495_v57 = vld [vmem:[#allocation86_spill] sm:$0xff] }
 0x3e5   : > { %v931_v29 = vsel %vm657_vm0, %v16484_v63, %v16483_v31  ;;  %v16487_v59 = vld [vmem:[#allocation76_spill] sm:$0xff]  ;;  %v943_v0 = vadd.f32 %v927_v34, %v749_v36  ;;  %v1050_v39 = vsel %vm657_vm0, %v16490_v9, %v16489_v2  ;;  %v1051_v31 = vsel %vm657_vm0, %v16492_v40, %v16491_v38  ;;  %v16496_v36 = vld [vmem:[#allocation82_spill] sm:$0xff] }
 0x3e6   : > { %v1049_v8 = vsel %vm657_vm0, %v16488_v51, %v16487_v59  ;;  %v945_v15 = vadd.f32 %v929_v35, %v751_v48  ;;  %v946_v49 = vadd.f32 %v930_v62, %v752_v46  ;;  %v947_v42 = vadd.f32 %v931_v29, %v753_v28  ;;  %v16493_v45 = vld [vmem:[#allocation84_spill] sm:$0xff]  ;;  %v16497_v51 = vld [vmem:[#allocation87_spill] sm:$0xff]  ;;  %v16499_v28 = vld [vmem:[#allocation94_spill] sm:$0xff] }
 0x3e7   : > { %v1064_v63 = vadd.f32 %v1048_v61, %v870_v6  ;;  %v1065_v7 = vadd.f32 %v1049_v8, %v871_v30  ;;  %v1052_v59 = vsel %vm657_vm0, %v16494_v14, %v16493_v45  ;;  %v1053_v19 = vsel %vm657_vm0, %v16496_v36, %v16495_v57  ;;  %v16500_v14 = vld [vmem:[#allocation91_spill] sm:$0xff]  ;;  %v16504_v62 = vld [vmem:[#allocation93_spill] sm:$0xff]  ;;  %v16507_v2 = vld [vmem:[#allocation104_spill] sm:$0xff] }
 0x3e8   : > { %v1066_v34 = vadd.f32 %v1050_v39, %v872_v52  ;;  %v1067_v9 = vadd.f32 %v1051_v31, %v873_v27  ;;  %v1120_v40 = vsel %vm657_vm0, %v16497_v51, %v9391_v53  ;;  %v1121_v48 = vsel %vm657_vm0, %v16498_v25, %v9395_v37  ;;  %v16501_v30 = vld [vmem:[#allocation95_spill] sm:$0xff]  ;;  %v16503_v53 = vld [vmem:[#allocation96_spill] sm:$0xff]  ;;  %v16505_v37 = vld [vmem:[#allocation102_spill] sm:$0xff] }
 0x3e9   : > { %v1122_v46 = vsel %vm657_vm0, %v9383_v50, %v9403_v11  ;;  %v1123_v6 = vsel %vm657_vm0, %v16500_v14, %v16499_v28  ;;  %v1124_v52 = vsel %vm657_vm0, %v16502_v5, %v16501_v30  ;;  %v1068_v27 = vadd.f32 %v1052_v59, %v874_v26  ;;  %v16506_v61 = vld [vmem:[#allocation101_spill] sm:$0xff]  ;;  %v16508_v39 = vld [vmem:[#allocation103_spill] sm:$0xff]  ;;  %v16516_v14 = vld [vmem:[#allocation110_spill] sm:$0xff] }
 0x3ea   : > { %v1069_v35 = vadd.f32 %v1053_v19, %v875_v54  ;;  %v1125_v29 = vsel %vm657_vm0, %v16504_v62, %v16503_v53  ;;  %v1243_v8 = vsel %vm1240_vm1, %v16506_v61, %v16505_v37  ;;  %v1136_v11 = vadd.f32 %v1120_v40, %v942_v18  ;;  %v16509_v31 = vld [vmem:[#allocation107_spill] sm:$0xff]  ;;  %v16510_v45 = vld [vmem:[#allocation105_spill] sm:$0xff]  ;;  %v16512_v19 = vld [vmem:[#allocation106_spill] sm:$0xff] }
 0x3eb   : > { %v1137_v50 = vadd.f32 %v1121_v48, %v943_v0  ;;  %v1244_v38 = vsel %vm1240_vm1, %v16508_v39, %v16507_v2  ;;  %v1245_v57 = vsel %vm1240_vm1, %v16510_v45, %v16509_v31  ;;  %v1138_v26 = vadd.f32 %v1122_v46, %v944_v43  ;;  %v16511_v36 = vld [vmem:[#allocation109_spill] sm:$0xff]  ;;  %v16513_v18 = vld [vmem:[#allocation112_spill] sm:$0xff]  ;;  %v16515_v48 = vld [vmem:[#allocation114_spill] sm:$0xff] }
 0x3ec   : > { %v1139_v54 = vadd.f32 %v1123_v6, %v945_v15  ;;  %v1140_v59 = vadd.f32 %v1124_v52, %v946_v49  ;;  %v1246_v51 = vsel %vm1240_vm1, %v16512_v19, %v16511_v36  ;;  %v9881_v25 = vadd.f32 %v1125_v29, %v947_v42  ;;  %v16514_v0 = vld [vmem:[#allocation108_spill] sm:$0xff]  ;;  %v16517_v43 = vld [vmem:[#allocation115_spill] sm:$0xff]  ;;  %v9955_v29 = vld [vmem:[%s8754_s28 + $0x70] sm:$0x1] }
 0x3ed   : > { %v1259_v28 = vadd.f32 %v1243_v8, %v1064_v63  ;;  %v1247_v40 = vsel %vm1240_vm1, %v16514_v0, %v16513_v18  ;;  %v1248_v30 = vsel %vm1240_vm1, %v16516_v14, %v16515_v48  ;;  %v1260_v5 = vadd.f32 %v1244_v38, %v1065_v7  ;;  %v16518_v49 = vld [vmem:[#allocation116_spill] sm:$0xff]  ;;  %v16519_v7 = vld [vmem:[#allocation119_spill] sm:$0xff]  ;;  %v9973_v2 = vld [vmem:[%s8754_s28 + $0x90] sm:$0x1] }
 0x3ee   : > { %v1261_v53 = vadd.f32 %v1245_v57, %v1066_v34  ;;  %v1315_v15 = vsel %vm1240_vm1, %v16517_v43, %v9527_v55  ;;  %v1316_v42 = vsel %vm1240_vm1, %v16518_v49, %v9531_v33  ;;  %v1262_v46 = vadd.f32 %v1246_v51, %v1067_v9  ;;  %v9952_v62 = vld [vmem:[%s8754_s28 + $0x60] sm:$0xfe]  ;;  %v9985_v57 = vld [vmem:[%s8754_s28 + $0xb0] sm:$0x1]  ;;  %v10006_v18 = vld [vmem:[%s16167_s3 + $0xc] ss:$0 sm:$0xff] }
 0x3ef   : > { %v1317_v63 = vsel %vm1240_vm1, %v9519_v41, %v9539_v4  ;;  %v1318_v6 = vsel %vm1240_vm1, %v9523_v56, %v9547_v12  ;;  %v1319_v34 = vsel %vm1240_vm1, %v16519_v7, %v9555_v10  ;;  %v1263_v52 = vadd.f32 %v1247_v40, %v1068_v27  ;;  %v9976_v39 = vld [vmem:[%s8754_s28 + $0xa0] sm:$0xfe]  ;;  %v10016_v48 = vld [vmem:[%s16167_s3 + $0x15] ss:$0 sm:$0xff] }
 0x3f0   : > { %v9904_v55 = vadd.f32 %v1248_v30, %v1069_v35  ;;  %v1437_v33 = vsel %vm1240_vm1, %v9621_v22, %v9623_v13  ;;  %v1438_v41 = vsel %vm1240_vm1, %v9625_v24, %v9627_v47  ;;  %v9912_v4 = vadd.f32 %v1315_v15, %v1136_v11  ;;  %v16520_v24 = vld [vmem:[#allocation120_spill] sm:$0xff]  ;;  %v9947_v35 = vld [vmem:[%s8754_s28 + $0x50] sm:$0x1] }
 0x3f1   : > { %v9914_v56 = vadd.f32 %v1316_v42, %v1137_v50  ;;  %v1439_v12 = vsel %vm1240_vm1, %v9629_v21, %v9633_v32  ;;  %v1440_v10 = vsel %vm1240_vm1, %v9631_v60, %v9637_v23  ;;  %v9922_v9 = vadd.f32 %v1317_v63, %v1138_v26  ;;  %v9936_v21 = vld [vmem:[%s16167_s3 + $0x3] ss:$0 sm:$0xff] }
 0x3f2   : > { %v9924_v22 = vadd.f32 %v1318_v6, %v1139_v54  ;;  %v9926_v13 = vadd.f32 %v1319_v34, %v1140_v59  ;;  %v9931_v47 = vsel %vm1240_vm1, %v16520_v24, %v9563_v17  ;;  %v9939_v32 = vld [vmem:[%s8754_s28 + $0x40] sm:$0xfe]  ;;  %v1453_v60 = vadd.f32 %v1437_v33, %v1259_v28  ;;  %v9993_v59 = vld [vmem:[%s8754_s28 + $0xd0] sm:$0x1] }
 0x3f3   : > { %v9941_v23 = vadd.f32 %v1438_v41, %v1260_v5  ;;  %v1441_v27 = vsel %vm1240_vm1, %v9635_v3, %v9643_v20  ;;  %v1775_v17 = vmul.f32 %v9936_v21, %v9939_v32  ;;  %v9957_v37 = vadd.f32 %v1439_v12, %v1261_v53  ;;  %v9970_v50 = vld [vmem:[%s8754_s28 + $0x80] sm:$0xfe] }
 0x3f4   : > { %v9959_v61 = vadd.f32 %v1440_v10, %v1262_v46  ;;  %v1776_v3 = vmul.f32 %v9936_v21, %v9947_v35  ;;  %v1777_v20 = vmul.f32 %v9936_v21, %v9952_v62  ;;  %v1778_v38 = vmul.f32 %v9936_v21, %v9955_v29  ;;  %v9990_v54 = vld [vmem:[%s8754_s28 + $0xc0] sm:$0xfe] }
 0x3f5   : > { %v1779_v31 = vmul.f32 %v9936_v21, %v9970_v50  ;;  %v1780_v45 = vmul.f32 %v9936_v21, %v9973_v2  ;;  %v1781_v26 = vmul.f32 %v9936_v21, %v9976_v39  ;;  %v9995_v36 = vadd.f32 %v1441_v27, %v1263_v52 }
 0x3f6   : > { %v1782_v19 = vmul.f32 %v9936_v21, %v9985_v57  ;;  %v1783_v51 = vmul.f32 %v9936_v21, %v9990_v54  ;;  %v1784_v28 = vmul.f32 %v9936_v21, %v9993_v59  ;;  %v10011_v0 = vsel %vm1240_vm1, %v9639_v1, %v9647_v58 }
 0x3f7   : > { %v1830_v40 = vrot.slane %v1775_v17, 1  ;;  %v1930_v14 = vmul.f32 %v10006_v18, %v9952_v62  ;;  %v1931_v30 = vmul.f32 %v10006_v18, %v9955_v29  ;;  %v1831_v43 = vrot.slane %v1776_v3, 1 }
 0x3f8   : > { %v1833_v15 = vrot.slane %v1777_v20, 1  ;;  %v2084_v1 = vmul.f32 %v10016_v48, %v9970_v50  ;;  %v2085_v58 = vmul.f32 %v10016_v48, %v9973_v2  ;;  %v1834_v49 = vrot.slane %v1778_v38, 1 }
 0x3f9   : > { %v1836_v42 = vrot.slane %v1779_v31, 1  ;;  %v1837_v46 = vrot.slane %v1780_v45, 1  ;;  %v1839_v63 = vrot.slane %v1781_v26, 1  ;;  %v1840_v6 = vrot.slane %v1782_v19, 1 }
 0x3fa   : > { %v1842_v7 = vrot.slane %v1783_v51, 1  ;;  %v1843_v34 = vrot.slane %v1784_v28, 1  ;;  %v1932_v52 = vmul.f32 %v10006_v18, %v9970_v50  ;;  %v1984_v33 = vrot.slane %v1930_v14, 1  ;;  %v10049_v14 = vld [vmem:[%s8754_s28 + $0xe0] sm:$0xfe] }
 0x3fb   : > { %v1985_v41 = vrot.slane %v1931_v30, 1  ;;  %v1933_v12 = vmul.f32 %v10006_v18, %v9973_v2  ;;  %v1832_v24 = vsel %vm1823_vm2, %v1830_v40, %v1831_v43  ;;  %v2138_v17 = vrot.slane %v2084_v1, 1 }
 0x3fc   : > { %v2139_v3 = vrot.slane %v2085_v58, 1  ;;  %v2086_v20 = vmul.f32 %v10016_v48, %v9976_v39  ;;  %v1835_v31 = vsel %vm1823_vm2, %v1833_v15, %v1834_v49  ;;  %v1838_v45 = vsel %vm1823_vm2, %v1836_v42, %v1837_v46 }
 0x3fd   : > { %v2087_v26 = vmul.f32 %v10016_v48, %v9985_v57  ;;  %v10043_v51 = vsel %vm1823_vm2, %v1839_v63, %v1840_v6  ;;  %v10046_v28 = vsel %vm1823_vm2, %v1842_v7, %v1843_v34  ;;  %v1987_v40 = vrot.slane %v1932_v52, 1  ;;  %v10063_v7 = vld [vmem:[%s8754_s28 + $0xf0] sm:$0x1] }
 0x3fe   : > { %v1986_v30 = vsel %vm1823_vm2, %v1984_v33, %v1985_v41  ;;  %v1988_v43 = vrot.slane %v1933_v12, 1  ;;  %v1934_v15 = vmul.f32 %v10006_v18, %v9976_v39  ;;  %v1935_v1 = vmul.f32 %v10006_v18, %v9985_v57 }
 0x3ff   : > { %v10058_v42 = vmul.f32 %v9936_v21, %v10049_v14  ;;  %v2140_v46 = vsel %vm1823_vm2, %v2138_v17, %v2139_v3  ;;  %v2141_v63 = vrot.slane %v2086_v20, 1  ;;  %v2142_v34 = vrot.slane %v2087_v26, 1 }
 0x400   : > { %v2088_v52 = vmul.f32 %v10016_v48, %v9990_v54  ;;  %v2089_v33 = vmul.f32 %v10016_v48, %v9993_v59  ;;  %v1990_v17 = vrot.slane %v1934_v15, 1  ;;  %v1991_v3 = vrot.slane %v1935_v1, 1  ;;  %v1741_v1 = vld [vmem:[%s8754_s28 + $0x100] sm:$0xfe] }
 0x401   : > { %v2090_v20 = vmul.f32 %v10016_v48, %v10049_v14 }
 0x402   : > { %v2145_v15 = vrot.slane %v2089_v33, 1 }
 0x413   : > { %v9961_v8 = vpop.permute.xlu0 %1597  ;;  %v9963_v11 = vpop.permute.xlu1 %1599 }
 0x414   : > { %16521 = vst [vmem:[#allocation8_spill] sm:$0xff] %v9961_v8  ;;  %16522 = vst [vmem:[#allocation28_spill] sm:$0xff] %v9963_v11 }
 0x417   : > { %v10022_v5 = vpop.permute.xlu0 %1601  ;;  %v10024_v53 = vpop.permute.xlu1 %1603 }
 0x418   : > { %16523 = vst [vmem:[#allocation23_spill] sm:$0xff] %v10022_v5  ;;  %16524 = vst [vmem:[#allocation30_spill] sm:$0xff] %v10024_v53  ;;  %v1742_v5 = vld [vmem:[%s8754_s28 + $0x110] sm:$0x1] }
 0x419   : > { %v10269_v53 = vld [vmem:[%s8854_s12 + $0xf0] sm:$0x1] }
 0x41a   : > { %16543 = vst [vmem:[#allocation10_spill] sm:$0xff] %v10269_v53 }
 0x41b   : > { %v1606_v10 = vpop.permute.xlu0 %1605  ;;  %v1608_v27 = vpop.permute.xlu1 %1607 }
 0x41c   : > { %v1631_v38 = vsel %vm1240_vm1, %v1606_v10, %v1608_v27  ;;  %v1936_v10 = vmul.f32 %v10006_v18, %v9990_v54  ;;  %v1989_v27 = vsel %vm1823_vm2, %v1987_v40, %v1988_v43  ;;  %v2143_v40 = vsel %vm1823_vm2, %v2141_v63, %v2142_v34 }
 0x41d   : > { %v1647_v19 = vadd.f32 %v1631_v38, %v1453_v60  ;;  %v2144_v43 = vrot.slane %v2088_v52, 1 }
 0x41f   : > { %v1858_v60 = vadd.f32 %v1832_v24, %v1647_v19  ;;  %v1610_v58 = vpop.permute.xlu0 %1609  ;;  %v1612_v49 = vpop.permute.xlu1 %1611  ;;  %v1937_v24 = vmul.f32 %v10006_v18, %v9993_v59 }
 0x420   : > { %v1632_v6 = vsel %vm1240_vm1, %v1610_v58, %v1612_v49 }
 0x421   : > { %v1648_v41 = vadd.f32 %v1632_v6, %v9941_v23  ;;  %v2012_v12 = vadd.f32 %v1986_v30, %v1858_v60  ;;  %v1786_v23 = vmul.f32 %v9936_v21, %v10063_v7  ;;  %v2091_v60 = vmul.f32 %v10016_v48, %v10063_v7 }
 0x422   : > { %v1993_v6 = vrot.slane %v1936_v10, 1  ;;  %v1992_v21 = vsel %vm1823_vm2, %v1990_v17, %v1991_v3  ;;  %v2092_v10 = vmul.f32 %v10016_v48, %v1741_v1  ;;  %v2146_v17 = vsel %vm1823_vm2, %v2144_v43, %v2145_v15 }
 0x423   : > { %v1859_v38 = vadd.f32 %v1835_v31, %v1648_v41  ;;  %v1614_v26 = vpop.permute.xlu0 %1613  ;;  %v1616_v19 = vpop.permute.xlu1 %1615  ;;  %v10079_v30 = vadd.f32 %v2140_v46, %v2012_v12  ;;  %v1994_v41 = vrot.slane %v1937_v24, 1  ;;  %v2147_v46 = vrot.slane %v2090_v20, 1 }
 0x424   : > { %v1633_v58 = vsel %vm1240_vm1, %v1614_v26, %v1616_v19  ;;  %v1938_v12 = vmul.f32 %v10006_v18, %v10049_v14  ;;  %v1939_v26 = vmul.f32 %v10006_v18, %v10063_v7  ;;  %v2093_v3 = vmul.f32 %v10016_v48, %v1742_v5 }
 0x425   : > { %16525 = vst [vmem:[#allocation25_spill] sm:$0xff] %v10079_v30  ;;  %v1649_v49 = vadd.f32 %v1633_v58, %v9957_v37  ;;  %v2013_v31 = vadd.f32 %v1989_v27, %v1859_v38  ;;  %v2148_v37 = vrot.slane %v2091_v60, 1  ;;  %v1845_v27 = vrot.slane %v10058_v42, 1  ;;  %v1743_v58 = vld [vmem:[%s8754_s28 + $0x120] sm:$0xfe] }
 0x426   : > { %v1846_v38 = vrot.slane %v1786_v23, 1  ;;  %v1997_v60 = vrot.slane %v1939_v26, 1  ;;  %v10120_v26 = vld [vmem:[%s16169_s5 + $0x3] ss:$0 sm:$0xff] }
 0x427   : > { %v1860_v63 = vadd.f32 %v1838_v45, %v1649_v49  ;;  %v1618_v34 = vpop.permute.xlu0 %1617  ;;  %v1620_v52 = vpop.permute.xlu1 %1619  ;;  %v10093_v33 = vadd.f32 %v2143_v40, %v2013_v31  ;;  %v1995_v45 = vsel %vm1823_vm2, %v1993_v6, %v1994_v41  ;;  %v1744_v40 = vld [vmem:[%s8754_s28 + $0x130] sm:$0x1]  ;;  %v1996_v49 = vrot.slane %v1938_v12, 1 }
 0x428   : > { %v1634_v24 = vsel %vm1240_vm1, %v1618_v34, %v1620_v52  ;;  %v1940_v31 = vmul.f32 %v10006_v18, %v1741_v1  ;;  %v1941_v34 = vmul.f32 %v10006_v18, %v1742_v5  ;;  %v2149_v23 = vsel %vm1823_vm2, %v2147_v46, %v2148_v37  ;;  %v10123_v46 = vld [vmem:[%s8854_s12 + $0x40] sm:$0xfe]  ;;  %v10126_v52 = vld [vmem:[%s8854_s12 + $0x50] sm:$0x1] }
 0x429   : > { %16526 = vst [vmem:[#allocation32_spill] sm:$0xff] %v10093_v33  ;;  %v1650_v20 = vadd.f32 %v1634_v24, %v9959_v61  ;;  %v2014_v19 = vadd.f32 %v1992_v21, %v1860_v63  ;;  %v2150_v6 = vrot.slane %v2092_v10, 1  ;;  %v2151_v21 = vrot.slane %v2093_v3, 1  ;;  %v10131_v37 = vld [vmem:[%s8854_s12 + $0x60] sm:$0xfe] }
 0x42a   : > { %v2094_v12 = vmul.f32 %v10016_v48, %v1743_v58  ;;  %v2095_v1 = vmul.f32 %v10016_v48, %v1744_v40  ;;  %v1458_v18 = vadd.f32 %v10011_v0, %v9904_v55  ;;  %v1795_v48 = vmul.f32 %v10120_v26, %v10123_v46 }
 0x42b   : > { %v1861_v42 = vadd.f32 %v10043_v51, %v1650_v20  ;;  %v1622_v43 = vpop.permute.xlu0 %1621  ;;  %v1624_v15 = vpop.permute.xlu1 %1623  ;;  %v10107_v61 = vadd.f32 %v2146_v17, %v2014_v19  ;;  %v1847_v51 = vsel %vm1823_vm2, %v1845_v27, %v1846_v38  ;;  %v1998_v55 = vsel %vm1823_vm2, %v1996_v49, %v1997_v60  ;;  %v10143_v19 = vld [vmem:[%s8854_s12 + $0x70] sm:$0x1] }
 0x42c   : > { %v1635_v41 = vsel %vm1240_vm1, %v1622_v43, %v1624_v15  ;;  %v2000_v0 = vrot.slane %v1941_v34, 1  ;;  %v1796_v17 = vmul.f32 %v10120_v26, %v10126_v52  ;;  %v1797_v3 = vmul.f32 %v10120_v26, %v10131_v37  ;;  %v16529_v34 = vld [vmem:[#allocation134_spill] sm:$0xff]  ;;  %v16531_v15 = vld [vmem:[#allocation135_spill] sm:$0xff] }
 0x42d   : > { %16527 = vst [vmem:[#allocation27_spill] sm:$0xff] %v10107_v61  ;;  %v1651_v5 = vadd.f32 %v1635_v41, %v9995_v36  ;;  %v2015_v63 = vadd.f32 %v1995_v45, %v1861_v42  ;;  %v1999_v36 = vrot.slane %v1940_v31, 1  ;;  %v2152_v45 = vsel %vm1823_vm2, %v2150_v6, %v2151_v21  ;;  %v16530_v42 = vld [vmem:[#allocation127_spill] sm:$0xff]  ;;  %v10158_v21 = vld [vmem:[%s8854_s12 + $0x80] sm:$0xfe] }
 0x42e   : > { %v2153_v58 = vrot.slane %v2094_v12, 1  ;;  %v1509_v40 = vsel %vm1240_vm1, %v9649_v16, %v9663_v44  ;;  %v1798_v60 = vmul.f32 %v10120_v26, %v10143_v19  ;;  %v1510_v43 = vsel %vm1240_vm1, %v16530_v42, %v16529_v34  ;;  %v10161_v12 = vld [vmem:[%s8854_s12 + $0x90] sm:$0x1]  ;;  %v10191_v42 = vld [vmem:[%s16169_s5 + $0xc] ss:$0 sm:$0xff] }
 0x42f   : > { %v1862_v10 = vadd.f32 %v10046_v28, %v1651_v5  ;;  %v1626_v24 = vpop.permute.xlu0 %1625  ;;  %v1628_v27 = vpop.permute.xlu1 %1627  ;;  %v10139_v20 = vadd.f32 %v2149_v23, %v2015_v63  ;;  %v2154_v28 = vrot.slane %v2095_v1, 1  ;;  %v16532_v23 = vld [vmem:[#allocation129_spill] sm:$0xff]  ;;  %v1886_v41 = vrot.slane %v1795_v48, 1  ;;  %v16536_v48 = vld [vmem:[#allocation136_spill] sm:$0xff] }
 0x430   : > { %v1636_v38 = vsel %vm1240_vm1, %v1626_v24, %v1628_v27  ;;  %v1511_v6 = vsel %vm1240_vm1, %v16532_v23, %v16531_v15  ;;  %v2001_v16 = vsel %vm1823_vm2, %v1999_v36, %v2000_v0  ;;  %v1799_v5 = vmul.f32 %v10120_v26, %v10158_v21  ;;  %v10178_v36 = vld [vmem:[%s8854_s12 + $0xa0] sm:$0xfe] }
 0x431   : > { %16528 = vst [vmem:[#allocation34_spill] sm:$0xff] %v10139_v20  ;;  %v1652_v49 = vadd.f32 %v1636_v38, %v1458_v18  ;;  %v2016_v31 = vadd.f32 %v1998_v55, %v1862_v10  ;;  %v1800_v63 = vmul.f32 %v10120_v26, %v10161_v12  ;;  %v16537_v10 = vld [vmem:[#allocation131_spill] sm:$0xff]  ;;  %v1887_v27 = vrot.slane %v1796_v17, 1 }
 0x432   : > { %v1512_v24 = vsel %vm1240_vm1, %v16537_v10, %v16536_v48  ;;  %v1889_v38 = vrot.slane %v1797_v3, 1  ;;  %v2155_v0 = vsel %vm1823_vm2, %v2153_v58, %v2154_v28  ;;  %v1801_v34 = vmul.f32 %v10120_v26, %v10178_v36  ;;  %v10198_v58 = vld [vmem:[%s16169_s5 + $0x15] ss:$0 sm:$0xff]  ;;  %v16541_v48 = vld [vmem:[#allocation137_spill] sm:$0xff]  ;;  %v16542_v10 = vld [vmem:[#allocation132_spill] sm:$0xff] }
 0x433   : > { %v1863_v44 = vadd.f32 %v1847_v51, %v1652_v49  ;;  %v10164_v1 = vpop.permute.xlu0 %1669  ;;  %v10166_v18 = vpop.permute.xlu1 %1671  ;;  %v10172_v55 = vadd.f32 %v2152_v45, %v2016_v31  ;;  %v10181_v51 = vld [vmem:[%s8854_s12 + $0xb0] sm:$0x1]  ;;  %v1890_v49 = vrot.slane %v1798_v60, 1  ;;  %v1525_v17 = vadd.f32 %v1509_v40, %v9912_v4 }
 0x434   : > { %16533 = vst [vmem:[#allocation29_spill] sm:$0xff] %v10164_v1  ;;  %16534 = vst [vmem:[#allocation36_spill] sm:$0xff] %v10166_v18  ;;  %v1802_v45 = vmul.f32 %v10120_v26, %v10181_v51  ;;  %v1526_v3 = vadd.f32 %v1510_v43, %v9914_v56  ;;  %v1950_v28 = vmul.f32 %v10191_v42, %v10131_v37  ;;  %v1892_v4 = vrot.slane %v1799_v5, 1  ;;  %v10265_v18 = vld [vmem:[%s8854_s12 + $0xe0] sm:$0xfe] }
 0x435   : > { %16535 = vst [vmem:[#allocation31_spill] sm:$0xff] %v10172_v55  ;;  %v2017_v31 = vadd.f32 %v2001_v16, %v1863_v44  ;;  %v1951_v60 = vmul.f32 %v10191_v42, %v10143_v19  ;;  %v1893_v40 = vrot.slane %v1800_v63, 1  ;;  %v2104_v43 = vmul.f32 %v10198_v58, %v10158_v21 }
 0x436   : > { %v1527_v16 = vadd.f32 %v1511_v6, %v9922_v9  ;;  %v10214_v44 = vadd.f32 %v1512_v24, %v9924_v22  ;;  %v10219_v55 = vsel %vm1240_vm1, %v16542_v10, %v16541_v48  ;;  %v2105_v20 = vmul.f32 %v10198_v58, %v10161_v12  ;;  %v10229_v9 = vld [vmem:[%s8854_s12 + $0xd0] sm:$0x1] }
 0x437   : > { %v10204_v15 = vpop.permute.xlu0 %1673  ;;  %v10206_v23 = vpop.permute.xlu1 %1675  ;;  %v10208_v56 = vadd.f32 %v2155_v0, %v2017_v31  ;;  %v1888_v5 = vsel %vm1823_vm2, %v1886_v41, %v1887_v27  ;;  %v1891_v63 = vsel %vm1823_vm2, %v1889_v38, %v1890_v49  ;;  %v1895_v0 = vrot.slane %v1801_v34, 1 }
 0x438   : > { %16538 = vst [vmem:[#allocation38_spill] sm:$0xff] %v10204_v15  ;;  %16539 = vst [vmem:[#allocation33_spill] sm:$0xff] %v10206_v23  ;;  %v1896_v31 = vrot.slane %v1802_v45, 1  ;;  %v2040_v22 = vrot.slane %v1950_v28, 1  ;;  %v2041_v6 = vrot.slane %v1951_v60, 1  ;;  %v1952_v24 = vmul.f32 %v10191_v42, %v10158_v21 }
 0x439   : > { %16540 = vst [vmem:[#allocation9_spill] sm:$0xff] %v10208_v56  ;;  %v10226_v56 = vld [vmem:[%s8854_s12 + $0xc0] sm:$0xfe]  ;;  %v1953_v48 = vmul.f32 %v10191_v42, %v10161_v12  ;;  %v1894_v41 = vsel %vm1823_vm2, %v1892_v4, %v1893_v40  ;;  %v10242_v38 = vmul.f32 %v10120_v26, %v10229_v9  ;;  %v2194_v49 = vrot.slane %v2104_v43, 1 }
 0x43a   : > { %v10238_v27 = vmul.f32 %v10120_v26, %v10226_v56  ;;  %v2195_v45 = vrot.slane %v2105_v20, 1  ;;  %v2106_v28 = vmul.f32 %v10198_v58, %v10178_v36  ;;  %v2107_v60 = vmul.f32 %v10198_v58, %v10181_v51 }
 0x43b   : > { %v1678_v10 = vpop.permute.xlu0 %1677  ;;  %v1680_v61 = vpop.permute.xlu1 %1679  ;;  %v10250_v40 = vsel %vm1823_vm2, %v1895_v0, %v1896_v31  ;;  %v1954_v33 = vmul.f32 %v10191_v42, %v10178_v36  ;;  %v1955_v43 = vmul.f32 %v10191_v42, %v10181_v51  ;;  %v2043_v20 = vrot.slane %v1952_v24, 1 }
 0x43c   : > { %v1703_v34 = vsel %vm1240_vm1, %v1678_v10, %v1680_v61  ;;  %v2042_v61 = vsel %vm1823_vm2, %v2040_v22, %v2041_v6  ;;  %v2044_v10 = vrot.slane %v1953_v48, 1  ;;  %v2108_v30 = vmul.f32 %v10198_v58, %v10226_v56 }
 0x43d   : > { %v1719_v4 = vadd.f32 %v1703_v34, %v1525_v17  ;;  %v1898_v0 = vrot.slane %v10238_v27, 1  ;;  %v1899_v31 = vrot.slane %v10242_v38, 1  ;;  %v2109_v34 = vmul.f32 %v10198_v58, %v10229_v9 }
 0x43e   : > { %v2196_v22 = vsel %vm1823_vm2, %v2194_v49, %v2195_v45  ;;  %v2197_v6 = vrot.slane %v2106_v28, 1  ;;  %v2198_v24 = vrot.slane %v2107_v60, 1  ;;  %v2047_v8 = vrot.slane %v1955_v43, 1 }
 0x43f   : > { %v1914_v15 = vadd.f32 %v1888_v5, %v1719_v4  ;;  %v1682_v23 = vpop.permute.xlu0 %1681  ;;  %v1684_v17 = vpop.permute.xlu1 %1683  ;;  %v2046_v4 = vrot.slane %v1954_v33, 1  ;;  %v2045_v27 = vsel %vm1823_vm2, %v2043_v20, %v2044_v10  ;;  %v2200_v38 = vrot.slane %v2108_v30, 1 }
 0x440   : > { %v1704_v1 = vsel %vm1240_vm1, %v1682_v23, %v1684_v17  ;;  %v1956_v11 = vmul.f32 %v10191_v42, %v10226_v56  ;;  %v1957_v23 = vmul.f32 %v10191_v42, %v10229_v9  ;;  %v2110_v33 = vmul.f32 %v10198_v58, %v10265_v18  ;;  %v10290_v17 = vld [vmem:[%s8854_s12 + $0x100] sm:$0xfe] }
 0x441   : > { %v1720_v48 = vadd.f32 %v1704_v1, %v1526_v3  ;;  %v2068_v5 = vadd.f32 %v2042_v61, %v1914_v15  ;;  %v2201_v3 = vrot.slane %v2109_v34, 1  ;;  %v1805_v30 = vmul.f32 %v10120_v26, %v10265_v18  ;;  %v10293_v34 = vld [vmem:[%s8854_s12 + $0x110] sm:$0x1] }
 0x442   : > { %v2199_v60 = vsel %vm1823_vm2, %v2197_v6, %v2198_v24  ;;  %v2111_v43 = vmul.f32 %v10198_v58, %v10269_v53  ;;  %v2048_v10 = vsel %vm1823_vm2, %v2046_v4, %v2047_v8  ;;  %v1959_v6 = vmul.f32 %v10191_v42, %v10269_v53 }
 0x443   : > { %v1915_v49 = vadd.f32 %v1891_v63, %v1720_v48  ;;  %v1686_v45 = vpop.permute.xlu0 %1685  ;;  %v1688_v28 = vpop.permute.xlu1 %1687  ;;  %v10276_v1 = vadd.f32 %v2196_v22, %v2068_v5  ;;  %v1806_v63 = vmul.f32 %v10120_v26, %v10269_v53  ;;  %v2049_v22 = vrot.slane %v1956_v11, 1 }
 0x444   : > { %v1705_v15 = vsel %vm1240_vm1, %v1686_v45, %v1688_v28  ;;  %v2050_v48 = vrot.slane %v1957_v23, 1  ;;  %v1958_v5 = vmul.f32 %v10191_v42, %v10265_v18  ;;  %v2202_v26 = vsel %vm1823_vm2, %v2200_v38, %v2201_v3 }
 0x445   : > { %16544 = vst [vmem:[#allocation44_spill] sm:$0xff] %v10276_v1  ;;  %v1721_v61 = vadd.f32 %v1705_v15, %v1527_v16  ;;  %v2069_v20 = vadd.f32 %v2045_v27, %v1915_v49  ;;  %v2203_v8 = vrot.slane %v2110_v33, 1  ;;  %v2204_v27 = vrot.slane %v2111_v43, 1  ;;  %v16547_v15 = vld [vmem:[#allocation133_spill] sm:$0xff] }
 0x446   : > { %v2112_v11 = vmul.f32 %v10198_v58, %v10290_v17  ;;  %v2113_v23 = vmul.f32 %v10198_v58, %v10293_v34  ;;  %v1529_v49 = vadd.f32 %v10219_v55, %v9926_v13  ;;  %v1900_v3 = vsel %vm1823_vm2, %v1898_v0, %v1899_v31 }
 0x447   : > { %v1916_v24 = vadd.f32 %v1894_v41, %v1721_v61  ;;  %v1690_v16 = vpop.permute.xlu0 %1689  ;;  %v1692_v45 = vpop.permute.xlu1 %1691  ;;  %v10299_v28 = vadd.f32 %v2199_v60, %v2069_v20  ;;  %v16546_v41 = vld [vmem:[#allocation138_spill] sm:$0xff]  ;;  %v2051_v33 = vsel %vm1823_vm2, %v2049_v22, %v2050_v48  ;;  %v2052_v43 = vrot.slane %v1958_v5, 1 }
 0x448   : > { %v1706_v4 = vsel %vm1240_vm1, %v1690_v16, %v1692_v45  ;;  %v1514_v60 = vsel %vm1240_vm1, %v16547_v15, %v16546_v41  ;;  %v2053_v20 = vrot.slane %v1959_v6, 1  ;;  %v1901_v1 = vrot.slane %v1805_v30, 1 }
 0x449   : > { %16545 = vst [vmem:[#allocation39_spill] sm:$0xff] %v10299_v28  ;;  %v1722_v61 = vadd.f32 %v1706_v4, %v10214_v44  ;;  %v2070_v38 = vadd.f32 %v2048_v10, %v1916_v24  ;;  %v1902_v53 = vrot.slane %v1806_v63, 1  ;;  %v2205_v41 = vsel %vm1823_vm2, %v2203_v8, %v2204_v27  ;;  %v2229_v8 = vld [vmem:[%s8754_s28 + $0x18] sm:$0x1]  ;;  %v10331_v27 = vld [vmem:[%s8754_s28 + $0x28] sm:$0xfe] }
 0x44a   : > { %v2206_v44 = vrot.slane %v2112_v11, 1  ;;  %v2207_v0 = vrot.slane %v2113_v23, 1  ;;  %v1336_v31 = vadd.f32 %v9931_v47, %v9881_v25  ;;  %v2054_v30 = vsel %vm1823_vm2, %v2052_v43, %v2053_v20  ;;  %v10334_v11 = vld [vmem:[%s8754_s28 + $0x38] sm:$0x1]  ;;  %v1725_v23 = vld [vmem:[%s8754_s28] sm:$0xfe] }
 0x44b   : > { %v1917_v16 = vadd.f32 %v10250_v40, %v1722_v61  ;;  %v1694_v45 = vpop.permute.xlu0 %1693  ;;  %v1696_v28 = vpop.permute.xlu1 %1695  ;;  %v10316_v13 = vadd.f32 %v2202_v26, %v2070_v38  ;;  %v1903_v24 = vsel %vm1823_vm2, %v1901_v1, %v1902_v53  ;;  %v2228_v26 = vld [vmem:[%s8754_s28 + $0x8] sm:$0xfe]  ;;  %v10345_v1 = vld [vmem:[%s8754_s28 + $0x20] sm:$0xfe]  ;;  %v10348_v61 = vld [vmem:[%s8754_s28 + $0x30] sm:$0x1] }
 0x44c   : > { %v1707_v55 = vsel %vm1240_vm1, %v1694_v45, %v1696_v28  ;;  %v1530_v63 = vadd.f32 %v1514_v60, %v1336_v31  ;;  %v2208_v47 = vsel %vm1823_vm2, %v2206_v44, %v2207_v0  ;;  %v10366_v44 = vld [vmem:[%s8754_s28 + $0x58] sm:$0x1] }
 0x44d   : > { %16548 = vst [vmem:[#allocation46_spill] sm:$0xff] %v10316_v13  ;;  %v1723_v10 = vadd.f32 %v1707_v55, %v1529_v49  ;;  %v2071_v40 = vadd.f32 %v2051_v33, %v1917_v16  ;;  %v1726_v49 = vld [vmem:[%s8754_s28 + $0x10] sm:$0x1] }
 0x44f   : > { %v1918_v22 = vadd.f32 %v1900_v3, %v1723_v10  ;;  %v1698_v48 = vpop.permute.xlu0 %1697  ;;  %v1700_v5 = vpop.permute.xlu1 %1699  ;;  %v10323_v6 = vadd.f32 %v2205_v41, %v2071_v40  ;;  %v10363_v41 = vld [vmem:[%s8754_s28 + $0x48] sm:$0xfe] }
 0x450   : > { %v1708_v25 = vsel %vm1240_vm1, %v1698_v48, %v1700_v5  ;;  %v10369_v5 = vld [vmem:[%s8754_s28 + $0x68] sm:$0xfe] }
 0x451   : > { %16549 = vst [vmem:[#allocation41_spill] sm:$0xff] %v10323_v6  ;;  %v1724_v28 = vadd.f32 %v1708_v25, %v1530_v63  ;;  %v2072_v4 = vadd.f32 %v2054_v30, %v1918_v22 }
 0x453   : > { %v10338_v15 = vadd.f32 %v1903_v24, %v1724_v28  ;;  %v10340_v60 = vpop.permute.xlu0 %2275  ;;  %v10342_v53 = vadd.f32 %v2208_v47, %v2072_v4 }
 0x454   : > { %v2279_v38 = vmul.f32 %v10340_v60, %v2228_v26  ;;  %v2281_v3 = vmul.f32 %v10340_v60, %v2229_v8  ;;  %v2278_v33 = vmul.f32 %v10340_v60, %v1725_v23  ;;  %v2280_v43 = vmul.f32 %v10340_v60, %v1726_v49  ;;  %v10378_v26 = vld [vmem:[%s8754_s28 + $0x78] sm:$0x1] }
 0x455   : > { %16550 = vst [vmem:[#allocation11_spill] sm:$0xff] %v10342_v53  ;;  %v2283_v20 = vmul.f32 %v10340_v60, %v10331_v27  ;;  %v2285_v16 = vmul.f32 %v10340_v60, %v10334_v11  ;;  %v2282_v45 = vmul.f32 %v10340_v60, %v10345_v1  ;;  %v2284_v55 = vmul.f32 %v10340_v60, %v10348_v61 }
 0x456   : > { %v2385_v0 = vrot.slane %v2279_v38, 1  ;;  %v2386_v31 = vrot.slane %v2281_v3, 1  ;;  %v2382_v10 = vrot.slane %v2278_v33, 1  ;;  %v2383_v40 = vrot.slane %v2280_v43, 1 }
 0x457   : > { %v2391_v30 = vrot.slane %v2283_v20, 1  ;;  %v2392_v63 = vrot.slane %v2285_v16, 1  ;;  %v2388_v22 = vrot.slane %v2282_v45, 1  ;;  %v2389_v48 = vrot.slane %v2284_v55, 1  ;;  %v10402_v55 = vld [vmem:[%s8754_s28 + $0x98] sm:$0x1] }
 0x458   : > { %v2387_v24 = vsel %vm1823_vm2, %v2385_v0, %v2386_v31  ;;  %v2384_v25 = vsel %vm1823_vm2, %v2382_v10, %v2383_v40  ;;  %v2287_v47 = vmul.f32 %v10340_v60, %v10363_v41  ;;  %v2289_v28 = vmul.f32 %v10340_v60, %v10366_v44  ;;  %v10406_v31 = vld [vmem:[%s8754_s28 + $0xa8] sm:$0xfe] }
 0x459   : > { %2432 = vrot.lane.b32.xlu1 %v2387_v24, %s16205_s29  ;;  %2430 = vrot.lane.b32.xlu0 %v2384_v25, %s16205_s29  ;;  %v2286_v8 = vmul.f32 %v10340_v60, %v9939_v32  ;;  %v2288_v49 = vmul.f32 %v10340_v60, %v9947_v35  ;;  %v2291_v38 = vmul.f32 %v10340_v60, %v10369_v5  ;;  %v10397_v35 = vld [vmem:[%s8754_s28 + $0x88] sm:$0xfe] }
 0x45a   : > { %v2397_v4 = vrot.slane %v2287_v47, 1  ;;  %v2398_v23 = vrot.slane %v2289_v28, 1  ;;  %v2293_v3 = vmul.f32 %v10340_v60, %v10378_v26  ;;  %v2290_v33 = vmul.f32 %v10340_v60, %v9952_v62 }
 0x45b   : > { %v2292_v43 = vmul.f32 %v10340_v60, %v9955_v29  ;;  %v2393_v32 = vsel %vm1823_vm2, %v2391_v30, %v2392_v63  ;;  %v2390_v20 = vsel %vm1823_vm2, %v2388_v22, %v2389_v48  ;;  %v2394_v16 = vrot.slane %v2286_v8, 1  ;;  %v10411_v63 = vld [vmem:[%s8754_s28 + $0xb8] sm:$0x1] }
 0x45c   : > { %v2395_v45 = vrot.slane %v2288_v49, 1  ;;  %v2399_v62 = vsel %vm1823_vm2, %v2397_v4, %v2398_v23  ;;  %v2403_v0 = vrot.slane %v2291_v38, 1  ;;  %v2404_v29 = vrot.slane %v2293_v3, 1 }
 0x45d   : > { %2436 = vrot.lane.b32.xlu1 %v2393_v32, %s16205_s29  ;;  %2434 = vrot.lane.b32.xlu0 %v2390_v20, %s16205_s29  ;;  %v2400_v10 = vrot.slane %v2290_v33, 1  ;;  %v2401_v40 = vrot.slane %v2292_v43, 1  ;;  %v2295_v30 = vmul.f32 %v10340_v60, %v10397_v35  ;;  %v2297_v48 = vmul.f32 %v10340_v60, %v10402_v55  ;;  %v10436_v43 = vld [vmem:[%s8754_s28 + $0xd8] sm:$0x1] }
 0x45e   : > { %v2396_v22 = vsel %vm1823_vm2, %v2394_v16, %v2395_v45  ;;  %v2294_v24 = vmul.f32 %v10340_v60, %v9970_v50  ;;  %v2296_v25 = vmul.f32 %v10340_v60, %v9973_v2  ;;  %v2299_v47 = vmul.f32 %v10340_v60, %v10406_v31  ;;  %v10432_v2 = vld [vmem:[%s8754_s28 + $0xc8] sm:$0xfe] }
 0x45f   : > { %v2301_v28 = vmul.f32 %v10340_v60, %v10411_v63  ;;  %v2405_v8 = vsel %vm1823_vm2, %v2403_v0, %v2404_v29  ;;  %v2409_v4 = vrot.slane %v2295_v30, 1  ;;  %v2298_v23 = vmul.f32 %v10340_v60, %v9976_v39  ;;  %v10454_v30 = vld [vmem:[%s8754_s28 + $0xf8] sm:$0x1] }
 0x460   : > { %v2300_v50 = vmul.f32 %v10340_v60, %v9985_v57  ;;  %v2402_v49 = vsel %vm1823_vm2, %v2400_v10, %v2401_v40  ;;  %v2410_v38 = vrot.slane %v2297_v48, 1  ;;  %v2406_v3 = vrot.slane %v2294_v24, 1  ;;  %v10451_v40 = vld [vmem:[%s8754_s28 + $0xe8] sm:$0xfe] }
 0x461   : > { %2440 = vrot.lane.b32.xlu1 %v2399_v62, %s16205_s29  ;;  %2438 = vrot.lane.b32.xlu0 %v2396_v22, %s16205_s29  ;;  %v2407_v33 = vrot.slane %v2296_v25, 1  ;;  %v2415_v32 = vrot.slane %v2299_v47, 1  ;;  %v2416_v39 = vrot.slane %v2301_v28, 1  ;;  %v2303_v57 = vmul.f32 %v10340_v60, %v10432_v2  ;;  %v2248_v28 = vld [vmem:[%s8854_s12 + $0x8] sm:$0xfe] }
 0x462   : > { %v2412_v20 = vrot.slane %v2298_v23, 1  ;;  %v2413_v16 = vrot.slane %v2300_v50, 1  ;;  %v2305_v45 = vmul.f32 %v10340_v60, %v10436_v43  ;;  %v2411_v62 = vsel %vm1823_vm2, %v2409_v4, %v2410_v38  ;;  %v1745_v38 = vld [vmem:[%s8854_s12] sm:$0xfe] }
 0x463   : > { %v2408_v0 = vsel %vm1823_vm2, %v2406_v3, %v2407_v33  ;;  %v2302_v29 = vmul.f32 %v10340_v60, %v9990_v54  ;;  %v2304_v10 = vmul.f32 %v10340_v60, %v9993_v59  ;;  %v2417_v22 = vsel %vm1823_vm2, %v2415_v32, %v2416_v39  ;;  %v10460_v54 = vpop.permute.xlu1 %2315  ;;  %v1746_v3 = vld [vmem:[%s8854_s12 + $0x10] sm:$0x1] }
 0x464   : > { %v2421_v48 = vrot.slane %v2303_v57, 1  ;;  %v2414_v24 = vsel %vm1823_vm2, %v2412_v20, %v2413_v16  ;;  %v2422_v25 = vrot.slane %v2305_v45, 1  ;;  %v2307_v59 = vmul.f32 %v10340_v60, %v10451_v40  ;;  %v1763_v57 = vld [vmem:[%s8854_s12 + $0x120] sm:$0xfe]  ;;  %v1764_v20 = vld [vmem:[%s8854_s12 + $0x130] sm:$0x1] }
 0x465   : > { %2444 = vrot.lane.b32.xlu1 %v2405_v8, %s16205_s29  ;;  %2442 = vrot.lane.b32.xlu0 %v2402_v49, %s16205_s29  ;;  %v2309_v47 = vmul.f32 %v10340_v60, %v10454_v30  ;;  %v2249_v8 = vld [vmem:[%s8854_s12 + $0x18] sm:$0x1]  ;;  %v2418_v4 = vrot.slane %v2302_v29, 1  ;;  %v2419_v23 = vrot.slane %v2304_v10, 1  ;;  %v2306_v50 = vmul.f32 %v10340_v60, %v10049_v14 }
 0x466   : > { %v2308_v49 = vmul.f32 %v10340_v60, %v10063_v7  ;;  %v2319_v33 = vmul.f32 %v10460_v54, %v2248_v28  ;;  %v2321_v32 = vmul.f32 %v10460_v54, %v2249_v8  ;;  %v2318_v39 = vmul.f32 %v10460_v54, %v1745_v38 }
 0x467   : > { %v2320_v14 = vmul.f32 %v10460_v54, %v1746_v3  ;;  %v2427_v7 = vrot.slane %v2307_v59, 1  ;;  %v2428_v60 = vrot.slane %v2309_v47, 1  ;;  %v1960_v16 = vmul.f32 %v10191_v42, %v10290_v17  ;;  %v10497_v17 = vld [vmem:[%s8854_s12 + $0x38] sm:$0x1] }
 0x468   : > { %v1961_v45 = vmul.f32 %v10191_v42, %v10293_v34  ;;  %v2424_v29 = vrot.slane %v2306_v50, 1  ;;  %v2425_v10 = vrot.slane %v2308_v49, 1  ;;  %v2114_v42 = vmul.f32 %v10198_v58, %v1763_v57  ;;  %v10511_v50 = vld [vmem:[%s8854_s12 + $0x58] sm:$0x1] }
 0x469   : > { %2448 = vrot.lane.b32.xlu1 %v2411_v62, %s16205_s29  ;;  %2446 = vrot.lane.b32.xlu0 %v2408_v0, %s16205_s29  ;;  %v2423_v62 = vsel %vm1823_vm2, %v2421_v48, %v2422_v25  ;;  %v2420_v0 = vsel %vm1823_vm2, %v2418_v4, %v2419_v23  ;;  %v2115_v34 = vmul.f32 %v10198_v58, %v1764_v20  ;;  %v10502_v48 = vld [vmem:[%s8854_s12 + $0x30] sm:$0x1]  ;;  %v2521_v25 = vrot.slane %v2319_v33, 1  ;;  %v10508_v23 = vld [vmem:[%s8854_s12 + $0x48] sm:$0xfe] }
 0x46a   : > { %v2522_v59 = vrot.slane %v2321_v32, 1  ;;  %v2518_v47 = vrot.slane %v2318_v39, 1  ;;  %v2519_v28 = vrot.slane %v2320_v14, 1  ;;  %v2429_v8 = vsel %vm1823_vm2, %v2427_v7, %v2428_v60 }
 0x46b   : > { %v2055_v49 = vrot.slane %v1960_v16, 1  ;;  %v2056_v38 = vrot.slane %v1961_v45, 1  ;;  %v2426_v58 = vsel %vm1823_vm2, %v2424_v29, %v2425_v10  ;;  %v2325_v3 = vmul.f32 %v10460_v54, %v10497_v17 }
 0x46c   : > { %v2324_v32 = vmul.f32 %v10460_v54, %v10502_v48  ;;  %v2209_v39 = vrot.slane %v2114_v42, 1  ;;  %v2210_v14 = vrot.slane %v2115_v34, 1  ;;  %v2523_v57 = vsel %vm1823_vm2, %v2521_v25, %v2522_v59 }
 0x46d   : > { %2452 = vrot.lane.b32.xlu1 %v2417_v22, %s16205_s29  ;;  %2450 = vrot.lane.b32.xlu0 %v2414_v24, %s16205_s29  ;;  %v10489_v22 = vld [vmem:[%s8854_s12 + $0x28] sm:$0xfe]  ;;  %v10492_v24 = vld [vmem:[%s8854_s12 + $0x20] sm:$0xfe]  ;;  %v2520_v20 = vsel %vm1823_vm2, %v2518_v47, %v2519_v28  ;;  %v2327_v7 = vmul.f32 %v10460_v54, %v10508_v23  ;;  %v2329_v60 = vmul.f32 %v10460_v54, %v10511_v50  ;;  %v2528_v42 = vrot.slane %v2325_v3, 1 }
 0x46e   : > { %v2323_v4 = vmul.f32 %v10460_v54, %v10489_v22  ;;  %v2322_v33 = vmul.f32 %v10460_v54, %v10492_v24  ;;  %v2326_v16 = vmul.f32 %v10460_v54, %v10123_v46  ;;  %v2328_v45 = vmul.f32 %v10460_v54, %v10126_v52 }
 0x46f   : > { %v2057_v29 = vsel %vm1823_vm2, %v2055_v49, %v2056_v38  ;;  %v2525_v25 = vrot.slane %v2324_v32, 1  ;;  %v2211_v46 = vsel %vm1823_vm2, %v2209_v39, %v2210_v14  ;;  %v2533_v59 = vrot.slane %v2327_v7, 1  ;;  %v10554_v32 = vld [vmem:[%s8854_s12 + $0x88] sm:$0xfe]  ;;  %v10559_v39 = vld [vmem:[%s8854_s12 + $0x98] sm:$0x1] }
 0x470   : > { %v2527_v10 = vrot.slane %v2323_v4, 1  ;;  %v2524_v34 = vrot.slane %v2322_v33, 1  ;;  %v2534_v52 = vrot.slane %v2329_v60, 1  ;;  %v2531_v4 = vrot.slane %v2328_v45, 1  ;;  %v10568_v60 = vld [vmem:[%s8854_s12 + $0xa8] sm:$0xfe] }
 0x471   : > { %2456 = vrot.lane.b32.xlu1 %v2423_v62, %s16205_s29  ;;  %2454 = vrot.lane.b32.xlu0 %v2420_v0, %s16205_s29  ;;  %v10533_v62 = vld [vmem:[%s8854_s12 + $0x68] sm:$0xfe]  ;;  %v10536_v0 = vld [vmem:[%s8854_s12 + $0x78] sm:$0x1]  ;;  %v2330_v49 = vmul.f32 %v10460_v54, %v10131_v37  ;;  %v2073_v38 = vadd.f32 %v2057_v29, %v10338_v15  ;;  %v2332_v33 = vmul.f32 %v10460_v54, %v10143_v19 }
 0x472   : > { %v2331_v47 = vmul.f32 %v10460_v54, %v10533_v62  ;;  %v2333_v28 = vmul.f32 %v10460_v54, %v10536_v0  ;;  %v2526_v3 = vsel %vm1823_vm2, %v2524_v34, %v2525_v25  ;;  %v2535_v15 = vsel %vm1823_vm2, %v2533_v59, %v2534_v52 }
 0x473   : > { %v10561_v37 = vadd.f32 %v2211_v46, %v2073_v38  ;;  %v2536_v7 = vrot.slane %v2330_v49, 1  ;;  %v2335_v19 = vmul.f32 %v10460_v54, %v10554_v32  ;;  %v2537_v45 = vrot.slane %v2332_v33, 1  ;;  %v10595_v49 = vld [vmem:[%s8854_s12 + $0xd8] sm:$0x1] }
 0x474   : > { %v2539_v14 = vrot.slane %v2331_v47, 1  ;;  %v2337_v29 = vmul.f32 %v10460_v54, %v10559_v39  ;;  %v2339_v34 = vmul.f32 %v10460_v54, %v10568_v60  ;;  %v2338_v52 = vmul.f32 %v10460_v54, %v10178_v36  ;;  %16553 = vst [vmem:[#allocation43_spill] sm:$0xff] %v10595_v49 }
 0x475   : > { %2460 = vrot.lane.b32.xlu1 %v2429_v8, %s16205_s29  ;;  %2458 = vrot.lane.b32.xlu0 %v2426_v58, %s16205_s29  ;;  %v2530_v8 = vrot.slane %v2326_v16, 1  ;;  %v2529_v58 = vsel %vm1823_vm2, %v2527_v10, %v2528_v42  ;;  %16551 = vst [vmem:[#allocation12_spill] sm:$0xff] %v10561_v37  ;;  %v10571_v16 = vld [vmem:[%s8854_s12 + $0xb8] sm:$0x1]  ;;  %v2334_v10 = vmul.f32 %v10460_v54, %v10158_v21  ;;  %v2545_v59 = vrot.slane %v2335_v19, 1 }
 0x476   : > { %v2336_v42 = vmul.f32 %v10460_v54, %v10161_v12  ;;  %v2341_v25 = vmul.f32 %v10460_v54, %v10571_v16  ;;  %v2340_v21 = vmul.f32 %v10460_v54, %v10181_v51  ;;  %v10591_v12 = vld [vmem:[%s8854_s12 + $0xc8] sm:$0xfe]  ;;  %v2538_v47 = vsel %vm1823_vm2, %v2536_v7, %v2537_v45  ;;  %v10613_v19 = vld [vmem:[%s8854_s12 + $0xf8] sm:$0x1] }
 0x477   : > { %16552 = vst [vmem:[#allocation48_spill] sm:$0xff] %v10591_v12  ;;  %v2551_v38 = vrot.slane %v2339_v34, 1  ;;  %v2343_v51 = vmul.f32 %v10460_v54, %v10591_v12  ;;  %v2345_v33 = vmul.f32 %v10460_v54, %v10595_v49  ;;  %v10610_v7 = vld [vmem:[%s8854_s12 + $0xe8] sm:$0xfe]  ;;  %16554 = vst [vmem:[#allocation50_spill] sm:$0xff] %v10613_v19 }
 0x478   : > { %v2552_v36 = vrot.slane %v2341_v25, 1 }
 0x479   : > { %2568 = vrot.lane.b32.xlu1 %v2523_v57, %s16205_s29  ;;  %2566 = vrot.lane.b32.xlu0 %v2520_v20, %s16205_s29  ;;  %v2532_v57 = vsel %vm1823_vm2, %v2530_v8, %v2531_v4  ;;  %v2540_v20 = vrot.slane %v2333_v28, 1  ;;  %v2546_v28 = vrot.slane %v2337_v29, 1  ;;  %v2542_v8 = vrot.slane %v2334_v10, 1 }
 0x47a   : > { %v2543_v4 = vrot.slane %v2336_v42, 1  ;;  %v2553_v45 = vsel %vm1823_vm2, %v2551_v38, %v2552_v36  ;;  %v2557_v29 = vrot.slane %v2343_v51, 1  ;;  %v2558_v42 = vrot.slane %v2345_v33, 1  ;;  %v7902_v36 = vld [vmem:[%s16167_s3 + $0xd] ss:$0 sm:$0xff] }
 0x47b   : > { %v2541_v46 = vsel %vm1823_vm2, %v2539_v14, %v2540_v20  ;;  %v2344_v20 = vmul.f32 %v10460_v54, %v10229_v9  ;;  %v2349_v9 = vmul.f32 %v10460_v54, %v10613_v19  ;;  %v7903_v51 = vld [vmem:[%s16169_s5 + $0xd] ss:$0 sm:$0xff] }
 0x47c   : > { %v2544_v14 = vsel %vm1823_vm2, %v2542_v8, %v2543_v4 }
 0x47d   : > { %2572 = vrot.lane.b32.xlu1 %v2529_v58, %s16205_s29  ;;  %2570 = vrot.lane.b32.xlu0 %v2526_v3, %s16205_s29  ;;  %v2548_v58 = vrot.slane %v2338_v52, 1  ;;  %v2549_v3 = vrot.slane %v2340_v21, 1  ;;  %v2555_v25 = vrot.slane %v2344_v20, 1  ;;  %v2559_v21 = vsel %vm1823_vm2, %v2557_v29, %v2558_v42 }
 0x47e   : > { %v2564_v8 = vrot.slane %v2349_v9, 1 }
 0x47f   : > { %v2550_v10 = vsel %vm1823_vm2, %v2548_v58, %v2549_v3 }
 0x481   : > { %2576 = vrot.lane.b32.xlu1 %v2535_v15, %s16205_s29  ;;  %2574 = vrot.lane.b32.xlu0 %v2532_v57, %s16205_s29  ;;  %v2547_v15 = vsel %vm1823_vm2, %v2545_v59, %v2546_v28  ;;  %v2342_v57 = vmul.f32 %v10460_v54, %v10226_v56  ;;  %v2347_v56 = vmul.f32 %v10460_v54, %v10610_v7  ;;  %v16555_v59 = vld [vmem:[#allocation10_spill] sm:$0xff] }
 0x482   : > { %v2348_v52 = vmul.f32 %v10460_v54, %v16555_v59 }
 0x483   : > { %v2554_v34 = vrot.slane %v2342_v57, 1 }
 0x484   : > { %v2561_v38 = vrot.slane %v2348_v52, 1 }
 0x485   : > { %2580 = vrot.lane.b32.xlu1 %v2541_v46, %s16205_s29  ;;  %2578 = vrot.lane.b32.xlu0 %v2538_v47, %s16205_s29  ;;  %v2346_v46 = vmul.f32 %v10460_v54, %v10265_v18  ;;  %v2563_v47 = vrot.slane %v2347_v56, 1  ;;  %v2556_v28 = vsel %vm1823_vm2, %v2554_v34, %v2555_v25 }
 0x487   : > { %v2560_v4 = vrot.slane %v2346_v46, 1  ;;  %v2565_v18 = vsel %vm1823_vm2, %v2563_v47, %v2564_v8 }
 0x489   : > { %2584 = vrot.lane.b32.xlu1 %v2547_v15, %s16205_s29  ;;  %2582 = vrot.lane.b32.xlu0 %v2544_v14, %s16205_s29  ;;  %v2562_v54 = vsel %vm1823_vm2, %v2560_v4, %v2561_v38 }
 0x48d   : > { %2588 = vrot.lane.b32.xlu1 %v2553_v45, %s16205_s29  ;;  %2586 = vrot.lane.b32.xlu0 %v2550_v10, %s16205_s29 }
 0x491   : > { %2592 = vrot.lane.b32.xlu1 %v2559_v21, %s16205_s29  ;;  %2590 = vrot.lane.b32.xlu0 %v2556_v28, %s16205_s29 }
 0x495   : > { %2596 = vrot.lane.b32.xlu1 %v2565_v18, %s16205_s29  ;;  %2594 = vrot.lane.b32.xlu0 %v2562_v54, %s16205_s29 }
 0x499   : > { %2629 = vrot.lane.b32.xlu0 %v7902_v36, %s16241_s27  ;;  %2669 = vrot.lane.b32.xlu1 %v7903_v51, %s16241_s27 }
 0x4cb   : > { %v10645_v58 = vpop.permute.xlu0 %2430  ;;  %v10647_v3 = vpop.permute.xlu1 %2432 }
 0x4cc   : > { %16556 = vst [vmem:[#allocation45_spill] sm:$0xff] %v10645_v58  ;;  %16557 = vst [vmem:[#allocation13_spill] sm:$0xff] %v10647_v3 }
 0x4cf   : > { %v10649_v33 = vpop.permute.xlu0 %2434  ;;  %v10651_v15 = vpop.permute.xlu1 %2436 }
 0x4d0   : > { %16558 = vst [vmem:[#allocation14_spill] sm:$0xff] %v10649_v33  ;;  %16559 = vst [vmem:[#allocation15_spill] sm:$0xff] %v10651_v15 }
 0x4d3   : > { %v10653_v14 = vpop.permute.xlu0 %2438  ;;  %v10655_v57 = vpop.permute.xlu1 %2440 }
 0x4d4   : > { %16560 = vst [vmem:[#allocation16_spill] sm:$0xff] %v10653_v14  ;;  %16561 = vst [vmem:[#allocation52_spill] sm:$0xff] %v10655_v57  ;;  %v10838_v14 = vld [vmem:[%s8754_s28 + $0x100] sm:$0xfe] }
 0x4d7   : > { %v10657_v20 = vpop.permute.xlu0 %2442  ;;  %v10659_v45 = vpop.permute.xlu1 %2444 }
 0x4d8   : > { %16562 = vst [vmem:[#allocation47_spill] sm:$0xff] %v10657_v20  ;;  %16563 = vst [vmem:[#allocation54_spill] sm:$0xff] %v10659_v45 }
 0x4db   : > { %v10661_v29 = vpop.permute.xlu0 %2446  ;;  %v10663_v10 = vpop.permute.xlu1 %2448 }
 0x4dc   : > { %16564 = vst [vmem:[#allocation49_spill] sm:$0xff] %v10661_v29  ;;  %16565 = vst [vmem:[#allocation62_spill] sm:$0xff] %v10663_v10 }
 0x4df   : > { %v10665_v42 = vpop.permute.xlu0 %2450  ;;  %v10667_v56 = vpop.permute.xlu1 %2452 }
 0x4e0   : > { %16566 = vst [vmem:[#allocation55_spill] sm:$0xff] %v10665_v42  ;;  %16567 = vst [vmem:[#allocation64_spill] sm:$0xff] %v10667_v56 }
 0x4e3   : > { %v10669_v9 = vpop.permute.xlu0 %2454  ;;  %v10673_v25 = vpop.permute.xlu1 %2456 }
 0x4e4   : > { %16568 = vst [vmem:[#allocation56_spill] sm:$0xff] %v10669_v9  ;;  %16570 = vst [vmem:[#allocation58_spill] sm:$0xff] %v10673_v25 }
 0x4e7   : > { %v10671_v34 = vpop.permute.xlu0 %2458  ;;  %v10677_v59 = vpop.permute.xlu1 %2460 }
 0x4e8   : > { %16569 = vst [vmem:[#allocation65_spill] sm:$0xff] %v10671_v34  ;;  %16572 = vst [vmem:[#allocation60_spill] sm:$0xff] %v10677_v59 }
 0x4eb   : > { %v10675_v46 = vpop.permute.xlu0 %2566  ;;  %v10683_v47 = vpop.permute.xlu1 %2568 }
 0x4ec   : > { %16571 = vst [vmem:[#allocation66_spill] sm:$0xff] %v10675_v46  ;;  %16575 = vst [vmem:[#allocation68_spill] sm:$0xff] %v10683_v47 }
 0x4ef   : > { %v10679_v52 = vpop.permute.xlu0 %2570  ;;  %v10687_v8 = vpop.permute.xlu1 %2572 }
 0x4f0   : > { %16573 = vst [vmem:[#allocation67_spill] sm:$0xff] %v10679_v52  ;;  %16577 = vst [vmem:[#allocation74_spill] sm:$0xff] %v10687_v8 }
 0x4f3   : > { %v10681_v21 = vpop.permute.xlu0 %2574  ;;  %v10693_v18 = vpop.permute.xlu1 %2576 }
 0x4f4   : > { %16574 = vst [vmem:[#allocation61_spill] sm:$0xff] %v10681_v21  ;;  %16580 = vst [vmem:[#allocation75_spill] sm:$0xff] %v10693_v18 }
 0x4f7   : > { %v10685_v28 = vpop.permute.xlu0 %2578  ;;  %v10697_v36 = vpop.permute.xlu1 %2580 }
 0x4f8   : > { %16576 = vst [vmem:[#allocation63_spill] sm:$0xff] %v10685_v28  ;;  %16582 = vst [vmem:[#allocation77_spill] sm:$0xff] %v10697_v36  ;;  %v10718_v28 = vld [vmem:[%s8754_s28 + $0x40] sm:$0xfe] }
 0x4fb   : > { %v10689_v4 = vpop.permute.xlu0 %2582 }
 0x4fc   : > { %16578 = vst [vmem:[#allocation73_spill] sm:$0xff] %v10689_v4  ;;  %v10711_v4 = vpop.permute.xlu1 %2584 }
 0x4fd   : > { %16584 = vst [vmem:[#allocation78_spill] sm:$0xff] %v10711_v4 }
 0x4ff   : > { %v10691_v38 = vpop.permute.xlu0 %2586 }
 0x500   : > { %16579 = vst [vmem:[#allocation76_spill] sm:$0xff] %v10691_v38 }
 0x503   : > { %v10695_v54 = vpop.permute.xlu0 %2590 }
 0x504   : > { %16581 = vst [vmem:[#allocation79_spill] sm:$0xff] %v10695_v54 }
 0x507   : > { %v10699_v51 = vpop.permute.xlu0 %2594 }
 0x508   : > { %16583 = vst [vmem:[#allocation81_spill] sm:$0xff] %v10699_v51 }
 0x50b   : > { %v10701_v37 = vpop.permute.xlu0 %2629 }
 0x50c   : > { %v2633_v53 = vmul.f32 %v10701_v37, %v10331_v27  ;;  %v2635_v6 = vmul.f32 %v10701_v37, %v10334_v11  ;;  %v2632_v13 = vmul.f32 %v10701_v37, %v10345_v1  ;;  %v2634_v38 = vmul.f32 %v10701_v37, %v10348_v61  ;;  %v10723_v11 = vld [vmem:[%s8754_s28 + $0x50] sm:$0x1] }
 0x50d   : > { %v2637_v54 = vmul.f32 %v10701_v37, %v10363_v41  ;;  %v2639_v51 = vmul.f32 %v10701_v37, %v10366_v44  ;;  %v2636_v27 = vmul.f32 %v10718_v28, %v10701_v37  ;;  %v2638_v1 = vmul.f32 %v10723_v11, %v10701_v37 }
 0x50e   : > { %v2739_v61 = vrot.slane %v2633_v53, 1  ;;  %v2740_v36 = vrot.slane %v2635_v6, 1  ;;  %v2736_v4 = vrot.slane %v2632_v13, 1  ;;  %v2737_v21 = vrot.slane %v2634_v38, 1  ;;  %v10736_v13 = vld [vmem:[%s8754_s28 + $0x60] sm:$0xfe] }
 0x50f   : > { %v2745_v18 = vrot.slane %v2637_v54, 1  ;;  %v2746_v52 = vrot.slane %v2639_v51, 1  ;;  %v2742_v8 = vrot.slane %v2636_v27, 1  ;;  %v2743_v46 = vrot.slane %v2638_v1, 1  ;;  %v10747_v51 = vpop.permute.xlu1 %2588 }
 0x510   : > { %v2741_v47 = vsel %vm1823_vm2, %v2739_v61, %v2740_v36  ;;  %v2738_v34 = vsel %vm1823_vm2, %v2736_v4, %v2737_v21  ;;  %v2641_v59 = vmul.f32 %v10701_v37, %v10369_v5  ;;  %v2643_v53 = vmul.f32 %v10701_v37, %v10378_v26  ;;  %v10741_v36 = vld [vmem:[%s8754_s28 + $0x70] sm:$0x1]  ;;  %16585 = vst [vmem:[#allocation84_spill] sm:$0xff] %v10747_v51 }
 0x511   : > { %2786 = vrot.lane.b32.xlu1 %v2741_v47, %s16205_s29  ;;  %2784 = vrot.lane.b32.xlu0 %v2738_v34, %s16205_s29  ;;  %v2640_v6 = vmul.f32 %v10736_v13, %v10701_v37  ;;  %v2642_v21 = vmul.f32 %v10741_v36, %v10701_v37  ;;  %v2645_v4 = vmul.f32 %v10701_v37, %v10397_v35  ;;  %v10752_v47 = vld [vmem:[%s8754_s28 + $0x80] sm:$0xfe] }
 0x512   : > { %v2751_v38 = vrot.slane %v2641_v59, 1  ;;  %v2752_v54 = vrot.slane %v2643_v53, 1  ;;  %v2647_v34 = vmul.f32 %v10701_v37, %v10402_v55  ;;  %v2644_v27 = vmul.f32 %v10752_v47, %v10701_v37  ;;  %v10757_v59 = vld [vmem:[%s8754_s28 + $0x90] sm:$0x1] }
 0x513   : > { %v2646_v1 = vmul.f32 %v10757_v59, %v10701_v37  ;;  %v2747_v61 = vsel %vm1823_vm2, %v2745_v18, %v2746_v52  ;;  %v2744_v53 = vsel %vm1823_vm2, %v2742_v8, %v2743_v46  ;;  %v2748_v51 = vrot.slane %v2640_v6, 1  ;;  %v10772_v8 = vld [vmem:[%s8754_s28 + $0xa0] sm:$0xfe]  ;;  %v10777_v6 = vld [vmem:[%s8754_s28 + $0xb0] sm:$0x1] }
 0x514   : > { %v2749_v9 = vrot.slane %v2642_v21, 1  ;;  %v2753_v25 = vsel %vm1823_vm2, %v2751_v38, %v2752_v54  ;;  %v2757_v33 = vrot.slane %v2645_v4, 1  ;;  %v2758_v15 = vrot.slane %v2647_v34, 1  ;;  %v10781_v54 = vpop.permute.xlu1 %2592  ;;  %v10791_v34 = vld [vmem:[%s8754_s28 + $0xc0] sm:$0xfe] }
 0x515   : > { %2790 = vrot.lane.b32.xlu1 %v2747_v61, %s16205_s29  ;;  %2788 = vrot.lane.b32.xlu0 %v2744_v53, %s16205_s29  ;;  %v2754_v58 = vrot.slane %v2644_v27, 1  ;;  %v2755_v3 = vrot.slane %v2646_v1, 1  ;;  %v2649_v42 = vmul.f32 %v10701_v37, %v10406_v31  ;;  %v2651_v46 = vmul.f32 %v10701_v37, %v10411_v63  ;;  %16586 = vst [vmem:[#allocation80_spill] sm:$0xff] %v10781_v54  ;;  %v10796_v1 = vld [vmem:[%s8754_s28 + $0xd0] sm:$0x1] }
 0x516   : > { %v2750_v52 = vsel %vm1823_vm2, %v2748_v51, %v2749_v9  ;;  %v2648_v18 = vmul.f32 %v10772_v8, %v10701_v37  ;;  %v2650_v38 = vmul.f32 %v10777_v6, %v10701_v37  ;;  %v2653_v9 = vmul.f32 %v10701_v37, %v10432_v2 }
 0x517   : > { %v2655_v21 = vmul.f32 %v10701_v37, %v10436_v43  ;;  %v2759_v4 = vsel %vm1823_vm2, %v2757_v33, %v2758_v15  ;;  %v2763_v51 = vrot.slane %v2649_v42, 1  ;;  %v2652_v27 = vmul.f32 %v10791_v34, %v10701_v37 }
 0x518   : > { %v2756_v61 = vsel %vm1823_vm2, %v2754_v58, %v2755_v3  ;;  %v2764_v53 = vrot.slane %v2651_v46, 1  ;;  %v2761_v54 = vrot.slane %v2650_v38, 1  ;;  %v2769_v33 = vrot.slane %v2653_v9, 1  ;;  %v10805_v56 = vpop.permute.xlu1 %2596  ;;  %v10817_v9 = vld [vmem:[%s8754_s28 + $0xf0] sm:$0x1] }
 0x519   : > { %2794 = vrot.lane.b32.xlu1 %v2753_v25, %s16205_s29  ;;  %2792 = vrot.lane.b32.xlu0 %v2750_v52, %s16205_s29  ;;  %v2654_v25 = vmul.f32 %v10796_v1, %v10701_v37  ;;  %v2760_v52 = vrot.slane %v2648_v18, 1  ;;  %v2770_v15 = vrot.slane %v2655_v21, 1  ;;  %v2657_v42 = vmul.f32 %v10701_v37, %v10451_v40  ;;  %16587 = vst [vmem:[#allocation86_spill] sm:$0xff] %v10805_v56  ;;  %v10812_v18 = vld [vmem:[%s8754_s28 + $0xe0] sm:$0xfe] }
 0x51a   : > { %v2766_v29 = vrot.slane %v2652_v27, 1  ;;  %v2659_v58 = vmul.f32 %v10701_v37, %v10454_v30  ;;  %v2765_v3 = vsel %vm1823_vm2, %v2763_v51, %v2764_v53  ;;  %v2656_v38 = vmul.f32 %v10812_v18, %v10701_v37  ;;  %v10825_v27 = vld [vmem:[%s8754_s28 + $0x118] sm:$0x1] }
 0x51b   : > { %v2767_v10 = vrot.slane %v2654_v25, 1  ;;  %v2762_v46 = vsel %vm1823_vm2, %v2760_v52, %v2761_v54  ;;  %v2658_v21 = vmul.f32 %v10817_v9, %v10701_v37  ;;  %v2771_v54 = vsel %vm1823_vm2, %v2769_v33, %v2770_v15  ;;  %v10843_v33 = vld [vmem:[%s8754_s28 + $0x110] sm:$0x1] }
 0x51c   : > { %v2775_v51 = vrot.slane %v2657_v42, 1  ;;  %v10831_v53 = vpop.permute.xlu1 %2669  ;;  %v2663_v56 = vmul.f32 %v10701_v37, %v10825_v27  ;;  %v2772_v20 = vrot.slane %v2656_v38, 1 }
 0x51d   : > { %2798 = vrot.lane.b32.xlu1 %v2759_v4, %s16205_s29  ;;  %2796 = vrot.lane.b32.xlu0 %v2756_v61, %s16205_s29  ;;  %v10822_v4 = vld [vmem:[%s8754_s28 + $0x108] sm:$0xfe]  ;;  %v2768_v25 = vsel %vm1823_vm2, %v2766_v29, %v2767_v10  ;;  %v2776_v61 = vrot.slane %v2659_v58, 1  ;;  %v2773_v45 = vrot.slane %v2658_v21, 1  ;;  %v2662_v29 = vmul.f32 %v10843_v33, %v10701_v37 }
 0x51e   : > { %v2661_v52 = vmul.f32 %v10701_v37, %v10822_v4  ;;  %v2673_v10 = vmul.f32 %v10831_v53, %v10489_v22  ;;  %v2675_v15 = vmul.f32 %v10831_v53, %v10497_v17  ;;  %v2672_v42 = vmul.f32 %v10831_v53, %v10492_v24 }
 0x51f   : > { %v2674_v58 = vmul.f32 %v10831_v53, %v10502_v48  ;;  %v2782_v38 = vrot.slane %v2663_v56, 1  ;;  %v2774_v21 = vsel %vm1823_vm2, %v2772_v20, %v2773_v45  ;;  %v2677_v56 = vmul.f32 %v10831_v53, %v10508_v23  ;;  %v10868_v45 = vld [vmem:[%s8854_s12 + $0x40] sm:$0xfe] }
 0x520   : > { %v2875_v22 = vrot.slane %v2673_v10, 1  ;;  %v2876_v17 = vrot.slane %v2675_v15, 1  ;;  %v2872_v24 = vrot.slane %v2672_v42, 1  ;;  %v2679_v20 = vmul.f32 %v10831_v53, %v10511_v50 }
 0x521   : > { %2802 = vrot.lane.b32.xlu1 %v2765_v3, %s16205_s29  ;;  %2800 = vrot.lane.b32.xlu0 %v2762_v46, %s16205_s29  ;;  %v2660_v3 = vmul.f32 %v10838_v14, %v10701_v37  ;;  %v2781_v46 = vrot.slane %v2661_v52, 1  ;;  %v2777_v37 = vsel %vm1823_vm2, %v2775_v51, %v2776_v61  ;;  %v2873_v57 = vrot.slane %v2674_v58, 1  ;;  %v10873_v52 = vld [vmem:[%s8854_s12 + $0x50] sm:$0x1]  ;;  %v10886_v58 = vld [vmem:[%s8854_s12 + $0x60] sm:$0xfe] }
 0x522   : > { %v2676_v61 = vmul.f32 %v10868_v45, %v10831_v53  ;;  %v2681_v15 = vmul.f32 %v10831_v53, %v10533_v62  ;;  %v2683_v42 = vmul.f32 %v10831_v53, %v10536_v0  ;;  %16588 = vst [vmem:[#allocation82_spill] sm:$0xff] %v10886_v58 }
 0x523   : > { %v2783_v48 = vsel %vm1823_vm2, %v2781_v46, %v2782_v38  ;;  %v2874_v10 = vsel %vm1823_vm2, %v2872_v24, %v2873_v57  ;;  %v2680_v46 = vmul.f32 %v10886_v58, %v10831_v53  ;;  %v10891_v38 = vld [vmem:[%s8854_s12 + $0x70] sm:$0x1]  ;;  %v2882_v57 = vrot.slane %v2679_v20, 1 }
 0x524   : > { %16589 = vst [vmem:[#allocation87_spill] sm:$0xff] %v10891_v38  ;;  %v2685_v24 = vmul.f32 %v10831_v53, %v10554_v32  ;;  %v2687_v58 = vmul.f32 %v10831_v53, %v10559_v39 }
 0x525   : > { %2806 = vrot.lane.b32.xlu1 %v2771_v54, %s16205_s29  ;;  %2804 = vrot.lane.b32.xlu0 %v2768_v25, %s16205_s29  ;;  %v2778_v54 = vrot.slane %v2660_v3, 1  ;;  %v2779_v25 = vrot.slane %v2662_v29, 1  ;;  %v2678_v3 = vmul.f32 %v10873_v52, %v10831_v53  ;;  %v2877_v29 = vsel %vm1823_vm2, %v2875_v22, %v2876_v17 }
 0x526   : > { %v2887_v22 = vrot.slane %v2681_v15, 1  ;;  %v2888_v17 = vrot.slane %v2683_v42, 1  ;;  %v2893_v15 = vrot.slane %v2685_v24, 1  ;;  %v2695_v24 = vmul.f32 %v10831_v53, %v10595_v49 }
 0x527   : > { %v2780_v51 = vsel %vm1823_vm2, %v2778_v54, %v2779_v25  ;;  %v2878_v54 = vrot.slane %v2676_v61, 1  ;;  %v2879_v25 = vrot.slane %v2678_v3, 1  ;;  %v10909_v3 = vld [vmem:[%s8854_s12 + $0x90] sm:$0x1] }
 0x529   : > { %2810 = vrot.lane.b32.xlu1 %v2777_v37, %s16205_s29  ;;  %2808 = vrot.lane.b32.xlu0 %v2774_v21, %s16205_s29  ;;  %v2682_v37 = vmul.f32 %v10891_v38, %v10831_v53  ;;  %v2881_v21 = vrot.slane %v2677_v56, 1  ;;  %v10902_v38 = vld [vmem:[%s8854_s12 + $0x80] sm:$0xfe]  ;;  %v2880_v61 = vsel %vm1823_vm2, %v2878_v54, %v2879_v25  ;;  %v2691_v54 = vmul.f32 %v10831_v53, %v10571_v16 }
 0x52a   : > { %v2684_v56 = vmul.f32 %v10902_v38, %v10831_v53  ;;  %v10922_v25 = vld [vmem:[%s8854_s12 + $0xa0] sm:$0xfe] }
 0x52b   : > { %v2883_v20 = vsel %vm1823_vm2, %v2881_v21, %v2882_v57  ;;  %v2689_v21 = vmul.f32 %v10831_v53, %v10568_v60  ;;  %16590 = vst [vmem:[#allocation88_spill] sm:$0xff] %v10922_v25 }
 0x52d   : > { %2814 = vrot.lane.b32.xlu1 %v2783_v48, %s16205_s29  ;;  %2812 = vrot.lane.b32.xlu0 %v2780_v51, %s16205_s29  ;;  %v2884_v48 = vrot.slane %v2680_v46, 1  ;;  %v2885_v51 = vrot.slane %v2682_v37, 1  ;;  %v2894_v46 = vrot.slane %v2687_v58, 1  ;;  %v2890_v37 = vrot.slane %v2684_v56, 1  ;;  %v10939_v56 = vld [vmem:[%s8854_s12 + $0xc0] sm:$0xfe] }
 0x52e   : > { %v2693_v58 = vmul.f32 %v10831_v53, %v10591_v12  ;;  %16592 = vst [vmem:[#allocation91_spill] sm:$0xff] %v10939_v56  ;;  %v2900_v12 = vrot.slane %v2691_v54, 1 }
 0x52f   : > { %v2886_v42 = vsel %vm1823_vm2, %v2884_v48, %v2885_v51  ;;  %v2895_v48 = vsel %vm1823_vm2, %v2893_v15, %v2894_v46  ;;  %v2899_v51 = vrot.slane %v2689_v21, 1  ;;  %v2906_v46 = vrot.slane %v2695_v24, 1 }
 0x530   : > { %v2905_v15 = vrot.slane %v2693_v58, 1  ;;  %v2697_v21 = vmul.f32 %v10831_v53, %v10610_v7  ;;  %v10963_v58 = vld [vmem:[%s8854_s12 + $0xf0] sm:$0x1] }
 0x531   : > { %2922 = vrot.lane.b32.xlu1 %v2877_v29, %s16205_s29  ;;  %2920 = vrot.lane.b32.xlu0 %v2874_v10, %s16205_s29  ;;  %v2686_v29 = vmul.f32 %v10909_v3, %v10831_v53  ;;  %v2889_v10 = vsel %vm1823_vm2, %v2887_v22, %v2888_v17  ;;  %v10927_v22 = vld [vmem:[%s8854_s12 + $0xb0] sm:$0x1]  ;;  %16594 = vst [vmem:[#allocation92_spill] sm:$0xff] %v10963_v58 }
 0x532   : > { %16591 = vst [vmem:[#allocation94_spill] sm:$0xff] %v10927_v22  ;;  %v2690_v17 = vmul.f32 %v10927_v22, %v10831_v53  ;;  %v2698_v24 = vmul.f32 %v10963_v58, %v10831_v53 }
 0x533   : > { %v2891_v57 = vrot.slane %v2686_v29, 1  ;;  %v10944_v29 = vld [vmem:[%s8854_s12 + $0xd0] sm:$0x1] }
 0x534   : > { %v2897_v49 = vrot.slane %v2690_v17, 1 }
 0x535   : > { %2926 = vrot.lane.b32.xlu1 %v2883_v20, %s16205_s29  ;;  %2924 = vrot.lane.b32.xlu0 %v2880_v61, %s16205_s29  ;;  %v2688_v20 = vmul.f32 %v10922_v25, %v10831_v53  ;;  %v2692_v61 = vmul.f32 %v10939_v56, %v10831_v53 }
 0x537   : > { %v2896_v22 = vrot.slane %v2688_v20, 1  ;;  %v2902_v56 = vrot.slane %v2692_v61, 1  ;;  %v10958_v20 = vld [vmem:[%s8854_s12 + $0xe0] sm:$0xfe]  ;;  %v10971_v61 = vld [vmem:[%s8854_s12 + $0x118] sm:$0x1] }
 0x538   : > { %16593 = vst [vmem:[#allocation95_spill] sm:$0xff] %v10958_v20  ;;  %v2696_v17 = vmul.f32 %v10958_v20, %v10831_v53  ;;  %v2909_v20 = vrot.slane %v2698_v24, 1 }
 0x539   : > { %2930 = vrot.lane.b32.xlu1 %v2889_v10, %s16205_s29  ;;  %2928 = vrot.lane.b32.xlu0 %v2886_v42, %s16205_s29  ;;  %v2694_v10 = vmul.f32 %v10944_v29, %v10831_v53  ;;  %v2892_v42 = vsel %vm1823_vm2, %v2890_v37, %v2891_v57  ;;  %v2699_v37 = vmul.f32 %v10831_v53, %v10613_v19  ;;  %v10982_v19 = vld [vmem:[%s8854_s12 + $0x100] sm:$0xfe] }
 0x53a   : > { %v2901_v57 = vsel %vm1823_vm2, %v2899_v51, %v2900_v12  ;;  %v2898_v54 = vsel %vm1823_vm2, %v2896_v22, %v2897_v49  ;;  %v2907_v12 = vsel %vm1823_vm2, %v2905_v15, %v2906_v46  ;;  %v2911_v49 = vrot.slane %v2697_v21, 1 }
 0x53b   : > { %v2903_v25 = vrot.slane %v2694_v10, 1  ;;  %v2912_v51 = vrot.slane %v2699_v37, 1  ;;  %v2908_v58 = vrot.slane %v2696_v17, 1 }
 0x53d   : > { %2934 = vrot.lane.b32.xlu1 %v2895_v48, %s16205_s29  ;;  %2932 = vrot.lane.b32.xlu0 %v2892_v42, %s16205_s29  ;;  %v10968_v48 = vld [vmem:[%s8854_s12 + $0x108] sm:$0xfe]  ;;  %v2904_v22 = vsel %vm1823_vm2, %v2902_v56, %v2903_v25  ;;  %v2703_v42 = vmul.f32 %v10831_v53, %v10971_v61  ;;  %v2913_v25 = vsel %vm1823_vm2, %v2911_v49, %v2912_v51 }
 0x53e   : > { %v2701_v10 = vmul.f32 %v10831_v53, %v10968_v48  ;;  %v2910_v46 = vsel %vm1823_vm2, %v2908_v58, %v2909_v20  ;;  %v7905_v20 = vld [vmem:[%s16169_s5 + $0x16] ss:$0 sm:$0xff] }
 0x53f   : > { %v2918_v21 = vrot.slane %v2703_v42, 1 }
 0x540   : > { %v2917_v56 = vrot.slane %v2701_v10, 1 }
 0x541   : > { %2938 = vrot.lane.b32.xlu1 %v2901_v57, %s16205_s29  ;;  %2936 = vrot.lane.b32.xlu0 %v2898_v54, %s16205_s29  ;;  %v2700_v57 = vmul.f32 %v10982_v19, %v10831_v53  ;;  %v10987_v54 = vld [vmem:[%s8854_s12 + $0x110] sm:$0x1] }
 0x542   : > { %v2702_v15 = vmul.f32 %v10987_v54, %v10831_v53  ;;  %v2919_v24 = vsel %vm1823_vm2, %v2917_v56, %v2918_v21 }
 0x543   : > { %v2914_v37 = vrot.slane %v2700_v57, 1 }
 0x544   : > { %v2915_v17 = vrot.slane %v2702_v15, 1 }
 0x545   : > { %2942 = vrot.lane.b32.xlu1 %v2907_v12, %s16205_s29  ;;  %2940 = vrot.lane.b32.xlu0 %v2904_v22, %s16205_s29  ;;  %v7904_v12 = vld [vmem:[%s16167_s3 + $0x16] ss:$0 sm:$0xff] }
 0x546   : > { %v2916_v53 = vsel %vm1823_vm2, %v2914_v37, %v2915_v17 }
 0x549   : > { %2946 = vrot.lane.b32.xlu1 %v2913_v25, %s16205_s29  ;;  %2944 = vrot.lane.b32.xlu0 %v2910_v46, %s16205_s29 }
 0x54d   : > { %2950 = vrot.lane.b32.xlu1 %v2919_v24, %s16205_s29  ;;  %2948 = vrot.lane.b32.xlu0 %v2916_v53, %s16205_s29 }
 0x551   : > { %2983 = vrot.lane.b32.xlu0 %v7904_v12, %s16241_s27  ;;  %3023 = vrot.lane.b32.xlu1 %v7905_v20, %s16241_s27 }
 0x583   : > { %v11009_v58 = vpop.permute.xlu0 %2784  ;;  %v11011_v49 = vpop.permute.xlu1 %2786 }
 0x584   : > { %16595 = vst [vmem:[#allocation96_spill] sm:$0xff] %v11009_v58  ;;  %16596 = vst [vmem:[#allocation93_spill] sm:$0xff] %v11011_v49 }
 0x587   : > { %v11013_v22 = vpop.permute.xlu0 %2788  ;;  %v11015_v51 = vpop.permute.xlu1 %2790 }
 0x588   : > { %16597 = vst [vmem:[#allocation102_spill] sm:$0xff] %v11013_v22  ;;  %16598 = vst [vmem:[#allocation101_spill] sm:$0xff] %v11015_v51 }
 0x58b   : > { %v11017_v10 = vpop.permute.xlu0 %2792  ;;  %v11019_v42 = vpop.permute.xlu1 %2794 }
 0x58c   : > { %16599 = vst [vmem:[#allocation104_spill] sm:$0xff] %v11017_v10  ;;  %16600 = vst [vmem:[#allocation103_spill] sm:$0xff] %v11019_v42 }
 0x58f   : > { %v11021_v57 = vpop.permute.xlu0 %2796  ;;  %v11023_v15 = vpop.permute.xlu1 %2798 }
 0x590   : > { %16601 = vst [vmem:[#allocation107_spill] sm:$0xff] %v11021_v57  ;;  %16602 = vst [vmem:[#allocation105_spill] sm:$0xff] %v11023_v15 }
 0x593   : > { %v11025_v25 = vpop.permute.xlu0 %2800  ;;  %v11027_v56 = vpop.permute.xlu1 %2802 }
 0x594   : > { %16603 = vst [vmem:[#allocation109_spill] sm:$0xff] %v11025_v25  ;;  %16604 = vst [vmem:[#allocation106_spill] sm:$0xff] %v11027_v56 }
 0x597   : > { %v11029_v46 = vpop.permute.xlu0 %2804  ;;  %v11031_v21 = vpop.permute.xlu1 %2806 }
 0x598   : > { %16605 = vst [vmem:[#allocation112_spill] sm:$0xff] %v11029_v46  ;;  %16606 = vst [vmem:[#allocation108_spill] sm:$0xff] %v11031_v21 }
 0x59b   : > { %v11033_v37 = vpop.permute.xlu0 %2808  ;;  %v11037_v24 = vpop.permute.xlu1 %2810 }
 0x59c   : > { %16607 = vst [vmem:[#allocation114_spill] sm:$0xff] %v11033_v37  ;;  %16609 = vst [vmem:[#allocation115_spill] sm:$0xff] %v11037_v24 }
 0x59f   : > { %v11035_v17 = vpop.permute.xlu0 %2812  ;;  %v11041_v12 = vpop.permute.xlu1 %2814 }
 0x5a0   : > { %16608 = vst [vmem:[#allocation110_spill] sm:$0xff] %v11035_v17  ;;  %16611 = vst [vmem:[#allocation119_spill] sm:$0xff] %v11041_v12 }
 0x5a3   : > { %v11039_v53 = vpop.permute.xlu0 %2920  ;;  %v11047_v51 = vpop.permute.xlu1 %2922 }
 0x5a4   : > { %16610 = vst [vmem:[#allocation116_spill] sm:$0xff] %v11039_v53  ;;  %16614 = vst [vmem:[#allocation127_spill] sm:$0xff] %v11047_v51 }
 0x5a7   : > { %v11043_v20 = vpop.permute.xlu0 %2924  ;;  %v11051_v49 = vpop.permute.xlu1 %2926 }
 0x5a8   : > { %16612 = vst [vmem:[#allocation120_spill] sm:$0xff] %v11043_v20  ;;  %16616 = vst [vmem:[#allocation129_spill] sm:$0xff] %v11051_v49 }
 0x5ab   : > { %v11045_v22 = vpop.permute.xlu0 %2928  ;;  %v11057_v17 = vpop.permute.xlu1 %2930 }
 0x5ac   : > { %16613 = vst [vmem:[#allocation134_spill] sm:$0xff] %v11045_v22  ;;  %16619 = vst [vmem:[#allocation137_spill] sm:$0xff] %v11057_v17 }
 0x5af   : > { %v11049_v58 = vpop.permute.xlu0 %2932  ;;  %v11061_v53 = vpop.permute.xlu1 %2934 }
 0x5b0   : > { %16615 = vst [vmem:[#allocation135_spill] sm:$0xff] %v11049_v58  ;;  %16621 = vst [vmem:[#allocation138_spill] sm:$0xff] %v11061_v53 }
 0x5b3   : > { %v11053_v46 = vpop.permute.xlu0 %2936  ;;  %v11075_v58 = vpop.permute.xlu1 %2938 }
 0x5b4   : > { %16617 = vst [vmem:[#allocation136_spill] sm:$0xff] %v11053_v46  ;;  %16623 = vst [vmem:[#allocation10_spill] sm:$0xff] %v11075_v58 }
 0x5b7   : > { %v11055_v37 = vpop.permute.xlu0 %2940 }
 0x5b8   : > { %16618 = vst [vmem:[#allocation131_spill] sm:$0xff] %v11055_v37 }
 0x5bb   : > { %v11059_v24 = vpop.permute.xlu0 %2944 }
 0x5bc   : > { %16620 = vst [vmem:[#allocation132_spill] sm:$0xff] %v11059_v24 }
 0x5bf   : > { %v11063_v12 = vpop.permute.xlu0 %2948 }
 0x5c0   : > { %16622 = vst [vmem:[#allocation133_spill] sm:$0xff] %v11063_v12 }
 0x5c3   : > { %v11065_v20 = vpop.permute.xlu0 %2983 }
 0x5c4   : > { %v2987_v22 = vmul.f32 %v11065_v20, %v10363_v41  ;;  %v2989_v49 = vmul.f32 %v11065_v20, %v10366_v44  ;;  %v2986_v46 = vmul.f32 %v10718_v28, %v11065_v20  ;;  %v2988_v37 = vmul.f32 %v10723_v11, %v11065_v20 }
 0x5c5   : > { %v2991_v24 = vmul.f32 %v11065_v20, %v10369_v5  ;;  %v2993_v12 = vmul.f32 %v11065_v20, %v10378_v26  ;;  %v2990_v41 = vmul.f32 %v10736_v13, %v11065_v20  ;;  %v2992_v44 = vmul.f32 %v10741_v36, %v11065_v20 }
 0x5c6   : > { %v3093_v53 = vrot.slane %v2987_v22, 1  ;;  %v3094_v17 = vrot.slane %v2989_v49, 1  ;;  %v3090_v51 = vrot.slane %v2986_v46, 1  ;;  %v3091_v21 = vrot.slane %v2988_v37, 1 }
 0x5c7   : > { %v3099_v25 = vrot.slane %v2991_v24, 1  ;;  %v3100_v56 = vrot.slane %v2993_v12, 1  ;;  %v3096_v57 = vrot.slane %v2990_v41, 1  ;;  %v3097_v58 = vrot.slane %v2992_v44, 1 }
 0x5c8   : > { %v3095_v15 = vsel %vm1823_vm2, %v3093_v53, %v3094_v17  ;;  %v3092_v5 = vsel %vm1823_vm2, %v3090_v51, %v3091_v21  ;;  %v2995_v26 = vmul.f32 %v11065_v20, %v10397_v35  ;;  %v2997_v10 = vmul.f32 %v11065_v20, %v10402_v55  ;;  %v11099_v21 = vpop.permute.xlu1 %2942 }
 0x5c9   : > { %3140 = vrot.lane.b32.xlu1 %v3095_v15, %s16205_s29  ;;  %3138 = vrot.lane.b32.xlu0 %v3092_v5, %s16205_s29  ;;  %v2994_v49 = vmul.f32 %v10752_v47, %v11065_v20  ;;  %v2996_v37 = vmul.f32 %v10757_v59, %v11065_v20  ;;  %v2999_v51 = vmul.f32 %v11065_v20, %v10406_v31 }
 0x5ca   : > { %v3105_v22 = vrot.slane %v2995_v26, 1  ;;  %v3106_v46 = vrot.slane %v2997_v10, 1  ;;  %16624 = vst [vmem:[#allocation139_spill] sm:$0xff] %v11099_v21  ;;  %v3001_v35 = vmul.f32 %v11065_v20, %v10411_v63  ;;  %v2998_v55 = vmul.f32 %v10772_v8, %v11065_v20 }
 0x5cb   : > { %v3000_v15 = vmul.f32 %v10777_v6, %v11065_v20  ;;  %v3101_v17 = vsel %vm1823_vm2, %v3099_v25, %v3100_v56  ;;  %v3098_v10 = vsel %vm1823_vm2, %v3096_v57, %v3097_v58  ;;  %v3102_v24 = vrot.slane %v2994_v49, 1 }
 0x5cc   : > { %v3103_v53 = vrot.slane %v2996_v37, 1  ;;  %v3107_v31 = vsel %vm1823_vm2, %v3105_v22, %v3106_v46  ;;  %v3111_v12 = vrot.slane %v2999_v51, 1  ;;  %v3112_v63 = vrot.slane %v3001_v35, 1  ;;  %v11121_v56 = vpop.permute.xlu1 %2946 }
 0x5cd   : > { %3144 = vrot.lane.b32.xlu1 %v3101_v17, %s16205_s29  ;;  %3142 = vrot.lane.b32.xlu0 %v3098_v10, %s16205_s29  ;;  %v3108_v41 = vrot.slane %v2998_v55, 1  ;;  %v3109_v44 = vrot.slane %v3000_v15, 1  ;;  %v3003_v5 = vmul.f32 %v11065_v20, %v10432_v2  ;;  %v3005_v58 = vmul.f32 %v11065_v20, %v10436_v43  ;;  %16625 = vst [vmem:[#allocation140_spill] sm:$0xff] %v11121_v56  ;;  %v11373_v56 = vld [vmem:[%s8754_s28 + $0x58] sm:$0x1] }
 0x5ce   : > { %v3104_v26 = vsel %vm1823_vm2, %v3102_v24, %v3103_v53  ;;  %v3002_v57 = vmul.f32 %v10791_v34, %v11065_v20  ;;  %v3004_v25 = vmul.f32 %v10796_v1, %v11065_v20  ;;  %v3007_v2 = vmul.f32 %v11065_v20, %v10451_v40 }
 0x5cf   : > { %v3009_v49 = vmul.f32 %v11065_v20, %v10454_v30  ;;  %v3113_v43 = vsel %vm1823_vm2, %v3111_v12, %v3112_v63  ;;  %v3117_v22 = vrot.slane %v3003_v5, 1  ;;  %v3006_v46 = vmul.f32 %v10812_v18, %v11065_v20  ;;  %v2247_v5 = vld [vmem:[%s8754_s28 + $0x138] sm:$0x1] }
 0x5d0   : > { %v3008_v37 = vmul.f32 %v10817_v9, %v11065_v20  ;;  %v3110_v51 = vsel %vm1823_vm2, %v3108_v41, %v3109_v44  ;;  %v3118_v35 = vrot.slane %v3005_v58, 1  ;;  %v3114_v55 = vrot.slane %v3002_v57, 1  ;;  %v11139_v10 = vpop.permute.xlu1 %2950 }
 0x5d1   : > { %3148 = vrot.lane.b32.xlu1 %v3107_v31, %s16205_s29  ;;  %3146 = vrot.lane.b32.xlu0 %v3104_v26, %s16205_s29  ;;  %v3115_v15 = vrot.slane %v3004_v25, 1  ;;  %v3123_v40 = vrot.slane %v3007_v2, 1  ;;  %v3124_v30 = vrot.slane %v3009_v49, 1  ;;  %v3011_v17 = vmul.f32 %v11065_v20, %v10822_v4  ;;  %16626 = vst [vmem:[#allocation141_spill] sm:$0xff] %v11139_v10  ;;  %v2246_v4 = vld [vmem:[%s8754_s28 + $0x128] sm:$0xfe] }
 0x5d2   : > { %v3120_v24 = vrot.slane %v3006_v46, 1  ;;  %v3121_v53 = vrot.slane %v3008_v37, 1  ;;  %v3013_v31 = vmul.f32 %v11065_v20, %v10825_v27  ;;  %v3119_v12 = vsel %vm1823_vm2, %v3117_v22, %v3118_v35  ;;  %v8328_v46 = vld [vmem:[%s8754_s28 + $0x130] sm:$0x1] }
 0x5d3   : > { %v3116_v63 = vsel %vm1823_vm2, %v3114_v55, %v3115_v15  ;;  %v3010_v41 = vmul.f32 %v10838_v14, %v11065_v20  ;;  %v3012_v44 = vmul.f32 %v10843_v33, %v11065_v20  ;;  %v3125_v27 = vsel %vm1823_vm2, %v3123_v40, %v3124_v30 }
 0x5d4   : > { %v3129_v26 = vrot.slane %v3011_v17, 1  ;;  %v3122_v58 = vsel %vm1823_vm2, %v3120_v24, %v3121_v53  ;;  %v3130_v57 = vrot.slane %v3013_v31, 1  ;;  %v11155_v25 = vpop.permute.xlu1 %3023  ;;  %v3015_v14 = vmul.f32 %v11065_v20, %v2246_v4 }
 0x5d5   : > { %3152 = vrot.lane.b32.xlu1 %v3113_v43, %s16205_s29  ;;  %3150 = vrot.lane.b32.xlu0 %v3110_v51, %s16205_s29  ;;  %v3017_v2 = vmul.f32 %v11065_v20, %v2247_v5  ;;  %v3126_v33 = vrot.slane %v3010_v41, 1  ;;  %v3127_v49 = vrot.slane %v3012_v44, 1  ;;  %v8327_v43 = vld [vmem:[%s8754_s28 + $0x120] sm:$0xfe]  ;;  %v3016_v37 = vmul.f32 %v8328_v46, %v11065_v20  ;;  %v16627_v5 = vld [vmem:[#allocation82_spill] sm:$0xff] }
 0x5d6   : > { %v3014_v22 = vmul.f32 %v8327_v43, %v11065_v20  ;;  %v3027_v51 = vmul.f32 %v11155_v25, %v10508_v23  ;;  %v3029_v35 = vmul.f32 %v11155_v25, %v10511_v50  ;;  %v3026_v55 = vmul.f32 %v10868_v45, %v11155_v25 }
 0x5d7   : > { %v3028_v15 = vmul.f32 %v10873_v52, %v11155_v25  ;;  %v3135_v40 = vrot.slane %v3015_v14, 1  ;;  %v3136_v30 = vrot.slane %v3017_v2, 1  ;;  %v3131_v20 = vsel %vm1823_vm2, %v3129_v26, %v3130_v57  ;;  %v16628_v26 = vld [vmem:[#allocation87_spill] sm:$0xff] }
 0x5d8   : > { %v3128_v17 = vsel %vm1823_vm2, %v3126_v33, %v3127_v49  ;;  %v3132_v24 = vrot.slane %v3014_v22, 1  ;;  %v3133_v53 = vrot.slane %v3016_v37, 1  ;;  %v3229_v23 = vrot.slane %v3027_v51, 1 }
 0x5d9   : > { %3156 = vrot.lane.b32.xlu1 %v3119_v12, %s16205_s29  ;;  %3154 = vrot.lane.b32.xlu0 %v3116_v63, %s16205_s29  ;;  %v3230_v50 = vrot.slane %v3029_v35, 1  ;;  %v3226_v31 = vrot.slane %v3026_v55, 1  ;;  %v3227_v12 = vrot.slane %v3028_v15, 1  ;;  %v3137_v63 = vsel %vm1823_vm2, %v3135_v40, %v3136_v30  ;;  %v16629_v15 = vld [vmem:[#allocation88_spill] sm:$0xff] }
 0x5da   : > { %v3031_v41 = vmul.f32 %v11155_v25, %v10533_v62  ;;  %v3134_v44 = vsel %vm1823_vm2, %v3132_v24, %v3133_v53  ;;  %v3033_v4 = vmul.f32 %v11155_v25, %v10536_v0  ;;  %v3035_v62 = vmul.f32 %v11155_v25, %v10554_v32 }
 0x5db   : > { %v3231_v57 = vsel %vm1823_vm2, %v3229_v23, %v3230_v50  ;;  %v3228_v14 = vsel %vm1823_vm2, %v3226_v31, %v3227_v12  ;;  %v3037_v0 = vmul.f32 %v11155_v25, %v10559_v39  ;;  %v3034_v2 = vmul.f32 %v10902_v38, %v11155_v25  ;;  %v16631_v31 = vld [vmem:[#allocation48_spill] sm:$0xff] }
 0x5dc   : > { %v3036_v33 = vmul.f32 %v10909_v3, %v11155_v25  ;;  %v3235_v49 = vrot.slane %v3031_v41, 1  ;;  %v3236_v43 = vrot.slane %v3033_v4, 1  ;;  %v3241_v37 = vrot.slane %v3035_v62, 1  ;;  %v16632_v41 = vld [vmem:[#allocation43_spill] sm:$0xff] }
 0x5dd   : > { %3160 = vrot.lane.b32.xlu1 %v3125_v27, %s16205_s29  ;;  %3158 = vrot.lane.b32.xlu0 %v3122_v58, %s16205_s29  ;;  %v3030_v27 = vmul.f32 %v16627_v5, %v11155_v25  ;;  %v3032_v58 = vmul.f32 %v16628_v26, %v11155_v25  ;;  %v3242_v51 = vrot.slane %v3037_v0, 1  ;;  %v3039_v32 = vmul.f32 %v11155_v25, %v10568_v60  ;;  %v16633_v4 = vld [vmem:[#allocation91_spill] sm:$0xff] }
 0x5de   : > { %v3238_v39 = vrot.slane %v3034_v2, 1  ;;  %v3239_v35 = vrot.slane %v3036_v33, 1  ;;  %v3041_v55 = vmul.f32 %v11155_v25, %v10571_v16  ;;  %v3038_v40 = vmul.f32 %v16629_v15, %v11155_v25  ;;  %v16635_v33 = vld [vmem:[#allocation95_spill] sm:$0xff] }
 0x5df   : > { %v3232_v22 = vrot.slane %v3030_v27, 1  ;;  %v3233_v46 = vrot.slane %v3032_v58, 1  ;;  %v3237_v30 = vsel %vm1823_vm2, %v3235_v49, %v3236_v43  ;;  %v3243_v60 = vsel %vm1823_vm2, %v3241_v37, %v3242_v51  ;;  %v16636_v43 = vld [vmem:[#allocation92_spill] sm:$0xff] }
 0x5e0   : > { %v3247_v53 = vrot.slane %v3039_v32, 1  ;;  %v3240_v23 = vsel %vm1823_vm2, %v3238_v39, %v3239_v35  ;;  %v3248_v16 = vrot.slane %v3041_v55, 1  ;;  %v3244_v50 = vrot.slane %v3038_v40, 1 }
 0x5e1   : > { %3164 = vrot.lane.b32.xlu1 %v3131_v20, %s16205_s29  ;;  %3162 = vrot.lane.b32.xlu0 %v3128_v17, %s16205_s29  ;;  %v3234_v20 = vsel %vm1823_vm2, %v3232_v22, %v3233_v46  ;;  %v16630_v17 = vld [vmem:[#allocation94_spill] sm:$0xff]  ;;  %v3043_v12 = vmul.f32 %v11155_v25, %v16631_v31  ;;  %v3042_v27 = vmul.f32 %v16633_v4, %v11155_v25 }
 0x5e2   : > { %v3040_v24 = vmul.f32 %v16630_v17, %v11155_v25  ;;  %v3044_v58 = vmul.f32 %v10944_v29, %v11155_v25  ;;  %v3249_v0 = vsel %vm1823_vm2, %v3247_v53, %v3248_v16  ;;  %v3046_v49 = vmul.f32 %v16635_v33, %v11155_v25  ;;  %v2267_v16 = vld [vmem:[%s8854_s12 + $0x138] sm:$0x1] }
 0x5e3   : > { %v3253_v2 = vrot.slane %v3043_v12, 1  ;;  %v3048_v22 = vmul.f32 %v16636_v43, %v11155_v25  ;;  %v3250_v51 = vrot.slane %v3042_v27, 1  ;;  %v3051_v35 = vmul.f32 %v11155_v25, %v10968_v48  ;;  %v8330_v27 = vld [vmem:[%s8854_s12 + $0x130] sm:$0x1] }
 0x5e4   : > { %v3251_v32 = vrot.slane %v3044_v58, 1  ;;  %v3256_v55 = vrot.slane %v3046_v49, 1  ;;  %v3052_v53 = vmul.f32 %v10987_v54, %v11155_v25  ;;  %v3056_v58 = vmul.f32 %v8330_v27, %v11155_v25 }
 0x5e5   : > { %3168 = vrot.lane.b32.xlu1 %v3137_v63, %s16205_s29  ;;  %3166 = vrot.lane.b32.xlu0 %v3134_v44, %s16205_s29  ;;  %v3245_v63 = vrot.slane %v3040_v24, 1  ;;  %v3045_v44 = vmul.f32 %v11155_v25, %v16632_v41  ;;  %v3257_v40 = vrot.slane %v3048_v22, 1 }
 0x5e6   : > { %v3252_v24 = vsel %vm1823_vm2, %v3250_v51, %v3251_v32  ;;  %v3263_v41 = vrot.slane %v3052_v53, 1  ;;  %v3269_v49 = vrot.slane %v3056_v58, 1 }
 0x5e7   : > { %v3246_v46 = vsel %vm1823_vm2, %v3244_v50, %v3245_v63  ;;  %v3254_v37 = vrot.slane %v3045_v44, 1  ;;  %v3258_v50 = vsel %vm1823_vm2, %v3256_v55, %v3257_v40  ;;  %v8329_v44 = vld [vmem:[%s8854_s12 + $0x120] sm:$0xfe] }
 0x5e8   : > { %v3054_v54 = vmul.f32 %v8329_v44, %v11155_v25 }
 0x5e9   : > { %3276 = vrot.lane.b32.xlu1 %v3231_v57, %s16205_s29  ;;  %3274 = vrot.lane.b32.xlu0 %v3228_v14, %s16205_s29  ;;  %v3047_v57 = vmul.f32 %v11155_v25, %v10610_v7  ;;  %v16634_v14 = vld [vmem:[#allocation50_spill] sm:$0xff] }
 0x5ea   : > { %v3049_v62 = vmul.f32 %v11155_v25, %v16634_v14 }
 0x5eb   : > { %v3259_v7 = vrot.slane %v3047_v57, 1 }
 0x5ec   : > { %v3260_v39 = vrot.slane %v3049_v62, 1 }
 0x5ed   : > { %3280 = vrot.lane.b32.xlu1 %v3237_v30, %s16205_s29  ;;  %3278 = vrot.lane.b32.xlu0 %v3234_v20, %s16205_s29  ;;  %v3053_v30 = vmul.f32 %v11155_v25, %v10971_v61  ;;  %v3255_v20 = vsel %vm1823_vm2, %v3253_v2, %v3254_v37  ;;  %v3265_v61 = vrot.slane %v3051_v35, 1  ;;  %v3268_v2 = vrot.slane %v3054_v54, 1  ;;  %v7907_v37 = vld [vmem:[%s16169_s5 + $0x5] ss:$0 sm:$0xff] }
 0x5ee   : > { %v3261_v48 = vsel %vm1823_vm2, %v3259_v7, %v3260_v39 }
 0x5ef   : > { %v3266_v31 = vrot.slane %v3053_v30, 1 }
 0x5f1   : > { %3284 = vrot.lane.b32.xlu1 %v3243_v60, %s16205_s29  ;;  %3282 = vrot.lane.b32.xlu0 %v3240_v23, %s16205_s29  ;;  %v3050_v60 = vmul.f32 %v10982_v19, %v11155_v25  ;;  %v2266_v23 = vld [vmem:[%s8854_s12 + $0x128] sm:$0xfe]  ;;  %v3057_v19 = vmul.f32 %v11155_v25, %v2267_v16  ;;  %v3267_v57 = vsel %vm1823_vm2, %v3265_v61, %v3266_v31 }
 0x5f2   : > { %v3055_v12 = vmul.f32 %v11155_v25, %v2266_v23  ;;  %v3270_v25 = vsel %vm1823_vm2, %v3268_v2, %v3269_v49  ;;  %v8332_v49 = vld [vmem:[%s8754_s28 + $0x18] sm:$0x1] }
 0x5f3   : > { %v3262_v63 = vrot.slane %v3050_v60, 1 }
 0x5f4   : > { %v3271_v14 = vrot.slane %v3055_v12, 1 }
 0x5f5   : > { %3288 = vrot.lane.b32.xlu1 %v3249_v0, %s16205_s29  ;;  %3286 = vrot.lane.b32.xlu0 %v3246_v46, %s16205_s29  ;;  %v3264_v62 = vsel %vm1823_vm2, %v3262_v63, %v3263_v41  ;;  %v3272_v0 = vrot.slane %v3057_v19, 1  ;;  %v7906_v46 = vld [vmem:[%s16167_s3 + $0x5] ss:$0 sm:$0xff] }
 0x5f7   : > { %v3273_v22 = vsel %vm1823_vm2, %v3271_v14, %v3272_v0  ;;  %v8331_v0 = vld [vmem:[%s8754_s28 + $0x8] sm:$0xfe] }
 0x5f9   : > { %3292 = vrot.lane.b32.xlu1 %v3255_v20, %s16205_s29  ;;  %3290 = vrot.lane.b32.xlu0 %v3252_v24, %s16205_s29 }
 0x5fd   : > { %3296 = vrot.lane.b32.xlu1 %v3261_v48, %s16205_s29  ;;  %3294 = vrot.lane.b32.xlu0 %v3258_v50, %s16205_s29 }
 0x601   : > { %3300 = vrot.lane.b32.xlu1 %v3267_v57, %s16205_s29  ;;  %3298 = vrot.lane.b32.xlu0 %v3264_v62, %s16205_s29 }
 0x605   : > { %3304 = vrot.lane.b32.xlu1 %v3273_v22, %s16205_s29  ;;  %3302 = vrot.lane.b32.xlu0 %v3270_v25, %s16205_s29  ;;  %v8333_v25 = vld [vmem:[%s8754_s28] sm:$0xfe]  ;;  %s16966_s29 = smov 120  }
 0x609   : > { %3337 = vrot.lane.b32.xlu0 %v7906_v46, %s16207_s25  ;;  %3377 = vrot.lane.b32.xlu1 %v7907_v37, %s16207_s25  ;;  %v8334_v37 = vld [vmem:[%s8754_s28 + $0x10] sm:$0x1] }
 0x63b   : > { %v11277_v51 = vpop.permute.xlu0 %3138  ;;  %v11279_v32 = vpop.permute.xlu1 %3140 }
 0x63c   : > { %16637 = vst [vmem:[#allocation82_spill] sm:$0xff] %v11277_v51  ;;  %16638 = vst [vmem:[#allocation87_spill] sm:$0xff] %v11279_v32 }
 0x63f   : > { %v11281_v7 = vpop.permute.xlu0 %3142  ;;  %v11283_v39 = vpop.permute.xlu1 %3144 }
 0x640   : > { %16639 = vst [vmem:[#allocation88_spill] sm:$0xff] %v11281_v7  ;;  %16640 = vst [vmem:[#allocation94_spill] sm:$0xff] %v11283_v39  ;;  %v11351_v7 = vld [vmem:[%s8754_s28 + $0x38] sm:$0x1] }
 0x643   : > { %v11285_v35 = vpop.permute.xlu0 %3146  ;;  %v11287_v55 = vpop.permute.xlu1 %3148 }
 0x644   : > { %16641 = vst [vmem:[#allocation48_spill] sm:$0xff] %v11285_v35  ;;  %16642 = vst [vmem:[#allocation43_spill] sm:$0xff] %v11287_v55 }
 0x647   : > { %v11289_v40 = vpop.permute.xlu0 %3150  ;;  %v11291_v30 = vpop.permute.xlu1 %3152 }
 0x648   : > { %16643 = vst [vmem:[#allocation91_spill] sm:$0xff] %v11289_v40  ;;  %16644 = vst [vmem:[#allocation50_spill] sm:$0xff] %v11291_v30  ;;  %v11834_v30 = vld [vmem:[%s8754_s28 + $0x100] sm:$0xfe] }
 0x64b   : > { %v11293_v20 = vpop.permute.xlu0 %3154  ;;  %v11295_v24 = vpop.permute.xlu1 %3156 }
 0x64c   : > { %16645 = vst [vmem:[#allocation95_spill] sm:$0xff] %v11293_v20  ;;  %16646 = vst [vmem:[#allocation92_spill] sm:$0xff] %v11295_v24 }
 0x64f   : > { %v11297_v60 = vpop.permute.xlu0 %3158  ;;  %v11299_v53 = vpop.permute.xlu1 %3160 }
 0x650   : > { %16647 = vst [vmem:[#allocation142_spill] sm:$0xff] %v11297_v60  ;;  %16648 = vst [vmem:[#allocation143_spill] sm:$0xff] %v11299_v53 }
 0x653   : > { %v11301_v23 = vpop.permute.xlu0 %3162  ;;  %v11305_v48 = vpop.permute.xlu1 %3164 }
 0x654   : > { %16649 = vst [vmem:[#allocation144_spill] sm:$0xff] %v11301_v23  ;;  %16651 = vst [vmem:[#allocation146_spill] sm:$0xff] %v11305_v48  ;;  %v11541_v48 = vld [vmem:[%s8854_s12 + $0x78] sm:$0x1] }
 0x657   : > { %v11303_v16 = vpop.permute.xlu0 %3166  ;;  %v11309_v50 = vpop.permute.xlu1 %3168 }
 0x658   : > { %16650 = vst [vmem:[#allocation145_spill] sm:$0xff] %v11303_v16  ;;  %16653 = vst [vmem:[#allocation148_spill] sm:$0xff] %v11309_v50  ;;  %v11405_v16 = vld [vmem:[%s8754_s28 + $0x88] sm:$0xfe] }
 0x65b   : > { %v11307_v61 = vpop.permute.xlu0 %3274  ;;  %v11315_v19 = vpop.permute.xlu1 %3276 }
 0x65c   : > { %16652 = vst [vmem:[#allocation147_spill] sm:$0xff] %v11307_v61  ;;  %16656 = vst [vmem:[#allocation151_spill] sm:$0xff] %v11315_v19  ;;  %v11346_v61 = vld [vmem:[%s8754_s28 + $0x28] sm:$0xfe] }
 0x65f   : > { %v11311_v31 = vpop.permute.xlu0 %3278  ;;  %v11319_v41 = vpop.permute.xlu1 %3280 }
 0x660   : > { %16654 = vst [vmem:[#allocation149_spill] sm:$0xff] %v11311_v31  ;;  %16658 = vst [vmem:[#allocation153_spill] sm:$0xff] %v11319_v41 }
 0x663   : > { %v11313_v12 = vpop.permute.xlu0 %3282  ;;  %v11325_v27 = vpop.permute.xlu1 %3284 }
 0x664   : > { %16655 = vst [vmem:[#allocation150_spill] sm:$0xff] %v11313_v12  ;;  %16661 = vst [vmem:[#allocation156_spill] sm:$0xff] %v11325_v27  ;;  %v11368_v12 = vld [vmem:[%s8754_s28 + $0x48] sm:$0xfe] }
 0x667   : > { %v11317_v63 = vpop.permute.xlu0 %3286  ;;  %v11329_v57 = vpop.permute.xlu1 %3288 }
 0x668   : > { %16657 = vst [vmem:[#allocation152_spill] sm:$0xff] %v11317_v63  ;;  %16663 = vst [vmem:[#allocation158_spill] sm:$0xff] %v11329_v57 }
 0x66b   : > { %v11321_v44 = vpop.permute.xlu0 %3290  ;;  %v11343_v41 = vpop.permute.xlu1 %3292 }
 0x66c   : > { %16659 = vst [vmem:[#allocation154_spill] sm:$0xff] %v11321_v44  ;;  %16665 = vst [vmem:[#allocation160_spill] sm:$0xff] %v11343_v41 }
 0x66f   : > { %v11323_v54 = vpop.permute.xlu0 %3294 }
 0x670   : > { %16660 = vst [vmem:[#allocation155_spill] sm:$0xff] %v11323_v54 }
 0x673   : > { %v11327_v58 = vpop.permute.xlu0 %3298 }
 0x674   : > { %16662 = vst [vmem:[#allocation157_spill] sm:$0xff] %v11327_v58 }
 0x677   : > { %v11331_v14 = vpop.permute.xlu0 %3302 }
 0x678   : > { %16664 = vst [vmem:[#allocation159_spill] sm:$0xff] %v11331_v14 }
 0x67b   : > { %v11333_v62 = vpop.permute.xlu0 %3337 }
 0x67c   : > { %v3341_v2 = vmul.f32 %v8331_v0, %v11333_v62  ;;  %v3343_v22 = vmul.f32 %v8332_v49, %v11333_v62  ;;  %v3340_v46 = vmul.f32 %v8333_v25, %v11333_v62  ;;  %v3342_v31 = vmul.f32 %v8334_v37, %v11333_v62  ;;  %v11356_v49 = vld [vmem:[%s8754_s28 + $0x20] sm:$0xfe]  ;;  %v11361_v37 = vld [vmem:[%s8754_s28 + $0x30] sm:$0x1] }
 0x67d   : > { %v3345_v19 = vmul.f32 %v11346_v61, %v11333_v62  ;;  %v3347_v0 = vmul.f32 %v11351_v7, %v11333_v62  ;;  %v3344_v25 = vmul.f32 %v11356_v49, %v11333_v62  ;;  %v3346_v39 = vmul.f32 %v11361_v37, %v11333_v62 }
 0x67e   : > { %v3447_v14 = vrot.slane %v3341_v2, 1  ;;  %v3448_v58 = vrot.slane %v3343_v22, 1  ;;  %v3444_v51 = vrot.slane %v3340_v46, 1  ;;  %v3445_v32 = vrot.slane %v3342_v31, 1  ;;  %v11388_v2 = vpop.permute.xlu1 %3296  ;;  %v11391_v22 = vld [vmem:[%s8754_s28 + $0x78] sm:$0x1] }
 0x67f   : > { %v3453_v54 = vrot.slane %v3345_v19, 1  ;;  %v3454_v44 = vrot.slane %v3347_v0, 1  ;;  %v3450_v41 = vrot.slane %v3344_v25, 1  ;;  %v3451_v63 = vrot.slane %v3346_v39, 1  ;;  %16666 = vst [vmem:[#allocation161_spill] sm:$0xff] %v11388_v2 }
 0x680   : > { %v3449_v57 = vsel %vm1823_vm2, %v3447_v14, %v3448_v58  ;;  %v3446_v10 = vsel %vm1823_vm2, %v3444_v51, %v3445_v32  ;;  %v3349_v27 = vmul.f32 %v11368_v12, %v11333_v62  ;;  %v3351_v31 = vmul.f32 %v11373_v56, %v11333_v62  ;;  %v11384_v32 = vld [vmem:[%s8754_s28 + $0x68] sm:$0xfe] }
 0x681   : > { %3494 = vrot.lane.b32.xlu1 %v3449_v57, %s16209_s26  ;;  %3492 = vrot.lane.b32.xlu0 %v3446_v10, %s16209_s26  ;;  %v3348_v39 = vmul.f32 %v10718_v28, %v11333_v62  ;;  %v3350_v51 = vmul.f32 %v10723_v11, %v11333_v62  ;;  %v3353_v14 = vmul.f32 %v11384_v32, %v11333_v62 }
 0x682   : > { %v3459_v19 = vrot.slane %v3349_v27, 1  ;;  %v3460_v58 = vrot.slane %v3351_v31, 1  ;;  %v3355_v10 = vmul.f32 %v11391_v22, %v11333_v62  ;;  %v3352_v28 = vmul.f32 %v10736_v13, %v11333_v62 }
 0x683   : > { %v3354_v11 = vmul.f32 %v10741_v36, %v11333_v62  ;;  %v3455_v27 = vsel %vm1823_vm2, %v3453_v54, %v3454_v44  ;;  %v3452_v57 = vsel %vm1823_vm2, %v3450_v41, %v3451_v63  ;;  %v3456_v46 = vrot.slane %v3348_v39, 1  ;;  %v11411_v41 = vld [vmem:[%s8754_s28 + $0x98] sm:$0x1] }
 0x684   : > { %v3457_v0 = vrot.slane %v3350_v51, 1  ;;  %v3461_v25 = vsel %vm1823_vm2, %v3459_v19, %v3460_v58  ;;  %v3465_v31 = vrot.slane %v3353_v14, 1  ;;  %v3466_v13 = vrot.slane %v3355_v10, 1  ;;  %v11419_v19 = vpop.permute.xlu1 %3300  ;;  %v11424_v58 = vld [vmem:[%s8754_s28 + $0xa8] sm:$0xfe] }
 0x685   : > { %3498 = vrot.lane.b32.xlu1 %v3455_v27, %s16209_s26  ;;  %3496 = vrot.lane.b32.xlu0 %v3452_v57, %s16209_s26  ;;  %v3462_v2 = vrot.slane %v3352_v28, 1  ;;  %v3463_v21 = vrot.slane %v3354_v11, 1  ;;  %v3357_v36 = vmul.f32 %v11405_v16, %v11333_v62  ;;  %v3359_v44 = vmul.f32 %v11411_v41, %v11333_v62  ;;  %16667 = vst [vmem:[#allocation162_spill] sm:$0xff] %v11419_v19  ;;  %v11429_v14 = vld [vmem:[%s8754_s28 + $0xb8] sm:$0x1] }
 0x686   : > { %v3458_v63 = vsel %vm1823_vm2, %v3456_v46, %v3457_v0  ;;  %v3356_v54 = vmul.f32 %v10752_v47, %v11333_v62  ;;  %v3358_v39 = vmul.f32 %v10757_v59, %v11333_v62  ;;  %v3361_v51 = vmul.f32 %v11424_v58, %v11333_v62  ;;  %v11536_v19 = vld [vmem:[%s8854_s12 + $0x68] sm:$0xfe] }
 0x687   : > { %v3363_v47 = vmul.f32 %v11429_v14, %v11333_v62  ;;  %v3467_v10 = vsel %vm1823_vm2, %v3465_v31, %v3466_v13  ;;  %v3471_v59 = vrot.slane %v3357_v36, 1  ;;  %v3360_v28 = vmul.f32 %v10772_v8, %v11333_v62  ;;  %v11442_v31 = vld [vmem:[%s8754_s28 + $0xc8] sm:$0xfe] }
 0x688   : > { %v3362_v11 = vmul.f32 %v10777_v6, %v11333_v62  ;;  %v3464_v27 = vsel %vm1823_vm2, %v3462_v2, %v3463_v21  ;;  %v3472_v57 = vrot.slane %v3359_v44, 1  ;;  %v3468_v46 = vrot.slane %v3356_v54, 1  ;;  %v11446_v8 = vpop.permute.xlu1 %3304  ;;  %v11449_v21 = vld [vmem:[%s8754_s28 + $0xd8] sm:$0x1] }
 0x689   : > { %3502 = vrot.lane.b32.xlu1 %v3461_v25, %s16209_s26  ;;  %3500 = vrot.lane.b32.xlu0 %v3458_v63, %s16209_s26  ;;  %v3469_v0 = vrot.slane %v3358_v39, 1  ;;  %v3477_v25 = vrot.slane %v3361_v51, 1  ;;  %v3478_v63 = vrot.slane %v3363_v47, 1  ;;  %v3365_v13 = vmul.f32 %v11442_v31, %v11333_v62  ;;  %16668 = vst [vmem:[#allocation163_spill] sm:$0xff] %v11446_v8 }
 0x68a   : > { %v3474_v6 = vrot.slane %v3360_v28, 1  ;;  %v3475_v36 = vrot.slane %v3362_v11, 1  ;;  %v3367_v2 = vmul.f32 %v11449_v21, %v11333_v62  ;;  %v3473_v44 = vsel %vm1823_vm2, %v3471_v59, %v3472_v57 }
 0x68b   : > { %v3470_v54 = vsel %vm1823_vm2, %v3468_v46, %v3469_v0  ;;  %v3364_v39 = vmul.f32 %v10791_v34, %v11333_v62  ;;  %v3366_v51 = vmul.f32 %v10796_v1, %v11333_v62  ;;  %v3479_v47 = vsel %vm1823_vm2, %v3477_v25, %v3478_v63  ;;  %v11471_v1 = vld [vmem:[%s8754_s28 + $0xf8] sm:$0x1] }
 0x68c   : > { %v3476_v28 = vsel %vm1823_vm2, %v3474_v6, %v3475_v36  ;;  %v3484_v59 = vrot.slane %v3367_v2, 1  ;;  %v11463_v11 = vpop.permute.xlu1 %3377  ;;  %v3371_v57 = vmul.f32 %v11471_v1, %v11333_v62  ;;  %v3368_v25 = vmul.f32 %v10812_v18, %v11333_v62  ;;  %v8352_v36 = vld [vmem:[%s8854_s12 + $0x18] sm:$0x1] }
 0x68d   : > { %3506 = vrot.lane.b32.xlu1 %v3467_v10, %s16209_s26  ;;  %3504 = vrot.lane.b32.xlu0 %v3464_v27, %s16209_s26  ;;  %v3483_v10 = vrot.slane %v3365_v13, 1  ;;  %v11466_v27 = vld [vmem:[%s8754_s28 + $0xe8] sm:$0xfe]  ;;  %v3480_v46 = vrot.slane %v3364_v39, 1  ;;  %v3481_v0 = vrot.slane %v3366_v51, 1  ;;  %v3370_v63 = vmul.f32 %v10817_v9, %v11333_v62 }
 0x68e   : > { %v3369_v34 = vmul.f32 %v11466_v27, %v11333_v62  ;;  %v8351_v13 = vld [vmem:[%s8854_s12 + $0x8] sm:$0xfe]  ;;  %v3383_v2 = vmul.f32 %v8352_v36, %v11463_v11  ;;  %v8354_v39 = vld [vmem:[%s8854_s12 + $0x10] sm:$0x1]  ;;  %v3490_v9 = vrot.slane %v3371_v57, 1  ;;  %v3393_v50 = vmul.f32 %v11536_v19, %v11463_v11 }
 0x68f   : > { %v3381_v6 = vmul.f32 %v8351_v13, %v11463_v11  ;;  %v3382_v18 = vmul.f32 %v8354_v39, %v11463_v11  ;;  %v3485_v62 = vsel %vm1823_vm2, %v3483_v10, %v3484_v59  ;;  %v3487_v13 = vrot.slane %v3370_v63, 1  ;;  %v11495_v57 = vld [vmem:[%s8854_s12 + $0x28] sm:$0xfe] }
 0x690   : > { %v3489_v51 = vrot.slane %v3369_v34, 1  ;;  %v3385_v10 = vmul.f32 %v11495_v57, %v11463_v11 }
 0x691   : > { %3510 = vrot.lane.b32.xlu1 %v3473_v44, %s16209_s26  ;;  %3508 = vrot.lane.b32.xlu0 %v3470_v54, %s16209_s26  ;;  %v8353_v44 = vld [vmem:[%s8854_s12] sm:$0xfe]  ;;  %v3583_v36 = vrot.slane %v3381_v6, 1  ;;  %v3581_v39 = vrot.slane %v3382_v18, 1  ;;  %v11511_v6 = vld [vmem:[%s8854_s12 + $0x30] sm:$0x1] }
 0x692   : > { %v3380_v54 = vmul.f32 %v8353_v44, %v11463_v11  ;;  %v3584_v44 = vrot.slane %v3383_v2, 1  ;;  %v3491_v34 = vsel %vm1823_vm2, %v3489_v51, %v3490_v9  ;;  %v3386_v2 = vmul.f32 %v11511_v6, %v11463_v11  ;;  %v11520_v51 = vld [vmem:[%s8854_s12 + $0x48] sm:$0xfe] }
 0x693   : > { %v3389_v9 = vmul.f32 %v11520_v51, %v11463_v11 }
 0x694   : > { %v3580_v8 = vrot.slane %v3380_v54, 1  ;;  %v3585_v54 = vsel %vm1823_vm2, %v3583_v36, %v3584_v44  ;;  %v3589_v36 = vrot.slane %v3385_v10, 1  ;;  %v3392_v10 = vmul.f32 %v16627_v5, %v11463_v11 }
 0x695   : > { %3514 = vrot.lane.b32.xlu1 %v3479_v47, %s16209_s26  ;;  %3512 = vrot.lane.b32.xlu0 %v3476_v28, %s16209_s26  ;;  %v3482_v47 = vsel %vm1823_vm2, %v3480_v46, %v3481_v0  ;;  %v3486_v28 = vrot.slane %v3368_v25, 1  ;;  %v11501_v46 = vld [vmem:[%s8854_s12 + $0x38] sm:$0x1]  ;;  %v11506_v25 = vld [vmem:[%s8854_s12 + $0x20] sm:$0xfe] }
 0x696   : > { %v3387_v0 = vmul.f32 %v11501_v46, %v11463_v11  ;;  %v3384_v63 = vmul.f32 %v11506_v25, %v11463_v11  ;;  %v3582_v18 = vsel %vm1823_vm2, %v3580_v8, %v3581_v39  ;;  %v3587_v39 = vrot.slane %v3386_v2, 1 }
 0x697   : > { %v3488_v59 = vsel %vm1823_vm2, %v3486_v28, %v3487_v13  ;;  %v3388_v28 = vmul.f32 %v10868_v45, %v11463_v11  ;;  %v3390_v13 = vmul.f32 %v10873_v52, %v11463_v11  ;;  %v3395_v52 = vmul.f32 %v11541_v48, %v11463_v11 }
 0x698   : > { %v3590_v44 = vrot.slane %v3387_v0, 1  ;;  %v3586_v8 = vrot.slane %v3384_v63, 1  ;;  %v3394_v2 = vmul.f32 %v16628_v26, %v11463_v11  ;;  %v3598_v5 = vrot.slane %v3392_v10, 1  ;;  %v11561_v26 = vld [vmem:[%s8854_s12 + $0x98] sm:$0x1] }
 0x699   : > { %3518 = vrot.lane.b32.xlu1 %v3485_v62, %s16209_s26  ;;  %3516 = vrot.lane.b32.xlu0 %v3482_v47, %s16209_s26  ;;  %v11525_v62 = vld [vmem:[%s8854_s12 + $0x58] sm:$0x1]  ;;  %v3592_v45 = vrot.slane %v3388_v28, 1  ;;  %v3593_v23 = vrot.slane %v3390_v13, 1  ;;  %v11556_v28 = vld [vmem:[%s8854_s12 + $0x88] sm:$0xfe] }
 0x69a   : > { %v3391_v47 = vmul.f32 %v11525_v62, %v11463_v11  ;;  %v3591_v0 = vsel %vm1823_vm2, %v3589_v36, %v3590_v44  ;;  %v3588_v63 = vsel %vm1823_vm2, %v3586_v8, %v3587_v39  ;;  %v3397_v13 = vmul.f32 %v11556_v28, %v11463_v11 }
 0x69b   : > { %v3599_v36 = vrot.slane %v3394_v2, 1  ;;  %v3399_v44 = vmul.f32 %v11561_v26, %v11463_v11  ;;  %v3396_v8 = vmul.f32 %v10902_v38, %v11463_v11 }
 0x69d   : > { %3522 = vrot.lane.b32.xlu1 %v3491_v34, %s16209_s26  ;;  %3520 = vrot.lane.b32.xlu0 %v3488_v59, %s16209_s26  ;;  %v3595_v34 = vrot.slane %v3389_v9, 1  ;;  %v3596_v59 = vrot.slane %v3391_v47, 1  ;;  %v3594_v9 = vsel %vm1823_vm2, %v3592_v45, %v3593_v23  ;;  %v3602_v47 = vrot.slane %v3395_v52, 1  ;;  %v11572_v23 = vld [vmem:[%s8854_s12 + $0xa8] sm:$0xfe] }
 0x69e   : > { %v3401_v39 = vmul.f32 %v11572_v23, %v11463_v11  ;;  %v3607_v45 = vrot.slane %v3397_v13, 1  ;;  %v3402_v52 = vmul.f32 %v16630_v17, %v11463_v11  ;;  %v3600_v10 = vsel %vm1823_vm2, %v3598_v5, %v3599_v36  ;;  %v11595_v13 = vld [vmem:[%s8854_s12 + $0xd8] sm:$0x1] }
 0x69f   : > { %16670 = vst [vmem:[#allocation165_spill] sm:$0xff] %v11595_v13  ;;  %v3407_v5 = vmul.f32 %v11595_v13, %v11463_v11 }
 0x6a0   : > { %v3611_v17 = vrot.slane %v3402_v52, 1  ;;  %v11610_v52 = vld [vmem:[%s8854_s12 + $0xe8] sm:$0xfe] }
 0x6a1   : > { %3630 = vrot.lane.b32.xlu1 %v3585_v54, %s16209_s26  ;;  %3628 = vrot.lane.b32.xlu0 %v3582_v18, %s16209_s26  ;;  %v3597_v54 = vsel %vm1823_vm2, %v3595_v34, %v3596_v59  ;;  %v3601_v18 = vrot.slane %v3393_v50, 1  ;;  %v3398_v50 = vmul.f32 %v10909_v3, %v11463_v11  ;;  %v11577_v34 = vld [vmem:[%s8854_s12 + $0xb8] sm:$0x1]  ;;  %v3400_v3 = vmul.f32 %v16629_v15, %v11463_v11 }
 0x6a2   : > { %v3403_v59 = vmul.f32 %v11577_v34, %v11463_v11 }
 0x6a3   : > { %v3603_v38 = vsel %vm1823_vm2, %v3601_v18, %v3602_v47  ;;  %v3605_v2 = vrot.slane %v3398_v50, 1  ;;  %v11590_v18 = vld [vmem:[%s8854_s12 + $0xc8] sm:$0xfe]  ;;  %v3610_v47 = vrot.slane %v3400_v3, 1  ;;  %v3406_v50 = vmul.f32 %v10944_v29, %v11463_v11 }
 0x6a4   : > { %16669 = vst [vmem:[#allocation164_spill] sm:$0xff] %v11590_v18  ;;  %v3405_v15 = vmul.f32 %v11590_v18, %v11463_v11  ;;  %v3620_v3 = vrot.slane %v3407_v5, 1 }
 0x6a5   : > { %3634 = vrot.lane.b32.xlu1 %v3591_v0, %s16209_s26  ;;  %3632 = vrot.lane.b32.xlu0 %v3588_v63, %s16209_s26  ;;  %v3608_v0 = vrot.slane %v3399_v44, 1  ;;  %v3604_v63 = vrot.slane %v3396_v8, 1  ;;  %v3404_v8 = vmul.f32 %v16633_v4, %v11463_v11 }
 0x6a7   : > { %v3609_v36 = vsel %vm1823_vm2, %v3607_v45, %v3608_v0  ;;  %v3606_v44 = vsel %vm1823_vm2, %v3604_v63, %v3605_v2  ;;  %v3409_v45 = vmul.f32 %v11610_v52, %v11463_v11  ;;  %v3616_v4 = vrot.slane %v3404_v8, 1 }
 0x6a8   : > { %v3617_v0 = vrot.slane %v3406_v50, 1  ;;  %v3408_v63 = vmul.f32 %v16635_v33, %v11463_v11  ;;  %v3410_v2 = vmul.f32 %v16636_v43, %v11463_v11 }
 0x6a9   : > { %3638 = vrot.lane.b32.xlu1 %v3597_v54, %s16209_s26  ;;  %3636 = vrot.lane.b32.xlu0 %v3594_v9, %s16209_s26  ;;  %v3613_v54 = vrot.slane %v3401_v39, 1  ;;  %v3614_v9 = vrot.slane %v3403_v59, 1  ;;  %v3619_v59 = vrot.slane %v3405_v15, 1 }
 0x6aa   : > { %v3618_v15 = vsel %vm1823_vm2, %v3616_v4, %v3617_v0  ;;  %v3623_v5 = vrot.slane %v3410_v2, 1 }
 0x6ab   : > { %v3615_v39 = vsel %vm1823_vm2, %v3613_v54, %v3614_v9  ;;  %v3621_v54 = vsel %vm1823_vm2, %v3619_v59, %v3620_v3  ;;  %v3625_v9 = vrot.slane %v3409_v45, 1 }
 0x6ad   : > { %3642 = vrot.lane.b32.xlu1 %v3603_v38, %s16209_s26  ;;  %3640 = vrot.lane.b32.xlu0 %v3600_v10, %s16209_s26  ;;  %v3612_v38 = vsel %vm1823_vm2, %v3610_v47, %v3611_v17  ;;  %v11615_v10 = vld [vmem:[%s8854_s12 + $0xf8] sm:$0x1]  ;;  %v3622_v17 = vrot.slane %v3408_v63, 1 }
 0x6ae   : > { %v3411_v29 = vmul.f32 %v11615_v10, %v11463_v11  ;;  %v7908_v11 = vld [vmem:[%s16167_s3 + $0xe] ss:$0 sm:$0xff] }
 0x6af   : > { %v3624_v43 = vsel %vm1823_vm2, %v3622_v17, %v3623_v5 }
 0x6b0   : > { %v3626_v47 = vrot.slane %v3411_v29, 1 }
 0x6b1   : > { %3646 = vrot.lane.b32.xlu1 %v3609_v36, %s16209_s26  ;;  %3644 = vrot.lane.b32.xlu0 %v3606_v44, %s16209_s26  ;;  %v7909_v36 = vld [vmem:[%s16169_s5 + $0xe] ss:$0 sm:$0xff] }
 0x6b2   : > { %v3627_v33 = vsel %vm1823_vm2, %v3625_v9, %v3626_v47 }
 0x6b5   : > { %3650 = vrot.lane.b32.xlu1 %v3615_v39, %s16209_s26  ;;  %3648 = vrot.lane.b32.xlu0 %v3612_v38, %s16209_s26 }
 0x6b9   : > { %3654 = vrot.lane.b32.xlu1 %v3621_v54, %s16209_s26  ;;  %3652 = vrot.lane.b32.xlu0 %v3618_v15, %s16209_s26 }
 0x6bd   : > { %3658 = vrot.lane.b32.xlu1 %v3627_v33, %s16209_s26  ;;  %3656 = vrot.lane.b32.xlu0 %v3624_v43, %s16209_s26 }
 0x6c1   : > { %3691 = vrot.lane.b32.xlu0 %v7908_v11, %s16207_s25  ;;  %3731 = vrot.lane.b32.xlu1 %v7909_v36, %s16207_s25 }
 0x6f3   : > { %v11641_v44 = vpop.permute.xlu0 %3492  ;;  %v11643_v8 = vpop.permute.xlu1 %3494 }
 0x6f4   : > { %16671 = vst [vmem:[#allocation166_spill] sm:$0xff] %v11641_v44  ;;  %16672 = vst [vmem:[#allocation167_spill] sm:$0xff] %v11643_v8 }
 0x6f7   : > { %v11645_v50 = vpop.permute.xlu0 %3496  ;;  %v11647_v39 = vpop.permute.xlu1 %3498 }
 0x6f8   : > { %16673 = vst [vmem:[#allocation168_spill] sm:$0xff] %v11645_v50  ;;  %16674 = vst [vmem:[#allocation169_spill] sm:$0xff] %v11647_v39 }
 0x6fb   : > { %v11649_v59 = vpop.permute.xlu0 %3500  ;;  %v11651_v38 = vpop.permute.xlu1 %3502 }
 0x6fc   : > { %16675 = vst [vmem:[#allocation170_spill] sm:$0xff] %v11649_v59  ;;  %16676 = vst [vmem:[#allocation171_spill] sm:$0xff] %v11651_v38 }
 0x6ff   : > { %v11653_v3 = vpop.permute.xlu0 %3504  ;;  %v11655_v45 = vpop.permute.xlu1 %3506 }
 0x700   : > { %16677 = vst [vmem:[#allocation172_spill] sm:$0xff] %v11653_v3  ;;  %16678 = vst [vmem:[#allocation173_spill] sm:$0xff] %v11655_v45 }
 0x703   : > { %v11657_v29 = vpop.permute.xlu0 %3508  ;;  %v11659_v4 = vpop.permute.xlu1 %3510 }
 0x704   : > { %16679 = vst [vmem:[#allocation174_spill] sm:$0xff] %v11657_v29  ;;  %16680 = vst [vmem:[#allocation175_spill] sm:$0xff] %v11659_v4 }
 0x707   : > { %v11661_v0 = vpop.permute.xlu0 %3512  ;;  %v11663_v63 = vpop.permute.xlu1 %3514 }
 0x708   : > { %16681 = vst [vmem:[#allocation176_spill] sm:$0xff] %v11661_v0  ;;  %16682 = vst [vmem:[#allocation177_spill] sm:$0xff] %v11663_v63 }
 0x70b   : > { %v11665_v2 = vpop.permute.xlu0 %3516  ;;  %v11669_v9 = vpop.permute.xlu1 %3518 }
 0x70c   : > { %16683 = vst [vmem:[#allocation178_spill] sm:$0xff] %v11665_v2  ;;  %16685 = vst [vmem:[#allocation180_spill] sm:$0xff] %v11669_v9 }
 0x70f   : > { %v11667_v54 = vpop.permute.xlu0 %3520  ;;  %v11673_v47 = vpop.permute.xlu1 %3522 }
 0x710   : > { %16684 = vst [vmem:[#allocation179_spill] sm:$0xff] %v11667_v54  ;;  %16687 = vst [vmem:[#allocation182_spill] sm:$0xff] %v11673_v47 }
 0x713   : > { %v11671_v15 = vpop.permute.xlu0 %3628  ;;  %v11679_v33 = vpop.permute.xlu1 %3630 }
 0x714   : > { %16686 = vst [vmem:[#allocation181_spill] sm:$0xff] %v11671_v15  ;;  %16690 = vst [vmem:[#allocation185_spill] sm:$0xff] %v11679_v33 }
 0x717   : > { %v11675_v17 = vpop.permute.xlu0 %3632  ;;  %v11683_v11 = vpop.permute.xlu1 %3634 }
 0x718   : > { %16688 = vst [vmem:[#allocation183_spill] sm:$0xff] %v11675_v17  ;;  %16692 = vst [vmem:[#allocation187_spill] sm:$0xff] %v11683_v11 }
 0x71b   : > { %v11677_v5 = vpop.permute.xlu0 %3636  ;;  %v11689_v39 = vpop.permute.xlu1 %3638 }
 0x71c   : > { %16689 = vst [vmem:[#allocation184_spill] sm:$0xff] %v11677_v5  ;;  %16695 = vst [vmem:[#allocation190_spill] sm:$0xff] %v11689_v39 }
 0x71f   : > { %v11681_v43 = vpop.permute.xlu0 %3640  ;;  %v11693_v44 = vpop.permute.xlu1 %3642 }
 0x720   : > { %16691 = vst [vmem:[#allocation186_spill] sm:$0xff] %v11681_v43  ;;  %16697 = vst [vmem:[#allocation192_spill] sm:$0xff] %v11693_v44  ;;  %v11714_v44 = vld [vmem:[%s8754_s28 + $0x40] sm:$0xfe] }
 0x723   : > { %v11685_v36 = vpop.permute.xlu0 %3644  ;;  %v11707_v43 = vpop.permute.xlu1 %3646 }
 0x724   : > { %16693 = vst [vmem:[#allocation188_spill] sm:$0xff] %v11685_v36  ;;  %16699 = vst [vmem:[#allocation194_spill] sm:$0xff] %v11707_v43 }
 0x727   : > { %v11687_v50 = vpop.permute.xlu0 %3648 }
 0x728   : > { %16694 = vst [vmem:[#allocation189_spill] sm:$0xff] %v11687_v50 }
 0x72b   : > { %v11691_v15 = vpop.permute.xlu0 %3652 }
 0x72c   : > { %16696 = vst [vmem:[#allocation191_spill] sm:$0xff] %v11691_v15 }
 0x72f   : > { %v11695_v17 = vpop.permute.xlu0 %3656 }
 0x730   : > { %16698 = vst [vmem:[#allocation193_spill] sm:$0xff] %v11695_v17 }
 0x733   : > { %v11697_v8 = vpop.permute.xlu0 %3691 }
 0x734   : > { %v3695_v33 = vmul.f32 %v11346_v61, %v11697_v8  ;;  %v3697_v11 = vmul.f32 %v11351_v7, %v11697_v8  ;;  %v3694_v36 = vmul.f32 %v11356_v49, %v11697_v8  ;;  %v3696_v50 = vmul.f32 %v11361_v37, %v11697_v8  ;;  %v11719_v7 = vld [vmem:[%s8754_s28 + $0x50] sm:$0x1] }
 0x735   : > { %v3699_v15 = vmul.f32 %v11368_v12, %v11697_v8  ;;  %v3701_v17 = vmul.f32 %v11373_v56, %v11697_v8  ;;  %v3698_v61 = vmul.f32 %v11714_v44, %v11697_v8  ;;  %v3700_v49 = vmul.f32 %v11719_v7, %v11697_v8 }
 0x736   : > { %v3801_v37 = vrot.slane %v3695_v33, 1  ;;  %v3802_v5 = vrot.slane %v3697_v11, 1  ;;  %v3798_v43 = vrot.slane %v3694_v36, 1  ;;  %v3799_v39 = vrot.slane %v3696_v50, 1  ;;  %v11732_v50 = vld [vmem:[%s8754_s28 + $0x60] sm:$0xfe]  ;;  %v11743_v36 = vpop.permute.xlu1 %3650 }
 0x737   : > { %v3807_v54 = vrot.slane %v3699_v15, 1  ;;  %v3808_v47 = vrot.slane %v3701_v17, 1  ;;  %v3804_v2 = vrot.slane %v3698_v61, 1  ;;  %v3805_v9 = vrot.slane %v3700_v49, 1  ;;  %v11737_v11 = vld [vmem:[%s8754_s28 + $0x70] sm:$0x1] }
 0x738   : > { %v3803_v0 = vsel %vm1823_vm2, %v3801_v37, %v3802_v5  ;;  %v3800_v63 = vsel %vm1823_vm2, %v3798_v43, %v3799_v39  ;;  %v3703_v29 = vmul.f32 %v11384_v32, %v11697_v8  ;;  %v3705_v33 = vmul.f32 %v11391_v22, %v11697_v8  ;;  %16700 = vst [vmem:[#allocation195_spill] sm:$0xff] %v11743_v36 }
 0x739   : > { %3848 = vrot.lane.b32.xlu1 %v3803_v0, %s16209_s26  ;;  %3846 = vrot.lane.b32.xlu0 %v3800_v63, %s16209_s26  ;;  %v3702_v15 = vmul.f32 %v11732_v50, %v11697_v8  ;;  %v3704_v39 = vmul.f32 %v11737_v11, %v11697_v8  ;;  %v3707_v43 = vmul.f32 %v11405_v16, %v11697_v8  ;;  %v11748_v63 = vld [vmem:[%s8754_s28 + $0x80] sm:$0xfe] }
 0x73a   : > { %v3813_v17 = vrot.slane %v3703_v29, 1  ;;  %v3814_v5 = vrot.slane %v3705_v33, 1  ;;  %v3709_v0 = vmul.f32 %v11411_v41, %v11697_v8  ;;  %v3706_v61 = vmul.f32 %v11748_v63, %v11697_v8  ;;  %v11753_v29 = vld [vmem:[%s8754_s28 + $0x90] sm:$0x1] }
 0x73b   : > { %v3708_v49 = vmul.f32 %v11753_v29, %v11697_v8  ;;  %v3809_v37 = vsel %vm1823_vm2, %v3807_v54, %v3808_v47  ;;  %v3806_v33 = vsel %vm1823_vm2, %v3804_v2, %v3805_v9  ;;  %v3810_v36 = vrot.slane %v3702_v15, 1  ;;  %v11768_v9 = vld [vmem:[%s8754_s28 + $0xa0] sm:$0xfe]  ;;  %v11773_v15 = vld [vmem:[%s8754_s28 + $0xb0] sm:$0x1] }
 0x73c   : > { %v3811_v4 = vrot.slane %v3704_v39, 1  ;;  %v3815_v60 = vsel %vm1823_vm2, %v3813_v17, %v3814_v5  ;;  %v3819_v53 = vrot.slane %v3707_v43, 1  ;;  %v3820_v3 = vrot.slane %v3709_v0, 1  ;;  %v11777_v5 = vpop.permute.xlu1 %3654  ;;  %v11787_v0 = vld [vmem:[%s8754_s28 + $0xc0] sm:$0xfe] }
 0x73d   : > { %3852 = vrot.lane.b32.xlu1 %v3809_v37, %s16209_s26  ;;  %3850 = vrot.lane.b32.xlu0 %v3806_v33, %s16209_s26  ;;  %v3816_v45 = vrot.slane %v3706_v61, 1  ;;  %v3817_v20 = vrot.slane %v3708_v49, 1  ;;  %v3711_v24 = vmul.f32 %v11424_v58, %v11697_v8  ;;  %v3713_v2 = vmul.f32 %v11429_v14, %v11697_v8  ;;  %16701 = vst [vmem:[#allocation196_spill] sm:$0xff] %v11777_v5  ;;  %v11792_v49 = vld [vmem:[%s8754_s28 + $0xd0] sm:$0x1] }
 0x73e   : > { %v3812_v54 = vsel %vm1823_vm2, %v3810_v36, %v3811_v4  ;;  %v3710_v47 = vmul.f32 %v11768_v9, %v11697_v8  ;;  %v3712_v17 = vmul.f32 %v11773_v15, %v11697_v8  ;;  %v3715_v4 = vmul.f32 %v11442_v31, %v11697_v8 }
 0x73f   : > { %v3717_v39 = vmul.f32 %v11449_v21, %v11697_v8  ;;  %v3821_v43 = vsel %vm1823_vm2, %v3819_v53, %v3820_v3  ;;  %v3825_v36 = vrot.slane %v3711_v24, 1  ;;  %v3714_v61 = vmul.f32 %v11787_v0, %v11697_v8 }
 0x740   : > { %v3818_v37 = vsel %vm1823_vm2, %v3816_v45, %v3817_v20  ;;  %v3826_v33 = vrot.slane %v3713_v2, 1  ;;  %v3823_v5 = vrot.slane %v3712_v17, 1  ;;  %v3831_v24 = vrot.slane %v3715_v4, 1  ;;  %v11801_v59 = vpop.permute.xlu1 %3658  ;;  %v11813_v4 = vld [vmem:[%s8754_s28 + $0xf0] sm:$0x1] }
 0x741   : > { %3856 = vrot.lane.b32.xlu1 %v3815_v60, %s16209_s26  ;;  %3854 = vrot.lane.b32.xlu0 %v3812_v54, %s16209_s26  ;;  %v3716_v60 = vmul.f32 %v11792_v49, %v11697_v8  ;;  %v3822_v54 = vrot.slane %v3710_v47, 1  ;;  %v3832_v53 = vrot.slane %v3717_v39, 1  ;;  %v3719_v3 = vmul.f32 %v11466_v27, %v11697_v8  ;;  %16702 = vst [vmem:[#allocation197_spill] sm:$0xff] %v11801_v59  ;;  %v11808_v47 = vld [vmem:[%s8754_s28 + $0xe0] sm:$0xfe] }
 0x742   : > { %v3828_v38 = vrot.slane %v3714_v61, 1  ;;  %v3721_v20 = vmul.f32 %v11471_v1, %v11697_v8  ;;  %v3827_v45 = vsel %vm1823_vm2, %v3825_v36, %v3826_v33  ;;  %v3718_v17 = vmul.f32 %v11808_v47, %v11697_v8 }
 0x743   : > { %v3829_v40 = vrot.slane %v3716_v60, 1  ;;  %v3824_v2 = vsel %vm1823_vm2, %v3822_v54, %v3823_v5  ;;  %v3720_v39 = vmul.f32 %v11813_v4, %v11697_v8  ;;  %v3837_v36 = vrot.slane %v3719_v3, 1  ;;  %v11829_v54 = vld [vmem:[%s8754_s28 + $0x118] sm:$0x1] }
 0x744   : > { %v3838_v61 = vrot.slane %v3721_v20, 1  ;;  %v11821_v60 = vpop.permute.xlu1 %3731  ;;  %v3834_v59 = vrot.slane %v3718_v17, 1 }
 0x745   : > { %3860 = vrot.lane.b32.xlu1 %v3821_v43, %s16209_s26  ;;  %3858 = vrot.lane.b32.xlu0 %v3818_v37, %s16209_s26  ;;  %v3833_v43 = vsel %vm1823_vm2, %v3831_v24, %v3832_v53  ;;  %v3830_v5 = vsel %vm1823_vm2, %v3828_v38, %v3829_v40  ;;  %v11824_v37 = vld [vmem:[%s8754_s28 + $0x108] sm:$0xfe]  ;;  %v3722_v40 = vmul.f32 %v11834_v30, %v11697_v8  ;;  %v11839_v38 = vld [vmem:[%s8754_s28 + $0x110] sm:$0x1] }
 0x746   : > { %v3723_v33 = vmul.f32 %v11824_v37, %v11697_v8  ;;  %v3724_v24 = vmul.f32 %v11839_v38, %v11697_v8  ;;  %v3735_v53 = vmul.f32 %v11495_v57, %v11821_v60  ;;  %v3737_v3 = vmul.f32 %v11501_v46, %v11821_v60 }
 0x747   : > { %v3734_v20 = vmul.f32 %v11506_v25, %v11821_v60  ;;  %v3736_v17 = vmul.f32 %v11511_v6, %v11821_v60 }
 0x748   : > { %v3841_v55 = vrot.slane %v3724_v24, 1  ;;  %v3937_v57 = vrot.slane %v3735_v53, 1  ;;  %v3938_v46 = vrot.slane %v3737_v3, 1  ;;  %v3743_v24 = vmul.f32 %v11536_v19, %v11821_v60  ;;  %v11882_v3 = vld [vmem:[%s8854_s12 + $0x60] sm:$0xfe] }
 0x749   : > { %3864 = vrot.lane.b32.xlu1 %v3827_v45, %s16209_s26  ;;  %3862 = vrot.lane.b32.xlu0 %v3824_v2, %s16209_s26  ;;  %v3725_v45 = vmul.f32 %v11829_v54, %v11697_v8  ;;  %v3835_v2 = vrot.slane %v3720_v39, 1  ;;  %v3843_v39 = vrot.slane %v3723_v33, 1  ;;  %v3839_v8 = vsel %vm1823_vm2, %v3837_v36, %v3838_v61  ;;  %v11864_v33 = vld [vmem:[%s8854_s12 + $0x40] sm:$0xfe]  ;;  %16703 = vst [vmem:[#allocation198_spill] sm:$0xff] %v11882_v3 }
 0x74a   : > { %v3934_v25 = vrot.slane %v3734_v20, 1  ;;  %v3935_v42 = vrot.slane %v3736_v17, 1  ;;  %v3739_v36 = vmul.f32 %v11520_v51, %v11821_v60  ;;  %v3745_v53 = vmul.f32 %v11541_v48, %v11821_v60  ;;  %v11887_v17 = vld [vmem:[%s8854_s12 + $0x70] sm:$0x1] }
 0x74b   : > { %v3844_v35 = vrot.slane %v3725_v45, 1  ;;  %v3738_v45 = vmul.f32 %v11864_v33, %v11821_v60  ;;  %v3742_v20 = vmul.f32 %v11882_v3, %v11821_v60  ;;  %16704 = vst [vmem:[#allocation199_spill] sm:$0xff] %v11887_v17  ;;  %v3749_v3 = vmul.f32 %v11561_v26, %v11821_v60 }
 0x74d   : > { %3868 = vrot.lane.b32.xlu1 %v3833_v43, %s16209_s26  ;;  %3866 = vrot.lane.b32.xlu0 %v3830_v5, %s16209_s26  ;;  %v3836_v43 = vsel %vm1823_vm2, %v3834_v59, %v3835_v2  ;;  %v3840_v5 = vrot.slane %v3722_v40, 1  ;;  %v3845_v6 = vsel %vm1823_vm2, %v3843_v39, %v3844_v35  ;;  %v3741_v59 = vmul.f32 %v11525_v62, %v11821_v60  ;;  %v11869_v2 = vld [vmem:[%s8854_s12 + $0x50] sm:$0x1] }
 0x74e   : > { %v3740_v40 = vmul.f32 %v11869_v2, %v11821_v60  ;;  %v3939_v35 = vsel %vm1823_vm2, %v3937_v57, %v3938_v46  ;;  %v3744_v39 = vmul.f32 %v11887_v17, %v11821_v60  ;;  %v3949_v57 = vrot.slane %v3743_v24, 1  ;;  %v11898_v17 = vld [vmem:[%s8854_s12 + $0x80] sm:$0xfe] }
 0x74f   : > { %v3842_v61 = vsel %vm1823_vm2, %v3840_v5, %v3841_v55  ;;  %v3936_v55 = vsel %vm1823_vm2, %v3934_v25, %v3935_v42  ;;  %v3944_v42 = vrot.slane %v3741_v59, 1  ;;  %v3950_v46 = vrot.slane %v3745_v53, 1 }
 0x750   : > { %v3941_v5 = vrot.slane %v3740_v40, 1  ;;  %v3747_v25 = vmul.f32 %v11556_v28, %v11821_v60  ;;  %v11905_v40 = vld [vmem:[%s8854_s12 + $0x90] sm:$0x1] }
 0x751   : > { %3872 = vrot.lane.b32.xlu1 %v3839_v8, %s16209_s26  ;;  %3870 = vrot.lane.b32.xlu0 %v3836_v43, %s16209_s26  ;;  %v3943_v8 = vrot.slane %v3739_v36, 1  ;;  %v3940_v43 = vrot.slane %v3738_v45, 1  ;;  %v3746_v36 = vmul.f32 %v11898_v17, %v11821_v60 }
 0x752   : > { %v3955_v24 = vrot.slane %v3747_v25, 1  ;;  %v3757_v25 = vmul.f32 %v11595_v13, %v11821_v60 }
 0x753   : > { %v3945_v59 = vsel %vm1823_vm2, %v3943_v8, %v3944_v42  ;;  %v3942_v45 = vsel %vm1823_vm2, %v3940_v43, %v3941_v5  ;;  %v3751_v8 = vmul.f32 %v11572_v23, %v11821_v60  ;;  %v3753_v43 = vmul.f32 %v11577_v34, %v11821_v60  ;;  %v11918_v5 = vld [vmem:[%s8854_s12 + $0xa0] sm:$0xfe] }
 0x754   : > { %16705 = vst [vmem:[#allocation200_spill] sm:$0xff] %v11918_v5 }
 0x755   : > { %3876 = vrot.lane.b32.xlu1 %v3845_v6, %s16209_s26  ;;  %3874 = vrot.lane.b32.xlu0 %v3842_v61, %s16209_s26  ;;  %v3946_v6 = vrot.slane %v3742_v20, 1  ;;  %v3947_v61 = vrot.slane %v3744_v39, 1  ;;  %v3956_v20 = vrot.slane %v3749_v3, 1  ;;  %v3952_v39 = vrot.slane %v3746_v36, 1  ;;  %v11935_v36 = vld [vmem:[%s8854_s12 + $0xc0] sm:$0xfe] }
 0x756   : > { %v3755_v3 = vmul.f32 %v11590_v18, %v11821_v60  ;;  %16707 = vst [vmem:[#allocation202_spill] sm:$0xff] %v11935_v36  ;;  %v3962_v18 = vrot.slane %v3753_v43, 1 }
 0x757   : > { %v3948_v53 = vsel %vm1823_vm2, %v3946_v6, %v3947_v61  ;;  %v3957_v6 = vsel %vm1823_vm2, %v3955_v24, %v3956_v20  ;;  %v3961_v61 = vrot.slane %v3751_v8, 1  ;;  %v3968_v20 = vrot.slane %v3757_v25, 1 }
 0x758   : > { %v3967_v24 = vrot.slane %v3755_v3, 1  ;;  %v3759_v8 = vmul.f32 %v11610_v52, %v11821_v60  ;;  %v11959_v3 = vld [vmem:[%s8854_s12 + $0xf0] sm:$0x1] }
 0x759   : > { %3984 = vrot.lane.b32.xlu1 %v3939_v35, %s16209_s26  ;;  %3982 = vrot.lane.b32.xlu0 %v3936_v55, %s16209_s26  ;;  %v3748_v35 = vmul.f32 %v11905_v40, %v11821_v60  ;;  %v3951_v55 = vsel %vm1823_vm2, %v3949_v57, %v3950_v46  ;;  %v11923_v57 = vld [vmem:[%s8854_s12 + $0xb0] sm:$0x1]  ;;  %16709 = vst [vmem:[#allocation204_spill] sm:$0xff] %v11959_v3 }
 0x75a   : > { %16706 = vst [vmem:[#allocation201_spill] sm:$0xff] %v11923_v57  ;;  %v3752_v46 = vmul.f32 %v11923_v57, %v11821_v60  ;;  %v3760_v25 = vmul.f32 %v11959_v3, %v11821_v60 }
 0x75b   : > { %v3953_v42 = vrot.slane %v3748_v35, 1  ;;  %v11940_v35 = vld [vmem:[%s8854_s12 + $0xd0] sm:$0x1] }
 0x75c   : > { %v3959_v13 = vrot.slane %v3752_v46, 1 }
 0x75d   : > { %3988 = vrot.lane.b32.xlu1 %v3945_v59, %s16209_s26  ;;  %3986 = vrot.lane.b32.xlu0 %v3942_v45, %s16209_s26  ;;  %v3750_v59 = vmul.f32 %v11918_v5, %v11821_v60  ;;  %v3754_v45 = vmul.f32 %v11935_v36, %v11821_v60 }
 0x75f   : > { %v3958_v57 = vrot.slane %v3750_v59, 1  ;;  %v3964_v36 = vrot.slane %v3754_v45, 1  ;;  %v11954_v59 = vld [vmem:[%s8854_s12 + $0xe0] sm:$0xfe] }
 0x760   : > { %16708 = vst [vmem:[#allocation203_spill] sm:$0xff] %v11954_v59  ;;  %v3758_v46 = vmul.f32 %v11954_v59, %v11821_v60  ;;  %v11978_v59 = vld [vmem:[%s8854_s12 + $0x100] sm:$0xfe] }
 0x761   : > { %3992 = vrot.lane.b32.xlu1 %v3951_v55, %s16209_s26  ;;  %3990 = vrot.lane.b32.xlu0 %v3948_v53, %s16209_s26  ;;  %v3756_v55 = vmul.f32 %v11940_v35, %v11821_v60  ;;  %v3954_v53 = vsel %vm1823_vm2, %v3952_v39, %v3953_v42  ;;  %v3761_v39 = vmul.f32 %v11615_v10, %v11821_v60 }
 0x762   : > { %v3963_v42 = vsel %vm1823_vm2, %v3961_v61, %v3962_v18  ;;  %v3960_v43 = vsel %vm1823_vm2, %v3958_v57, %v3959_v13  ;;  %v3969_v18 = vsel %vm1823_vm2, %v3967_v24, %v3968_v20  ;;  %v11968_v61 = vld [vmem:[%s8854_s12 + $0x108] sm:$0xfe]  ;;  %v3970_v3 = vrot.slane %v3758_v46, 1  ;;  %16710 = vst [vmem:[#allocation205_spill] sm:$0xff] %v11978_v59  ;;  %v11983_v20 = vld [vmem:[%s8854_s12 + $0x110] sm:$0x1] }
 0x763   : > { %v3965_v5 = vrot.slane %v3756_v55, 1  ;;  %v3974_v57 = vrot.slane %v3761_v39, 1  ;;  %v3763_v45 = vmul.f32 %v11968_v61, %v11821_v60  ;;  %v11973_v55 = vld [vmem:[%s8854_s12 + $0x118] sm:$0x1]  ;;  %v3762_v24 = vmul.f32 %v11978_v59, %v11821_v60 }
 0x765   : > { %3996 = vrot.lane.b32.xlu1 %v3957_v6, %s16209_s26  ;;  %3994 = vrot.lane.b32.xlu0 %v3954_v53, %s16209_s26  ;;  %v3973_v6 = vrot.slane %v3759_v8, 1  ;;  %v3966_v13 = vsel %vm1823_vm2, %v3964_v36, %v3965_v5  ;;  %v3765_v53 = vmul.f32 %v11973_v55, %v11821_v60  ;;  %v3764_v5 = vmul.f32 %v11983_v20, %v11821_v60 }
 0x766   : > { %v3979_v8 = vrot.slane %v3763_v45, 1  ;;  %v3976_v46 = vrot.slane %v3762_v24, 1 }
 0x767   : > { %v3975_v36 = vsel %vm1823_vm2, %v3973_v6, %v3974_v57 }
 0x769   : > { %4000 = vrot.lane.b32.xlu1 %v3963_v42, %s16209_s26  ;;  %3998 = vrot.lane.b32.xlu0 %v3960_v43, %s16209_s26  ;;  %v3971_v42 = vrot.slane %v3760_v25, 1  ;;  %v3980_v43 = vrot.slane %v3765_v53, 1  ;;  %v3977_v25 = vrot.slane %v3764_v5, 1 }
 0x76b   : > { %v3972_v39 = vsel %vm1823_vm2, %v3970_v3, %v3971_v42  ;;  %v3981_v59 = vsel %vm1823_vm2, %v3979_v8, %v3980_v43  ;;  %v3978_v60 = vsel %vm1823_vm2, %v3976_v46, %v3977_v25  ;;  %v7911_v3 = vld [vmem:[%s16169_s5 + $0x17] ss:$0 sm:$0xff] }
 0x76d   : > { %4004 = vrot.lane.b32.xlu1 %v3969_v18, %s16209_s26  ;;  %4002 = vrot.lane.b32.xlu0 %v3966_v13, %s16209_s26  ;;  %v7910_v18 = vld [vmem:[%s16167_s3 + $0x17] ss:$0 sm:$0xff] }
 0x771   : > { %4008 = vrot.lane.b32.xlu1 %v3975_v36, %s16209_s26  ;;  %4006 = vrot.lane.b32.xlu0 %v3972_v39, %s16209_s26 }
 0x775   : > { %4012 = vrot.lane.b32.xlu1 %v3981_v59, %s16209_s26  ;;  %4010 = vrot.lane.b32.xlu0 %v3978_v60, %s16209_s26 }
 0x779   : > { %4045 = vrot.lane.b32.xlu0 %v7910_v18, %s16207_s25  ;;  %4085 = vrot.lane.b32.xlu1 %v7911_v3, %s16207_s25  ;;  %s16301_s25 = sshll.u32 %s8701_s17, 10 }
 0x7ab   : > { %v12005_v6 = vpop.permute.xlu0 %3846  ;;  %v12007_v13 = vpop.permute.xlu1 %3848 }
 0x7ac   : > { %16711 = vst [vmem:[#allocation206_spill] sm:$0xff] %v12005_v6  ;;  %16712 = vst [vmem:[#allocation207_spill] sm:$0xff] %v12007_v13 }
 0x7af   : > { %v12009_v57 = vpop.permute.xlu0 %3850  ;;  %v12011_v59 = vpop.permute.xlu1 %3852 }
 0x7b0   : > { %16713 = vst [vmem:[#allocation208_spill] sm:$0xff] %v12009_v57  ;;  %16714 = vst [vmem:[#allocation209_spill] sm:$0xff] %v12011_v59 }
 0x7b3   : > { %v12013_v45 = vpop.permute.xlu0 %3854  ;;  %v12015_v53 = vpop.permute.xlu1 %3856 }
 0x7b7   : > { %v12017_v42 = vpop.permute.xlu0 %3858  ;;  %v12019_v24 = vpop.permute.xlu1 %3860 }
 0x7bb   : > { %v12021_v5 = vpop.permute.xlu0 %3862  ;;  %v12023_v36 = vpop.permute.xlu1 %3864 }
 0x7bc   : > { %16715 = vst [vmem:[#allocation210_spill] sm:$0xff] %v12021_v5  ;;  %16716 = vst [vmem:[#allocation211_spill] sm:$0xff] %v12023_v36 }
 0x7bf   : > { %v12025_v8 = vpop.permute.xlu0 %3866  ;;  %v12027_v39 = vpop.permute.xlu1 %3868 }
 0x7c0   : > { %16717 = vst [vmem:[#allocation212_spill] sm:$0xff] %v12025_v8  ;;  %16718 = vst [vmem:[#allocation213_spill] sm:$0xff] %v12027_v39 }
 0x7c3   : > { %v12029_v43 = vpop.permute.xlu0 %3870  ;;  %v12033_v25 = vpop.permute.xlu1 %3872 }
 0x7c4   : > { %16719 = vst [vmem:[#allocation214_spill] sm:$0xff] %v12029_v43  ;;  %16721 = vst [vmem:[#allocation216_spill] sm:$0xff] %v12033_v25 }
 0x7c7   : > { %v12031_v46 = vpop.permute.xlu0 %3874  ;;  %v12037_v18 = vpop.permute.xlu1 %3876 }
 0x7c8   : > { %16720 = vst [vmem:[#allocation215_spill] sm:$0xff] %v12031_v46  ;;  %16723 = vst [vmem:[#allocation218_spill] sm:$0xff] %v12037_v18 }
 0x7cb   : > { %v12035_v60 = vpop.permute.xlu0 %3982  ;;  %v12043_v59 = vpop.permute.xlu1 %3984 }
 0x7cc   : > { %16722 = vst [vmem:[#allocation217_spill] sm:$0xff] %v12035_v60  ;;  %16726 = vst [vmem:[#allocation221_spill] sm:$0xff] %v12043_v59 }
 0x7cf   : > { %v12039_v3 = vpop.permute.xlu0 %3986  ;;  %v12047_v13 = vpop.permute.xlu1 %3988 }
 0x7d0   : > { %16724 = vst [vmem:[#allocation219_spill] sm:$0xff] %v12039_v3  ;;  %16728 = vst [vmem:[#allocation223_spill] sm:$0xff] %v12047_v13 }
 0x7d3   : > { %v12041_v57 = vpop.permute.xlu0 %3990  ;;  %v12053_v46 = vpop.permute.xlu1 %3992 }
 0x7d4   : > { %16725 = vst [vmem:[#allocation220_spill] sm:$0xff] %v12041_v57  ;;  %16731 = vst [vmem:[#allocation226_spill] sm:$0xff] %v12053_v46 }
 0x7d7   : > { %v12045_v6 = vpop.permute.xlu0 %3994  ;;  %v12057_v60 = vpop.permute.xlu1 %3996 }
 0x7d8   : > { %16727 = vst [vmem:[#allocation222_spill] sm:$0xff] %v12045_v6  ;;  %16733 = vst [vmem:[#allocation228_spill] sm:$0xff] %v12057_v60 }
 0x7db   : > { %v12049_v8 = vpop.permute.xlu0 %3998  ;;  %v12071_v6 = vpop.permute.xlu1 %4000 }
 0x7dc   : > { %16729 = vst [vmem:[#allocation224_spill] sm:$0xff] %v12049_v8  ;;  %16735 = vst [vmem:[#allocation230_spill] sm:$0xff] %v12071_v6 }
 0x7df   : > { %v12051_v43 = vpop.permute.xlu0 %4002 }
 0x7e0   : > { %16730 = vst [vmem:[#allocation225_spill] sm:$0xff] %v12051_v43 }
 0x7e3   : > { %v12055_v25 = vpop.permute.xlu0 %4006 }
 0x7e4   : > { %16732 = vst [vmem:[#allocation227_spill] sm:$0xff] %v12055_v25 }
 0x7e7   : > { %v12059_v18 = vpop.permute.xlu0 %4010 }
 0x7e8   : > { %16734 = vst [vmem:[#allocation229_spill] sm:$0xff] %v12059_v18 }
 0x7eb   : > { %v12061_v3 = vpop.permute.xlu0 %4045 }
 0x7ec   : > { %v4049_v59 = vmul.f32 %v11368_v12, %v12061_v3  ;;  %v4051_v13 = vmul.f32 %v11373_v56, %v12061_v3  ;;  %v4048_v8 = vmul.f32 %v11714_v44, %v12061_v3  ;;  %v4050_v43 = vmul.f32 %v11719_v7, %v12061_v3 }
 0x7ed   : > { %v4053_v25 = vmul.f32 %v11384_v32, %v12061_v3  ;;  %v4055_v18 = vmul.f32 %v11391_v22, %v12061_v3  ;;  %v4052_v12 = vmul.f32 %v11732_v50, %v12061_v3  ;;  %v4054_v56 = vmul.f32 %v11737_v11, %v12061_v3 }
 0x7ee   : > { %v4155_v60 = vrot.slane %v4049_v59, 1  ;;  %v4156_v57 = vrot.slane %v4051_v13, 1  ;;  %v4152_v44 = vrot.slane %v4048_v8, 1  ;;  %v4153_v46 = vrot.slane %v4050_v43, 1  ;;  %v12095_v43 = vpop.permute.xlu1 %4004 }
 0x7ef   : > { %v4161_v39 = vrot.slane %v4053_v25, 1  ;;  %v4162_v7 = vrot.slane %v4055_v18, 1  ;;  %v4158_v5 = vrot.slane %v4052_v12, 1  ;;  %v4159_v6 = vrot.slane %v4054_v56, 1 }
 0x7f0   : > { %v4157_v36 = vsel %vm1823_vm2, %v4155_v60, %v4156_v57  ;;  %v4154_v32 = vsel %vm1823_vm2, %v4152_v44, %v4153_v46  ;;  %v4057_v22 = vmul.f32 %v11405_v16, %v12061_v3  ;;  %v4059_v50 = vmul.f32 %v11411_v41, %v12061_v3 }
 0x7f1   : > { %4202 = vrot.lane.b32.xlu1 %v4157_v36, %s16209_s26  ;;  %4200 = vrot.lane.b32.xlu0 %v4154_v32, %s16209_s26  ;;  %v4056_v11 = vmul.f32 %v11748_v63, %v12061_v3  ;;  %v4058_v57 = vmul.f32 %v11753_v29, %v12061_v3  ;;  %v4061_v8 = vmul.f32 %v11424_v58, %v12061_v3 }
 0x7f2   : > { %v4167_v13 = vrot.slane %v4057_v22, 1  ;;  %v4168_v59 = vrot.slane %v4059_v50, 1  ;;  %v4063_v16 = vmul.f32 %v11429_v14, %v12061_v3  ;;  %v4060_v41 = vmul.f32 %v11768_v9, %v12061_v3  ;;  %v12117_v56 = vpop.permute.xlu1 %4008 }
 0x7f3   : > { %v4062_v36 = vmul.f32 %v11773_v15, %v12061_v3  ;;  %v4163_v63 = vsel %vm1823_vm2, %v4161_v39, %v4162_v7  ;;  %v4160_v46 = vsel %vm1823_vm2, %v4158_v5, %v4159_v6  ;;  %v4164_v25 = vrot.slane %v4056_v11, 1 }
 0x7f4   : > { %v4165_v29 = vrot.slane %v4058_v57, 1  ;;  %v4169_v58 = vsel %vm1823_vm2, %v4167_v13, %v4168_v59  ;;  %v4173_v60 = vrot.slane %v4061_v8, 1  ;;  %v4174_v14 = vrot.slane %v4063_v16, 1 }
 0x7f5   : > { %4206 = vrot.lane.b32.xlu1 %v4163_v63, %s16209_s26  ;;  %4204 = vrot.lane.b32.xlu0 %v4160_v46, %s16209_s26  ;;  %v4170_v18 = vrot.slane %v4060_v41, 1  ;;  %v4171_v12 = vrot.slane %v4062_v36, 1  ;;  %v4065_v9 = vmul.f32 %v11442_v31, %v12061_v3  ;;  %v4067_v6 = vmul.f32 %v11449_v21, %v12061_v3 }
 0x7f6   : > { %v4166_v15 = vsel %vm1823_vm2, %v4164_v25, %v4165_v29  ;;  %v4064_v5 = vmul.f32 %v11787_v0, %v12061_v3  ;;  %v4066_v39 = vmul.f32 %v11792_v49, %v12061_v3  ;;  %v4069_v31 = vmul.f32 %v11466_v27, %v12061_v3  ;;  %v12135_v59 = vpop.permute.xlu1 %4012  ;;  %v8403_v29 = vld [vmem:[%s8754_s28 + $0x128] sm:$0xfe] }
 0x7f7   : > { %v4071_v44 = vmul.f32 %v11471_v1, %v12061_v3  ;;  %v4175_v21 = vsel %vm1823_vm2, %v4173_v60, %v4174_v14  ;;  %v4179_v7 = vrot.slane %v4065_v9, 1  ;;  %v4068_v0 = vmul.f32 %v11808_v47, %v12061_v3  ;;  %v8406_v9 = vld [vmem:[%s8754_s28 + $0x130] sm:$0x1] }
 0x7f8   : > { %v4070_v49 = vmul.f32 %v11813_v4, %v12061_v3  ;;  %v4172_v32 = vsel %vm1823_vm2, %v4170_v18, %v4171_v12  ;;  %v4180_v22 = vrot.slane %v4067_v6, 1  ;;  %v4176_v50 = vrot.slane %v4064_v5, 1  ;;  %v8405_v18 = vld [vmem:[%s8754_s28 + $0x120] sm:$0xfe] }
 0x7f9   : > { %4210 = vrot.lane.b32.xlu1 %v4169_v58, %s16209_s26  ;;  %4208 = vrot.lane.b32.xlu0 %v4166_v15, %s16209_s26  ;;  %v4177_v11 = vrot.slane %v4066_v39, 1  ;;  %v4185_v27 = vrot.slane %v4069_v31, 1  ;;  %v4186_v1 = vrot.slane %v4071_v44, 1  ;;  %v4073_v13 = vmul.f32 %v11824_v37, %v12061_v3 }
 0x7fa   : > { %v4182_v47 = vrot.slane %v4068_v0, 1  ;;  %v4183_v4 = vrot.slane %v4070_v49, 1  ;;  %v4075_v57 = vmul.f32 %v11829_v54, %v12061_v3  ;;  %v4181_v8 = vsel %vm1823_vm2, %v4179_v7, %v4180_v22  ;;  %v12149_v25 = vpop.permute.xlu1 %4085 }
 0x7fb   : > { %v4178_v16 = vsel %vm1823_vm2, %v4176_v50, %v4177_v11  ;;  %v4072_v41 = vmul.f32 %v11834_v30, %v12061_v3  ;;  %v4074_v37 = vmul.f32 %v11839_v38, %v12061_v3  ;;  %v4187_v36 = vsel %vm1823_vm2, %v4185_v27, %v4186_v1  ;;  %v8404_v30 = vld [vmem:[%s8754_s28 + $0x138] sm:$0x1]  ;;  %v16736_v27 = vld [vmem:[#allocation198_spill] sm:$0xff] }
 0x7fc   : > { %v4191_v63 = vrot.slane %v4073_v13, 1  ;;  %v4184_v54 = vsel %vm1823_vm2, %v4182_v47, %v4183_v4  ;;  %v4192_v46 = vrot.slane %v4075_v57, 1  ;;  %v4077_v58 = vmul.f32 %v8403_v29, %v12061_v3  ;;  %v16737_v4 = vld [vmem:[#allocation199_spill] sm:$0xff] }
 0x7fd   : > { %4214 = vrot.lane.b32.xlu1 %v4175_v21, %s16209_s26  ;;  %4212 = vrot.lane.b32.xlu0 %v4172_v32, %s16209_s26  ;;  %v4079_v60 = vmul.f32 %v8404_v30, %v12061_v3  ;;  %v4188_v38 = vrot.slane %v4072_v41, 1  ;;  %v4189_v14 = vrot.slane %v4074_v37, 1  ;;  %v4076_v12 = vmul.f32 %v8405_v18, %v12061_v3  ;;  %v7920_v18 = vld [vmem:[%s16167_s3 + $0x10] ss:$0 sm:$0xff] }
 0x7fe   : > { %v4078_v15 = vmul.f32 %v8406_v9, %v12061_v3  ;;  %v4089_v6 = vmul.f32 %v11520_v51, %v12149_v25  ;;  %v4091_v5 = vmul.f32 %v11525_v62, %v12149_v25  ;;  %v4088_v39 = vmul.f32 %v11864_v33, %v12149_v25  ;;  %v7922_v9 = vld [vmem:[%s16167_s3 + $0x19] ss:$0 sm:$0xff] }
 0x7ff   : > { %v4090_v31 = vmul.f32 %v11869_v2, %v12149_v25  ;;  %v4193_v44 = vsel %vm1823_vm2, %v4191_v63, %v4192_v46  ;;  %v4197_v21 = vrot.slane %v4077_v58, 1  ;;  %v4190_v3 = vsel %vm1823_vm2, %v4188_v38, %v4189_v14  ;;  %v7919_v14 = vld [vmem:[%s16169_s5 + $0x7] ss:$0 sm:$0xff] }
 0x800   : > { %v4198_v7 = vrot.slane %v4079_v60, 1  ;;  %v4194_v0 = vrot.slane %v4076_v12, 1  ;;  %v4195_v49 = vrot.slane %v4078_v15, 1  ;;  %v4291_v51 = vrot.slane %v4089_v6, 1  ;;  %v7921_v12 = vld [vmem:[%s16169_s5 + $0x10] ss:$0 sm:$0xff] }
 0x801   : > { %4218 = vrot.lane.b32.xlu1 %v4181_v8, %s16209_s26  ;;  %4216 = vrot.lane.b32.xlu0 %v4178_v16, %s16209_s26  ;;  %v4292_v62 = vrot.slane %v4091_v5, 1  ;;  %v4288_v32 = vrot.slane %v4088_v39, 1  ;;  %v4289_v22 = vrot.slane %v4090_v31, 1  ;;  %v4093_v50 = vmul.f32 %v11536_v19, %v12149_v25  ;;  %v7923_v15 = vld [vmem:[%s16169_s5 + $0x19] ss:$0 sm:$0xff] }
 0x802   : > { %v4095_v11 = vmul.f32 %v11541_v48, %v12149_v25  ;;  %v4092_v1 = vmul.f32 %v16736_v27, %v12149_v25  ;;  %v4199_v13 = vsel %vm1823_vm2, %v4197_v21, %v4198_v7  ;;  %v4196_v47 = vsel %vm1823_vm2, %v4194_v0, %v4195_v49  ;;  %v7924_v6 = vld [vmem:[%s16167_s3 + $0x8] ss:$0 sm:$0xff]  ;;  %v7926_v39 = vld [vmem:[%s16167_s3 + $0x11] ss:$0 sm:$0xff] }
 0x803   : > { %v4094_v57 = vmul.f32 %v16737_v4, %v12149_v25  ;;  %v4293_v8 = vsel %vm1823_vm2, %v4291_v51, %v4292_v62  ;;  %v4290_v19 = vsel %vm1823_vm2, %v4288_v32, %v4289_v22  ;;  %v4297_v16 = vrot.slane %v4093_v50, 1  ;;  %v7925_v5 = vld [vmem:[%s16169_s5 + $0x8] ss:$0 sm:$0xff]  ;;  %v7927_v31 = vld [vmem:[%s16169_s5 + $0x11] ss:$0 sm:$0xff]  ;;  %v8407_v51 = vld [vmem:[%s8754_s28] sm:$0xff] }
 0x804   : > { %v4298_v48 = vrot.slane %v4095_v11, 1  ;;  %v4294_v41 = vrot.slane %v4092_v1, 1  ;;  %v4097_v37 = vmul.f32 %v11556_v28, %v12149_v25  ;;  %v4099_v63 = vmul.f32 %v11561_v26, %v12149_v25  ;;  %v16740_v0 = vld [vmem:[#allocation201_spill] sm:$0xff]  ;;  %v8408_v62 = vld [vmem:[%s16167_s3] ss:$0 sm:$0xff] }
 0x805   : > { %4222 = vrot.lane.b32.xlu1 %v4187_v36, %s16209_s26  ;;  %4220 = vrot.lane.b32.xlu0 %v4184_v54, %s16209_s26  ;;  %v4295_v36 = vrot.slane %v4094_v57, 1  ;;  %v4096_v54 = vmul.f32 %v11898_v17, %v12149_v25  ;;  %v4098_v46 = vmul.f32 %v11905_v40, %v12149_v25  ;;  %v7918_v40 = vld [vmem:[%s16167_s3 + $0x7] ss:$0 sm:$0xff]  ;;  %v4103_v21 = vmul.f32 %v11577_v34, %v12149_v25  ;;  %v8410_v34 = vld [vmem:[%s16167_s3 + $0x9] ss:$0 sm:$0xff] }
 0x806   : > { %v4299_v29 = vsel %vm1823_vm2, %v4297_v16, %v4298_v48  ;;  %v4303_v58 = vrot.slane %v4097_v37, 1  ;;  %v4304_v28 = vrot.slane %v4099_v63, 1  ;;  %v4102_v49 = vmul.f32 %v16740_v0, %v12149_v25  ;;  %v8409_v32 = vld [vmem:[%s8754_s28 + $0x20] sm:$0xff]  ;;  %v7928_v50 = vld [vmem:[%s16167_s3 + $0x1a] ss:$0 sm:$0xff]  ;;  %v16742_v16 = vld [vmem:[#allocation165_spill] sm:$0xff] }
 0x807   : > { %v4296_v30 = vsel %vm1823_vm2, %v4294_v41, %v4295_v36  ;;  %v4300_v60 = vrot.slane %v4096_v54, 1  ;;  %v4301_v38 = vrot.slane %v4098_v46, 1  ;;  %v461_v22 = vmul.f32 %v8410_v34, %v8409_v32  ;;  %v7929_v11 = vld [vmem:[%s16169_s5 + $0x1a] ss:$0 sm:$0xff]  ;;  %v16741_v57 = vld [vmem:[#allocation164_spill] sm:$0xff]  ;;  %v16743_v41 = vld [vmem:[#allocation202_spill] sm:$0xff] }
 0x808   : > { %v4305_v26 = vsel %vm1823_vm2, %v4303_v58, %v4304_v28  ;;  %v4107_v48 = vmul.f32 %v16742_v16, %v12149_v25  ;;  %v4104_v37 = vmul.f32 %v16743_v41, %v12149_v25  ;;  %v4106_v36 = vmul.f32 %v11940_v35, %v12149_v25  ;;  %v8411_v63 = vld [vmem:[%s8854_s12] sm:$0xff]  ;;  %v8414_v58 = vld [vmem:[%s16167_s3 + $0x12] ss:$0 sm:$0xff] }
 0x809   : > { %4226 = vrot.lane.b32.xlu1 %v4193_v44, %s16209_s26  ;;  %4224 = vrot.lane.b32.xlu0 %v4190_v3, %s16209_s26  ;;  %v4302_v17 = vsel %vm1823_vm2, %v4300_v60, %v4301_v38  ;;  %v4101_v44 = vmul.f32 %v11572_v23, %v12149_v25  ;;  %v16739_v3 = vld [vmem:[#allocation200_spill] sm:$0xff]  ;;  %v435_v23 = vmul.f32 %v8408_v62, %v8407_v51 }
 0x80a   : > { %v4100_v7 = vmul.f32 %v16739_v3, %v12149_v25  ;;  %v8412_v54 = vld [vmem:[%s16169_s5] ss:$0 sm:$0xff]  ;;  %v436_v60 = vmul.f32 %v8409_v32, %v8408_v62  ;;  %v4109_v35 = vmul.f32 %v11610_v52, %v12149_v25  ;;  %v4111_v38 = vmul.f32 %v11615_v10, %v12149_v25  ;;  %v8416_v10 = vld [vmem:[%s16169_s5 + $0x9] ss:$0 sm:$0xff] }
 0x80b   : > { %v4309_v1 = vrot.slane %v4101_v44, 1  ;;  %v447_v46 = vmul.f32 %v8412_v54, %v8411_v63  ;;  %v481_v28 = vadd.f32 %v461_v22, %v435_v23  ;;  %v8418_v51 = vld [vmem:[%s8754_s28 + $0x60] sm:$0xff] }
 0x80c   : > { %v4322_v0 = vrot.slane %v4111_v38, 1  ;;  %v504_v62 = vmul.f32 %v8418_v51, %v8414_v58  ;;  %v8424_v38 = vld [vmem:[%s8854_s12 + $0x130] sm:$0x1]  ;;  %v16756_v51 = vld [vmem:[#allocation40_spill] sm:$0xff] }
 0x80d   : > { %4230 = vrot.lane.b32.xlu1 %v4199_v13, %s16209_s26  ;;  %4228 = vrot.lane.b32.xlu0 %v4196_v47, %s16209_s26  ;;  %v4310_v13 = vrot.slane %v4103_v21, 1  ;;  %v4306_v47 = vrot.slane %v4100_v7, 1  ;;  %v8417_v21 = vld [vmem:[%s8854_s12 + $0x40] sm:$0xff]  ;;  %v4321_v7 = vrot.slane %v4109_v35, 1 }
 0x80e   : > { %v474_v3 = vmul.f32 %v8417_v21, %v8416_v10 }
 0x811   : > { %4338 = vrot.lane.b32.xlu1 %v4293_v8, %s16209_s26  ;;  %4336 = vrot.lane.b32.xlu0 %v4290_v19, %s16209_s26  ;;  %v4105_v8 = vmul.f32 %v16741_v57, %v12149_v25  ;;  %v4307_v19 = vrot.slane %v4102_v49, 1  ;;  %v4113_v49 = vmul.f32 %v11968_v61, %v12149_v25  ;;  %v8419_v57 = vld [vmem:[%s16169_s5 + $0x12] ss:$0 sm:$0xff] }
 0x815   : > { %4342 = vrot.lane.b32.xlu1 %v4299_v29, %s16209_s26  ;;  %4340 = vrot.lane.b32.xlu0 %v4296_v30, %s16209_s26  ;;  %v8413_v29 = vld [vmem:[%s8754_s28 + $0x40] sm:$0xff] }
 0x816   : > { %v503_v30 = vmul.f32 %v8414_v58, %v8413_v29  ;;  %v462_v52 = vmul.f32 %v8413_v29, %v8410_v34  ;;  %v4115_v34 = vmul.f32 %v11973_v55, %v12149_v25 }
 0x818   : > { %v482_v61 = vadd.f32 %v462_v52, %v436_v60  ;;  %v8423_v60 = vld [vmem:[%s8854_s12 + $0x120] sm:$0xfe] }
 0x819   : > { %4346 = vrot.lane.b32.xlu1 %v4305_v26, %s16209_s26  ;;  %4344 = vrot.lane.b32.xlu0 %v4302_v17, %s16209_s26  ;;  %v4311_v26 = vsel %vm1823_vm2, %v4309_v1, %v4310_v13  ;;  %v4315_v17 = vrot.slane %v4105_v8, 1  ;;  %v4114_v13 = vmul.f32 %v11983_v20, %v12149_v25  ;;  %v515_v8 = vmul.f32 %v8419_v57, %v8417_v21 }
 0x81a   : > { %v4327_v20 = vrot.slane %v4113_v49, 1  ;;  %v4116_v35 = vmul.f32 %v8423_v60, %v12149_v25  ;;  %v16769_v60 = vld [vmem:[#allocation83_spill] sm:$0xff] }
 0x81b   : > { %v4325_v58 = vrot.slane %v4114_v13, 1 }
 0x81d   : > { %4942 = vrot.lane.b32.xlu1 %v7918_v40, %s16241_s27  ;;  %4982 = vrot.lane.b32.xlu0 %v7919_v14, %s16241_s27  ;;  %v16744_v40 = vld [vmem:[#allocation203_spill] sm:$0xff] }
 0x81e   : > { %v4108_v14 = vmul.f32 %v16744_v40, %v12149_v25  ;;  %v524_v40 = vadd.f32 %v504_v62, %v482_v61  ;;  %v16757_v62 = vld [vmem:[#allocation35_spill] sm:$0xff]  ;;  %v16760_v61 = vld [vmem:[#allocation57_spill] sm:$0xff] }
 0x820   : > { %v4318_v23 = vrot.slane %v4108_v14, 1  ;;  %v16748_v14 = vld [vmem:[#allocation19_spill] sm:$0xff] }
 0x821   : > { %5296 = vrot.lane.b32.xlu1 %v7920_v18, %s16241_s27  ;;  %5336 = vrot.lane.b32.xlu0 %v7921_v12, %s16241_s27  ;;  %v16745_v18 = vld [vmem:[#allocation204_spill] sm:$0xff] }
 0x822   : > { %v4110_v12 = vmul.f32 %v16745_v18, %v12149_v25  ;;  %v16749_v18 = vld [vmem:[#allocation18_spill] sm:$0xff] }
 0x824   : > { %v4319_v32 = vrot.slane %v4110_v12, 1  ;;  %v658_v12 = vsel %vm657_vm0, %v16749_v18, %v16748_v14 }
 0x825   : > { %5650 = vrot.lane.b32.xlu1 %v7922_v9, %s16241_s27  ;;  %5690 = vrot.lane.b32.xlu0 %v7923_v15, %s16241_s27  ;;  %v4308_v9 = vsel %vm1823_vm2, %v4306_v47, %v4307_v19  ;;  %v4316_v15 = vrot.slane %v4107_v48, 1  ;;  %v8420_v19 = vld [vmem:[%s8854_s12 + $0x60] sm:$0xff]  ;;  %v4323_v48 = vsel %vm1823_vm2, %v4321_v7, %v4322_v0  ;;  %v4330_v0 = vrot.slane %v4116_v35, 1  ;;  %s7964_s27 = sshll.u32 %s8746_s20, 6  ;;  %s7870_s20 = sshll.u32 %s15967_s0, 6 }
 0x826   : > { %v516_v16 = vmul.f32 %v8420_v19, %v8419_v57  ;;  %v4320_v41 = vsel %vm1823_vm2, %v4318_v23, %v4319_v32  ;;  %v852_v23 = vsel %vm657_vm0, %v16757_v62, %v16756_v51  ;;  %v16758_v32 = vld [vmem:[#allocation42_spill] sm:$0xff]  ;;  %s15964_s26 = scalar_lea.vmem %s17277_s2, %s7964_s27  ;;  %s15984_s1 = scalar_lea.vmem [#allocation4], %s7870_s20 }
 0x827   : > { %v4317_v22 = vsel %vm1823_vm2, %v4315_v17, %v4316_v15  ;;  %v523_v17 = vadd.f32 %v503_v30, %v481_v28  ;;  %v16751_v15 = vld [vmem:[#allocation17_spill] sm:$0xff]  ;;  %v16754_v30 = vld [vmem:[#allocation26_spill] sm:$0xff]  ;;  %s7719_s27 = scalar_lea.sflag [#allocation5], %s15967_s0 }
 0x828   : > { %v16755_v28 = vld [vmem:[#allocation22_spill] sm:$0xff] }
 0x829   : > { %6004 = vrot.lane.b32.xlu1 %v7924_v6, %s16738_s30  ;;  %6044 = vrot.lane.b32.xlu0 %v7925_v5, %s16738_s30  ;;  %v4312_v6 = vrot.slane %v4104_v37, 1  ;;  %v4313_v5 = vrot.slane %v4106_v36, 1  ;;  %v4328_v37 = vrot.slane %v4115_v34, 1  ;;  %v8421_v36 = vld [vmem:[%s8854_s12 + $0x128] sm:$0xfe] }
 0x82a   : > { %v4117_v63 = vmul.f32 %v8421_v36, %v12149_v25  ;;  %v16759_v34 = vld [vmem:[#allocation37_spill] sm:$0xff]  ;;  %v8427_v51 = vld [vmem:[%s8754_s28 + $0x10] sm:$0x1] }
 0x82c   : > { %v4333_v21 = vrot.slane %v4117_v63, 1 }
 0x82d   : > { %6358 = vrot.lane.b32.xlu1 %v7926_v39, %s16738_s30  ;;  %6398 = vrot.lane.b32.xlu0 %v7927_v31, %s16738_s30  ;;  %v8415_v39 = vld [vmem:[%s8854_s12 + $0x20] sm:$0xff] }
 0x82e   : > { %v473_v31 = vmul.f32 %v8416_v10, %v8415_v39  ;;  %v448_v44 = vmul.f32 %v8415_v39, %v8412_v54  ;;  %v8422_v54 = vld [vmem:[%s8854_s12 + $0x138] sm:$0x1]  ;;  %v16752_v39 = vld [vmem:[#allocation24_spill] sm:$0xff]  ;;  %v16753_v10 = vld [vmem:[#allocation21_spill] sm:$0xff] }
 0x830   : > { %v489_v47 = vadd.f32 %v473_v31, %v447_v46  ;;  %v490_v55 = vadd.f32 %v474_v3, %v448_v44  ;;  %v4119_v46 = vmul.f32 %v8422_v54, %v12149_v25  ;;  %v731_v31 = vsel %vm657_vm0, %v16755_v28, %v16754_v30  ;;  %v16778_v28 = vld [vmem:[#allocation118_spill] sm:$0xff] }
 0x831   : > { %6712 = vrot.lane.b32.xlu1 %v7928_v50, %s16738_s30  ;;  %6752 = vrot.lane.b32.xlu0 %v7929_v11, %s16738_s30  ;;  %v4314_v50 = vsel %vm1823_vm2, %v4312_v6, %v4313_v5  ;;  %v16747_v11 = vld [vmem:[#allocation205_spill] sm:$0xff]  ;;  %v4329_v44 = vsel %vm1823_vm2, %v4327_v20, %v4328_v37  ;;  %v16767_v37 = vld [vmem:[#allocation71_spill] sm:$0xff]  ;;  %s16007_s30 = scalar_lea.vmem [#allocation2], %s7870_s20 }
 0x832   : > { %v4112_v1 = vmul.f32 %v16747_v11, %v12149_v25  ;;  %v531_v5 = vadd.f32 %v515_v8, %v489_v47  ;;  %v532_v52 = vadd.f32 %v516_v16, %v490_v55  ;;  %v4334_v7 = vrot.slane %v4119_v46, 1  ;;  %v16761_v47 = vld [vmem:[#allocation51_spill] sm:$0xff]  ;;  %v16763_v55 = vld [vmem:[#allocation53_spill] sm:$0xff]  ;;  %v16764_v16 = vld [vmem:[#allocation70_spill] sm:$0xff] }
 0x833   : > { %v924_v57 = vsel %vm657_vm0, %v16761_v47, %v16760_v61  ;;  %v16762_v8 = vld [vmem:[#allocation59_spill] sm:$0xff] }
 0x834   : > { %v4324_v29 = vrot.slane %v4112_v1, 1  ;;  %v747_v13 = vadd.f32 %v731_v31, %v532_v52  ;;  %v925_v19 = vsel %vm657_vm0, %v16763_v55, %v16762_v8  ;;  %v4335_v46 = vsel %vm1823_vm2, %v4333_v21, %v4334_v7  ;;  %v16775_v52 = vld [vmem:[#allocation99_spill] sm:$0xff]  ;;  %v16779_v31 = vld [vmem:[#allocation113_spill] sm:$0xff]  ;;  %v8425_v7 = vld [vmem:[%s16167_s3 + $0x3] ss:$0 sm:$0xff] }
 0x835   : > { %4350 = vrot.lane.b32.xlu1 %v4311_v26, %s16746_s11  ;;  %4348 = vrot.lane.b32.xlu0 %v4308_v9, %s16746_s11  ;;  %v4118_v26 = vmul.f32 %v8424_v38, %v12149_v25  ;;  %v16750_v9 = vld [vmem:[#allocation20_spill] sm:$0xff]  ;;  %v730_v25 = vsel %vm657_vm0, %v16753_v10, %v16752_v39  ;;  %v16770_v38 = vld [vmem:[#allocation90_spill] sm:$0xff]  ;;  %v16776_v10 = vld [vmem:[#allocation117_spill] sm:$0xff]  ;;  %v1772_v62 = vmul.f32 %v8427_v51, %v8425_v7 }
 0x836   : > { %v659_v6 = vsel %vm657_vm0, %v16751_v15, %v16750_v9  ;;  %v4326_v3 = vsel %vm1823_vm2, %v4324_v29, %v4325_v58  ;;  %v746_v1 = vadd.f32 %v730_v25, %v531_v5  ;;  %v16768_v58 = vld [vmem:[#allocation89_spill] sm:$0xff]  ;;  %v941_v14 = vadd.f32 %v925_v19, %v747_v13  ;;  %v16772_v9 = vld [vmem:[#allocation98_spill] sm:$0xff]  ;;  %v16774_v5 = vld [vmem:[#allocation100_spill] sm:$0xff] }
 0x837   : > { %v4331_v49 = vrot.slane %v4118_v26, 1  ;;  %v675_v11 = vadd.f32 %v659_v6, %v524_v40  ;;  %v1118_v35 = vsel %vm657_vm0, %v16769_v60, %v16768_v58  ;;  %v16771_v26 = vld [vmem:[#allocation85_spill] sm:$0xff]  ;;  %v1242_v39 = vsel %vm1240_vm1, %v16775_v52, %v16774_v5  ;;  %v16777_v25 = vld [vmem:[#allocation111_spill] sm:$0xff]  ;;  %v16780_v8 = vld [vmem:[#allocation122_spill] sm:$0xff] }
 0x838   : > { %v940_v40 = vadd.f32 %v924_v57, %v746_v1  ;;  %v16773_v15 = vld [vmem:[#allocation97_spill] sm:$0xff]  ;;  %v1313_v30 = vsel %vm1240_vm1, %v16777_v25, %v16776_v10  ;;  %v1825_v58 = vrot.slane %v1772_v62, 1  ;;  %v8431_v60 = vld [vmem:[%s16169_s5 + $0x3] ss:$0 sm:$0xff]  ;;  %v8436_v52 = vld [vmem:[%s8754_s28 + $0x50] sm:$0x1] }
 0x839   : > { %4354 = vrot.lane.b32.xlu1 %v4317_v22, %s16746_s11  ;;  %4352 = vrot.lane.b32.xlu0 %v4314_v50, %s16746_s11  ;;  %v853_v22 = vsel %vm657_vm0, %v16759_v34, %v16758_v32  ;;  %v674_v50 = vadd.f32 %v658_v12, %v523_v17  ;;  %v4332_v29 = vsel %vm1823_vm2, %v4330_v0, %v4331_v49  ;;  %v8426_v0 = vld [vmem:[%s8754_s28] sm:$0xfe]  ;;  %v8429_v34 = vld [vmem:[%s8754_s28 + $0x30] sm:$0x1]  ;;  %v16781_v55 = vld [vmem:[#allocation121_spill] sm:$0xff] }
 0x83a   : > { %v869_v54 = vadd.f32 %v853_v22, %v675_v11  ;;  %v1119_v17 = vsel %vm657_vm0, %v16771_v26, %v16770_v38  ;;  %v1241_v6 = vsel %vm1240_vm1, %v16773_v15, %v16772_v9  ;;  %v1134_v21 = vadd.f32 %v1118_v35, %v940_v40  ;;  %v8432_v35 = vld [vmem:[%s8854_s12] sm:$0xfe]  ;;  %v8433_v26 = vld [vmem:[%s8854_s12 + $0x10] sm:$0x1] }
 0x83b   : > { %v868_v63 = vadd.f32 %v852_v23, %v674_v50  ;;  %v1771_v49 = vmul.f32 %v8426_v0, %v8425_v7  ;;  %v8428_v23 = vld [vmem:[%s8754_s28 + $0x20] sm:$0xfe]  ;;  %v1774_v22 = vmul.f32 %v8429_v34, %v8425_v7  ;;  %v8430_v50 = vld [vmem:[%s16167_s3 + $0xc] ss:$0 sm:$0xff]  ;;  %v1435_v19 = vsel %vm1240_vm1, %v16781_v55, %v16780_v8  ;;  %v8438_v51 = vld [vmem:[%s8854_s12 + $0x30] sm:$0x1] }
 0x83c   : > { %v1773_v32 = vmul.f32 %v8428_v23, %v8425_v7  ;;  %v1926_v11 = vmul.f32 %v8430_v50, %v8428_v23  ;;  %v1927_v1 = vmul.f32 %v8430_v50, %v8429_v34  ;;  %v1329_v47 = vadd.f32 %v1313_v30, %v1134_v21  ;;  %v8434_v15 = vld [vmem:[%s8754_s28 + $0x40] sm:$0xfe] }
 0x83d   : > { %4358 = vrot.lane.b32.xlu1 %v4323_v48, %s16746_s11  ;;  %4356 = vrot.lane.b32.xlu0 %v4320_v41, %s16746_s11  ;;  %v16765_v48 = vld [vmem:[#allocation69_spill] sm:$0xff]  ;;  %v16766_v41 = vld [vmem:[#allocation72_spill] sm:$0xff]  ;;  %v1791_v38 = vmul.f32 %v8432_v35, %v8431_v60  ;;  %v1794_v62 = vmul.f32 %v8438_v51, %v8431_v60 }
 0x83e   : > { %v1046_v20 = vsel %vm657_vm0, %v16765_v48, %v16764_v16  ;;  %v1047_v36 = vsel %vm657_vm0, %v16767_v37, %v16766_v41  ;;  %v16782_v16 = vld [vmem:[#allocation124_spill] sm:$0xff]  ;;  %v16783_v48 = vld [vmem:[#allocation123_spill] sm:$0xff]  ;;  %v16785_v37 = vld [vmem:[#allocation125_spill] sm:$0xff]  ;;  %v1827_v40 = vrot.slane %v1773_v32, 1 }
 0x83f   : > { %v1062_v18 = vadd.f32 %v1046_v20, %v868_v63  ;;  %v1063_v12 = vadd.f32 %v1047_v36, %v869_v54  ;;  %v1436_v20 = vsel %vm1240_vm1, %v16783_v48, %v16782_v16  ;;  %v16784_v41 = vld [vmem:[#allocation128_spill] sm:$0xff]  ;;  %v16786_v63 = vld [vmem:[#allocation130_spill] sm:$0xff] }
 0x840   : > { %v1507_v36 = vsel %vm1240_vm1, %v16785_v37, %v16784_v41  ;;  %v16787_v54 = vld [vmem:[#allocation126_spill] sm:$0xff]  ;;  %v8437_v0 = vld [vmem:[%s8854_s12 + $0x20] sm:$0xfe] }
 0x841   : > { %4362 = vrot.lane.b32.xlu1 %v4329_v44, %s16746_s11  ;;  %4360 = vrot.lane.b32.xlu0 %v4326_v3, %s16746_s11  ;;  %v1314_v44 = vsel %vm1240_vm1, %v16779_v31, %v16778_v28  ;;  %v1135_v3 = vadd.f32 %v1119_v17, %v941_v14  ;;  %v1257_v13 = vadd.f32 %v1241_v6, %v1062_v18  ;;  %v1828_v14 = vrot.slane %v1774_v22, 1  ;;  %v8435_v6 = vld [vmem:[%s16167_s3 + $0x15] ss:$0 sm:$0xff]  ;;  %v16788_v32 = vld [vmem:[#allocation28_spill] sm:$0xff] }
 0x842   : > { %v1258_v61 = vadd.f32 %v1242_v39, %v1063_v12  ;;  %v1792_v17 = vmul.f32 %v8433_v26, %v8431_v60  ;;  %v1978_v18 = vrot.slane %v1926_v11, 1  ;;  %v1979_v12 = vrot.slane %v1927_v1, 1  ;;  %v16789_v34 = vld [vmem:[#allocation8_spill] sm:$0xff]  ;;  %v16790_v11 = vld [vmem:[#allocation30_spill] sm:$0xff]  ;;  %v16791_v1 = vld [vmem:[#allocation23_spill] sm:$0xff] }
 0x843   : > { %v1330_v57 = vadd.f32 %v1314_v44, %v1135_v3  ;;  %v1451_v9 = vadd.f32 %v1435_v19, %v1257_v13  ;;  %v12418_v5 = vmul.f32 %v8435_v6, %v8434_v15  ;;  %v12421_v39 = vmul.f32 %v8436_v52, %v8435_v6  ;;  %v8439_v19 = vld [vmem:[%s16169_s5 + $0xc] ss:$0 sm:$0xff]  ;;  %v8440_v37 = vld [vmem:[%s8754_s28 + $0x60] sm:$0xfe]  ;;  %v16795_v26 = vld [vmem:[#allocation38_spill] sm:$0xff] }
 0x844   : > { %v1452_v10 = vadd.f32 %v1436_v20, %v1258_v61  ;;  %v1523_v25 = vadd.f32 %v1507_v36, %v1329_v47  ;;  %v1928_v28 = vmul.f32 %v8434_v15, %v8430_v50  ;;  %v1880_v44 = vrot.slane %v1791_v38, 1  ;;  %v16792_v47 = vld [vmem:[#allocation36_spill] sm:$0xff]  ;;  %v16794_v38 = vld [vmem:[#allocation33_spill] sm:$0xff]  ;;  %v8442_v15 = vld [vmem:[%s16169_s5 + $0x15] ss:$0 sm:$0xff] }
 0x845   : > { %4366 = vrot.lane.b32.xlu1 %v4335_v46, %s16746_s11  ;;  %4364 = vrot.lane.b32.xlu0 %v4332_v29, %s16746_s11  ;;  %v1508_v46 = vsel %vm1240_vm1, %v16787_v54, %v16786_v63  ;;  %v1824_v29 = vrot.slane %v1771_v49, 1  ;;  %v1881_v21 = vrot.slane %v1792_v17, 1  ;;  %v1929_v3 = vmul.f32 %v8436_v52, %v8430_v50  ;;  %v8441_v63 = vld [vmem:[%s8754_s28 + $0x70] sm:$0x1] }
 0x846   : > { %v1524_v30 = vadd.f32 %v1508_v46, %v1330_v57  ;;  %v1829_v7 = vsel %vm1823_vm2, %v1827_v40, %v1828_v14  ;;  %v1793_v49 = vmul.f32 %v8437_v0, %v8431_v60  ;;  %v1980_v23 = vsel %vm1823_vm2, %v1978_v18, %v1979_v12  ;;  %v16793_v57 = vld [vmem:[#allocation29_spill] sm:$0xff] }
 0x847   : > { %v1826_v31 = vsel %vm1823_vm2, %v1824_v29, %v1825_v58  ;;  %v1629_v22 = vsel %vm1240_vm1, %v16789_v34, %v16788_v32  ;;  %v1630_v13 = vsel %vm1240_vm1, %v16791_v1, %v16790_v11  ;;  %v2132_v50 = vrot.slane %v12418_v5, 1 }
 0x848   : > { %v2133_v61 = vrot.slane %v12421_v39, 1  ;;  %v1701_v8 = vsel %vm1240_vm1, %v16793_v57, %v16792_v47  ;;  %v1981_v55 = vrot.slane %v1928_v28, 1  ;;  %v1946_v16 = vmul.f32 %v8439_v19, %v8437_v0  ;;  %v16798_v57 = vld [vmem:[#allocation54_spill] sm:$0xff] }
 0x849   : > { %v1947_v48 = vmul.f32 %v8439_v19, %v8438_v51  ;;  %v1882_v20 = vsel %vm1823_vm2, %v1880_v44, %v1881_v21  ;;  %v1982_v41 = vrot.slane %v1929_v3, 1  ;;  %v2082_v36 = vmul.f32 %v8440_v37, %v8435_v6 }
 0x84a   : > { %v2083_v54 = vmul.f32 %v8441_v63, %v8435_v6  ;;  %v1645_v46 = vadd.f32 %v1629_v22, %v1451_v9  ;;  %v1646_v29 = vadd.f32 %v1630_v13, %v1452_v10  ;;  %v1883_v58 = vrot.slane %v1793_v49, 1  ;;  %v16804_v63 = vld [vmem:[#allocation25_spill] sm:$0xff] }
 0x84b   : > { %v1884_v60 = vrot.slane %v1794_v62, 1  ;;  %v1717_v35 = vadd.f32 %v1701_v8, %v1523_v25  ;;  %v1702_v17 = vsel %vm1240_vm1, %v16795_v26, %v16794_v38  ;;  %v1948_v40 = vmul.f32 %v8439_v19, %v11864_v33  ;;  %v16799_v8 = vld [vmem:[#allocation47_spill] sm:$0xff] }
 0x84c   : > { %v1949_v14 = vmul.f32 %v8439_v19, %v11869_v2  ;;  %v2034_v18 = vrot.slane %v1946_v16, 1  ;;  %v2035_v12 = vrot.slane %v1947_v48, 1  ;;  %v2100_v9 = vmul.f32 %v8442_v15, %v11864_v33  ;;  %v16800_v16 = vld [vmem:[#allocation62_spill] sm:$0xff]  ;;  %v16801_v48 = vld [vmem:[#allocation49_spill] sm:$0xff]  ;;  %v16807_v38 = vld [vmem:[#allocation107_spill] sm:$0xff] }
 0x84d   : > { %v2101_v6 = vmul.f32 %v8442_v15, %v11869_v2  ;;  %v1983_v5 = vsel %vm1823_vm2, %v1981_v55, %v1982_v41  ;;  %v2135_v52 = vrot.slane %v2082_v36, 1  ;;  %v2102_v39 = vmul.f32 %v8442_v15, %v16736_v27 }
 0x84e   : > { %v2103_v10 = vmul.f32 %v8442_v15, %v16737_v4  ;;  %v1856_v25 = vadd.f32 %v1826_v31, %v1645_v46  ;;  %v1857_v28 = vadd.f32 %v1829_v7, %v1646_v29  ;;  %v1718_v44 = vadd.f32 %v1702_v17, %v1524_v30  ;;  %v16796_v30 = vld [vmem:[#allocation52_spill] sm:$0xff]  ;;  %v16808_v17 = vld [vmem:[#allocation43_spill] sm:$0xff] }
 0x84f   : > { %v2136_v21 = vrot.slane %v2083_v54, 1  ;;  %v1912_v3 = vadd.f32 %v1882_v20, %v1717_v35  ;;  %v1885_v0 = vsel %vm1823_vm2, %v1883_v58, %v1884_v60  ;;  %v2037_v49 = vrot.slane %v1948_v40, 1  ;;  %v16797_v7 = vld [vmem:[#allocation16_spill] sm:$0xff]  ;;  %v16806_v35 = vld [vmem:[#allocation105_spill] sm:$0xff] }
 0x850   : > { %v2038_v51 = vrot.slane %v1949_v14, 1  ;;  %v2036_v33 = vsel %vm1823_vm2, %v2034_v18, %v2035_v12  ;;  %v2188_v62 = vrot.slane %v2100_v9, 1  ;;  %v2189_v2 = vrot.slane %v2101_v6, 1  ;;  %v16803_v20 = vld [vmem:[#allocation104_spill] sm:$0xff]  ;;  %v16810_v18 = vld [vmem:[#allocation27_spill] sm:$0xff] }
 0x851   : > { %v2191_v32 = vrot.slane %v2102_v39, 1  ;;  %v2192_v34 = vrot.slane %v2103_v10, 1  ;;  %v1913_v22 = vadd.f32 %v1885_v0, %v1718_v44  ;;  %v2134_v27 = vsel %vm1823_vm2, %v2132_v50, %v2133_v61  ;;  %v16802_v61 = vld [vmem:[#allocation103_spill] sm:$0xff]  ;;  %v16805_v29 = vld [vmem:[#allocation32_spill] sm:$0xff]  ;;  %v16814_v39 = vld [vmem:[#allocation109_spill] sm:$0xff] }
 0x852   : > { %v2010_v11 = vadd.f32 %v1980_v23, %v1856_v25  ;;  %v2011_v4 = vadd.f32 %v1983_v5, %v1857_v28  ;;  %v2137_v31 = vsel %vm1823_vm2, %v2135_v52, %v2136_v21  ;;  %v2464_v1 = vsel %vm657_vm0, %v16797_v7, %v16796_v30  ;;  %v16809_v40 = vld [vmem:[#allocation48_spill] sm:$0xff]  ;;  %v16812_v9 = vld [vmem:[#allocation55_spill] sm:$0xff]  ;;  %v16813_v52 = vld [vmem:[#allocation106_spill] sm:$0xff] }
 0x853   : > { %v2066_v13 = vadd.f32 %v2036_v33, %v1912_v3  ;;  %v2039_v47 = vsel %vm1823_vm2, %v2037_v49, %v2038_v51  ;;  %v2465_v55 = vsel %vm657_vm0, %v16799_v8, %v16798_v57  ;;  %v2190_v19 = vsel %vm1823_vm2, %v2188_v62, %v2189_v2  ;;  %v16811_v15 = vld [vmem:[#allocation64_spill] sm:$0xff]  ;;  %v12511_v3 = vld [vmem:[%s8754_s28 + $0x50] sm:$0x3]  ;;  %v16818_v49 = vld [vmem:[#allocation91_spill] sm:$0xff] }
 0x854   : > { %v2466_v23 = vsel %vm657_vm0, %v16801_v48, %v16800_v16  ;;  %v2193_v50 = vsel %vm1823_vm2, %v2191_v32, %v2192_v34  ;;  %v2818_v41 = vsel %vm657_vm0, %v16803_v20, %v16802_v61  ;;  %v12477_v37 = vadd.f32 %v2134_v27, %v2010_v11  ;;  %v12503_v28 = vld [vmem:[%s16167_s3 + $0x6] ss:$0 sm:$0xff]  ;;  %v16817_v0 = vld [vmem:[#allocation50_spill] sm:$0xff]  ;;  %v16819_v33 = vld [vmem:[#allocation171_spill] sm:$0xff] }
 0x855   : > { %v12479_v36 = vadd.f32 %v2137_v31, %v2011_v4  ;;  %v2480_v54 = vadd.f32 %v2464_v1, %v16804_v63  ;;  %v2067_v46 = vadd.f32 %v2039_v47, %v1913_v22  ;;  %v2481_v58 = vadd.f32 %v2465_v55, %v16805_v29  ;;  %v12508_v21 = vld [vmem:[%s8754_s28 + $0x40] sm:$0xfc]  ;;  %v16820_v62 = vld [vmem:[#allocation170_spill] sm:$0xff]  ;;  %v16821_v22 = vld [vmem:[#allocation13_spill] sm:$0xff] }
 0x856   : > { %v12483_v60 = vadd.f32 %v2190_v19, %v2066_v13  ;;  %v2819_v26 = vsel %vm657_vm0, %v16807_v38, %v16806_v35  ;;  %v3172_v14 = vsel %vm657_vm0, %v16809_v40, %v16808_v17  ;;  %v2482_v12 = vadd.f32 %v2466_v23, %v16810_v18  ;;  %v16822_v27 = vld [vmem:[#allocation45_spill] sm:$0xff]  ;;  %v16823_v7 = vld [vmem:[#allocation34_spill] sm:$0xff]  ;;  %v16824_v47 = vld [vmem:[#allocation108_spill] sm:$0xff] }
 0x857   : > { %v2467_v6 = vsel %vm657_vm0, %v16812_v9, %v16811_v15  ;;  %v2834_v5 = vadd.f32 %v2818_v41, %v2480_v54  ;;  %v2820_v10 = vsel %vm657_vm0, %v16814_v39, %v16813_v52  ;;  %v3173_v51 = vsel %vm657_vm0, %v16818_v49, %v16817_v0  ;;  %v16825_v57 = vld [vmem:[#allocation112_spill] sm:$0xff]  ;;  %v16827_v19 = vld [vmem:[#allocation95_spill] sm:$0xff]  ;;  %v16828_v61 = vld [vmem:[#allocation173_spill] sm:$0xff] }
 0x858   : > { %v3526_v2 = vsel %vm1240_vm1, %v16820_v62, %v16819_v33  ;;  %v4442_v32 = vmul.f32 %v12503_v28, %v12508_v21  ;;  %v4443_v34 = vmul.f32 %v12503_v28, %v12511_v3  ;;  %v2462_v11 = vsel %vm657_vm0, %v16822_v27, %v16821_v22  ;;  %v16826_v55 = vld [vmem:[#allocation92_spill] sm:$0xff]  ;;  %v12549_v29 = vld [vmem:[%s8754_s28 + $0x70] sm:$0x3]  ;;  %v16832_v17 = vld [vmem:[#allocation15_spill] sm:$0xff] }
 0x859   : > { %v12526_v4 = vadd.f32 %v2193_v50, %v2067_v46  ;;  %v2835_v31 = vadd.f32 %v2819_v26, %v2481_v58  ;;  %v3188_v30 = vadd.f32 %v3172_v14, %v2834_v5  ;;  %v2483_v1 = vadd.f32 %v2467_v6, %v16823_v7  ;;  %v16829_v20 = vld [vmem:[#allocation172_spill] sm:$0xff]  ;;  %v16834_v40 = vld [vmem:[#allocation58_spill] sm:$0xff]  ;;  %v16836_v9 = vld [vmem:[#allocation143_spill] sm:$0xff] }
 0x85a   : > { %v2836_v13 = vadd.f32 %v2820_v10, %v2482_v12  ;;  %v2821_v8 = vsel %vm657_vm0, %v16825_v57, %v16824_v47  ;;  %v3174_v16 = vsel %vm657_vm0, %v16827_v19, %v16826_v55  ;;  %v3527_v50 = vsel %vm1240_vm1, %v16829_v20, %v16828_v61  ;;  %v12546_v46 = vld [vmem:[%s8754_s28 + $0x60] sm:$0xfc]  ;;  %v16837_v6 = vld [vmem:[#allocation142_spill] sm:$0xff]  ;;  %v16838_v39 = vld [vmem:[#allocation175_spill] sm:$0xff] }
 0x85b   : > { %v3189_v48 = vadd.f32 %v3173_v51, %v2835_v31  ;;  %v3542_v23 = vadd.f32 %v3526_v2, %v3188_v30  ;;  %v3880_v41 = vsel %vm1240_vm1, %v12013_v45, %v12015_v53  ;;  %v4497_v58 = vrot.slane %v4442_v32, 2  ;;  %v16833_v45 = vld [vmem:[#allocation14_spill] sm:$0xff]  ;;  %v16835_v14 = vld [vmem:[#allocation56_spill] sm:$0xff]  ;;  %v16843_v57 = vld [vmem:[#allocation115_spill] sm:$0xff] }
 0x85c   : > { %v4498_v35 = vrot.slane %v4443_v34, 2  ;;  %v4444_v38 = vmul.f32 %v12503_v28, %v12546_v46  ;;  %v4445_v26 = vmul.f32 %v12503_v28, %v12549_v29  ;;  %v2463_v53 = vsel %vm657_vm0, %v16833_v45, %v16832_v17  ;;  %v16839_v10 = vld [vmem:[#allocation174_spill] sm:$0xff]  ;;  %v12568_v51 = vld [vmem:[%s8754_s28 + $0x80] sm:$0xfc] }
 0x85d   : > { %v2468_v18 = vsel %vm657_vm0, %v16835_v14, %v16834_v40  ;;  %v2837_v12 = vadd.f32 %v2821_v8, %v2483_v1  ;;  %v3190_v15 = vadd.f32 %v3174_v16, %v2836_v13  ;;  %v3175_v5 = vsel %vm657_vm0, %v16837_v6, %v16836_v9  ;;  %v12571_v33 = vld [vmem:[%s8754_s28 + $0x90] sm:$0x3]  ;;  %v16840_v1 = vld [vmem:[#allocation31_spill] sm:$0xff]  ;;  %v16846_v61 = vld [vmem:[#allocation176_spill] sm:$0xff] }
 0x85e   : > { %v3543_v52 = vadd.f32 %v3527_v50, %v3189_v48  ;;  %v3528_v0 = vsel %vm1240_vm1, %v16839_v10, %v16838_v39  ;;  %v3896_v49 = vadd.f32 %v3880_v41, %v3542_v23  ;;  %v3881_v62 = vsel %vm1240_vm1, %v12017_v42, %v12019_v24  ;;  %v16841_v42 = vld [vmem:[#allocation60_spill] sm:$0xff]  ;;  %v16842_v24 = vld [vmem:[#allocation65_spill] sm:$0xff]  ;;  %v16844_v8 = vld [vmem:[#allocation114_spill] sm:$0xff] }
 0x85f   : > { %v4446_v34 = vmul.f32 %v12503_v28, %v12568_v51  ;;  %v4447_v22 = vmul.f32 %v12503_v28, %v12571_v33  ;;  %v4499_v27 = vsel %vm4490_vm3, %v4497_v58, %v4498_v35  ;;  %v4500_v30 = vrot.slane %v4444_v38, 2  ;;  %v16845_v23 = vld [vmem:[#allocation177_spill] sm:$0xff]  ;;  %v4402_v41 = vld [vmem:[%s8754_s28 + $0xa0] sm:$0xfc]  ;;  %v16847_v58 = vld [vmem:[#allocation211_spill] sm:$0xff] }
 0x860   : > { %v4501_v7 = vrot.slane %v4445_v26, 2  ;;  %v2484_v13 = vadd.f32 %v2468_v18, %v16840_v1  ;;  %v2469_v47 = vsel %vm657_vm0, %v16842_v24, %v16841_v42  ;;  %v2822_v55 = vsel %vm657_vm0, %v16844_v8, %v16843_v57  ;;  %v16848_v35 = vld [vmem:[#allocation210_spill] sm:$0xff]  ;;  %v16850_v39 = vld [vmem:[#allocation9_spill] sm:$0xff]  ;;  %v16856_v8 = vld [vmem:[#allocation68_spill] sm:$0xff] }
 0x861   : > { %v3191_v16 = vadd.f32 %v3175_v5, %v2837_v12  ;;  %v3544_v48 = vadd.f32 %v3528_v0, %v3190_v15  ;;  %v3529_v20 = vsel %vm1240_vm1, %v16846_v61, %v16845_v23  ;;  %v3897_v50 = vadd.f32 %v3881_v62, %v3543_v52  ;;  %v4403_v14 = vld [vmem:[%s8754_s28 + $0xb0] sm:$0x3]  ;;  %v16860_v61 = vld [vmem:[#allocation119_spill] sm:$0xff] }
 0x862   : > { %v3882_v38 = vsel %vm1240_vm1, %v16848_v35, %v16847_v58  ;;  %v4503_v40 = vrot.slane %v4446_v34, 2  ;;  %v4448_v18 = vmul.f32 %v12503_v28, %v4402_v41  ;;  %v4502_v12 = vsel %vm4490_vm3, %v4500_v30, %v4501_v7  ;;  %v16851_v62 = vld [vmem:[#allocation146_spill] sm:$0xff]  ;;  %v16854_v30 = vld [vmem:[#allocation212_spill] sm:$0xff] }
 0x863   : > { %v12498_v25 = vpop.permute.xlu0 %4200  ;;  %v12505_v44 = vpop.permute.xlu1 %4202  ;;  %v4504_v9 = vrot.slane %v4447_v22, 2  ;;  %v4449_v6 = vmul.f32 %v12503_v28, %v4403_v14  ;;  %v12604_v5 = vadd.f32 %v2462_v11, %v12477_v37  ;;  %v12607_v52 = vadd.f32 %v2463_v53, %v12479_v36  ;;  %v4404_v22 = vld [vmem:[%s8754_s28 + $0xc0] sm:$0xfc]  ;;  %v4405_v1 = vld [vmem:[%s8754_s28 + $0xd0] sm:$0x3] }
 0x864   : > { %16815 = vst [vmem:[#allocation198_spill] sm:$0xff] %v12498_v25  ;;  %16816 = vst [vmem:[#allocation199_spill] sm:$0xff] %v12505_v44  ;;  %v2485_v10 = vadd.f32 %v2469_v47, %v16850_v39  ;;  %v3545_v34 = vadd.f32 %v3529_v20, %v3191_v16  ;;  %v4506_v53 = vrot.slane %v4448_v18, 2  ;;  %v4451_v57 = vmul.f32 %v12503_v28, %v4405_v1  ;;  %v16858_v16 = vld [vmem:[#allocation74_spill] sm:$0xff]  ;;  %v16862_v35 = vld [vmem:[#allocation148_spill] sm:$0xff] }
 0x865   : > { %v4505_v42 = vsel %vm4490_vm3, %v4503_v40, %v4504_v9  ;;  %v4507_v47 = vrot.slane %v4449_v6, 2  ;;  %v16861_v20 = vld [vmem:[#allocation110_spill] sm:$0xff] }
 0x866   : > { %v16865_v40 = vld [vmem:[#allocation178_spill] sm:$0xff] }
 0x867   : > { %v12541_v63 = vpop.permute.xlu0 %4204  ;;  %v12543_v54 = vpop.permute.xlu1 %4206  ;;  %v16867_v9 = vld [vmem:[#allocation214_spill] sm:$0xff] }
 0x868   : > { %16830 = vst [vmem:[#allocation200_spill] sm:$0xff] %v12541_v63  ;;  %16831 = vst [vmem:[#allocation201_spill] sm:$0xff] %v12543_v54 }
 0x86b   : > { %v4209_v2 = vpop.permute.xlu0 %4208  ;;  %v4211_v32 = vpop.permute.xlu1 %4210 }
 0x86c   : > { %v4234_v31 = vsel %vm1240_vm1, %v4209_v2, %v4211_v32  ;;  %v16852_v2 = vld [vmem:[#allocation144_spill] sm:$0xff] }
 0x86d   : > { %v4250_v19 = vadd.f32 %v4234_v31, %v3896_v49  ;;  %v2838_v49 = vadd.f32 %v2822_v55, %v2484_v13  ;;  %v3176_v32 = vsel %vm657_vm0, %v16852_v2, %v16851_v62  ;;  %v16853_v31 = vld [vmem:[#allocation213_spill] sm:$0xff]  ;;  %v4450_v13 = vmul.f32 %v12503_v28, %v4404_v22  ;;  %v16857_v55 = vld [vmem:[#allocation66_spill] sm:$0xff] }
 0x86e   : > { %v3883_v7 = vsel %vm1240_vm1, %v16854_v30, %v16853_v31  ;;  %v4510_v31 = vrot.slane %v4451_v57, 2  ;;  %v16874_v57 = vld [vmem:[#allocation179_spill] sm:$0xff] }
 0x86f   : > { %v12596_v26 = vadd.f32 %v4499_v27, %v4250_v19  ;;  %v4213_v17 = vpop.permute.xlu0 %4212  ;;  %v4215_v45 = vpop.permute.xlu1 %4214  ;;  %v3898_v27 = vadd.f32 %v3882_v38, %v3544_v48  ;;  %v2598_v19 = vsel %vm657_vm0, %v16857_v55, %v16856_v8  ;;  %v16859_v48 = vld [vmem:[#allocation67_spill] sm:$0xff]  ;;  %v3192_v58 = vadd.f32 %v3176_v32, %v2838_v49  ;;  %v16863_v38 = vld [vmem:[#allocation145_spill] sm:$0xff]  ;;  %v4407_v49 = vld [vmem:[%s8754_s28 + $0xf0] sm:$0x3] }
 0x870   : > { %v4235_v15 = vsel %vm1240_vm1, %v4213_v17, %v4215_v45  ;;  %v2599_v23 = vsel %vm657_vm0, %v16859_v48, %v16858_v16  ;;  %v3177_v17 = vsel %vm657_vm0, %v16863_v38, %v16862_v35  ;;  %v16864_v45 = vld [vmem:[#allocation180_spill] sm:$0xff]  ;;  %v3899_v18 = vadd.f32 %v3883_v7, %v3545_v34  ;;  %v16871_v8 = vld [vmem:[#allocation77_spill] sm:$0xff]  ;;  %v16872_v55 = vld [vmem:[#allocation63_spill] sm:$0xff] }
 0x871   : > { %16849 = vst [vmem:[#allocation164_spill] sm:$0xff] %v12596_v26  ;;  %v4251_v0 = vadd.f32 %v4235_v15, %v3897_v50  ;;  %v2823_v50 = vsel %vm657_vm0, %v16861_v20, %v16860_v61  ;;  %v3530_v14 = vsel %vm1240_vm1, %v16865_v40, %v16864_v45  ;;  %v16866_v15 = vld [vmem:[#allocation216_spill] sm:$0xff]  ;;  %v4509_v2 = vrot.slane %v4450_v13, 2  ;;  %v16870_v13 = vld [vmem:[#allocation61_spill] sm:$0xff]  ;;  %v16879_v45 = vld [vmem:[#allocation78_spill] sm:$0xff] }
 0x872   : > { %v3884_v6 = vsel %vm1240_vm1, %v16867_v9, %v16866_v15  ;;  %v4453_v34 = vmul.f32 %v12503_v28, %v4407_v49  ;;  %v2614_v30 = vadd.f32 %v2598_v19, %v12483_v60  ;;  %v2839_v7 = vadd.f32 %v2823_v50, %v2485_v10  ;;  %v16875_v10 = vld [vmem:[#allocation218_spill] sm:$0xff]  ;;  %v16876_v19 = vld [vmem:[#allocation215_spill] sm:$0xff]  ;;  %v16878_v35 = vld [vmem:[#allocation44_spill] sm:$0xff] }
 0x873   : > { %v12617_v37 = vadd.f32 %v4502_v12, %v4251_v0  ;;  %v4217_v11 = vpop.permute.xlu0 %4216  ;;  %v4219_v36 = vpop.permute.xlu1 %4218  ;;  %v4406_v12 = vld [vmem:[%s8754_s28 + $0xe0] sm:$0xfc]  ;;  %v12652_v1 = vadd.f32 %v2599_v23, %v12526_v4  ;;  %v3885_v48 = vsel %vm1240_vm1, %v16876_v19, %v16875_v10  ;;  %v4511_v20 = vsel %vm4490_vm3, %v4509_v2, %v4510_v31  ;;  %v16880_v40 = vld [vmem:[#allocation73_spill] sm:$0xff]  ;;  %v16885_v2 = vld [vmem:[#allocation79_spill] sm:$0xff] }
 0x874   : > { %v4236_v24 = vsel %vm1240_vm1, %v4217_v11, %v4219_v36  ;;  %v4452_v32 = vmul.f32 %v12503_v28, %v4406_v12  ;;  %v3546_v11 = vadd.f32 %v3530_v14, %v3192_v58  ;;  %v3193_v16 = vadd.f32 %v3177_v17, %v2839_v7  ;;  %v16881_v12 = vld [vmem:[#allocation39_spill] sm:$0xff]  ;;  %v16882_v9 = vld [vmem:[#allocation84_spill] sm:$0xff]  ;;  %v16888_v31 = vld [vmem:[#allocation93_spill] sm:$0xff] }
 0x875   : > { %16855 = vst [vmem:[#allocation165_spill] sm:$0xff] %v12617_v37  ;;  %v4252_v41 = vadd.f32 %v4236_v24, %v3898_v27  ;;  %v4508_v27 = vsel %vm4490_vm3, %v4506_v53, %v4507_v47  ;;  %v2601_v53 = vsel %vm657_vm0, %v16872_v55, %v16871_v8  ;;  %v16873_v47 = vld [vmem:[#allocation182_spill] sm:$0xff]  ;;  %v4513_v58 = vrot.slane %v4453_v34, 2  ;;  %v16889_v34 = vld [vmem:[#allocation96_spill] sm:$0xff]  ;;  %v16896_v19 = vld [vmem:[#allocation41_spill] sm:$0xff] }
 0x876   : > { %v3531_v28 = vsel %vm1240_vm1, %v16874_v57, %v16873_v47  ;;  %v3900_v60 = vadd.f32 %v3884_v6, %v3546_v11  ;;  %v2602_v17 = vsel %vm657_vm0, %v16880_v40, %v16879_v45  ;;  %v2617_v15 = vadd.f32 %v2601_v53, %v16881_v12  ;;  %v16883_v6 = vld [vmem:[#allocation76_spill] sm:$0xff]  ;;  %v16890_v11 = vld [vmem:[#allocation101_spill] sm:$0xff]  ;;  %v16893_v53 = vld [vmem:[#allocation46_spill] sm:$0xff] }
 0x877   : > { %v12643_v39 = vadd.f32 %v4505_v42, %v4252_v41  ;;  %v4221_v0 = vpop.permute.xlu0 %4220  ;;  %v4223_v62 = vpop.permute.xlu1 %4222  ;;  %v16869_v42 = vld [vmem:[#allocation75_spill] sm:$0xff]  ;;  %v4512_v41 = vrot.slane %v4452_v32, 2  ;;  %v3547_v14 = vadd.f32 %v3531_v28, %v3193_v16  ;;  %v16886_v32 = vld [vmem:[#allocation86_spill] sm:$0xff]  ;;  %v2816_v7 = vsel %vm657_vm0, %v16889_v34, %v16888_v31  ;;  %v16895_v28 = vld [vmem:[#allocation116_spill] sm:$0xff] }
 0x878   : > { %v4237_v22 = vsel %vm1240_vm1, %v4221_v0, %v4223_v62  ;;  %v2600_v24 = vsel %vm657_vm0, %v16870_v13, %v16869_v42  ;;  %v2603_v0 = vsel %vm657_vm0, %v16883_v6, %v16882_v9  ;;  %v16884_v62 = vld [vmem:[#allocation80_spill] sm:$0xff]  ;;  %v2618_v47 = vadd.f32 %v2602_v17, %v16893_v53  ;;  %v16894_v57 = vld [vmem:[#allocation127_spill] sm:$0xff]  ;;  %v16899_v17 = vld [vmem:[#allocation137_spill] sm:$0xff] }
 0x879   : > { %16868 = vst [vmem:[#allocation202_spill] sm:$0xff] %v12643_v39  ;;  %v4253_v36 = vadd.f32 %v4237_v22, %v3899_v18  ;;  %v2616_v38 = vadd.f32 %v2600_v24, %v16878_v35  ;;  %v2604_v49 = vsel %vm657_vm0, %v16885_v2, %v16884_v62  ;;  %v3901_v13 = vadd.f32 %v3885_v48, %v3547_v14  ;;  %v16900_v14 = vld [vmem:[#allocation134_spill] sm:$0xff]  ;;  %v16905_v2 = vld [vmem:[#allocation139_spill] sm:$0xff]  ;;  %v16911_v34 = vld [vmem:[#allocation140_spill] sm:$0xff] }
 0x87a   : > { %v2952_v16 = vsel %vm657_vm0, %v16895_v28, %v16894_v57  ;;  %v2832_v45 = vadd.f32 %v2816_v7, %v12604_v5  ;;  %v16903_v6 = vld [vmem:[#allocation10_spill] sm:$0xff]  ;;  %v16912_v7 = vld [vmem:[#allocation132_spill] sm:$0xff]  ;;  %v16915_v53 = vld [vmem:[#allocation129_spill] sm:$0xff] }
 0x87b   : > { %v12666_v4 = vadd.f32 %v4508_v27, %v4253_v36  ;;  %v4225_v23 = vpop.permute.xlu0 %4224  ;;  %v4227_v61 = vpop.permute.xlu1 %4226  ;;  %v16887_v27 = vld [vmem:[#allocation81_spill] sm:$0xff]  ;;  %v16891_v36 = vld [vmem:[#allocation102_spill] sm:$0xff]  ;;  %v12711_v9 = vadd.f32 %v2952_v16, %v2614_v30  ;;  %v12731_v30 = vld [vmem:[%s8854_s12 + $0x40] sm:$0xfc] }
 0x87c   : > { %v4238_v50 = vsel %vm1240_vm1, %v4225_v23, %v4227_v61  ;;  %v2605_v22 = vsel %vm657_vm0, %v16887_v27, %v16886_v32  ;;  %v2817_v42 = vsel %vm657_vm0, %v16891_v36, %v16890_v11  ;;  %v2619_v23 = vadd.f32 %v2603_v0, %v16896_v19  ;;  %v16897_v61 = vld [vmem:[#allocation11_spill] sm:$0xff]  ;;  %v16904_v0 = vld [vmem:[#allocation136_spill] sm:$0xff]  ;;  %v12734_v31 = vld [vmem:[%s8854_s12 + $0x50] sm:$0x3] }
 0x87d   : > { %16877 = vst [vmem:[#allocation203_spill] sm:$0xff] %v12666_v4  ;;  %v4254_v18 = vadd.f32 %v4238_v50, %v3900_v60  ;;  %v4514_v60 = vsel %vm4490_vm3, %v4512_v41, %v4513_v58  ;;  %v2620_v48 = vadd.f32 %v2604_v49, %v16897_v61  ;;  %v12703_v40 = vadd.f32 %v2817_v42, %v12607_v52  ;;  %v16901_v58 = vld [vmem:[#allocation138_spill] sm:$0xff]  ;;  %v16906_v49 = vld [vmem:[#allocation131_spill] sm:$0xff]  ;;  %v12726_v27 = vld [vmem:[%s16169_s5 + $0x6] ss:$0 sm:$0xff] }
 0x87e   : > { %v2954_v41 = vsel %vm657_vm0, %v16900_v14, %v16899_v17  ;;  %v2956_v62 = vsel %vm657_vm0, %v16904_v0, %v16903_v6  ;;  %v2957_v5 = vsel %vm657_vm0, %v16906_v49, %v16905_v2  ;;  %16909 = vst [vmem:[#allocation18_spill] sm:$0xff] %v12726_v27  ;;  %v2958_v11 = vsel %vm657_vm0, %v16912_v7, %v16911_v34  ;;  %v16913_v36 = vld [vmem:[#allocation156_spill] sm:$0xff]  ;;  %v16914_v42 = vld [vmem:[#allocation150_spill] sm:$0xff]  ;;  %v16918_v19 = vld [vmem:[#allocation133_spill] sm:$0xff] }
 0x87f   : > { %v12690_v24 = vadd.f32 %v4511_v20, %v4254_v18  ;;  %v4229_v8 = vpop.permute.xlu0 %4228  ;;  %v4231_v55 = vpop.permute.xlu1 %4230  ;;  %v16898_v20 = vld [vmem:[#allocation12_spill] sm:$0xff]  ;;  %v16902_v18 = vld [vmem:[#allocation135_spill] sm:$0xff]  ;;  %v2970_v16 = vadd.f32 %v2954_v41, %v2616_v38  ;;  %v16919_v17 = vld [vmem:[#allocation158_spill] sm:$0xff]  ;;  %v2974_v2 = vadd.f32 %v2958_v11, %v2620_v48 }
 0x880   : > { %v4239_v10 = vsel %vm1240_vm1, %v4229_v8, %v4231_v55  ;;  %v2621_v50 = vadd.f32 %v2605_v22, %v16898_v20  ;;  %v2955_v12 = vsel %vm657_vm0, %v16902_v18, %v16901_v58  ;;  %v4462_v8 = vmul.f32 %v12726_v27, %v12731_v30  ;;  %v16916_v57 = vld [vmem:[#allocation120_spill] sm:$0xff]  ;;  %v16921_v18 = vld [vmem:[#allocation190_spill] sm:$0xff]  ;;  %v16926_v41 = vld [vmem:[#allocation155_spill] sm:$0xff] }
 0x881   : > { %16892 = vst [vmem:[#allocation204_spill] sm:$0xff] %v12690_v24  ;;  %v4255_v35 = vadd.f32 %v4239_v10, %v3901_v13  ;;  %v3308_v13 = vsel %vm657_vm0, %v16914_v42, %v16913_v36  ;;  %v4463_v55 = vmul.f32 %v12726_v27, %v12734_v31  ;;  %v2953_v28 = vsel %vm657_vm0, %v16916_v57, %v16915_v53  ;;  %v16917_v10 = vld [vmem:[#allocation141_spill] sm:$0xff]  ;;  %v16920_v14 = vld [vmem:[#allocation152_spill] sm:$0xff]  ;;  %v16924_v7 = vld [vmem:[#allocation154_spill] sm:$0xff] }
 0x882   : > { %v2959_v61 = vsel %vm657_vm0, %v16918_v19, %v16917_v10  ;;  %v2972_v20 = vadd.f32 %v2956_v62, %v2618_v47  ;;  %v3309_v58 = vsel %vm657_vm0, %v16920_v14, %v16919_v17  ;;  %v16922_v6 = vld [vmem:[#allocation184_spill] sm:$0xff]  ;;  %v3324_v49 = vadd.f32 %v3308_v13, %v2970_v16  ;;  %v16931_v11 = vld [vmem:[#allocation87_spill] sm:$0xff]  ;;  %v16932_v13 = vld [vmem:[#allocation82_spill] sm:$0xff] }
 0x883   : > { %v12719_v52 = vadd.f32 %v4514_v60, %v4255_v35  ;;  %v12721_v32 = vpop.permute.xlu0 %4336  ;;  %v12728_v22 = vpop.permute.xlu1 %4338  ;;  %v2971_v60 = vadd.f32 %v2955_v12, %v2617_v15  ;;  %v2973_v35 = vadd.f32 %v2957_v5, %v2619_v23  ;;  %v3662_v0 = vsel %vm1240_vm1, %v16922_v6, %v16921_v18  ;;  %v16923_v34 = vld [vmem:[#allocation160_spill] sm:$0xff]  ;;  %v16925_v15 = vld [vmem:[#allocation161_spill] sm:$0xff]  ;;  %v16929_v5 = vld [vmem:[#allocation226_spill] sm:$0xff] }
 0x884   : > { %16908 = vst [vmem:[#allocation19_spill] sm:$0xff] %v12721_v32  ;;  %16910 = vst [vmem:[#allocation20_spill] sm:$0xff] %v12728_v22  ;;  %v3310_v38 = vsel %vm657_vm0, %v16924_v7, %v16923_v34  ;;  %v3311_v12 = vsel %vm657_vm0, %v16926_v41, %v16925_v15  ;;  %v2975_v62 = vadd.f32 %v2959_v61, %v2621_v50  ;;  %v16930_v36 = vld [vmem:[#allocation220_spill] sm:$0xff]  ;;  %v4553_v53 = vrot.slane %v4462_v8, 2  ;;  %v16933_v10 = vld [vmem:[#allocation162_spill] sm:$0xff] }
 0x885   : > { %16907 = vst [vmem:[#allocation205_spill] sm:$0xff] %v12719_v52  ;;  %v4016_v42 = vsel %vm1240_vm1, %v16930_v36, %v16929_v5  ;;  %v4554_v48 = vrot.slane %v4463_v55, 2  ;;  %v3170_v57 = vsel %vm657_vm0, %v16932_v13, %v16931_v11  ;;  %v3325_v16 = vadd.f32 %v3309_v58, %v2971_v60  ;;  %v16934_v19 = vld [vmem:[#allocation157_spill] sm:$0xff]  ;;  %v16935_v34 = vld [vmem:[#allocation163_spill] sm:$0xff]  ;;  %v16937_v7 = vld [vmem:[#allocation192_spill] sm:$0xff] }
 0x886   : > { %v3312_v17 = vsel %vm657_vm0, %v16934_v19, %v16933_v10  ;;  %v3678_v14 = vadd.f32 %v3662_v0, %v3324_v49  ;;  %v3326_v18 = vadd.f32 %v3310_v38, %v2972_v20  ;;  %v3327_v6 = vadd.f32 %v3311_v12, %v2973_v35  ;;  %v16936_v50 = vld [vmem:[#allocation159_spill] sm:$0xff]  ;;  %v16938_v15 = vld [vmem:[#allocation186_spill] sm:$0xff]  ;;  %v16940_v41 = vld [vmem:[#allocation188_spill] sm:$0xff] }
 0x887   : > { %v12764_v47 = vpop.permute.xlu0 %4340  ;;  %v12766_v23 = vpop.permute.xlu1 %4342  ;;  %v3313_v61 = vsel %vm657_vm0, %v16936_v50, %v16935_v34  ;;  %v3663_v8 = vsel %vm1240_vm1, %v16938_v15, %v16937_v7  ;;  %v16939_v55 = vld [vmem:[#allocation194_spill] sm:$0xff]  ;;  %v16941_v58 = vld [vmem:[#allocation195_spill] sm:$0xff]  ;;  %v16942_v5 = vld [vmem:[#allocation189_spill] sm:$0xff]  ;;  %v3328_v11 = vadd.f32 %v3312_v17, %v2974_v2  ;;  %v4555_v34 = vsel %vm4490_vm3, %v4553_v53, %v4554_v48 }
 0x888   : > { %16927 = vst [vmem:[#allocation17_spill] sm:$0xff] %v12764_v47  ;;  %16928 = vst [vmem:[#allocation24_spill] sm:$0xff] %v12766_v23  ;;  %v3664_v60 = vsel %vm1240_vm1, %v16940_v41, %v16939_v55  ;;  %v3665_v0 = vsel %vm1240_vm1, %v16942_v5, %v16941_v58  ;;  %v16943_v20 = vld [vmem:[#allocation196_spill] sm:$0xff]  ;;  %v16944_v35 = vld [vmem:[#allocation191_spill] sm:$0xff]  ;;  %v4032_v38 = vadd.f32 %v4016_v42, %v3678_v14 }
 0x889   : > { %v3666_v49 = vsel %vm1240_vm1, %v16944_v35, %v16943_v20  ;;  %v16945_v13 = vld [vmem:[#allocation197_spill] sm:$0xff]  ;;  %v12798_v7 = vadd.f32 %v2953_v28, %v12652_v1  ;;  %v12800_v15 = vadd.f32 %v3170_v57, %v2832_v45  ;;  %v3329_v42 = vadd.f32 %v3313_v61, %v2975_v62  ;;  %v12806_v2 = vld [vmem:[%s8754_s28 + $0x18] sm:$0x3]  ;;  %v16950_v28 = vld [vmem:[#allocation228_spill] sm:$0xff] }
 0x88a   : > { %v16946_v10 = vld [vmem:[#allocation193_spill] sm:$0xff]  ;;  %16949 = vst [vmem:[#allocation22_spill] sm:$0xff] %v12806_v2  ;;  %v3679_v17 = vadd.f32 %v3663_v8, %v3325_v16  ;;  %v3680_v41 = vadd.f32 %v3664_v60, %v3326_v18  ;;  %v12808_v53 = vadd.f32 %v3665_v0, %v3327_v6  ;;  %v12810_v48 = vadd.f32 %v3666_v49, %v3328_v11  ;;  %v12816_v1 = vld [vmem:[%s8754_s28 + $0x38] sm:$0x3]  ;;  %v16951_v62 = vld [vmem:[#allocation222_spill] sm:$0xff] }
 0x88b   : > { %v4345_v12 = vpop.permute.xlu0 %4344  ;;  %v4347_v36 = vpop.permute.xlu1 %4346  ;;  %v3667_v19 = vsel %vm1240_vm1, %v16946_v10, %v16945_v13  ;;  %16947 = vst [vmem:[#allocation21_spill] sm:$0xff] %v12800_v15  ;;  %v12803_v55 = vld [vmem:[%s8754_s28 + $0x8] sm:$0xfc]  ;;  %v4017_v57 = vsel %vm1240_vm1, %v16951_v62, %v16950_v28  ;;  %v16952_v61 = vld [vmem:[#allocation230_spill] sm:$0xff]  ;;  %v16953_v5 = vld [vmem:[#allocation224_spill] sm:$0xff] }
 0x88c   : > { %v4370_v50 = vsel %vm1240_vm1, %v4345_v12, %v4347_v36  ;;  %16948 = vst [vmem:[#allocation26_spill] sm:$0xff] %v12803_v55  ;;  %v12813_v58 = vld [vmem:[%s8754_s28 + $0x28] sm:$0xfc]  ;;  %v12818_v45 = vadd.f32 %v3667_v19, %v3329_v42  ;;  %v4018_v20 = vsel %vm1240_vm1, %v16953_v5, %v16952_v61  ;;  %v12827_v16 = vld [vmem:[%s8754_s28] sm:$0xfc] }
 0x88d   : > { %v4386_v14 = vadd.f32 %v4370_v50, %v4032_v38  ;;  %16954 = vst [vmem:[#allocation40_spill] sm:$0xff] %v12827_v16  ;;  %v12830_v18 = vld [vmem:[%s8754_s28 + $0x10] sm:$0x3]  ;;  %v12839_v0 = vld [vmem:[%s8754_s28 + $0x20] sm:$0xfc] }
 0x88e   : > { %16955 = vst [vmem:[#allocation35_spill] sm:$0xff] %v12830_v18  ;;  %16959 = vst [vmem:[#allocation51_spill] sm:$0xff] %v12839_v0  ;;  %v12842_v35 = vld [vmem:[%s8754_s28 + $0x30] sm:$0x3]  ;;  %v12864_v50 = vld [vmem:[%s8754_s28 + $0x58] sm:$0x3] }
 0x88f   : > { %v12832_v6 = vadd.f32 %v4555_v34, %v4386_v14  ;;  %v12834_v8 = vpop.permute.xlu0 %4982  ;;  %v12836_v60 = vpop.permute.xlu1 %4942  ;;  %16960 = vst [vmem:[#allocation59_spill] sm:$0xff] %v12842_v35  ;;  %v12861_v34 = vld [vmem:[%s8754_s28 + $0x48] sm:$0xfc]  ;;  %v12914_v26 = vld [vmem:[%s8854_s12 + $0x60] sm:$0xfc] }
 0x890   : > { %16957 = vst [vmem:[#allocation37_spill] sm:$0xff] %v12834_v8  ;;  %16958 = vst [vmem:[#allocation57_spill] sm:$0xff] %v12836_v60  ;;  %v4946_v49 = vmul.f32 %v12836_v60, %v12803_v55  ;;  %v4948_v38 = vmul.f32 %v12836_v60, %v12806_v2  ;;  %v4945_v12 = vmul.f32 %v12836_v60, %v12827_v16  ;;  %v12871_v39 = vld [vmem:[%s8754_s28 + $0x68] sm:$0xfc]  ;;  %v12917_v32 = vld [vmem:[%s8854_s12 + $0x70] sm:$0x3] }
 0x891   : > { %16956 = vst [vmem:[#allocation42_spill] sm:$0xff] %v12832_v6  ;;  %v4947_v36 = vmul.f32 %v12836_v60, %v12830_v18  ;;  %v4950_v11 = vmul.f32 %v12836_v60, %v12813_v58  ;;  %v4952_v13 = vmul.f32 %v12836_v60, %v12816_v1  ;;  %v4949_v10 = vmul.f32 %v12836_v60, %v12839_v0  ;;  %v12991_v16 = vld [vmem:[%s8854_s12 + $0x28] sm:$0xfc] }
 0x892   : > { %v4951_v19 = vmul.f32 %v12836_v60, %v12842_v35  ;;  %v5052_v42 = vrot.slane %v4946_v49, 2  ;;  %v5053_v14 = vrot.slane %v4948_v38, 2  ;;  %v5049_v28 = vrot.slane %v4945_v12, 2  ;;  %16963 = vst [vmem:[#allocation69_spill] sm:$0xff] %v12871_v39  ;;  %v12880_v12 = vld [vmem:[%s8754_s28 + $0x78] sm:$0x3] }
 0x893   : > { %v5050_v62 = vrot.slane %v4947_v36, 2  ;;  %v12866_v61 = vpop.permute.xlu0 %5336  ;;  %v12868_v5 = vpop.permute.xlu1 %5296  ;;  %v5058_v24 = vrot.slane %v4950_v11, 2  ;;  %v5059_v52 = vrot.slane %v4952_v13, 2  ;;  %v5055_v4 = vrot.slane %v4949_v10, 2  ;;  %16964 = vst [vmem:[#allocation72_spill] sm:$0xff] %v12880_v12  ;;  %v16965_v11 = vld [vmem:[#allocation225_spill] sm:$0xff] }
 0x894   : > { %16961 = vst [vmem:[#allocation53_spill] sm:$0xff] %v12866_v61  ;;  %16962 = vst [vmem:[#allocation70_spill] sm:$0xff] %v12868_v5  ;;  %v5056_v6 = vrot.slane %v4951_v19, 2  ;;  %v5054_v37 = vsel %vm4490_vm3, %v5052_v42, %v5053_v14  ;;  %v4954_v49 = vmul.f32 %v12836_v60, %v12861_v34  ;;  %v4956_v38 = vmul.f32 %v12836_v60, %v12864_v50 }
 0x895   : > { %v5051_v47 = vsel %vm4490_vm3, %v5049_v28, %v5050_v62  ;;  %v12882_v36 = vadd.f32 %v4017_v57, %v3679_v17  ;;  %v4019_v13 = vsel %vm1240_vm1, %v16965_v11, %v12095_v43  ;;  %5099 = vrot.lane.b32.xlu1 %v5054_v37, %s16966_s29  ;;  %v4953_v10 = vmul.f32 %v12836_v60, %v12508_v21 }
 0x896   : > { %5097 = vrot.lane.b32.xlu0 %v5051_v47, %s16966_s29  ;;  %v5064_v19 = vrot.slane %v4954_v49, 2  ;;  %v5065_v42 = vrot.slane %v4956_v38, 2  ;;  %v4955_v17 = vmul.f32 %v12836_v60, %v12511_v3  ;;  %v4958_v57 = vmul.f32 %v12836_v60, %v12871_v39  ;;  %v12908_v49 = vld [vmem:[%s8754_s28 + $0x88] sm:$0xfc]  ;;  %v4904_v38 = vld [vmem:[%s8754_s28 + $0x98] sm:$0x3] }
 0x897   : > { %v12895_v14 = vadd.f32 %v4018_v20, %v3680_v41  ;;  %v12897_v43 = vpop.permute.xlu0 %5690  ;;  %v12899_v37 = vpop.permute.xlu1 %5650  ;;  %v4960_v47 = vmul.f32 %v12836_v60, %v12880_v12  ;;  %v4957_v28 = vmul.f32 %v12836_v60, %v12546_v46  ;;  %v4959_v62 = vmul.f32 %v12836_v60, %v12549_v29  ;;  %16969 = vst [vmem:[#allocation83_spill] sm:$0xff] %v12908_v49  ;;  %v12982_v12 = vld [vmem:[%s8854_s12 + $0x20] sm:$0xfc] }
 0x898   : > { %16967 = vst [vmem:[#allocation71_spill] sm:$0xff] %v12897_v43  ;;  %16968 = vst [vmem:[#allocation89_spill] sm:$0xff] %v12899_v37  ;;  %v5060_v41 = vsel %vm4490_vm3, %v5058_v24, %v5059_v52  ;;  %v5057_v20 = vsel %vm4490_vm3, %v5055_v4, %v5056_v6  ;;  %v5061_v11 = vrot.slane %v4953_v10, 2  ;;  %v5062_v23 = vrot.slane %v4955_v17, 2  ;;  %v12933_v24 = vld [vmem:[%s8854_s12 + $0x8] sm:$0xfc] }
 0x899   : > { %16970 = vst [vmem:[#allocation90_spill] sm:$0xff] %v12914_v26  ;;  %16971 = vst [vmem:[#allocation85_spill] sm:$0xff] %v12917_v32  ;;  %v12920_v46 = vadd.f32 %v4019_v13, %v12808_v53  ;;  %5103 = vrot.lane.b32.xlu1 %v5060_v41, %s16966_s29  ;;  %v12926_v29 = vmul.f32 %v12726_v27, %v12914_v26  ;;  %v12930_v4 = vmul.f32 %v12726_v27, %v12917_v32  ;;  %v12936_v52 = vld [vmem:[%s8854_s12 + $0x18] sm:$0x3]  ;;  %v12942_v17 = vld [vmem:[%s8854_s12] sm:$0xfc] }
 0x89a   : > { %5101 = vrot.lane.b32.xlu0 %v5057_v20, %s16966_s29  ;;  %v5066_v53 = vsel %vm4490_vm3, %v5064_v19, %v5065_v42  ;;  %v5070_v6 = vrot.slane %v4958_v57, 2  ;;  %v5071_v13 = vrot.slane %v4960_v47, 2  ;;  %v4962_v10 = vmul.f32 %v12836_v60, %v12908_v49  ;;  %v12952_v42 = vld [vmem:[%s8854_s12 + $0x10] sm:$0x3] }
 0x89b   : > { %v12944_v41 = vpop.permute.xlu0 %6044  ;;  %v12946_v20 = vpop.permute.xlu1 %6004  ;;  %v5067_v22 = vrot.slane %v4957_v28, 2  ;;  %v5068_v63 = vrot.slane %v4959_v62, 2  ;;  %v4964_v54 = vmul.f32 %v12836_v60, %v4904_v38  ;;  %v4961_v19 = vmul.f32 %v12836_v60, %v12568_v51  ;;  %v12962_v62 = vld [vmem:[%s8854_s12 + $0x80] sm:$0xfc]  ;;  %v12965_v38 = vld [vmem:[%s8854_s12 + $0x90] sm:$0x3] }
 0x89c   : > { %16972 = vst [vmem:[#allocation98_spill] sm:$0xff] %v12944_v41  ;;  %16973 = vst [vmem:[#allocation97_spill] sm:$0xff] %v12946_v20  ;;  %v5063_v57 = vsel %vm4490_vm3, %v5061_v11, %v5062_v23  ;;  %v4963_v47 = vmul.f32 %v12836_v60, %v12571_v33  ;;  %v4986_v25 = vmul.f32 %v12834_v8, %v12933_v24  ;;  %v4422_v11 = vld [vmem:[%s8854_s12 + $0xa0] sm:$0xfc]  ;;  %v4423_v60 = vld [vmem:[%s8854_s12 + $0xb0] sm:$0x3] }
 0x89d   : > { %v4988_v28 = vmul.f32 %v12834_v8, %v12936_v52  ;;  %16974 = vst [vmem:[#allocation100_spill] sm:$0xff] %v12962_v62  ;;  %16975 = vst [vmem:[#allocation99_spill] sm:$0xff] %v12965_v38  ;;  %5107 = vrot.lane.b32.xlu1 %v5066_v53, %s16966_s29  ;;  %v4985_v51 = vmul.f32 %v12834_v8, %v12942_v17  ;;  %v4987_v33 = vmul.f32 %v12834_v8, %v12952_v42  ;;  %v12994_v20 = vld [vmem:[%s8854_s12 + $0x38] sm:$0x3] }
 0x89e   : > { %5105 = vrot.lane.b32.xlu0 %v5063_v57, %s16966_s29  ;;  %v4466_v23 = vmul.f32 %v12726_v27, %v12962_v62  ;;  %v5076_v44 = vrot.slane %v4962_v10, 2  ;;  %v4467_v49 = vmul.f32 %v12726_v27, %v12965_v38  ;;  %v4468_v53 = vmul.f32 %v12726_v27, %v4422_v11 }
 0x89f   : > { %v4469_v57 = vmul.f32 %v12726_v27, %v4423_v60  ;;  %v12984_v39 = vpop.permute.xlu0 %6398  ;;  %v12986_v32 = vpop.permute.xlu1 %6358  ;;  %v5072_v62 = vsel %vm4490_vm3, %v5070_v6, %v5071_v13  ;;  %v5069_v26 = vsel %vm4490_vm3, %v5067_v22, %v5068_v63  ;;  %v5077_v18 = vrot.slane %v4964_v54, 2 }
 0x8a0   : > { %16976 = vst [vmem:[#allocation117_spill] sm:$0xff] %v12984_v39  ;;  %16977 = vst [vmem:[#allocation111_spill] sm:$0xff] %v12986_v32  ;;  %v5073_v10 = vrot.slane %v4961_v19, 2  ;;  %v5074_v38 = vrot.slane %v4963_v47, 2  ;;  %v5188_v2 = vrot.slane %v4986_v25, 2  ;;  %v5189_v11 = vrot.slane %v4988_v28, 2 }
 0x8a1   : > { %v5340_v60 = vmul.f32 %v12866_v61, %v12991_v16  ;;  %v12999_v39 = vld [vmem:[%s8854_s12 + $0x30] sm:$0x3]  ;;  %5111 = vrot.lane.b32.xlu1 %v5072_v62, %s16966_s29  ;;  %v4556_v63 = vrot.slane %v12926_v29, 2  ;;  %v5185_v54 = vrot.slane %v4985_v51, 2  ;;  %v5186_v22 = vrot.slane %v4987_v33, 2 }
 0x8a2   : > { %5109 = vrot.lane.b32.xlu0 %v5069_v26, %s16966_s29  ;;  %v5342_v6 = vmul.f32 %v12866_v61, %v12994_v20  ;;  %v4557_v25 = vrot.slane %v12930_v4, 2  ;;  %v4559_v13 = vrot.slane %v4466_v23, 2  ;;  %v5339_v19 = vmul.f32 %v12866_v61, %v12982_v12  ;;  %v4424_v28 = vld [vmem:[%s8854_s12 + $0xc0] sm:$0xfc] }
 0x8a3   : > { %v5341_v47 = vmul.f32 %v12866_v61, %v12999_v39  ;;  %v13012_v62 = vpop.permute.xlu0 %6752  ;;  %v13014_v26 = vpop.permute.xlu1 %6712  ;;  %v4560_v29 = vrot.slane %v4467_v49, 2  ;;  %v4562_v51 = vrot.slane %v4468_v53, 2  ;;  %v4563_v33 = vrot.slane %v4469_v57, 2 }
 0x8a4   : > { %16978 = vst [vmem:[#allocation118_spill] sm:$0xff] %v13012_v62  ;;  %16979 = vst [vmem:[#allocation113_spill] sm:$0xff] %v13014_v26  ;;  %v13017_v32 = vmul.f32 %v12726_v27, %v4424_v28  ;;  %v5078_v4 = vsel %vm4490_vm3, %v5076_v44, %v5077_v18  ;;  %v5075_v23 = vsel %vm4490_vm3, %v5073_v10, %v5074_v38  ;;  %v5542_v15 = vrot.slane %v5340_v60, 2  ;;  %v16980_v10 = vld [vmem:[#allocation227_spill] sm:$0xff]  ;;  %v16981_v60 = vld [vmem:[#allocation229_spill] sm:$0xff] }
 0x8a5   : > { %v5190_v55 = vsel %vm4490_vm3, %v5188_v2, %v5189_v11  ;;  %5115 = vrot.lane.b32.xlu1 %v5078_v4, %s16966_s29  ;;  %v5187_v26 = vsel %vm4490_vm3, %v5185_v54, %v5186_v22  ;;  %v5543_v49 = vrot.slane %v5342_v6, 2  ;;  %v5300_v53 = vmul.f32 %v12868_v5, %v12813_v58  ;;  %v4425_v28 = vld [vmem:[%s8854_s12 + $0xd0] sm:$0x3]  ;;  %v4426_v62 = vld [vmem:[%s8854_s12 + $0xe0] sm:$0xfc] }
 0x8a6   : > { %5113 = vrot.lane.b32.xlu0 %v5075_v23, %s16966_s29  ;;  %v5302_v57 = vmul.f32 %v12868_v5, %v12816_v1  ;;  %v5539_v44 = vrot.slane %v5339_v19, 2  ;;  %v5540_v18 = vrot.slane %v5341_v47, 2  ;;  %v5299_v2 = vmul.f32 %v12868_v5, %v12839_v0 }
 0x8a7   : > { %v5301_v38 = vmul.f32 %v12868_v5, %v12842_v35  ;;  %v13036_v11 = vsel %vm1240_vm1, %v16980_v10, %v12117_v56  ;;  %v13041_v54 = vsel %vm1240_vm1, %v16981_v60, %v12135_v59  ;;  %v4349_v22 = vpop.permute.xlu0 %4348  ;;  %v4558_v6 = vsel %vm4490_vm3, %v4556_v63, %v4557_v25  ;;  %v4351_v19 = vpop.permute.xlu1 %4350  ;;  %v4427_v60 = vld [vmem:[%s8854_s12 + $0xf0] sm:$0x3] }
 0x8a8   : > { %v4561_v47 = vsel %vm4490_vm3, %v4559_v13, %v4560_v29  ;;  %v4371_v4 = vsel %vm1240_vm1, %v4349_v22, %v4351_v19  ;;  %v4564_v23 = vsel %vm4490_vm3, %v4562_v51, %v4563_v33  ;;  %v13049_v56 = vmul.f32 %v12726_v27, %v4425_v28 }
 0x8a9   : > { %v4565_v10 = vrot.slane %v13017_v32, 2  ;;  %v4387_v59 = vadd.f32 %v4371_v4, %v12882_v36  ;;  %5235 = vrot.lane.b32.xlu1 %v5190_v55, %s16966_s29  ;;  %v5544_v63 = vsel %vm4490_vm3, %v5542_v15, %v5543_v49  ;;  %v5406_v25 = vrot.slane %v5300_v53, 2  ;;  %v13070_v49 = vld [vmem:[%s8854_s12 + $0x48] sm:$0xfc] }
 0x8aa   : > { %5233 = vrot.lane.b32.xlu0 %v5187_v26, %s16966_s29  ;;  %v13058_v13 = vmul.f32 %v12726_v27, %v4426_v62  ;;  %v5541_v29 = vsel %vm4490_vm3, %v5539_v44, %v5540_v18  ;;  %v5407_v51 = vrot.slane %v5302_v57, 2  ;;  %v5403_v33 = vrot.slane %v5299_v2, 2  ;;  %v13078_v18 = vld [vmem:[%s8854_s12 + $0x58] sm:$0x3] }
 0x8ab   : > { %v5404_v32 = vrot.slane %v5301_v38, 2  ;;  %v13062_v22 = vadd.f32 %v4558_v6, %v4387_v59  ;;  %v4353_v36 = vpop.permute.xlu0 %4352  ;;  %v4355_v55 = vpop.permute.xlu1 %4354  ;;  %v4990_v26 = vmul.f32 %v12834_v8, %v12991_v16  ;;  %v4992_v15 = vmul.f32 %v12834_v8, %v12994_v20 }
 0x8ac   : > { %v4473_v62 = vmul.f32 %v12726_v27, %v4427_v60  ;;  %v4372_v53 = vsel %vm1240_vm1, %v4353_v36, %v4355_v55  ;;  %v4989_v57 = vmul.f32 %v12834_v8, %v12982_v12  ;;  %v4991_v44 = vmul.f32 %v12834_v8, %v12999_v39 }
 0x8ad   : > { %16982 = vst [vmem:[#allocation122_spill] sm:$0xff] %v13062_v22  ;;  %v5694_v2 = vmul.f32 %v12897_v43, %v13070_v49  ;;  %v4388_v38 = vadd.f32 %v4372_v53, %v12895_v14  ;;  %5589 = vrot.lane.b32.xlu1 %v5544_v63, %s16966_s29  ;;  %v4566_v6 = vrot.slane %v13049_v56, 2  ;;  %v5696_v19 = vmul.f32 %v12897_v43, %v13078_v18 }
 0x8ae   : > { %5587 = vrot.lane.b32.xlu0 %v5541_v29, %s16966_s29  ;;  %v5693_v28 = vmul.f32 %v12897_v43, %v12731_v30  ;;  %v5408_v4 = vsel %vm4490_vm3, %v5406_v25, %v5407_v51  ;;  %v5405_v59 = vsel %vm4490_vm3, %v5403_v33, %v5404_v32  ;;  %v4568_v60 = vrot.slane %v13058_v13, 2 }
 0x8af   : > { %v5695_v14 = vmul.f32 %v12897_v43, %v12734_v31  ;;  %v13095_v63 = vadd.f32 %v4561_v47, %v4388_v38  ;;  %v4357_v29 = vpop.permute.xlu0 %4356  ;;  %v4359_v36 = vpop.permute.xlu1 %4358  ;;  %v5194_v56 = vrot.slane %v4990_v26, 2  ;;  %v5195_v55 = vrot.slane %v4992_v15, 2 }
 0x8b0   : > { %v4569_v53 = vrot.slane %v4473_v62, 2  ;;  %v4373_v22 = vsel %vm1240_vm1, %v4357_v29, %v4359_v36  ;;  %v5191_v27 = vrot.slane %v4989_v57, 2  ;;  %v5192_v35 = vrot.slane %v4991_v44, 2 }
 0x8b1   : > { %16983 = vst [vmem:[#allocation121_spill] sm:$0xff] %v13095_v63  ;;  %v5896_v0 = vrot.slane %v5694_v2, 2  ;;  %v4389_v25 = vadd.f32 %v4373_v22, %v12920_v46  ;;  %5453 = vrot.lane.b32.xlu1 %v5408_v4, %s16966_s29  ;;  %v5897_v13 = vrot.slane %v5696_v19, 2  ;;  %v5893_v51 = vrot.slane %v5693_v28, 2  ;;  %v16984_v46 = vld [vmem:[#allocation94_spill] sm:$0xff]  ;;  %v16985_v22 = vld [vmem:[#allocation88_spill] sm:$0xff] }
 0x8b2   : > { %5451 = vrot.lane.b32.xlu0 %v5405_v59, %s16966_s29  ;;  %v5654_v47 = vmul.f32 %v12899_v37, %v12861_v34  ;;  %v5894_v33 = vrot.slane %v5695_v14, 2  ;;  %v5656_v32 = vmul.f32 %v12899_v37, %v12864_v50  ;;  %v5653_v26 = vmul.f32 %v12899_v37, %v12508_v21 }
 0x8b3   : > { %v5655_v15 = vmul.f32 %v12899_v37, %v12511_v3  ;;  %v3171_v62 = vsel %vm657_vm0, %v16985_v22, %v16984_v46  ;;  %v4036_v57 = vadd.f32 %v13036_v11, %v12810_v48  ;;  %v4037_v44 = vadd.f32 %v13041_v54, %v12818_v45  ;;  %v4361_v38 = vpop.permute.xlu0 %4360  ;;  %v4363_v19 = vpop.permute.xlu1 %4362  ;;  %v16990_v46 = vld [vmem:[#allocation153_spill] sm:$0xff] }
 0x8b4   : > { %v13116_v2 = vadd.f32 %v4564_v23, %v4389_v25  ;;  %v4567_v28 = vsel %vm4490_vm3, %v4565_v10, %v4566_v6  ;;  %v4374_v4 = vsel %vm1240_vm1, %v4361_v38, %v4363_v19  ;;  %v5196_v59 = vsel %vm4490_vm3, %v5194_v56, %v5195_v55  ;;  %v16993_v38 = vld [vmem:[#allocation166_spill] sm:$0xff] }
 0x8b5   : > { %v5193_v14 = vsel %vm4490_vm3, %v5191_v27, %v5192_v35  ;;  %v4390_v29 = vadd.f32 %v4374_v4, %v4036_v57  ;;  %5239 = vrot.lane.b32.xlu1 %v5196_v59, %s16966_s29  ;;  %v4570_v48 = vsel %vm4490_vm3, %v4568_v60, %v4569_v53  ;;  %v5898_v45 = vsel %vm4490_vm3, %v5896_v0, %v5897_v13 }
 0x8b6   : > { %16986 = vst [vmem:[#allocation124_spill] sm:$0xff] %v13116_v2  ;;  %5237 = vrot.lane.b32.xlu0 %v5193_v14, %s16966_s29  ;;  %v5760_v11 = vrot.slane %v5654_v47, 2  ;;  %v5895_v54 = vsel %vm4490_vm3, %v5893_v51, %v5894_v33  ;;  %v5761_v23 = vrot.slane %v5656_v32, 2  ;;  %v5757_v10 = vrot.slane %v5653_v26, 2  ;;  %v16988_v32 = vld [vmem:[#allocation151_spill] sm:$0xff] }
 0x8b7   : > { %v5758_v6 = vrot.slane %v5655_v15, 2  ;;  %v13127_v36 = vadd.f32 %v4567_v28, %v4390_v29  ;;  %v4365_v56 = vpop.permute.xlu0 %4364  ;;  %v4367_v55 = vpop.permute.xlu1 %4366  ;;  %v5344_v27 = vmul.f32 %v12866_v61, %v13070_v49  ;;  %v5346_v35 = vmul.f32 %v12866_v61, %v13078_v18  ;;  %v16989_v26 = vld [vmem:[#allocation147_spill] sm:$0xff] }
 0x8b8   : > { %v5343_v60 = vmul.f32 %v12866_v61, %v12731_v30  ;;  %v4375_v0 = vsel %vm1240_vm1, %v4365_v56, %v4367_v55  ;;  %v5345_v53 = vmul.f32 %v12866_v61, %v12734_v31  ;;  %v6048_v25 = vmul.f32 %v12944_v41, %v12933_v24  ;;  %v16991_v24 = vld [vmem:[#allocation149_spill] sm:$0xff] }
 0x8b9   : > { %16987 = vst [vmem:[#allocation123_spill] sm:$0xff] %v13127_v36  ;;  %v6050_v13 = vmul.f32 %v12944_v41, %v12936_v52  ;;  %v4391_v51 = vadd.f32 %v4375_v0, %v4037_v44  ;;  %5943 = vrot.lane.b32.xlu1 %v5898_v45, %s16966_s29  ;;  %v6047_v47 = vmul.f32 %v12944_v41, %v12942_v17  ;;  %v16992_v44 = vld [vmem:[#allocation167_spill] sm:$0xff]  ;;  %v5548_v4 = vrot.slane %v5344_v27, 2  ;;  %v16996_v27 = vld [vmem:[#allocation169_spill] sm:$0xff] }
 0x8ba   : > { %5941 = vrot.lane.b32.xlu0 %v5895_v54, %s16966_s29  ;;  %v6049_v33 = vmul.f32 %v12944_v41, %v12952_v42  ;;  %v3306_v15 = vsel %vm657_vm0, %v16989_v26, %v16988_v32  ;;  %v3307_v22 = vsel %vm657_vm0, %v16991_v24, %v16990_v46  ;;  %v5762_v52 = vsel %vm4490_vm3, %v5760_v11, %v5761_v23  ;;  %v17000_v32 = vld [vmem:[#allocation22_spill] sm:$0xff]  ;;  %v17002_v24 = vld [vmem:[#allocation35_spill] sm:$0xff] }
 0x8bb   : > { %v5759_v57 = vsel %vm4490_vm3, %v5757_v10, %v5758_v6  ;;  %v3524_v19 = vsel %vm1240_vm1, %v16993_v38, %v16992_v44  ;;  %v13159_v28 = vadd.f32 %v4570_v48, %v4391_v51  ;;  %v5549_v59 = vrot.slane %v5346_v35, 2  ;;  %v16995_v48 = vld [vmem:[#allocation21_spill] sm:$0xff]  ;;  %v16997_v35 = vld [vmem:[#allocation168_spill] sm:$0xff]  ;;  %v16998_v51 = vld [vmem:[#allocation26_spill] sm:$0xff] }
 0x8bc   : > { %v5545_v14 = vrot.slane %v5343_v60, 2  ;;  %v5546_v29 = vrot.slane %v5345_v53, 2  ;;  %v6250_v45 = vrot.slane %v6048_v25, 2  ;;  %v6251_v54 = vrot.slane %v6050_v13, 2  ;;  %v17004_v44 = vld [vmem:[#allocation185_spill] sm:$0xff] }
 0x8bd   : > { %16994 = vst [vmem:[#allocation128_spill] sm:$0xff] %v13159_v28  ;;  %5807 = vrot.lane.b32.xlu1 %v5762_v52, %s16966_s29  ;;  %v6247_v56 = vrot.slane %v6047_v47, 2  ;;  %v6248_v11 = vrot.slane %v6049_v33, 2  ;;  %v3187_v23 = vadd.f32 %v3171_v62, %v12703_v40  ;;  %v3322_v10 = vadd.f32 %v3306_v15, %v12711_v9  ;;  %v16999_v47 = vld [vmem:[#allocation97_spill] sm:$0xff]  ;;  %v17001_v15 = vld [vmem:[#allocation40_spill] sm:$0xff] }
 0x8be   : > { %5805 = vrot.lane.b32.xlu0 %v5759_v57, %s16966_s29  ;;  %v3323_v6 = vadd.f32 %v3307_v22, %v12798_v7  ;;  %v3540_v55 = vadd.f32 %v3524_v19, %v16995_v48  ;;  %v3525_v60 = vsel %vm1240_vm1, %v16997_v35, %v16996_v27  ;;  %v5550_v0 = vsel %vm4490_vm3, %v5548_v4, %v5549_v59  ;;  %v17005_v38 = vld [vmem:[#allocation181_spill] sm:$0xff]  ;;  %v17008_v27 = vld [vmem:[#allocation207_spill] sm:$0xff]  ;;  %v17009_v35 = vld [vmem:[#allocation206_spill] sm:$0xff] }
 0x8bf   : > { %v5304_v53 = vmul.f32 %v12868_v5, %v12861_v34  ;;  %v5306_v25 = vmul.f32 %v12868_v5, %v12864_v50  ;;  %v5547_v40 = vsel %vm4490_vm3, %v5545_v14, %v5546_v29  ;;  %v6252_v9 = vsel %vm4490_vm3, %v6250_v45, %v6251_v54 }
 0x8c0   : > { %v5303_v7 = vmul.f32 %v12868_v5, %v12508_v21  ;;  %v5305_v62 = vmul.f32 %v12868_v5, %v12511_v3  ;;  %v6249_v13 = vsel %vm4490_vm3, %v6247_v56, %v6248_v11  ;;  %v6008_v33 = vmul.f32 %v16999_v47, %v16998_v51  ;;  %v17003_v3 = vld [vmem:[#allocation111_spill] sm:$0xff] }
 0x8c1   : > { %5593 = vrot.lane.b32.xlu1 %v5550_v0, %s16966_s29  ;;  %v6010_v26 = vmul.f32 %v16999_v47, %v17000_v32  ;;  %v6007_v46 = vmul.f32 %v16999_v47, %v17001_v15  ;;  %v6009_v21 = vmul.f32 %v16999_v47, %v17002_v24  ;;  %v6362_v22 = vmul.f32 %v17003_v3, %v12813_v58  ;;  %v17006_v56 = vld [vmem:[#allocation187_spill] sm:$0xff] }
 0x8c2   : > { %5591 = vrot.lane.b32.xlu0 %v5547_v40, %s16966_s29  ;;  %v6364_v52 = vmul.f32 %v17003_v3, %v12816_v1  ;;  %v3541_v57 = vadd.f32 %v3525_v60, %v3187_v23  ;;  %v3660_v19 = vsel %vm1240_vm1, %v17005_v38, %v17004_v44  ;;  %v5412_v4 = vrot.slane %v5304_v53, 2  ;;  %v17007_v11 = vld [vmem:[#allocation183_spill] sm:$0xff]  ;;  %v17010_v40 = vld [vmem:[#allocation209_spill] sm:$0xff]  ;;  %v17011_v23 = vld [vmem:[#allocation208_spill] sm:$0xff] }
 0x8c3   : > { %v5413_v59 = vrot.slane %v5306_v25, 2  ;;  %v5409_v14 = vrot.slane %v5303_v7, 2  ;;  %v5410_v29 = vrot.slane %v5305_v62, 2  ;;  %v6468_v45 = vrot.slane %v6362_v22, 2  ;;  %v17012_v22 = vld [vmem:[#allocation221_spill] sm:$0xff] }
 0x8c4   : > { %v6469_v54 = vrot.slane %v6364_v52, 2  ;;  %v3661_v48 = vsel %vm1240_vm1, %v17007_v11, %v17006_v56  ;;  %v3878_v0 = vsel %vm1240_vm1, %v17009_v35, %v17008_v27  ;;  %v3879_v60 = vsel %vm1240_vm1, %v17011_v23, %v17010_v40  ;;  %v17013_v52 = vld [vmem:[#allocation217_spill] sm:$0xff] }
 0x8c5   : > { %6297 = vrot.lane.b32.xlu1 %v6252_v9, %s16746_s11  ;;  %v6114_v53 = vrot.slane %v6008_v33, 2  ;;  %v6115_v25 = vrot.slane %v6010_v26, 2  ;;  %v6111_v7 = vrot.slane %v6007_v46, 2  ;;  %v6112_v62 = vrot.slane %v6009_v21, 2  ;;  %v13240_v56 = vld [vmem:[%s8854_s12 + $0x68] sm:$0xfc] }
 0x8c6   : > { %6295 = vrot.lane.b32.xlu0 %v6249_v13, %s16746_s11  ;;  %v13211_v51 = vsel %vm4490_vm3, %v6468_v45, %v6469_v54  ;;  %v3676_v32 = vadd.f32 %v3660_v19, %v3322_v10  ;;  %v4014_v44 = vsel %vm1240_vm1, %v17013_v52, %v17012_v22  ;;  %v4994_v38 = vmul.f32 %v12834_v8, %v13070_v49  ;;  %v17020_v23 = vld [vmem:[#allocation85_spill] sm:$0xff] }
 0x8c7   : > { %v4996_v9 = vmul.f32 %v12834_v8, %v13078_v18  ;;  %v5414_v13 = vsel %vm4490_vm3, %v5412_v4, %v5413_v59  ;;  %v5411_v33 = vsel %vm4490_vm3, %v5409_v14, %v5410_v29  ;;  %v4993_v26 = vmul.f32 %v12834_v8, %v12731_v30  ;;  %v17017_v4 = vld [vmem:[#allocation223_spill] sm:$0xff] }
 0x8c8   : > { %v4995_v10 = vmul.f32 %v12834_v8, %v12734_v31  ;;  %v3677_v46 = vadd.f32 %v3661_v48, %v3323_v6  ;;  %v13226_v21 = vadd.f32 %v3878_v0, %v3540_v55  ;;  %v13228_v19 = vadd.f32 %v3879_v60, %v3541_v57  ;;  %v17018_v59 = vld [vmem:[#allocation219_spill] sm:$0xff]  ;;  %v17019_v0 = vld [vmem:[#allocation90_spill] sm:$0xff] }
 0x8c9   : > { %5457 = vrot.lane.b32.xlu1 %v5414_v13, %s16966_s29  ;;  %v13232_v45 = vadd.f32 %v4014_v44, %v3676_v32  ;;  %v4015_v14 = vsel %vm1240_vm1, %v17018_v59, %v17017_v4  ;;  %v6116_v29 = vsel %vm4490_vm3, %v6114_v53, %v6115_v25  ;;  %v6113_v54 = vsel %vm4490_vm3, %v6111_v7, %v6112_v62  ;;  %v13243_v6 = vld [vmem:[%s8854_s12 + $0x78] sm:$0x3]  ;;  %v8443_v53 = vld [vmem:[%s16167_s3 + $0x6] ss:$0 sm:$0xff]  ;;  %v17021_v62 = vld [vmem:[#allocation117_spill] sm:$0xff] }
 0x8ca   : > { %17014 = vst [vmem:[#allocation125_spill] sm:$0xff] %v13226_v21  ;;  %17015 = vst [vmem:[#allocation130_spill] sm:$0xff] %v13228_v19  ;;  %5455 = vrot.lane.b32.xlu0 %v5411_v33, %s16966_s29  ;;  %v5200_v55 = vrot.slane %v4994_v38, 2  ;;  %v5201_v57 = vrot.slane %v4996_v9, 2  ;;  %v5698_v11 = vmul.f32 %v12897_v43, %v13240_v56  ;;  %v5700_v48 = vmul.f32 %v12897_v43, %v13243_v6 }
 0x8cb   : > { %17016 = vst [vmem:[#allocation126_spill] sm:$0xff] %v13232_v45  ;;  %v5197_v27 = vrot.slane %v4993_v26, 2  ;;  %v5198_v35 = vrot.slane %v4995_v10, 2  ;;  %v5697_v40 = vmul.f32 %v12897_v43, %v17019_v0  ;;  %v5699_v60 = vmul.f32 %v12897_v43, %v17020_v23  ;;  %v13592_v45 = vld [vmem:[%s8854_s12 + $0x40] sm:$0xfc] }
 0x8cc   : > { %v4438_v25 = vmul.f32 %v8443_v53, %v17001_v15  ;;  %v4439_v7 = vmul.f32 %v8443_v53, %v17002_v24  ;;  %v6402_v32 = vmul.f32 %v17021_v62, %v12991_v16  ;;  %v6404_v22 = vmul.f32 %v17021_v62, %v12994_v20 }
 0x8cd   : > { %6161 = vrot.lane.b32.xlu1 %v6116_v29, %s16746_s11  ;;  %v6401_v52 = vmul.f32 %v17021_v62, %v12982_v12  ;;  %v6403_v44 = vmul.f32 %v17021_v62, %v12999_v39  ;;  %v6012_v15 = vmul.f32 %v16999_v47, %v12813_v58  ;;  %v5202_v24 = vsel %vm4490_vm3, %v5200_v55, %v5201_v57 }
 0x8ce   : > { %6159 = vrot.lane.b32.xlu0 %v6113_v54, %s16746_s11  ;;  %v5902_v38 = vrot.slane %v5698_v11, 2  ;;  %v5903_v9 = vrot.slane %v5700_v48, 2  ;;  %v6014_v13 = vmul.f32 %v16999_v47, %v12816_v1  ;;  %v5199_v33 = vsel %vm4490_vm3, %v5197_v27, %v5198_v35  ;;  %v17023_v48 = vld [vmem:[#allocation51_spill] sm:$0xff] }
 0x8cf   : > { %v5899_v26 = vrot.slane %v5697_v40, 2  ;;  %v5900_v10 = vrot.slane %v5699_v60, 2  ;;  %v6120_v4 = vrot.slane %v6012_v15, 2  ;;  %v13274_v59 = vadd.f32 %v4015_v14, %v3677_v46  ;;  %v17024_v40 = vld [vmem:[#allocation69_spill] sm:$0xff]  ;;  %v13289_v15 = vld [vmem:[%s8754_s28 + $0x60] sm:$0xfc] }
 0x8d0   : > { %v4491_v29 = vrot.slane %v4438_v25, 2  ;;  %v4492_v54 = vrot.slane %v4439_v7, 2  ;;  %v6121_v58 = vrot.slane %v6014_v13, 2  ;;  %v6604_v55 = vrot.slane %v6402_v32, 2  ;;  %v17025_v25 = vld [vmem:[#allocation72_spill] sm:$0xff] }
 0x8d1   : > { %17022 = vst [vmem:[#allocation28_spill] sm:$0xff] %v13274_v59  ;;  %5243 = vrot.lane.b32.xlu1 %v5202_v24, %s16966_s29  ;;  %v6605_v57 = vrot.slane %v6404_v22, 2  ;;  %v6601_v11 = vrot.slane %v6401_v52, 2  ;;  %v6602_v1 = vrot.slane %v6403_v44, 2  ;;  %v4440_v27 = vmul.f32 %v8443_v53, %v17023_v48  ;;  %v13294_v22 = vld [vmem:[%s8754_s28 + $0x70] sm:$0x3] }
 0x8d2   : > { %5241 = vrot.lane.b32.xlu0 %v5199_v33, %s16966_s29  ;;  %v5904_v35 = vsel %vm4490_vm3, %v5902_v38, %v5903_v9  ;;  %v5658_v46 = vmul.f32 %v12899_v37, %v17024_v40  ;;  %v13283_v14 = vsel %vm4490_vm3, %v6120_v4, %v6121_v58  ;;  %v5901_v60 = vsel %vm4490_vm3, %v5899_v26, %v5900_v10  ;;  %v17026_v44 = vld [vmem:[#allocation59_spill] sm:$0xff]  ;;  %v17027_v38 = vld [vmem:[#allocation18_spill] sm:$0xff]  ;;  %v7134_v59 = vld [vmem:[%s16171_s7 + $0x68] sm:$0xff] }
 0x8d3   : > { %v5660_v7 = vmul.f32 %v12899_v37, %v17025_v25  ;;  %v5657_v32 = vmul.f32 %v13289_v15, %v12899_v37  ;;  %v5659_v52 = vmul.f32 %v13294_v22, %v12899_v37  ;;  %v4441_v24 = vmul.f32 %v8443_v53, %v17026_v44 }
 0x8d4   : > { %v4458_v9 = vmul.f32 %v17027_v38, %v12942_v17  ;;  %v4459_v13 = vmul.f32 %v17027_v38, %v12952_v42  ;;  %v6606_v33 = vsel %vm4490_vm3, %v6604_v55, %v6605_v57  ;;  %v6603_v26 = vsel %vm4490_vm3, %v6601_v11, %v6602_v1 }
 0x8d5   : > { %5947 = vrot.lane.b32.xlu1 %v5904_v35, %s16966_s29  ;;  %v6361_v10 = vmul.f32 %v17003_v3, %v17023_v48  ;;  %v6363_v53 = vmul.f32 %v17003_v3, %v17026_v44  ;;  %v13312_v4 = vsel %vm4490_vm3, %v4491_v29, %v4492_v54  ;;  %v4494_v17 = vrot.slane %v4440_v27, 2 }
 0x8d6   : > { %5945 = vrot.lane.b32.xlu0 %v5901_v60, %s16966_s29  ;;  %17028 = vst [vmem:[#allocation8_spill] sm:$0xff] %v13312_v4  ;;  %v4460_v42 = vmul.f32 %v17027_v38, %v12982_v12  ;;  %v5766_v58 = vrot.slane %v5658_v46, 2  ;;  %v5767_v35 = vrot.slane %v5660_v7, 2  ;;  %v5763_v60 = vrot.slane %v5657_v32, 2  ;;  %v13327_v32 = vld [vmem:[%s16167_s3 + $0xf] ss:$0 sm:$0xff] }
 0x8d7   : > { %v5764_v36 = vrot.slane %v5659_v52, 2  ;;  %v6406_v55 = vmul.f32 %v17021_v62, %v13070_v49  ;;  %v4495_v57 = vrot.slane %v4441_v24, 2  ;;  %v4547_v11 = vrot.slane %v4458_v9, 2 }
 0x8d8   : > { %v4461_v1 = vmul.f32 %v17027_v38, %v12999_v39  ;;  %v6408_v29 = vmul.f32 %v17021_v62, %v13078_v18  ;;  %v4548_v54 = vrot.slane %v4459_v13, 2  ;;  %v6465_v27 = vrot.slane %v6361_v10, 2  ;;  %v13336_v13 = vld [vmem:[%s16167_s3 + $0x18] ss:$0 sm:$0xff] }
 0x8d9   : > { %6651 = vrot.lane.b32.xlu1 %v6606_v33, %s16746_s11  ;;  %v6466_v46 = vrot.slane %v6363_v53, 2  ;;  %v6610_v7 = vrot.slane %v6406_v55, 2  ;;  %v4550_v52 = vrot.slane %v4460_v42, 2  ;;  %v5348_v24 = vmul.f32 %v12866_v61, %v13240_v56 }
 0x8da   : > { %6649 = vrot.lane.b32.xlu0 %v6603_v26, %s16746_s11  ;;  %v5350_v38 = vmul.f32 %v12866_v61, %v13243_v6  ;;  %v6611_v9 = vrot.slane %v6408_v29, 2  ;;  %v5768_v33 = vsel %vm4490_vm3, %v5766_v58, %v5767_v35  ;;  %v5765_v26 = vsel %vm4490_vm3, %v5763_v60, %v5764_v36 }
 0x8db   : > { %v5347_v10 = vmul.f32 %v12866_v61, %v17019_v0  ;;  %v5349_v53 = vmul.f32 %v12866_v61, %v17020_v23  ;;  %v4551_v42 = vrot.slane %v4461_v1, 2  ;;  %v13351_v29 = vmul.f32 %v13327_v32, %v17023_v48  ;;  %v13365_v1 = vld [vmem:[%s8754_s28 + $0x40] sm:$0xfc] }
 0x8dc   : > { %v13347_v55 = vsel %vm4490_vm3, %v6610_v7, %v6611_v9  ;;  %v13355_v36 = vmul.f32 %v13327_v32, %v17026_v44  ;;  %v13358_v58 = vsel %vm4490_vm3, %v4494_v17, %v4495_v57  ;;  %v13361_v35 = vsel %vm4490_vm3, %v4547_v11, %v4548_v54 }
 0x8dd   : > { %5811 = vrot.lane.b32.xlu1 %v5768_v33, %s16966_s29  ;;  %17029 = vst [vmem:[#allocation30_spill] sm:$0xff] %v13358_v58  ;;  %17030 = vst [vmem:[#allocation23_spill] sm:$0xff] %v13361_v35  ;;  %v6467_v60 = vsel %vm4490_vm3, %v6465_v27, %v6466_v46  ;;  %v13369_v7 = vmul.f32 %v13365_v1, %v13336_v13  ;;  %v5554_v9 = vrot.slane %v5348_v24, 2  ;;  %v5555_v33 = vrot.slane %v5350_v38, 2  ;;  %v17042_v58 = vld [vmem:[#allocation83_spill] sm:$0xff] }
 0x8de   : > { %5809 = vrot.lane.b32.xlu0 %v5765_v26, %s16966_s29  ;;  %v6052_v26 = vmul.f32 %v12944_v41, %v12991_v16  ;;  %v6054_v17 = vmul.f32 %v12944_v41, %v12994_v20  ;;  %v5551_v57 = vrot.slane %v5347_v10, 2  ;;  %v5552_v28 = vrot.slane %v5349_v53, 2  ;;  %v17032_v16 = vld [vmem:[#allocation118_spill] sm:$0xff] }
 0x8df   : > { %v6051_v11 = vmul.f32 %v12944_v41, %v12982_v12  ;;  %v6053_v54 = vmul.f32 %v12944_v41, %v12999_v39  ;;  %v13380_v27 = vsel %vm4490_vm3, %v4550_v52, %v4551_v42  ;;  %v6756_v46 = vmul.f32 %v17032_v16, %v13070_v49 }
 0x8e0   : > { %17031 = vst [vmem:[#allocation36_spill] sm:$0xff] %v13380_v27  ;;  %v4645_v20 = vrot.slane %v13351_v29, 2  ;;  %v4646_v24 = vrot.slane %v13355_v36, 2  ;;  %v6758_v12 = vmul.f32 %v17032_v16, %v13078_v18  ;;  %v6755_v39 = vmul.f32 %v17032_v16, %v12731_v30  ;;  %v13404_v30 = vld [vmem:[%s8754_s28 + $0x50] sm:$0x3] }
 0x8e1   : > { %6515 = vrot.lane.b32.xlu1 %v13211_v51, %s16746_s11  ;;  %v6757_v52 = vmul.f32 %v17032_v16, %v12734_v31  ;;  %v6056_v51 = vmul.f32 %v12944_v41, %v13070_v49  ;;  %v5556_v38 = vsel %vm4490_vm3, %v5554_v9, %v5555_v33  ;;  %v6256_v10 = vrot.slane %v6052_v26, 2 }
 0x8e2   : > { %6513 = vrot.lane.b32.xlu0 %v6467_v60, %s16746_s11  ;;  %v6257_v53 = vrot.slane %v6054_v17, 2  ;;  %v6058_v42 = vmul.f32 %v12944_v41, %v13078_v18  ;;  %v5553_v29 = vsel %vm4490_vm3, %v5551_v57, %v5552_v28  ;;  %v6253_v36 = vrot.slane %v6051_v11, 2 }
 0x8e3   : > { %v6254_v60 = vrot.slane %v6053_v54, 2  ;;  %v6262_v2 = vrot.slane %v6056_v51, 2  ;;  %v4748_v31 = vmul.f32 %v13404_v30, %v13336_v13  ;;  %v4595_v49 = vmul.f32 %v13365_v1, %v13327_v32 }
 0x8e4   : > { %v4596_v18 = vmul.f32 %v13404_v30, %v13327_v32  ;;  %v6263_v9 = vrot.slane %v6058_v42, 2  ;;  %v6958_v28 = vrot.slane %v6756_v46, 2  ;;  %v6959_v33 = vrot.slane %v6758_v12, 2  ;;  %v13439_v42 = vld [vmem:[%s8754_s28 + $0x80] sm:$0xfc] }
 0x8e5   : > { %5597 = vrot.lane.b32.xlu1 %v5556_v38, %s16966_s29  ;;  %v6955_v26 = vrot.slane %v6755_v39, 2  ;;  %v6956_v17 = vrot.slane %v6757_v52, 2  ;;  %v5308_v57 = vmul.f32 %v12868_v5, %v17024_v40  ;;  %v5310_v11 = vmul.f32 %v12868_v5, %v17025_v25 }
 0x8e6   : > { %5595 = vrot.lane.b32.xlu0 %v5553_v29, %s16966_s29  ;;  %v4749_v54 = vmul.f32 %v13289_v15, %v13336_v13  ;;  %v13419_v51 = vsel %vm4490_vm3, %v6262_v2, %v6263_v9  ;;  %v6258_v38 = vsel %vm4490_vm3, %v6256_v10, %v6257_v53  ;;  %v6255_v46 = vsel %vm4490_vm3, %v6253_v36, %v6254_v60  ;;  %v13444_v36 = vld [vmem:[%s8754_s28 + $0x90] sm:$0x3] }
 0x8e7   : > { %v5307_v12 = vmul.f32 %v13289_v15, %v12868_v5  ;;  %v5309_v40 = vmul.f32 %v13294_v22, %v12868_v5  ;;  %v4799_v25 = vrot.slane %v13369_v7, 2  ;;  %v4750_v2 = vmul.f32 %v13294_v22, %v13336_v13 }
 0x8e8   : > { %v4597_v39 = vmul.f32 %v13289_v15, %v13327_v32  ;;  %v4598_v52 = vmul.f32 %v13294_v22, %v13327_v32  ;;  %v6960_v10 = vsel %vm4490_vm3, %v6958_v28, %v6959_v33  ;;  %v6957_v53 = vsel %vm4490_vm3, %v6955_v26, %v6956_v17 }
 0x8e9   : > { %6301 = vrot.lane.b32.xlu1 %v6258_v38, %s16746_s11  ;;  %v4751_v29 = vmul.f32 %v13439_v42, %v13336_v13  ;;  %v4752_v7 = vmul.f32 %v13444_v36, %v13336_v13  ;;  %v5418_v60 = vrot.slane %v5308_v57, 2  ;;  %v5419_v9 = vrot.slane %v5310_v11, 2 }
 0x8ea   : > { %6299 = vrot.lane.b32.xlu0 %v6255_v46, %s16746_s11  ;;  %v13449_v38 = vsel %vm4490_vm3, %v4645_v20, %v4646_v24  ;;  %v4800_v46 = vrot.slane %v4748_v31, 2  ;;  %v5415_v63 = vrot.slane %v5307_v12, 2  ;;  %v5416_v28 = vrot.slane %v5309_v40, 2  ;;  %v17034_v12 = vld [vmem:[#allocation113_spill] sm:$0xff] }
 0x8eb   : > { %17033 = vst [vmem:[#allocation29_spill] sm:$0xff] %v13449_v38  ;;  %v6011_v33 = vmul.f32 %v16999_v47, %v17023_v48  ;;  %v6013_v26 = vmul.f32 %v16999_v47, %v17026_v44  ;;  %v4648_v17 = vrot.slane %v4595_v49, 2  ;;  %v4649_v27 = vrot.slane %v4596_v18, 2 }
 0x8ec   : > { %v4802_v57 = vrot.slane %v4749_v54, 2  ;;  %v4803_v11 = vrot.slane %v4750_v2, 2  ;;  %v4651_v35 = vrot.slane %v4597_v39, 2  ;;  %v4652_v20 = vrot.slane %v4598_v52, 2 }
 0x8ed   : > { %7005 = vrot.lane.b32.xlu1 %v6960_v10, %s16746_s11  ;;  %v4805_v24 = vrot.slane %v4751_v29, 2  ;;  %v4806_v31 = vrot.slane %v4752_v7, 2  ;;  %v6716_v40 = vmul.f32 %v17034_v12, %v12861_v34  ;;  %v6718_v48 = vmul.f32 %v17034_v12, %v12864_v50 }
 0x8ee   : > { %7003 = vrot.lane.b32.xlu0 %v6957_v53, %s16746_s11  ;;  %v6715_v44 = vmul.f32 %v13365_v1, %v17034_v12  ;;  %v6717_v10 = vmul.f32 %v13404_v30, %v17034_v12  ;;  %v5420_v49 = vsel %vm4490_vm3, %v5418_v60, %v5419_v9  ;;  %v5417_v18 = vsel %vm4490_vm3, %v5415_v63, %v5416_v28  ;;  %v7122_v9 = vld [vmem:[%s16171_s7 + $0x8] sm:$0xff] }
 0x8ef   : > { %v6117_v54 = vrot.slane %v6011_v33, 2  ;;  %v6118_v2 = vrot.slane %v6013_v26, 2  ;;  %v13470_v34 = vsel %vm4490_vm3, %v4799_v25, %v4800_v46  ;;  %v13473_v50 = vsel %vm4490_vm3, %v4648_v17, %v4649_v27  ;;  %v7126_v46 = vld [vmem:[%s16171_s7 + $0x28] sm:$0xff]  ;;  %v7124_v17 = vld [vmem:[%s16171_s7 + $0x18] sm:$0xff] }
 0x8f0   : > { %17035 = vst [vmem:[#allocation33_spill] sm:$0xff] %v13470_v34  ;;  %17036 = vst [vmem:[#allocation38_spill] sm:$0xff] %v13473_v50  ;;  %v13476_v39 = vsel %vm4490_vm3, %v4802_v57, %v4803_v11  ;;  %v4998_v52 = vmul.f32 %v12834_v8, %v13240_v56  ;;  %v5000_v63 = vmul.f32 %v12834_v8, %v13243_v6  ;;  %v6822_v25 = vrot.slane %v6716_v40, 2  ;;  %v7128_v57 = vld [vmem:[%s16171_s7 + $0x38] sm:$0xff]  ;;  %v13520_v11 = vld [vmem:[%s8754_s28 + $0xa0] sm:$0xfc] }
 0x8f1   : > { %5461 = vrot.lane.b32.xlu1 %v5420_v49, %s16966_s29  ;;  %17037 = vst [vmem:[#allocation52_spill] sm:$0xff] %v13476_v39  ;;  %v13483_v53 = vsel %vm4490_vm3, %v4651_v35, %v4652_v20  ;;  %v13486_v29 = vsel %vm4490_vm3, %v4805_v24, %v4806_v31  ;;  %v6823_v27 = vrot.slane %v6718_v48, 2  ;;  %v6819_v7 = vrot.slane %v6715_v44, 2  ;;  %v13527_v24 = vld [vmem:[%s8754_s28 + $0xb0] sm:$0x3]  ;;  %v7121_v49 = vld [vmem:[%s16171_s7] sm:$0xff] }
 0x8f2   : > { %5459 = vrot.lane.b32.xlu0 %v5417_v18, %s16966_s29  ;;  %17038 = vst [vmem:[#allocation16_spill] sm:$0xff] %v13483_v53  ;;  %17039 = vst [vmem:[#allocation54_spill] sm:$0xff] %v13486_v29  ;;  %v6820_v60 = vrot.slane %v6717_v10, 2  ;;  %v6119_v35 = vsel %vm4490_vm3, %v6117_v54, %v6118_v2  ;;  %v4997_v28 = vmul.f32 %v12834_v8, %v17019_v0  ;;  %v13513_v0 = vld [vmem:[%s8854_s12 + $0x88] sm:$0xfc]  ;;  %v5207_v40 = vrot.slane %v5000_v63, 2 }
 0x8f3   : > { %v4999_v33 = vmul.f32 %v12834_v8, %v17020_v23  ;;  %v13501_v26 = vmul.f32 %v13439_v42, %v13327_v32  ;;  %v13517_v23 = vmul.f32 %v13444_v36, %v13327_v32  ;;  %v13524_v20 = vmul.f32 %v13520_v11, %v13336_v13  ;;  %v13534_v48 = vld [vmem:[%s8854_s12 + $0x98] sm:$0x3]  ;;  %v7125_v18 = vld [vmem:[%s16171_s7 + $0x20] sm:$0xff]  ;;  %v7142_v53 = vld [vmem:[%s16171_s7 + $0xa8] sm:$0xff] }
 0x8f4   : > { %v13531_v31 = vmul.f32 %v13527_v24, %v13336_v13  ;;  %v13538_v44 = vmul.f32 %v12897_v43, %v13513_v0  ;;  %v7967_v10 = vpack.c.bf16 %v7126_v46, %v7122_v9  ;;  %v6824_v54 = vsel %vm4490_vm3, %v6822_v25, %v6823_v27  ;;  %v7123_v9 = vld [vmem:[%s16171_s7 + $0x10] sm:$0xff]  ;;  %v7132_v29 = vld [vmem:[%s16171_s7 + $0x58] sm:$0xff]  ;;  %v7129_v39 = vld [vmem:[%s16171_s7 + $0x40] sm:$0xff] }
 0x8f5   : > { %6165 = vrot.lane.b32.xlu1 %v13283_v14, %s16746_s11  ;;  %v5206_v14 = vrot.slane %v4998_v52, 2  ;;  %v6821_v2 = vsel %vm4490_vm3, %v6819_v7, %v6820_v60  ;;  %v13550_v52 = vmul.f32 %v12897_v43, %v13534_v48  ;;  %v8031_v63 = vpack.c.bf16 %v7128_v57, %v7124_v17  ;;  %v7127_v46 = vld [vmem:[%s16171_s7 + $0x30] sm:$0xff]  ;;  %v17040_v7 = vld [vmem:[#allocation100_spill] sm:$0xff]  ;;  %v17041_v17 = vld [vmem:[#allocation99_spill] sm:$0xff] }
 0x8f6   : > { %6163 = vrot.lane.b32.xlu0 %v6119_v35, %s16746_s11  ;;  %v7130_v35 = vld [vmem:[%s16171_s7 + $0x48] sm:$0xff]  ;;  %v5203_v25 = vrot.slane %v4997_v28, 2  ;;  %v5204_v27 = vrot.slane %v4999_v33, 2  ;;  %v13563_v60 = vmul.f32 %v12897_v43, %v17040_v7  ;;  %v13567_v57 = vmul.f32 %v12897_v43, %v17041_v17  ;;  %7968 = vmatprep.subr.bf16.mxu0 %v7967_v10  ;;  %v7136_v28 = vld [vmem:[%s16171_s7 + $0x78] sm:$0xff] }
 0x8f7   : > { %v4654_v33 = vrot.slane %v13501_v26, 2  ;;  %v4655_v10 = vrot.slane %v13517_v23, 2  ;;  %v13584_v7 = vmul.f32 %v13520_v11, %v13327_v32  ;;  %v7969_v17 = vpack.c.bf16 %v7125_v18, %v7121_v49  ;;  %8032 = vmatprep.subr.bf16.mxu1 %v8031_v63  ;;  %v7133_v49 = vld [vmem:[%s16171_s7 + $0x60] sm:$0xff]  ;;  %v7131_v18 = vld [vmem:[%s16171_s7 + $0x50] sm:$0xff] }
 0x8f8   : > { %v5208_v34 = vsel %vm4490_vm3, %v5206_v14, %v5207_v40  ;;  %v13596_v26 = vmul.f32 %v13592_v45, %v17021_v62  ;;  %v8033_v23 = vpack.c.bf16 %v7127_v46, %v7123_v9  ;;  %v7135_v14 = vld [vmem:[%s16171_s7 + $0x70] sm:$0xff]  ;;  %v5909_v40 = vrot.slane %v13550_v52, 2  ;;  %v7138_v46 = vld [vmem:[%s16171_s7 + $0x88] sm:$0xff] }
 0x8f9   : > { %6869 = vrot.lane.b32.xlu1 %v6824_v54, %s16746_s11  ;;  %v5908_v54 = vrot.slane %v13538_v44, 2  ;;  %v13609_v44 = vld [vmem:[%s8854_s12 + $0x50] sm:$0x3]  ;;  %7970 = vmatpush1.bf16.msra.mxu0 %v7969_v17  ;;  %v7971_v63 = vpack.c.bf16 %v7134_v59, %v7130_v35  ;;  %v8035_v9 = vpack.c.bf16 %v7136_v28, %v7132_v29  ;;  %v5205_v52 = vsel %vm4490_vm3, %v5203_v25, %v5204_v27  ;;  %v7140_v59 = vld [vmem:[%s16171_s7 + $0x98] sm:$0xff] }
 0x8fa   : > { %6867 = vrot.lane.b32.xlu0 %v6821_v2, %s16746_s11  ;;  %v13613_v2 = vmul.f32 %v13609_v44, %v17021_v62  ;;  %v5905_v50 = vrot.slane %v13563_v60, 2  ;;  %v5906_v38 = vrot.slane %v13567_v57, 2  ;;  %v13626_v4 = vmul.f32 %v12899_v37, %v17042_v58  ;;  %8034 = vmatpush1.bf16.msra.mxu1 %v8033_v23  ;;  %v7144_v29 = vld [vmem:[%s16171_s7 + $0xb8] sm:$0xff]  ;;  %v7137_v60 = vld [vmem:[%s16171_s7 + $0x80] sm:$0xff]  ;;  %v7139_v23 = vld [vmem:[%s16171_s7 + $0x90] sm:$0xff] }
 0x8fb   : > { %v13637_v35 = vld [vmem:[%s8754_s28 + $0x98] sm:$0x3]  ;;  %v7973_v58 = vpack.c.bf16 %v7133_v49, %v7129_v39  ;;  %v8037_v27 = vpack.c.bf16 %v7135_v14, %v7131_v18  ;;  %v7141_v57 = vld [vmem:[%s16171_s7 + $0xa0] sm:$0xff]  ;;  %v13651_v28 = vsel %vm4490_vm3, %v4654_v33, %v4655_v10  ;;  %v13655_v17 = vmul.f32 %v13527_v24, %v13327_v32  ;;  %7972 = vmatprep.subr.bf16.mxu0 %v7971_v63  ;;  %v7143_v49 = vld [vmem:[%s16171_s7 + $0xb0] sm:$0xff] }
 0x8fc   : > { %v13641_v25 = vmul.f32 %v13637_v35, %v12899_v37  ;;  %17043 = vst [vmem:[#allocation47_spill] sm:$0xff] %v13651_v28  ;;  %8036 = vmatprep.subr.bf16.mxu1 %v8035_v9  ;;  %v7975_v39 = vpack.c.bf16 %v7142_v53, %v7138_v46  ;;  %v7146_v33 = vld [vmem:[%s16171_s7 + $0xc8] sm:$0xff]  ;;  %v6608_v10 = vrot.slane %v13613_v2, 2  ;;  %v13669_v32 = vmul.f32 %v13439_v42, %v12899_v37  ;;  %v7148_v14 = vld [vmem:[%s16171_s7 + $0xd8] sm:$0xff]  ;;  %v8455_v46 = vld [vmem:[%s8754_s28 + $0xc0] sm:$0xfc] }
 0x8fd   : > { %5247 = vrot.lane.b32.xlu1 %v5208_v34, %s16966_s29  ;;  %v6607_v34 = vrot.slane %v13596_v26, 2  ;;  %v13673_v53 = vmul.f32 %v13444_v36, %v12899_v37  ;;  %7974 = vmatpush1.bf16.msra.mxu0 %v7973_v58  ;;  %v8039_v26 = vpack.c.bf16 %v7144_v29, %v7140_v59  ;;  %v7150_v18 = vld [vmem:[%s16171_s7 + $0xe8] sm:$0xff]  ;;  %v7152_v2 = vld [vmem:[%s16171_s7 + $0xf8] sm:$0xff]  ;;  %v5910_v63 = vsel %vm4490_vm3, %v5908_v54, %v5909_v40  ;;  %v8456_v58 = vld [vmem:[%s8754_s28 + $0xd0] sm:$0x3] }
 0x8fe   : > { %5245 = vrot.lane.b32.xlu0 %v5205_v52, %s16966_s29  ;;  %v5907_v9 = vsel %vm4490_vm3, %v5905_v50, %v5906_v38  ;;  %v13688_v52 = vmul.f32 %v8455_v46, %v13336_v13  ;;  %8038 = vmatpush1.bf16.msra.mxu1 %v8037_v27  ;;  %v5772_v59 = vrot.slane %v13626_v4, 2  ;;  %v5773_v29 = vrot.slane %v13641_v25, 2  ;;  %v7145_v50 = vld [vmem:[%s16171_s7 + $0xc0] sm:$0xff]  ;;  %v13705_v40 = vld [vmem:[%s8754_s28 + $0x48] sm:$0xfc] }
 0x8ff   : > { %7976 = vmatprep.subr.bf16.mxu0 %v7975_v39  ;;  %v13696_v28 = vmul.f32 %v8456_v58, %v13336_v13  ;;  %v7977_v38 = vpack.c.bf16 %v7141_v57, %v7137_v60  ;;  %v7149_v54 = vld [vmem:[%s16171_s7 + $0xe0] sm:$0xff]  ;;  %v13709_v4 = vmul.f32 %v13705_v40, %v17003_v3  ;;  %8040 = vmatprep.subr.bf16.mxu1 %v8039_v26  ;;  %v7147_v60 = vld [vmem:[%s16171_s7 + $0xd0] sm:$0xff]  ;;  %v7154_v39 = vld [vmem:[%s16171_s7 + $0x108] sm:$0xff]  ;;  %v4809_v58 = vrot.slane %v13531_v31, 2 }
 0x900   : > { %v8041_v25 = vpack.c.bf16 %v7143_v49, %v7139_v23  ;;  %v7979_v13 = vpack.c.bf16 %v7150_v18, %v7146_v33  ;;  %v8043_v27 = vpack.c.bf16 %v7152_v2, %v7148_v14  ;;  %v7151_v57 = vld [vmem:[%s16171_s7 + $0xf0] sm:$0xff]  ;;  %v5770_v23 = vrot.slane %v13673_v53, 2  ;;  %v13724_v49 = vld [vmem:[%s8754_s28 + $0x58] sm:$0x3]  ;;  %v7158_v26 = vld [vmem:[%s16171_s7 + $0x128] sm:$0xff] }
 0x901   : > { %5951 = vrot.lane.b32.xlu1 %v5910_v63, %s16966_s29  ;;  %v6609_v63 = vsel %vm4490_vm3, %v6607_v34, %v6608_v10  ;;  %v13728_v33 = vmul.f32 %v13724_v49, %v17003_v3  ;;  %7978 = vmatpush1.bf16.msra.mxu0 %v7977_v38  ;;  %v7156_v18 = vld [vmem:[%s16171_s7 + $0x118] sm:$0xff]  ;;  %v13741_v10 = vmul.f32 %v13365_v1, %v17003_v3  ;;  %v4808_v53 = vrot.slane %v13524_v20, 2  ;;  %v7155_v31 = vld [vmem:[%s16171_s7 + $0x110] sm:$0xff] }
 0x902   : > { %5949 = vrot.lane.b32.xlu0 %v5907_v9, %s16966_s29  ;;  %v5769_v9 = vrot.slane %v13669_v32, 2  ;;  %v7160_v34 = vld [vmem:[%s16171_s7 + $0x138] sm:$0xff]  ;;  %v13745_v32 = vmul.f32 %v13404_v30, %v17003_v3  ;;  %8042 = vmatpush1.bf16.msra.mxu1 %v8041_v25  ;;  %v7981_v14 = vpack.c.bf16 %v7149_v54, %v7145_v50  ;;  %v13753_v2 = vmul.f32 %v12866_v61, %v13513_v0  ;;  %v7153_v25 = vld [vmem:[%s16171_s7 + $0x100] sm:$0xff] }
 0x903   : > { %7980 = vmatprep.subr.bf16.mxu0 %v7979_v13  ;;  %v13757_v46 = vmul.f32 %v12866_v61, %v13534_v48  ;;  %v8045_v38 = vpack.c.bf16 %v7151_v57, %v7147_v60  ;;  %v4657_v20 = vrot.slane %v13584_v7, 2  ;;  %v4658_v50 = vrot.slane %v13655_v17, 2  ;;  %8044 = vmatprep.subr.bf16.mxu1 %v8043_v27  ;;  %v7157_v13 = vld [vmem:[%s16171_s7 + $0x120] sm:$0xff] }
 0x904   : > { %v7983_v54 = vpack.c.bf16 %v7158_v26, %v7154_v39  ;;  %v5774_v27 = vsel %vm4490_vm3, %v5772_v59, %v5773_v29  ;;  %v5771_v60 = vsel %vm4490_vm3, %v5769_v9, %v5770_v23  ;;  %v6474_v57 = vrot.slane %v13709_v4, 2  ;;  %v7162_v26 = vld [vmem:[%s16171_s7 + $0x148] sm:$0xff]  ;;  %v13791_v4 = vld [vmem:[%s8854_s12 + $0x80] sm:$0xfc]  ;;  %v13798_v23 = vld [vmem:[%s8854_s12 + $0x90] sm:$0x3] }
 0x905   : > { %6655 = vrot.lane.b32.xlu1 %v13347_v55, %s16746_s11  ;;  %v8047_v55 = vpack.c.bf16 %v7160_v34, %v7156_v18  ;;  %v6475_v39 = vrot.slane %v13728_v33, 2  ;;  %7982 = vmatpush1.bf16.msra.mxu0 %v7981_v14  ;;  %v7166_v18 = vld [vmem:[%s16171_s7 + $0x168] sm:$0xff]  ;;  %v6471_v59 = vrot.slane %v13741_v10, 2  ;;  %v6472_v29 = vrot.slane %v13745_v32, 2  ;;  %v7164_v34 = vld [vmem:[%s16171_s7 + $0x158] sm:$0xff] }
 0x906   : > { %6653 = vrot.lane.b32.xlu0 %v6609_v63, %s16746_s11  ;;  %v7159_v63 = vld [vmem:[%s16171_s7 + $0x130] sm:$0xff]  ;;  %v13795_v9 = vmul.f32 %v13791_v4, %v12866_v61  ;;  %v5353_v33 = vmul.f32 %v13798_v23, %v12866_v61  ;;  %8046 = vmatpush1.bf16.msra.mxu1 %v8045_v38  ;;  %v7168_v10 = vld [vmem:[%s16171_s7 + $0x178] sm:$0xff]  ;;  %v5560_v32 = vrot.slane %v13753_v2, 2  ;;  %v5561_v14 = vrot.slane %v13757_v46, 2  ;;  %v7165_v2 = vld [vmem:[%s16171_s7 + $0x160] sm:$0xff] }
 0x907   : > { %v13773_v17 = vpop.permute.xlu1 %5099  ;;  %7984 = vmatprep.subr.bf16.mxu0 %v7983_v54  ;;  %v4812_v38 = vrot.slane %v13696_v28, 2  ;;  %v13816_v54 = vmul.f32 %v13592_v45, %v12944_v41  ;;  %8048 = vmatprep.subr.bf16.mxu1 %v8047_v55  ;;  %v8049_v19 = vpack.c.bf16 %v7159_v63, %v7155_v31  ;;  %v7987_v21 = vpack.c.bf16 %v7166_v18, %v7162_v26  ;;  %v7163_v31 = vld [vmem:[%s16171_s7 + $0x150] sm:$0xff]  ;;  %v7174_v26 = vld [vmem:[%s16171_s7 + $0x1a8] sm:$0xff]  ;;  %v7172_v18 = vld [vmem:[%s16171_s7 + $0x198] sm:$0xff] }
 0x908   : > { %v13771_v7 = vpop.permute.xlu0 %5097  ;;  %17045 = vst [vmem:[#allocation49_spill] sm:$0xff] %v13773_v17  ;;  %v7985_v17 = vpack.c.bf16 %v7157_v13, %v7153_v25  ;;  %v13829_v28 = vsel %vm4490_vm3, %v4808_v53, %v4809_v58  ;;  %v13833_v55 = vmul.f32 %v13609_v44, %v12944_v41  ;;  %v13836_v25 = vsel %vm4490_vm3, %v4657_v20, %v4658_v50  ;;  %v7170_v53 = vld [vmem:[%s16171_s7 + $0x188] sm:$0xff] }
 0x909   : > { %17044 = vst [vmem:[#allocation62_spill] sm:$0xff] %v13771_v7  ;;  %5815 = vrot.lane.b32.xlu1 %v5774_v27, %s16966_s29  ;;  %v4811_v7 = vrot.slane %v13688_v52, 2  ;;  %v7161_v27 = vld [vmem:[%s16171_s7 + $0x140] sm:$0xff]  ;;  %v8051_v13 = vpack.c.bf16 %v7168_v10, %v7164_v34  ;;  %v6476_v58 = vsel %vm4490_vm3, %v6474_v57, %v6475_v39  ;;  %v6473_v63 = vsel %vm4490_vm3, %v6471_v59, %v6472_v29  ;;  %v7176_v34 = vld [vmem:[%s16171_s7 + $0x1b8] sm:$0xff]  ;;  %v13877_v29 = vld [vmem:[%s16169_s5 + $0xf] ss:$0 sm:$0xff] }
 0x90a   : > { %5813 = vrot.lane.b32.xlu0 %v5771_v60, %s16966_s29  ;;  %v7167_v60 = vld [vmem:[%s16171_s7 + $0x170] sm:$0xff]  ;;  %v5557_v20 = vrot.slane %v13795_v9, 2  ;;  %v5558_v50 = vrot.slane %v5353_v33, 2  ;;  %7986 = vmatpush1.bf16.msra.mxu0 %v7985_v17  ;;  %v5562_v17 = vsel %vm4490_vm3, %v5560_v32, %v5561_v14  ;;  %v13867_v57 = vmul.f32 %v17032_v16, %v13240_v56  ;;  %v7169_v56 = vld [vmem:[%s16171_s7 + $0x180] sm:$0xff] }
 0x90b   : > { %v13826_v52 = vpop.permute.xlu1 %5103  ;;  %8050 = vmatpush1.bf16.msra.mxu1 %v8049_v19  ;;  %v13863_v19 = vsel %vm4490_vm3, %v4811_v7, %v4812_v38  ;;  %v6259_v39 = vrot.slane %v13816_v54, 2  ;;  %v13872_v59 = vmul.f32 %v17032_v16, %v13243_v6  ;;  %7988 = vmatprep.subr.bf16.mxu0 %v7987_v21  ;;  %v7989_v7 = vpack.c.bf16 %v7165_v2, %v7161_v27  ;;  %v7173_v6 = vld [vmem:[%s16171_s7 + $0x1a0] sm:$0xff]  ;;  %v7171_v27 = vld [vmem:[%s16171_s7 + $0x190] sm:$0xff] }
 0x90c   : > { %v13824_v46 = vpop.permute.xlu0 %5101  ;;  %17047 = vst [vmem:[#allocation104_spill] sm:$0xff] %v13826_v52  ;;  %17048 = vst [vmem:[#allocation25_spill] sm:$0xff] %v13863_v19  ;;  %8052 = vmatprep.subr.bf16.mxu1 %v8051_v13  ;;  %v8053_v9 = vpack.c.bf16 %v7167_v60, %v7163_v31  ;;  %v6260_v32 = vrot.slane %v13833_v55, 2  ;;  %v13891_v21 = vld [vmem:[%s8854_s12 + $0x60] sm:$0xfc]  ;;  %v7991_v38 = vpack.c.bf16 %v7174_v26, %v7170_v53  ;;  %v7175_v2 = vld [vmem:[%s16171_s7 + $0x1b0] sm:$0xff] }
 0x90d   : > { %17046 = vst [vmem:[#allocation103_spill] sm:$0xff] %v13824_v46  ;;  %6519 = vrot.lane.b32.xlu1 %v6476_v58, %s16746_s11  ;;  %v13895_v14 = vmul.f32 %v13891_v21, %v17032_v16  ;;  %v8055_v54 = vpack.c.bf16 %v7176_v34, %v7172_v18  ;;  %v7178_v55 = vld [vmem:[%s16171_s7 + $0x1c8] sm:$0xff]  ;;  %v5559_v13 = vsel %vm4490_vm3, %v5557_v20, %v5558_v50  ;;  %v13908_v31 = vld [vmem:[%s8854_s12 + $0x70] sm:$0x3]  ;;  %v7180_v20 = vld [vmem:[%s16171_s7 + $0x1d8] sm:$0xff] }
 0x90e   : > { %6517 = vrot.lane.b32.xlu0 %v6473_v63, %s16746_s11  ;;  %v13912_v60 = vmul.f32 %v13908_v31, %v17032_v16  ;;  %v13915_v53 = vld [vmem:[%s8754_s28 + $0x88] sm:$0xfc]  ;;  %7990 = vmatpush1.bf16.msra.mxu0 %v7989_v7  ;;  %v7184_v50 = vld [vmem:[%s16171_s7 + $0x1f8] sm:$0xff]  ;;  %v8464_v26 = vld [vmem:[%s8854_s12 + $0x20] sm:$0xfc]  ;;  %v6261_v46 = vsel %vm4490_vm3, %v6259_v39, %v6260_v32  ;;  %v13976_v32 = vmul.f32 %v13439_v42, %v12868_v5 }
 0x90f   : > { %v13887_v10 = vpop.permute.xlu1 %5107  ;;  %v13919_v58 = vmul.f32 %v13915_v53, %v12868_v5  ;;  %8054 = vmatpush1.bf16.msra.mxu1 %v8053_v9  ;;  %v7182_v63 = vld [vmem:[%s16171_s7 + $0x1e8] sm:$0xff]  ;;  %v13934_v18 = vmul.f32 %v8464_v26, %v13877_v29  ;;  %v8465_v34 = vld [vmem:[%s8854_s12 + $0x30] sm:$0x3]  ;;  %v13942_v9 = vmul.f32 %v13637_v35, %v12868_v5  ;;  %7992 = vmatprep.subr.bf16.mxu0 %v7991_v38  ;;  %v7181_v35 = vld [vmem:[%s16171_s7 + $0x1e0] sm:$0xff]  ;;  %v6961_v52 = vrot.slane %v13895_v14, 2 }
 0x910   : > { %v13885_v33 = vpop.permute.xlu0 %5105  ;;  %17050 = vst [vmem:[#allocation105_spill] sm:$0xff] %v13887_v10  ;;  %v13938_v7 = vmul.f32 %v8465_v34, %v13877_v29  ;;  %v6965_v10 = vrot.slane %v13872_v59, 2  ;;  %8056 = vmatprep.subr.bf16.mxu1 %v8055_v54  ;;  %v8057_v26 = vpack.c.bf16 %v7175_v2, %v7171_v27  ;;  %v7177_v34 = vld [vmem:[%s16171_s7 + $0x1c0] sm:$0xff]  ;;  %v7995_v38 = vpack.c.bf16 %v7182_v63, %v7178_v55  ;;  %v7186_v27 = vld [vmem:[%s16171_s7 + $0x208] sm:$0xff]  ;;  %v14141_v19 = vld [vmem:[%s8854_s12 + $0xb8] sm:$0x3] }
 0x911   : > { %17049 = vst [vmem:[#allocation32_spill] sm:$0xff] %v13885_v33  ;;  %5601 = vrot.lane.b32.xlu1 %v5562_v17, %s16966_s29  ;;  %v6964_v33 = vrot.slane %v13867_v57, 2  ;;  %v13949_v17 = vld [vmem:[%s16169_s5 + $0x18] ss:$0 sm:$0xff]  ;;  %v8059_v54 = vpack.c.bf16 %v7184_v50, %v7180_v20  ;;  %v6962_v2 = vrot.slane %v13912_v60, 2  ;;  %v5424_v39 = vrot.slane %v13919_v58, 2 }
 0x912   : > { %5599 = vrot.lane.b32.xlu0 %v5559_v13, %s16966_s29  ;;  %v7993_v13 = vpack.c.bf16 %v7173_v6, %v7169_v56  ;;  %v7179_v56 = vld [vmem:[%s16171_s7 + $0x1d0] sm:$0xff]  ;;  %v13980_v14 = vmul.f32 %v13444_v36, %v12868_v5  ;;  %v7190_v55 = vld [vmem:[%s16171_s7 + $0x228] sm:$0xff]  ;;  %v7188_v60 = vld [vmem:[%s16171_s7 + $0x218] sm:$0xff]  ;;  %v5425_v42 = vrot.slane %v13942_v9, 2  ;;  %v13997_v36 = vmul.f32 %v13705_v40, %v16999_v47  ;;  %17059 = vst [vmem:[#allocation50_spill] sm:$0xff] %v14141_v19 }
 0x913   : > { %v13959_v59 = vpop.permute.xlu1 %5111  ;;  %v7183_v6 = vld [vmem:[%s16171_s7 + $0x1f0] sm:$0xff]  ;;  %8058 = vmatpush1.bf16.msra.mxu1 %v8057_v26  ;;  %v7192_v58 = vld [vmem:[%s16171_s7 + $0x238] sm:$0xff]  ;;  %v14001_v63 = vmul.f32 %v13724_v49, %v16999_v47  ;;  %v14005_v20 = vmul.f32 %v13365_v1, %v16999_v47  ;;  %v7185_v40 = vld [vmem:[%s16171_s7 + $0x200] sm:$0xff]  ;;  %v6963_v50 = vsel %vm4490_vm3, %v6961_v52, %v6962_v2  ;;  %v14053_v52 = vmul.f32 %v13609_v44, %v13949_v17 }
 0x914   : > { %v13957_v57 = vpop.permute.xlu0 %5109  ;;  %17052 = vst [vmem:[#allocation43_spill] sm:$0xff] %v13959_v59  ;;  %7994 = vmatpush1.bf16.msra.mxu0 %v7993_v13  ;;  %8060 = vmatprep.subr.bf16.mxu1 %v8059_v54  ;;  %v8061_v9 = vpack.c.bf16 %v7183_v6, %v7179_v56  ;;  %v7189_v49 = vld [vmem:[%s16171_s7 + $0x220] sm:$0xff]  ;;  %v7191_v54 = vld [vmem:[%s16171_s7 + $0x230] sm:$0xff]  ;;  %v7194_v56 = vld [vmem:[%s16171_s7 + $0x248] sm:$0xff]  ;;  %v6966_v6 = vsel %vm4490_vm3, %v6964_v33, %v6965_v10  ;;  %v6126_v2 = vrot.slane %v13997_v36, 2 }
 0x915   : > { %17051 = vst [vmem:[#allocation107_spill] sm:$0xff] %v13957_v57  ;;  %6305 = vrot.lane.b32.xlu1 %v13419_v51, %s16746_s11  ;;  %v14010_v51 = vmul.f32 %v13404_v30, %v16999_v47  ;;  %7996 = vmatprep.subr.bf16.mxu0 %v7995_v38  ;;  %v14025_v30 = vmul.f32 %v13592_v45, %v13949_v17  ;;  %v7187_v38 = vld [vmem:[%s16171_s7 + $0x210] sm:$0xff]  ;;  %v7200_v33 = vld [vmem:[%s16171_s7 + $0x278] sm:$0xff]  ;;  %v14138_v59 = vld [vmem:[%s8854_s12 + $0xa8] sm:$0xfc] }
 0x916   : > { %6303 = vrot.lane.b32.xlu0 %v6261_v46, %s16746_s11  ;;  %v7997_v46 = vpack.c.bf16 %v7181_v35, %v7177_v34  ;;  %v7999_v34 = vpack.c.bf16 %v7190_v55, %v7186_v27  ;;  %v8063_v35 = vpack.c.bf16 %v7192_v58, %v7188_v60  ;;  %v5421_v27 = vrot.slane %v13976_v32, 2  ;;  %v7198_v60 = vld [vmem:[%s16171_s7 + $0x268] sm:$0xff]  ;;  %v7196_v58 = vld [vmem:[%s16171_s7 + $0x258] sm:$0xff] }
 0x917   : > { %v14020_v13 = vpop.permute.xlu1 %5115  ;;  %v5422_v55 = vrot.slane %v13980_v14, 2  ;;  %8062 = vmatpush1.bf16.msra.mxu1 %v8061_v9  ;;  %v5426_v10 = vsel %vm4490_vm3, %v5424_v39, %v5425_v42  ;;  %v6127_v32 = vrot.slane %v14001_v63, 2  ;;  %v6123_v14 = vrot.slane %v14005_v20, 2  ;;  %v14061_v9 = vld [vmem:[%s8754_s28 + $0x68] sm:$0xfc] }
 0x918   : > { %v14018_v1 = vpop.permute.xlu0 %5113  ;;  %17054 = vst [vmem:[#allocation27_spill] sm:$0xff] %v14020_v13  ;;  %7998 = vmatpush1.bf16.msra.mxu0 %v7997_v46  ;;  %v6124_v46 = vrot.slane %v14010_v51, 2  ;;  %8064 = vmatprep.subr.bf16.mxu1 %v8063_v35  ;;  %v14072_v42 = vld [vmem:[%s8754_s28 + $0x78] sm:$0x3]  ;;  %v8065_v63 = vpack.c.bf16 %v7191_v54, %v7187_v38  ;;  %v8003_v20 = vpack.c.bf16 %v7198_v60, %v7194_v56  ;;  %v7199_v56 = vld [vmem:[%s16171_s7 + $0x270] sm:$0xff] }
 0x919   : > { %17053 = vst [vmem:[#allocation48_spill] sm:$0xff] %v14018_v1  ;;  %7009 = vrot.lane.b32.xlu1 %v6966_v6, %s16746_s11  ;;  %v14065_v6 = vmul.f32 %v14061_v9, %v17034_v12  ;;  %8000 = vmatprep.subr.bf16.mxu0 %v7999_v34  ;;  %v14076_v36 = vmul.f32 %v14072_v42, %v17034_v12  ;;  %v7193_v1 = vld [vmem:[%s16171_s7 + $0x240] sm:$0xff] }
 0x91a   : > { %7007 = vrot.lane.b32.xlu0 %v6963_v50, %s16746_s11  ;;  %v8001_v50 = vpack.c.bf16 %v7189_v49, %v7185_v40  ;;  %v8067_v51 = vpack.c.bf16 %v7200_v33, %v7196_v58  ;;  %v7197_v40 = vld [vmem:[%s16171_s7 + $0x260] sm:$0xff]  ;;  %v7195_v49 = vld [vmem:[%s16171_s7 + $0x250] sm:$0xff]  ;;  %v5423_v34 = vsel %vm4490_vm3, %v5421_v27, %v5422_v55  ;;  %v14090_v35 = vmul.f32 %v13289_v15, %v17034_v12  ;;  %v7202_v27 = vld [vmem:[%s16171_s7 + $0x288] sm:$0xff] }
 0x91b   : > { %v14069_v39 = vpop.permute.xlu1 %5235  ;;  %v14094_v38 = vmul.f32 %v13294_v22, %v17034_v12  ;;  %v14098_v54 = vmul.f32 %v12834_v8, %v13513_v0  ;;  %v7206_v15 = vld [vmem:[%s16171_s7 + $0x2a8] sm:$0xff]  ;;  %v4855_v22 = vrot.slane %v14025_v30, 2  ;;  %v14114_v0 = vmul.f32 %v12834_v8, %v13534_v48  ;;  %v7204_v30 = vld [vmem:[%s16171_s7 + $0x298] sm:$0xff]  ;;  %8066 = vmatpush1.bf16.msra.mxu1 %v8065_v63  ;;  %v7205_v63 = vld [vmem:[%s16171_s7 + $0x2a0] sm:$0xff] }
 0x91c   : > { %v14067_v26 = vpop.permute.xlu0 %5233  ;;  %17056 = vst [vmem:[#allocation55_spill] sm:$0xff] %v14069_v39  ;;  %8002 = vmatpush1.bf16.msra.mxu0 %v8001_v50  ;;  %v14118_v55 = vmul.f32 %v13791_v4, %v12834_v8  ;;  %v5003_v60 = vmul.f32 %v13798_v23, %v12834_v8  ;;  %v7208_v58 = vld [vmem:[%s16171_s7 + $0x2b8] sm:$0xff]  ;;  %v4856_v33 = vrot.slane %v14053_v52, 2  ;;  %v6128_v48 = vsel %vm4490_vm3, %v6126_v2, %v6127_v32  ;;  %v7201_v32 = vld [vmem:[%s16171_s7 + $0x280] sm:$0xff] }
 0x91d   : > { %17055 = vst [vmem:[#allocation64_spill] sm:$0xff] %v14067_v26  ;;  %5465 = vrot.lane.b32.xlu1 %v5426_v10, %s16966_s29  ;;  %v6125_v10 = vsel %vm4490_vm3, %v6123_v14, %v6124_v46  ;;  %v6828_v50 = vrot.slane %v14065_v6, 2  ;;  %8004 = vmatprep.subr.bf16.mxu0 %v8003_v20  ;;  %v6829_v57 = vrot.slane %v14076_v36, 2  ;;  %v8005_v52 = vpack.c.bf16 %v7197_v40, %v7193_v1  ;;  %v7203_v1 = vld [vmem:[%s16171_s7 + $0x290] sm:$0xff] }
 0x91e   : > { %5463 = vrot.lane.b32.xlu0 %v5423_v34, %s16966_s29  ;;  %8068 = vmatprep.subr.bf16.mxu1 %v8067_v51  ;;  %v8069_v26 = vpack.c.bf16 %v7199_v56, %v7195_v49  ;;  %v8007_v2 = vpack.c.bf16 %v7206_v15, %v7202_v27  ;;  %v6825_v14 = vrot.slane %v14090_v35, 2  ;;  %v6826_v46 = vrot.slane %v14094_v38, 2  ;;  %v7207_v20 = vld [vmem:[%s16171_s7 + $0x2b0] sm:$0xff]  ;;  %v7210_v38 = vld [vmem:[%s16171_s7 + $0x2c8] sm:$0xff] }
 0x91f   : > { %v14134_v13 = vpop.permute.xlu1 %5589  ;;  %v5212_v6 = vrot.slane %v14098_v54, 2  ;;  %v8071_v36 = vpack.c.bf16 %v7208_v58, %v7204_v30  ;;  %v5213_v51 = vrot.slane %v14114_v0, 2  ;;  %v5209_v40 = vrot.slane %v14118_v55, 2  ;;  %v7214_v54 = vld [vmem:[%s16171_s7 + $0x2e8] sm:$0xff]  ;;  %v14184_v55 = vld [vmem:[%s8854_s12 + $0xa0] sm:$0xfc] }
 0x920   : > { %v14132_v34 = vpop.permute.xlu0 %5587  ;;  %17058 = vst [vmem:[#allocation109_spill] sm:$0xff] %v14134_v13  ;;  %v5210_v49 = vrot.slane %v5003_v60, 2  ;;  %v14164_v35 = vmul.f32 %v12897_v43, %v14138_v59  ;;  %v17060_v56 = vrot.slane %v13938_v7, 2  ;;  %v17061_v27 = vrot.slane %v13934_v18, 2  ;;  %8006 = vmatpush1.bf16.msra.mxu0 %v8005_v52  ;;  %8070 = vmatpush1.bf16.msra.mxu1 %v8069_v26  ;;  %v7212_v7 = vld [vmem:[%s16171_s7 + $0x2d8] sm:$0xff] }
 0x921   : > { %17057 = vst [vmem:[#allocation106_spill] sm:$0xff] %v14132_v34  ;;  %6169 = vrot.lane.b32.xlu1 %v6128_v48, %s16746_s11  ;;  %v14181_v0 = vmul.f32 %v12897_v43, %v14141_v19  ;;  %v14188_v60 = vmul.f32 %v14184_v55, %v12897_v43  ;;  %v7216_v18 = vld [vmem:[%s16171_s7 + $0x2f8] sm:$0xff]  ;;  %v14201_v48 = vld [vmem:[%s8854_s12 + $0xb0] sm:$0x3]  ;;  %8008 = vmatprep.subr.bf16.mxu0 %v8007_v2  ;;  %v7213_v2 = vld [vmem:[%s16171_s7 + $0x2e0] sm:$0xff] }
 0x922   : > { %6167 = vrot.lane.b32.xlu0 %v6125_v10, %s16746_s11  ;;  %v14177_v15 = vsel %vm4490_vm3, %v17061_v27, %v17060_v56  ;;  %v14205_v10 = vmul.f32 %v14201_v48, %v12897_v43  ;;  %8072 = vmatprep.subr.bf16.mxu1 %v8071_v36  ;;  %v8009_v26 = vpack.c.bf16 %v7205_v63, %v7201_v32 }
 0x923   : > { %v14198_v58 = vpop.permute.xlu1 %5453  ;;  %v8073_v52 = vpack.c.bf16 %v7207_v20, %v7203_v1  ;;  %v14208_v56 = vsel %vm4490_vm3, %v4855_v22, %v4856_v33  ;;  %v6830_v27 = vsel %vm4490_vm3, %v6828_v50, %v6829_v57  ;;  %v8011_v34 = vpack.c.bf16 %v7214_v54, %v7210_v38  ;;  %v7211_v22 = vld [vmem:[%s16171_s7 + $0x2d0] sm:$0xff]  ;;  %v14242_v20 = vld [vmem:[%s8854_s12 + $0x78] sm:$0x3] }
 0x924   : > { %v14196_v30 = vpop.permute.xlu0 %5451  ;;  %17063 = vst [vmem:[#allocation171_spill] sm:$0xff] %v14198_v58  ;;  %17064 = vst [vmem:[#allocation170_spill] sm:$0xff] %v14208_v56  ;;  %v7209_v58 = vld [vmem:[%s16171_s7 + $0x2c0] sm:$0xff]  ;;  %v5214_v57 = vsel %vm4490_vm3, %v5212_v6, %v5213_v51  ;;  %v5211_v33 = vsel %vm4490_vm3, %v5209_v40, %v5210_v49  ;;  %v5914_v50 = vrot.slane %v14164_v35, 2  ;;  %v8075_v32 = vpack.c.bf16 %v7216_v18, %v7212_v7  ;;  %v14235_v6 = vld [vmem:[%s8854_s12 + $0x68] sm:$0xfc] }
 0x925   : > { %17062 = vst [vmem:[#allocation91_spill] sm:$0xff] %v14196_v30  ;;  %v6827_v30 = vsel %vm4490_vm3, %v6825_v14, %v6826_v46  ;;  %6873 = vrot.lane.b32.xlu1 %v6830_v27, %s16746_s11  ;;  %v7215_v14 = vld [vmem:[%s16171_s7 + $0x2f0] sm:$0xff]  ;;  %v7218_v46 = vld [vmem:[%s16171_s7 + $0x308] sm:$0xff]  ;;  %v5915_v36 = vrot.slane %v14181_v0, 2  ;;  %v5911_v63 = vrot.slane %v14188_v60, 2  ;;  %v14239_v1 = vmul.f32 %v14235_v6, %v17021_v62  ;;  %8010 = vmatpush1.bf16.msra.mxu0 %v8009_v26  ;;  %v7220_v49 = vld [vmem:[%s16171_s7 + $0x318] sm:$0xff] }
 0x926   : > { %6871 = vrot.lane.b32.xlu0 %v6827_v30, %s16746_s11  ;;  %v14246_v51 = vmul.f32 %v14242_v20, %v17021_v62  ;;  %8074 = vmatpush1.bf16.msra.mxu1 %v8073_v52  ;;  %v7222_v40 = vld [vmem:[%s16171_s7 + $0x328] sm:$0xff]  ;;  %v7224_v35 = vld [vmem:[%s16171_s7 + $0x338] sm:$0xff]  ;;  %v5912_v0 = vrot.slane %v14205_v10, 2  ;;  %v14264_v60 = vmul.f32 %v13891_v21, %v17021_v62  ;;  %v14268_v7 = vmul.f32 %v13908_v31, %v17021_v62 }
 0x927   : > { %v14259_v54 = vpop.permute.xlu1 %5239  ;;  %v14271_v18 = vld [vmem:[%s8754_s28 + $0xa8] sm:$0xfc]  ;;  %v14274_v30 = vld [vmem:[%s8754_s28 + $0xb8] sm:$0x3]  ;;  %8012 = vmatprep.subr.bf16.mxu0 %v8011_v34  ;;  %8076 = vmatprep.subr.bf16.mxu1 %v8075_v32  ;;  %v8013_v26 = vpack.c.bf16 %v7213_v2, %v7209_v58  ;;  %v14286_v27 = vmul.f32 %v13520_v11, %v12899_v37  ;;  %v14292_v34 = vmul.f32 %v13527_v24, %v12899_v37  ;;  %v7217_v32 = vld [vmem:[%s16171_s7 + $0x300] sm:$0xff] }
 0x928   : > { %v14257_v38 = vpop.permute.xlu0 %5237  ;;  %17066 = vst [vmem:[#allocation45_spill] sm:$0xff] %v14259_v54  ;;  %v14278_v52 = vmul.f32 %v12899_v37, %v14271_v18  ;;  %v14282_v10 = vmul.f32 %v12899_v37, %v14274_v30  ;;  %v8015_v58 = vpack.c.bf16 %v7222_v40, %v7218_v46  ;;  %v8079_v2 = vpack.c.bf16 %v7224_v35, %v7220_v49  ;;  %v7221_v11 = vld [vmem:[%s16171_s7 + $0x320] sm:$0xff]  ;;  %v7228_v54 = vld [vmem:[%s16171_s7 + $0x358] sm:$0xff] }
 0x929   : > { %17065 = vst [vmem:[#allocation13_spill] sm:$0xff] %v14257_v38  ;;  %v8077_v38 = vpack.c.bf16 %v7215_v14, %v7211_v22  ;;  %5251 = vrot.lane.b32.xlu1 %v5214_v57, %s16966_s29  ;;  %v14302_v22 = vmul.f32 %v13592_v45, %v13877_v29  ;;  %v14306_v57 = vmul.f32 %v13609_v44, %v13877_v29  ;;  %v7223_v14 = vld [vmem:[%s16171_s7 + $0x330] sm:$0xff]  ;;  %v7226_v45 = vld [vmem:[%s16171_s7 + $0x348] sm:$0xff]  ;;  %v6616_v35 = vrot.slane %v14239_v1, 2 }
 0x92a   : > { %5249 = vrot.lane.b32.xlu0 %v5211_v33, %s16966_s29  ;;  %v14310_v24 = vmul.f32 %v13891_v21, %v13949_v17  ;;  %8014 = vmatpush1.bf16.msra.mxu0 %v8013_v26  ;;  %v7219_v33 = vld [vmem:[%s16171_s7 + $0x310] sm:$0xff]  ;;  %v5916_v40 = vsel %vm4490_vm3, %v5914_v50, %v5915_v36  ;;  %v5913_v49 = vsel %vm4490_vm3, %v5911_v63, %v5912_v0  ;;  %v7230_v26 = vld [vmem:[%s16171_s7 + $0x368] sm:$0xff]  ;;  %v7232_v50 = vld [vmem:[%s16171_s7 + $0x378] sm:$0xff]  ;;  %v6613_v36 = vrot.slane %v14264_v60, 2 }
 0x92b   : > { %8078 = vmatpush1.bf16.msra.mxu1 %v8077_v38  ;;  %v14323_v46 = vpop.permute.xlu1 %5943  ;;  %v6617_v38 = vrot.slane %v14246_v51, 2  ;;  %8016 = vmatprep.subr.bf16.mxu0 %v8015_v58  ;;  %v6614_v63 = vrot.slane %v14268_v7, 2  ;;  %v5778_v1 = vrot.slane %v14278_v52, 2  ;;  %v8017_v51 = vpack.c.bf16 %v7221_v11, %v7217_v32  ;;  %v7225_v0 = vld [vmem:[%s16171_s7 + $0x340] sm:$0xff]  ;;  %v7227_v32 = vld [vmem:[%s16171_s7 + $0x350] sm:$0xff] }
 0x92c   : > { %v14321_v44 = vpop.permute.xlu0 %5941  ;;  %17068 = vst [vmem:[#allocation108_spill] sm:$0xff] %v14323_v46  ;;  %8080 = vmatprep.subr.bf16.mxu1 %v8079_v2  ;;  %v7229_v58 = vld [vmem:[%s16171_s7 + $0x360] sm:$0xff]  ;;  %v5779_v2 = vrot.slane %v14282_v10, 2  ;;  %v5775_v60 = vrot.slane %v14286_v27, 2  ;;  %v5776_v7 = vrot.slane %v14292_v34, 2  ;;  %v8081_v52 = vpack.c.bf16 %v7223_v14, %v7219_v33  ;;  %v7231_v11 = vld [vmem:[%s16171_s7 + $0x370] sm:$0xff] }
 0x92d   : > { %17067 = vst [vmem:[#allocation34_spill] sm:$0xff] %v14321_v44  ;;  %5955 = vrot.lane.b32.xlu1 %v5916_v40, %s16966_s29  ;;  %v14360_v40 = vmul.f32 %v14061_v9, %v17003_v3  ;;  %v14364_v10 = vmul.f32 %v14072_v42, %v17003_v3  ;;  %v8019_v27 = vpack.c.bf16 %v7230_v26, %v7226_v45  ;;  %v7234_v33 = vld [vmem:[%s16171_s7 + $0x388] sm:$0xff]  ;;  %v14379_v46 = vld [vmem:[%s8754_s28 + $0x60] sm:$0xfc] }
 0x92e   : > { %5953 = vrot.lane.b32.xlu0 %v5913_v49, %s16966_s29  ;;  %8018 = vmatpush1.bf16.msra.mxu0 %v8017_v51  ;;  %v8083_v34 = vpack.c.bf16 %v7232_v50, %v7228_v54  ;;  %v14371_v14 = vmul.f32 %v13908_v31, %v13949_v17  ;;  %v6618_v44 = vsel %vm4490_vm3, %v6616_v35, %v6617_v38  ;;  %v14384_v54 = vld [vmem:[%s8754_s28 + $0x70] sm:$0x3]  ;;  %v7238_v50 = vld [vmem:[%s16171_s7 + $0x3a8] sm:$0xff]  ;;  %v7236_v51 = vld [vmem:[%s16171_s7 + $0x398] sm:$0xff] }
 0x92f   : > { %v14375_v37 = vpop.permute.xlu1 %5807  ;;  %v6369_v45 = vmul.f32 %v14379_v46, %v17003_v3  ;;  %v6371_v26 = vmul.f32 %v14384_v54, %v17003_v3  ;;  %8082 = vmatpush1.bf16.msra.mxu1 %v8081_v52  ;;  %v7240_v35 = vld [vmem:[%s16171_s7 + $0x3b8] sm:$0xff]  ;;  %v6615_v38 = vsel %vm4490_vm3, %v6613_v36, %v6614_v63  ;;  %8020 = vmatprep.subr.bf16.mxu0 %v8019_v27  ;;  %v17072_v52 = vld [vmem:[#allocation198_spill] sm:$0xff]  ;;  %v7233_v36 = vld [vmem:[%s16171_s7 + $0x380] sm:$0xff] }
 0x930   : > { %v14373_v49 = vpop.permute.xlu0 %5805  ;;  %17070 = vst [vmem:[#allocation92_spill] sm:$0xff] %v14375_v37  ;;  %8084 = vmatprep.subr.bf16.mxu1 %v8083_v34  ;;  %v8085_v37 = vpack.c.bf16 %v7231_v11, %v7227_v32  ;;  %v17071_v3 = vld [vmem:[#allocation199_spill] sm:$0xff]  ;;  %v5780_v62 = vsel %vm4490_vm3, %v5778_v1, %v5779_v2  ;;  %v5777_v39 = vsel %vm4490_vm3, %v5775_v60, %v5776_v7  ;;  %v7237_v63 = vld [vmem:[%s16171_s7 + $0x3a0] sm:$0xff]  ;;  %v7235_v1 = vld [vmem:[%s16171_s7 + $0x390] sm:$0xff]  ;;  %v4705_v34 = vrot.slane %v14306_v57, 2 }
 0x931   : > { %17069 = vst [vmem:[#allocation112_spill] sm:$0xff] %v14373_v49  ;;  %v8021_v49 = vpack.c.bf16 %v7229_v58, %v7225_v0  ;;  %v4232_v13 = vsel %vm1240_vm1, %v17072_v52, %v17071_v3  ;;  %6659 = vrot.lane.b32.xlu1 %v6618_v44, %s16746_s11  ;;  %v6480_v3 = vrot.slane %v14360_v40, 2  ;;  %v6481_v0 = vrot.slane %v14364_v10, 2  ;;  %v7239_v2 = vld [vmem:[%s16171_s7 + $0x3b0] sm:$0xff]  ;;  %v7242_v27 = vld [vmem:[%s16171_s7 + $0x3c8] sm:$0xff]  ;;  %v7248_v57 = vld [vmem:[%s16171_s7 + $0x3f8] sm:$0xff] }
 0x932   : > { %6657 = vrot.lane.b32.xlu0 %v6615_v38, %s16746_s11  ;;  %v8023_v44 = vpack.c.bf16 %v7238_v50, %v7234_v33  ;;  %v8087_v58 = vpack.c.bf16 %v7240_v35, %v7236_v51  ;;  %v6477_v32 = vrot.slane %v6369_v45, 2  ;;  %v6478_v11 = vrot.slane %v6371_v26, 2  ;;  %v7246_v26 = vld [vmem:[%s16171_s7 + $0x3e8] sm:$0xff]  ;;  %v17076_v51 = vld [vmem:[#allocation200_spill] sm:$0xff] }
 0x933   : > { %8022 = vmatpush1.bf16.msra.mxu0 %v8021_v49  ;;  %v14422_v7 = vpop.permute.xlu1 %5593  ;;  %v5356_v40 = vmul.f32 %v12866_v61, %v14138_v59  ;;  %v5358_v10 = vmul.f32 %v12866_v61, %v14141_v19  ;;  %8086 = vmatpush1.bf16.msra.mxu1 %v8085_v37  ;;  %v5355_v33 = vmul.f32 %v14184_v55, %v12866_v61  ;;  %v7244_v37 = vld [vmem:[%s16171_s7 + $0x3d8] sm:$0xff]  ;;  %v17075_v50 = vld [vmem:[#allocation201_spill] sm:$0xff]  ;;  %v4858_v38 = vrot.slane %v14310_v24, 2 }
 0x934   : > { %v14420_v60 = vpop.permute.xlu0 %5591  ;;  %17074 = vst [vmem:[#allocation173_spill] sm:$0xff] %v14422_v7  ;;  %v5357_v49 = vmul.f32 %v14201_v48, %v12866_v61  ;;  %8024 = vmatprep.subr.bf16.mxu0 %v8023_v44  ;;  %8088 = vmatprep.subr.bf16.mxu1 %v8087_v58  ;;  %v8025_v45 = vpack.c.bf16 %v7237_v63, %v7233_v36  ;;  %v17078_v61 = vld [vmem:[#allocation130_spill] sm:$0xff] }
 0x935   : > { %17073 = vst [vmem:[#allocation95_spill] sm:$0xff] %v14420_v60  ;;  %v4233_v35 = vsel %vm1240_vm1, %v17076_v51, %v17075_v50  ;;  %5819 = vrot.lane.b32.xlu1 %v5780_v62, %s16966_s29  ;;  %v14453_v52 = vmul.f32 %v13891_v21, %v13877_v29  ;;  %v8089_v36 = vpack.c.bf16 %v7239_v2, %v7235_v1  ;;  %v5566_v51 = vrot.slane %v5356_v40, 2 }
 0x936   : > { %5817 = vrot.lane.b32.xlu0 %v5777_v39, %s16966_s29  ;;  %v6060_v63 = vmul.f32 %v14235_v6, %v12944_v41  ;;  %v6062_v44 = vmul.f32 %v14242_v20, %v12944_v41  ;;  %v6059_v58 = vmul.f32 %v13891_v21, %v12944_v41  ;;  %v6061_v24 = vmul.f32 %v13908_v31, %v12944_v41  ;;  %v17077_v21 = vld [vmem:[#allocation125_spill] sm:$0xff] }
 0x937   : > { %8026 = vmatpush1.bf16.msra.mxu0 %v8025_v45  ;;  %v14465_v39 = vpop.permute.xlu1 %6297  ;;  %v6482_v50 = vsel %vm4490_vm3, %v6480_v3, %v6481_v0  ;;  %v6479_v1 = vsel %vm4490_vm3, %v6477_v32, %v6478_v11  ;;  %8090 = vmatpush1.bf16.msra.mxu1 %v8089_v36  ;;  %v8027_v6 = vpack.c.bf16 %v7246_v26, %v7242_v27  ;;  %v5567_v20 = vrot.slane %v5358_v10, 2  ;;  %v7241_v0 = vld [vmem:[%s16171_s7 + $0x3c0] sm:$0xff]  ;;  %v14491_v27 = vld [vmem:[%s8854_s12 + $0x88] sm:$0xfc] }
 0x938   : > { %v14463_v62 = vpop.permute.xlu0 %6295  ;;  %v8091_v2 = vpack.c.bf16 %v7248_v57, %v7244_v37  ;;  %v5563_v56 = vrot.slane %v5355_v33, 2  ;;  %v5564_v60 = vrot.slane %v5357_v49, 2  ;;  %v4248_v7 = vadd.f32 %v4232_v13, %v17077_v21  ;;  %v7245_v13 = vld [vmem:[%s16171_s7 + $0x3e0] sm:$0xff]  ;;  %v14496_v49 = vld [vmem:[%s8854_s12 + $0x98] sm:$0x3]  ;;  %v7243_v37 = vld [vmem:[%s16171_s7 + $0x3d0] sm:$0xff] }
 0x939   : > { %v4249_v41 = vadd.f32 %v4233_v35, %v17078_v61  ;;  %v4859_v45 = vrot.slane %v14371_v14, 2  ;;  %6523 = vrot.lane.b32.xlu1 %v6482_v50, %s16746_s11  ;;  %v4618_v3 = vmul.f32 %v13908_v31, %v13877_v29  ;;  %v6268_v61 = vrot.slane %v6060_v63, 2  ;;  %8028 = vmatprep.subr.bf16.mxu0 %v8027_v6  ;;  %v7247_v57 = vld [vmem:[%s16171_s7 + $0x3f0] sm:$0xff] }
 0x93a   : > { %6521 = vrot.lane.b32.xlu0 %v6479_v1, %s16746_s11  ;;  %v6269_v32 = vrot.slane %v6062_v44, 2  ;;  %v6265_v14 = vrot.slane %v6059_v58, 2  ;;  %v6266_v11 = vrot.slane %v6061_v24, 2  ;;  %8092 = vmatprep.subr.bf16.mxu1 %v8091_v2  ;;  %v6763_v29 = vmul.f32 %v13791_v4, %v17032_v16  ;;  %v17082_v24 = vld [vmem:[#allocation8_spill] sm:$0xff]  ;;  %v17083_v1 = vld [vmem:[#allocation30_spill] sm:$0xff] }
 0x93b   : > { %v14484_v10 = vpop.permute.xlu1 %5457  ;;  %v6765_v31 = vmul.f32 %v13798_v23, %v17032_v16  ;;  %v6764_v33 = vmul.f32 %v14491_v27, %v17032_v16  ;;  %v6766_v26 = vmul.f32 %v14496_v49, %v17032_v16  ;;  %v17081_v35 = vrot.slane %v14302_v22, 2 }
 0x93c   : > { %v14482_v40 = vpop.permute.xlu0 %5455  ;;  %17080 = vst [vmem:[#allocation15_spill] sm:$0xff] %v14484_v10  ;;  %v5568_v63 = vsel %vm4490_vm3, %v5566_v51, %v5567_v20  ;;  %v5565_v44 = vsel %vm4490_vm3, %v5563_v56, %v5564_v60  ;;  %v8029_v58 = vpack.c.bf16 %v7245_v13, %v7241_v0  ;;  %v4523_v50 = vadd.f32 %v17082_v24, %v4248_v7  ;;  %v17089_v24 = vld [vmem:[#allocation16_spill] sm:$0xff] }
 0x93d   : > { %17079 = vst [vmem:[#allocation172_spill] sm:$0xff] %v14482_v40  ;;  %v14509_v36 = vsel %vm4490_vm3, %v17081_v35, %v4705_v34  ;;  %v4524_v6 = vadd.f32 %v17083_v1, %v4249_v41  ;;  %5605 = vrot.lane.b32.xlu1 %v5568_v63, %s16966_s29  ;;  %v4707_v22 = vrot.slane %v14453_v52, 2  ;;  %v4708_v2 = vrot.slane %v4618_v3, 2  ;;  %v14528_v35 = vld [vmem:[%s8754_s28 + $0xa0] sm:$0xfc] }
 0x93e   : > { %5603 = vrot.lane.b32.xlu0 %v5565_v44, %s16966_s29  ;;  %v14519_v34 = vsel %vm4490_vm3, %v4858_v38, %v4859_v45  ;;  %v6270_v51 = vsel %vm4490_vm3, %v6268_v61, %v6269_v32  ;;  %v6267_v56 = vsel %vm4490_vm3, %v6265_v14, %v6266_v11  ;;  %8030 = vmatpush1.bf16.msra.mxu0 %v8029_v58  ;;  %v6967_v20 = vrot.slane %v6763_v29, 2  ;;  %v14533_v52 = vld [vmem:[%s8754_s28 + $0xb0] sm:$0x3]  ;;  %v17084_v32 = vld [vmem:[#allocation29_spill] sm:$0xff]  ;;  %v17088_v58 = vld [vmem:[#allocation164_spill] sm:$0xff] }
 0x93f   : > { %v8093_v60 = vpack.c.bf16 %v7247_v57, %v7243_v37  ;;  %v14525_v41 = vpop.permute.xlu1 %6161  ;;  %v6968_v21 = vrot.slane %v6765_v31, 2  ;;  %v6970_v0 = vrot.slane %v6764_v33, 2  ;;  %v6971_v13 = vrot.slane %v6766_v26, 2  ;;  %v17085_v11 = vld [vmem:[#allocation38_spill] sm:$0xff]  ;;  %v17086_v33 = vld [vmem:[#allocation20_spill] sm:$0xff]  ;;  %v17087_v26 = vld [vmem:[#allocation19_spill] sm:$0xff] }
 0x940   : > { %v14523_v7 = vpop.permute.xlu0 %6159  ;;  %v5315_v38 = vmul.f32 %v14528_v35, %v12868_v5  ;;  %v5317_v45 = vmul.f32 %v14533_v52, %v12868_v5  ;;  %v5316_v3 = vmul.f32 %v12868_v5, %v14271_v18  ;;  %v5318_v61 = vmul.f32 %v12868_v5, %v14274_v30 }
 0x941   : > { %8094 = vmatpush1.bf16.msra.mxu1 %v8093_v60  ;;  %v4677_v14 = vadd.f32 %v17084_v32, %v4523_v50  ;;  %v4678_v29 = vadd.f32 %v17085_v11, %v4524_v6  ;;  %6309 = vrot.lane.b32.xlu1 %v6270_v51, %s16746_s11  ;;  %v14546_v31 = vsel %vm4490_vm3, %v4707_v22, %v4708_v2  ;;  %v17092_v60 = vld [vmem:[#allocation126_spill] sm:$0xff]  ;;  %v17093_v11 = vld [vmem:[#allocation24_spill] sm:$0xff] }
 0x942   : > { %6307 = vrot.lane.b32.xlu0 %v6267_v56, %s16746_s11  ;;  %v4368_v37 = vsel %vm1240_vm1, %v17087_v26, %v17086_v33  ;;  %v6019_v57 = vmul.f32 %v14379_v46, %v16999_v47  ;;  %v6021_v63 = vmul.f32 %v14384_v54, %v16999_v47  ;;  %v6020_v44 = vmul.f32 %v14061_v9, %v16999_v47  ;;  %v17094_v33 = vld [vmem:[#allocation17_spill] sm:$0xff] }
 0x943   : > { %v4679_v50 = vadd.f32 %v17089_v24, %v17088_v58  ;;  %v14561_v6 = vpop.permute.xlu1 %5243  ;;  %v6969_v22 = vsel %vm4490_vm3, %v6967_v20, %v6968_v21  ;;  %v6972_v2 = vsel %vm4490_vm3, %v6970_v0, %v6971_v13  ;;  %v6022_v46 = vmul.f32 %v14072_v42, %v16999_v47  ;;  %v17095_v58 = vld [vmem:[#allocation33_spill] sm:$0xff]  ;;  %v14577_v0 = vld [vmem:[%s8754_s28 + $0x80] sm:$0xfc] }
 0x944   : > { %v14559_v1 = vpop.permute.xlu0 %5241  ;;  %17091 = vst [vmem:[#allocation58_spill] sm:$0xff] %v14561_v6  ;;  %v5427_v51 = vrot.slane %v5315_v38, 2  ;;  %v5428_v54 = vrot.slane %v5317_v45, 2  ;;  %v5430_v56 = vrot.slane %v5316_v3, 2  ;;  %v5431_v9 = vrot.slane %v5318_v61, 2 }
 0x945   : > { %17090 = vst [vmem:[#allocation14_spill] sm:$0xff] %v14559_v1  ;;  %v4384_v32 = vadd.f32 %v4368_v37, %v17092_v60  ;;  %v4369_v26 = vsel %vm1240_vm1, %v17094_v33, %v17093_v11  ;;  %v14572_v24 = vadd.f32 %v17095_v58, %v4677_v14  ;;  %7013 = vrot.lane.b32.xlu1 %v6972_v2, %s16746_s11  ;;  %v6129_v42 = vrot.slane %v6019_v57, 2  ;;  %v14586_v61 = vld [vmem:[%s8754_s28 + $0x90] sm:$0x3]  ;;  %v14593_v57 = vld [vmem:[%s8754_s28 + $0x98] sm:$0x3] }
 0x946   : > { %7011 = vrot.lane.b32.xlu0 %v6969_v22, %s16746_s11  ;;  %v6130_v20 = vrot.slane %v6021_v63, 2  ;;  %v6132_v21 = vrot.slane %v6020_v44, 2  ;;  %v6723_v13 = vmul.f32 %v14577_v0, %v17034_v12  ;;  %v6133_v3 = vrot.slane %v6022_v46, 2  ;;  %v17098_v44 = vld [vmem:[#allocation52_spill] sm:$0xff]  ;;  %v17099_v2 = vld [vmem:[#allocation54_spill] sm:$0xff] }
 0x947   : > { %v14583_v45 = vpop.permute.xlu1 %5947  ;;  %v6725_v14 = vmul.f32 %v14586_v61, %v17034_v12  ;;  %v6724_v37 = vmul.f32 %v13915_v53, %v17034_v12  ;;  %v6726_v63 = vmul.f32 %v14593_v57, %v17034_v12  ;;  %v14598_v22 = vadd.f32 %v17098_v44, %v4678_v29  ;;  %v17101_v33 = vld [vmem:[#allocation28_spill] sm:$0xff]  ;;  %v17104_v29 = vld [vmem:[#allocation23_spill] sm:$0xff] }
 0x948   : > { %v14581_v38 = vpop.permute.xlu0 %5945  ;;  %17097 = vst [vmem:[#allocation143_spill] sm:$0xff] %v14583_v45  ;;  %v14601_v60 = vadd.f32 %v17099_v2, %v4679_v50  ;;  %v5429_v46 = vsel %vm4490_vm3, %v5427_v51, %v5428_v54  ;;  %v5432_v11 = vsel %vm4490_vm3, %v5430_v56, %v5431_v9  ;;  %v4385_v58 = vadd.f32 %v4369_v26, %v17101_v33  ;;  %v17103_v45 = vld [vmem:[#allocation47_spill] sm:$0xff] }
 0x949   : > { %17096 = vst [vmem:[#allocation56_spill] sm:$0xff] %v14581_v38  ;;  %v17102_v38 = vld [vmem:[#allocation165_spill] sm:$0xff]  ;;  %v4771_v6 = vmul.f32 %v13791_v4, %v13949_v17  ;;  %5469 = vrot.lane.b32.xlu1 %v5432_v11, %s16966_s29  ;;  %v4579_v44 = vadd.f32 %v17104_v29, %v4384_v32  ;;  %v4772_v50 = vmul.f32 %v13798_v23, %v13949_v17  ;;  %v6831_v54 = vrot.slane %v6723_v13, 2  ;;  %v17105_v13 = vld [vmem:[#allocation36_spill] sm:$0xff]  ;;  %v17106_v11 = vld [vmem:[#allocation202_spill] sm:$0xff] }
 0x94a   : > { %17100 = vst [vmem:[#allocation142_spill] sm:$0xff] %v14601_v60  ;;  %v4680_v1 = vadd.f32 %v17103_v45, %v17102_v38  ;;  %5467 = vrot.lane.b32.xlu0 %v5429_v46, %s16966_s29  ;;  %v6131_v51 = vsel %vm4490_vm3, %v6129_v42, %v6130_v20  ;;  %v6134_v26 = vsel %vm4490_vm3, %v6132_v21, %v6133_v3  ;;  %v6832_v38 = vrot.slane %v6725_v14, 2  ;;  %v14635_v3 = vld [vmem:[%s8854_s12 + $0xc0] sm:$0xfc]  ;;  %v14646_v29 = vld [vmem:[%s8854_s12 + $0xd0] sm:$0x3] }
 0x94b   : > { %v14618_v9 = vpop.permute.xlu1 %6651  ;;  %v6834_v45 = vrot.slane %v6724_v37, 2  ;;  %v6835_v2 = vrot.slane %v6726_v63, 2  ;;  %v5005_v32 = vmul.f32 %v14184_v55, %v12834_v8  ;;  %v5007_v17 = vmul.f32 %v14201_v48, %v12834_v8  ;;  %v14640_v37 = vld [vmem:[%s8854_s12 + $0xc8] sm:$0xfc]  ;;  %v14643_v63 = vld [vmem:[%s8854_s12 + $0xd8] sm:$0x3] }
 0x94c   : > { %v14616_v56 = vpop.permute.xlu0 %6649  ;;  %v5006_v42 = vmul.f32 %v12834_v8, %v14138_v59  ;;  %v5008_v20 = vmul.f32 %v12834_v8, %v14141_v19  ;;  %v4580_v46 = vadd.f32 %v17105_v13, %v4385_v58  ;;  %v4681_v21 = vadd.f32 %v13836_v25, %v17106_v11  ;;  %17107 = vst [vmem:[#allocation175_spill] sm:$0xff] %v14640_v37  ;;  %v17110_v19 = vld [vmem:[#allocation55_spill] sm:$0xff] }
 0x94d   : > { %6173 = vrot.lane.b32.xlu1 %v6134_v26, %s16746_s11  ;;  %v5709_v14 = vmul.f32 %v14635_v3, %v12897_v43  ;;  %17108 = vst [vmem:[#allocation174_spill] sm:$0xff] %v14643_v63  ;;  %v4861_v33 = vrot.slane %v4771_v6, 2  ;;  %v5711_v58 = vmul.f32 %v14646_v29, %v12897_v43  ;;  %v5710_v25 = vmul.f32 %v12897_v43, %v14640_v37 }
 0x94e   : > { %6171 = vrot.lane.b32.xlu0 %v6131_v51, %s16746_s11  ;;  %v5712_v51 = vmul.f32 %v12897_v43, %v14643_v63  ;;  %v4733_v26 = vadd.f32 %v14177_v15, %v4579_v44  ;;  %v4862_v13 = vrot.slane %v4772_v50, 2  ;;  %v6833_v6 = vsel %vm4490_vm3, %v6831_v54, %v6832_v38  ;;  %v17111_v43 = vld [vmem:[#allocation64_spill] sm:$0xff] }
 0x94f   : > { %v14657_v40 = vpop.permute.xlu1 %5811  ;;  %v6836_v10 = vsel %vm4490_vm3, %v6834_v45, %v6835_v2  ;;  %v5215_v8 = vrot.slane %v5005_v32, 2  ;;  %v5216_v12 = vrot.slane %v5007_v17, 2  ;;  %v5218_v47 = vrot.slane %v5006_v42, 2  ;;  %v17112_v2 = vld [vmem:[#allocation117_spill] sm:$0xff] }
 0x950   : > { %v14655_v11 = vpop.permute.xlu0 %5809  ;;  %v5219_v5 = vrot.slane %v5008_v20, 2  ;;  %v14662_v60 = vadd.f32 %v13829_v28, %v4680_v1  ;;  %v5265_v15 = vsel %vm657_vm0, %v17111_v43, %v17110_v19  ;;  %v4734_v44 = vadd.f32 %v14509_v36, %v4580_v46  ;;  %v17113_v17 = vld [vmem:[#allocation25_spill] sm:$0xff]  ;;  %v17115_v1 = vld [vmem:[#allocation170_spill] sm:$0xff] }
 0x951   : > { %6877 = vrot.lane.b32.xlu1 %v6836_v10, %s16746_s11  ;;  %v5917_v50 = vrot.slane %v5709_v14, 2  ;;  %v5918_v54 = vrot.slane %v5711_v58, 2  ;;  %v5920_v38 = vrot.slane %v5710_v25, 2  ;;  %v5921_v45 = vrot.slane %v5712_v51, 2  ;;  %v17116_v25 = vld [vmem:[#allocation42_spill] sm:$0xff] }
 0x952   : > { %17109 = vst [vmem:[#allocation31_spill] sm:$0xff] %v14662_v60  ;;  %6875 = vrot.lane.b32.xlu0 %v6833_v6, %s16746_s11  ;;  %v6413_v32 = vmul.f32 %v13791_v4, %v17112_v2  ;;  %v14673_v28 = vadd.f32 %v17113_v17, %v4681_v21  ;;  %v4887_v42 = vadd.f32 %v17115_v1, %v4733_v26  ;;  %v17121_v6 = vld [vmem:[#allocation57_spill] sm:$0xff] }
 0x953   : > { %v14678_v43 = vpop.permute.xlu1 %6515  ;;  %v6415_v19 = vmul.f32 %v13798_v23, %v17112_v2  ;;  %v6414_v10 = vmul.f32 %v14491_v27, %v17112_v2  ;;  %v4863_v36 = vsel %vm4490_vm3, %v4861_v33, %v4862_v13  ;;  %v5217_v46 = vsel %vm4490_vm3, %v5215_v8, %v5216_v12  ;;  %v17117_v23 = vld [vmem:[#allocation109_spill] sm:$0xff]  ;;  %v17118_v33 = vld [vmem:[#allocation106_spill] sm:$0xff] }
 0x954   : > { %17114 = vst [vmem:[#allocation60_spill] sm:$0xff] %v14673_v28  ;;  %v14676_v20 = vpop.permute.xlu0 %6513  ;;  %v5220_v4 = vsel %vm4490_vm3, %v5218_v47, %v5219_v5  ;;  %v6416_v21 = vmul.f32 %v14496_v49, %v17112_v2  ;;  %v5281_v14 = vadd.f32 %v5265_v15, %v4887_v42  ;;  %v14690_v58 = vadd.f32 %v14519_v34, %v4734_v44  ;;  %v17124_v1 = vld [vmem:[#allocation49_spill] sm:$0xff]  ;;  %v17125_v42 = vld [vmem:[#allocation62_spill] sm:$0xff] }
 0x955   : > { %v4735_v51 = vadd.f32 %v14546_v31, %v17116_v25  ;;  %5255 = vrot.lane.b32.xlu1 %v5220_v4, %s16966_s29  ;;  %v5619_v8 = vsel %vm657_vm0, %v17118_v33, %v17117_v23  ;;  %v5919_v5 = vsel %vm4490_vm3, %v5917_v50, %v5918_v54  ;;  %v5922_v47 = vsel %vm4490_vm3, %v5920_v38, %v5921_v45  ;;  %v17122_v50 = vld [vmem:[#allocation108_spill] sm:$0xff]  ;;  %v17123_v54 = vld [vmem:[#allocation34_spill] sm:$0xff]  ;;  %v17126_v4 = vld [vmem:[#allocation89_spill] sm:$0xff] }
 0x956   : > { %5253 = vrot.lane.b32.xlu0 %v5217_v46, %s16966_s29  ;;  %v6619_v12 = vrot.slane %v6413_v32, 2  ;;  %v6620_v31 = vrot.slane %v6415_v19, 2  ;;  %v6622_v13 = vrot.slane %v6414_v10, 2  ;;  %v4965_v15 = vmul.f32 %v14528_v35, %v17121_v6  ;;  %v14722_v46 = vld [vmem:[%s8754_s28 + $0xc0] sm:$0xfc] }
 0x957   : > { %v14703_v34 = vpop.permute.xlu1 %5597  ;;  %v4967_v44 = vmul.f32 %v14533_v52, %v17121_v6  ;;  %v5973_v38 = vsel %vm657_vm0, %v17123_v54, %v17122_v50  ;;  %v6623_v45 = vrot.slane %v6416_v21, 2  ;;  %v4966_v32 = vmul.f32 %v17121_v6, %v14271_v18  ;;  %v14727_v25 = vld [vmem:[%s8754_s28 + $0xc8] sm:$0xfc]  ;;  %v14730_v23 = vld [vmem:[%s8754_s28 + $0xd8] sm:$0x3] }
 0x958   : > { %v14701_v26 = vpop.permute.xlu0 %5595  ;;  %17120 = vst [vmem:[#allocation115_spill] sm:$0xff] %v14703_v34  ;;  %v4968_v17 = vmul.f32 %v17121_v6, %v14274_v30  ;;  %v5129_v19 = vsel %vm657_vm0, %v17125_v42, %v17124_v1  ;;  %v5635_v10 = vadd.f32 %v5619_v8, %v5281_v14  ;;  %v5669_v21 = vmul.f32 %v14722_v46, %v17126_v4  ;;  %v14736_v50 = vld [vmem:[%s8754_s28 + $0xd0] sm:$0x3] }
 0x959   : > { %17119 = vst [vmem:[#allocation65_spill] sm:$0xff] %v14701_v26  ;;  %5959 = vrot.lane.b32.xlu1 %v5922_v47, %s16966_s29  ;;  %v6327_v33 = vsel %vm1240_vm1, %v14463_v62, %v14465_v39  ;;  %v5671_v14 = vmul.f32 %v14736_v50, %v17126_v4  ;;  %v5670_v8 = vmul.f32 %v17126_v4, %v14727_v25  ;;  %v5079_v28 = vrot.slane %v4965_v15, 2 }
 0x95a   : > { %5957 = vrot.lane.b32.xlu0 %v5919_v5, %s16966_s29  ;;  %v5672_v5 = vmul.f32 %v17126_v4, %v14730_v23  ;;  %v5989_v47 = vadd.f32 %v5973_v38, %v5635_v10  ;;  %v6621_v42 = vsel %vm4490_vm3, %v6619_v12, %v6620_v31  ;;  %v5080_v62 = vrot.slane %v4967_v44, 2 }
 0x95b   : > { %v14746_v1 = vpop.permute.xlu1 %6301  ;;  %v6681_v39 = vsel %vm1240_vm1, %v14616_v56, %v14618_v9  ;;  %v6624_v60 = vsel %vm4490_vm3, %v6622_v13, %v6623_v45  ;;  %v5082_v26 = vrot.slane %v4966_v32, 2  ;;  %v5083_v34 = vrot.slane %v4968_v17, 2  ;;  %v17128_v13 = vld [vmem:[#allocation111_spill] sm:$0xff] }
 0x95c   : > { %v14744_v54 = vpop.permute.xlu0 %6299  ;;  %v5145_v6 = vadd.f32 %v5129_v19, %v14572_v24  ;;  %v6343_v4 = vadd.f32 %v6327_v33, %v5989_v47  ;;  %v14754_v38 = vadd.f32 %v4863_v36, %v4735_v51  ;;  %v5781_v12 = vrot.slane %v5669_v21, 2  ;;  %v17129_v19 = vld [vmem:[#allocation53_spill] sm:$0xff]  ;;  %v17132_v33 = vld [vmem:[#allocation171_spill] sm:$0xff] }
 0x95d   : > { %17127 = vst [vmem:[#allocation114_spill] sm:$0xff] %v14744_v54  ;;  %6663 = vrot.lane.b32.xlu1 %v6624_v60, %s16746_s11  ;;  %v5782_v31 = vrot.slane %v5671_v14, 2  ;;  %v5784_v15 = vrot.slane %v5670_v8, 2  ;;  %v5785_v44 = vrot.slane %v5672_v5, 2  ;;  %v5081_v9 = vsel %vm4490_vm3, %v5079_v28, %v5080_v62  ;;  %v14772_v28 = vld [vmem:[%s16170_s6] ss:$0 sm:$0xff] }
 0x95e   : > { %6661 = vrot.lane.b32.xlu0 %v6621_v42, %s16746_s11  ;;  %v6697_v10 = vadd.f32 %v6681_v39, %v6343_v4  ;;  %v6373_v45 = vmul.f32 %v14577_v0, %v17128_v13  ;;  %v6375_v24 = vmul.f32 %v14586_v61, %v17128_v13  ;;  %v5084_v51 = vsel %vm4490_vm3, %v5082_v26, %v5083_v34  ;;  %v17131_v34 = vld [vmem:[#allocation103_spill] sm:$0xff]  ;;  %v17135_v42 = vld [vmem:[#allocation112_spill] sm:$0xff] }
 0x95f   : > { %v7006_v56 = vpop.permute.xlu1 %7005  ;;  %v6374_v60 = vmul.f32 %v13915_v53, %v17128_v13  ;;  %v6376_v32 = vmul.f32 %v14593_v57, %v17128_v13  ;;  %v5359_v4 = vmul.f32 %v14635_v3, %v17129_v19  ;;  %v5361_v26 = vmul.f32 %v14646_v29, %v17129_v19  ;;  %v17130_v53 = vld [vmem:[#allocation104_spill] sm:$0xff]  ;;  %v17133_v14 = vld [vmem:[#allocation91_spill] sm:$0xff] }
 0x960   : > { %v7004_v54 = vpop.permute.xlu0 %7003  ;;  %v5130_v21 = vsel %vm657_vm0, %v17131_v34, %v17130_v53  ;;  %v5483_v8 = vsel %vm657_vm0, %v17133_v14, %v17132_v33  ;;  %v5783_v5 = vsel %vm4490_vm3, %v5781_v12, %v5782_v31  ;;  %v5786_v47 = vsel %vm4490_vm3, %v5784_v15, %v5785_v44  ;;  %v8486_v33 = vld [vmem:[%s8854_s12 + $0x90] sm:$0x3] }
 0x961   : > { %v7035_v36 = vsel %vm1240_vm1, %v7004_v54, %v7006_v56  ;;  %5119 = vrot.lane.b32.xlu1 %v5084_v51, %s16966_s29  ;;  %v17134_v54 = vld [vmem:[#allocation92_spill] sm:$0xff]  ;;  %v6483_v56 = vrot.slane %v6373_v45, 2  ;;  %v6486_v51 = vrot.slane %v6374_v60, 2  ;;  %v6487_v53 = vrot.slane %v6376_v32, 2  ;;  %v17137_v32 = vld [vmem:[#allocation98_spill] sm:$0xff] }
 0x962   : > { %v7051_v17 = vadd.f32 %v7035_v36, %v6697_v10  ;;  %5117 = vrot.lane.b32.xlu0 %v5081_v9, %s16966_s29  ;;  %v5837_v62 = vsel %vm657_vm0, %v17135_v42, %v17134_v54  ;;  %v6484_v9 = vrot.slane %v6375_v24, 2  ;;  %v5360_v12 = vmul.f32 %v17129_v19, %v14640_v37  ;;  %v8485_v60 = vld [vmem:[%s8854_s12 + $0x80] sm:$0xfc] }
 0x963   : > { %v14793_v10 = vpop.permute.xlu1 %5461  ;;  %v5362_v31 = vmul.f32 %v17129_v19, %v14643_v63  ;;  %v5499_v15 = vadd.f32 %v5483_v8, %v5145_v6  ;;  %v5569_v34 = vrot.slane %v5359_v4, 2  ;;  %v5570_v45 = vrot.slane %v5361_v26, 2 }
 0x964   : > { %v14791_v39 = vpop.permute.xlu0 %5459  ;;  %v7097_v36 = vadd.f32 %v14772_v28, %v7051_v17  ;;  %v6191_v24 = vsel %vm1240_vm1, %v14523_v7, %v14525_v41  ;;  %v6063_v17 = vmul.f32 %v8485_v60, %v17137_v32  ;;  %v6065_v14 = vmul.f32 %v8486_v33, %v17137_v32 }
 0x965   : > { %17136 = vst [vmem:[#allocation177_spill] sm:$0xff] %v14791_v39  ;;  %5823 = vrot.lane.b32.xlu1 %v5786_v47, %s16966_s29  ;;  %v6064_v6 = vmul.f32 %v14491_v27, %v17137_v32  ;;  %v5853_v8 = vadd.f32 %v5837_v62, %v5499_v15  ;;  %v6485_v4 = vsel %vm4490_vm3, %v6483_v56, %v6484_v9  ;;  %v5572_v42 = vrot.slane %v5360_v12, 2  ;;  %v17138_v62 = vld [vmem:[#allocation105_spill] sm:$0xff]  ;;  %v17139_v15 = vld [vmem:[#allocation32_spill] sm:$0xff] }
 0x966   : > { %5821 = vrot.lane.b32.xlu0 %v5783_v5, %s16966_s29  ;;  %v7105_v44 = vmax.f32 %v7097_v36, 0.0  ;;  %v6066_v7 = vmul.f32 %v14496_v49, %v17137_v32  ;;  %v6545_v41 = vsel %vm1240_vm1, %v14676_v20, %v14678_v43  ;;  %v6488_v54 = vsel %vm4490_vm3, %v6486_v51, %v6487_v53 }
 0x967   : > { %v14813_v47 = vpop.permute.xlu1 %6165  ;;  %v5573_v36 = vrot.slane %v5362_v31, 2  ;;  %v14823_v27 = vadd.f32 %v5130_v21, %v14598_v22  ;;  %v5131_v39 = vsel %vm657_vm0, %v17139_v15, %v17138_v62  ;;  %v6207_v56 = vadd.f32 %v6191_v24, %v5853_v8 }
 0x968   : > { %v14811_v5 = vpop.permute.xlu0 %6163  ;;  %v7113_v26 = vmin.f32 %v7105_v44, 6.0  ;;  %v5571_v49 = vsel %vm4490_vm3, %v5569_v34, %v5570_v45  ;;  %v6271_v20 = vrot.slane %v6063_v17, 2  ;;  %v6272_v43 = vrot.slane %v6065_v14, 2  ;;  %v14838_v44 = vld [vmem:[%s16168_s4] ss:$0 sm:$0xff]  ;;  %v17141_v17 = vld [vmem:[#allocation50_spill] sm:$0xff] }
 0x969   : > { %6527 = vrot.lane.b32.xlu1 %v6488_v54, %s16746_s11  ;;  %v6274_v9 = vrot.slane %v6064_v6, 2  ;;  %v6561_v51 = vadd.f32 %v6545_v41, %v6207_v56  ;;  %v6275_v21 = vrot.slane %v6066_v7, 2  ;;  %v6767_v12 = vmul.f32 %v14184_v55, %v17032_v16  ;;  %17140 = vst [vmem:[#allocation176_spill] sm:$0xff] %v14838_v44  ;;  %v17142_v6 = vld [vmem:[#allocation142_spill] sm:$0xff] }
 0x96a   : > { %6525 = vrot.lane.b32.xlu0 %v6485_v4, %s16746_s11  ;;  %7335 = vmatprep.mubr.f32.mxu0 %v7113_v26  ;;  %v6769_v31 = vmul.f32 %v14201_v48, %v17032_v16  ;;  %v5574_v45 = vsel %vm4490_vm3, %v5572_v42, %v5573_v36  ;;  %v6768_v24 = vmul.f32 %v17032_v16, %v14138_v59  ;;  %v17145_v54 = vld [vmem:[#allocation70_spill] sm:$0xff] }
 0x96b   : > { %7448 = vmatprep.mubr.f32.mxu1 %v7113_v26  ;;  %v6870_v22 = vpop.permute.xlu1 %6869  ;;  %v6770_v14 = vmul.f32 %v17032_v16, %v17141_v17  ;;  %v14847_v8 = vadd.f32 %v5131_v39, %v17142_v6  ;;  %v14854_v26 = vld [vmem:[%s16169_s5 + $0xf] ss:$0 sm:$0xff]  ;;  %v6273_v41 = vsel %vm4490_vm3, %v6271_v20, %v6272_v43  ;;  %v5319_v39 = vmul.f32 %v14722_v46, %v17145_v54 }
 0x96c   : > { %v6868_v53 = vpop.permute.xlu0 %6867  ;;  %17144 = vst [vmem:[#allocation210_spill] sm:$0xff] %v14854_v26  ;;  %v4619_v7 = vmul.f32 %v14854_v26, %v8485_v60  ;;  %v4620_v59 = vmul.f32 %v14854_v26, %v8486_v33  ;;  %v5321_v42 = vmul.f32 %v14736_v50, %v17145_v54  ;;  %v6276_v56 = vsel %vm4490_vm3, %v6274_v9, %v6275_v21  ;;  %v17152_v17 = vld [vmem:[#allocation13_spill] sm:$0xff] }
 0x96d   : > { %v6899_v34 = vsel %vm1240_vm1, %v6868_v53, %v6870_v22  ;;  %17143 = vst [vmem:[#allocation211_spill] sm:$0xff] %v14847_v8  ;;  %5609 = vrot.lane.b32.xlu1 %v5574_v45, %s16966_s29  ;;  %v6974_v60 = vrot.slane %v6769_v31, 2  ;;  %v6977_v33 = vrot.slane %v6770_v14, 2  ;;  %v5320_v20 = vmul.f32 %v17145_v54, %v14727_v25  ;;  %v17148_v53 = vld [vmem:[#allocation43_spill] sm:$0xff]  ;;  %v17151_v45 = vld [vmem:[#allocation45_spill] sm:$0xff] }
 0x96e   : > { %v6915_v4 = vadd.f32 %v6899_v34, %v6561_v51  ;;  %5607 = vrot.lane.b32.xlu0 %v5571_v49, %s16966_s29  ;;  %v6973_v49 = vrot.slane %v6767_v12, 2  ;;  %v6976_v51 = vrot.slane %v6768_v24, 2  ;;  %v5322_v43 = vmul.f32 %v17145_v54, %v14730_v23  ;;  %v17149_v22 = vld [vmem:[#allocation107_spill] sm:$0xff]  ;;  %v17153_v6 = vld [vmem:[#allocation97_spill] sm:$0xff] }
 0x96f   : > { %v14866_v15 = vpop.permute.xlu1 %5247  ;;  %v14876_v34 = vsel %vm657_vm0, %v17149_v22, %v17148_v53  ;;  %v5266_v9 = vsel %vm657_vm0, %v17152_v17, %v17151_v45  ;;  %v4710_v21 = vrot.slane %v4619_v7, 2  ;;  %v4711_v31 = vrot.slane %v4620_v59, 2 }
 0x970   : > { %v7066_v36 = vadd.f32 %v14838_v44, %v6915_v4  ;;  %v14864_v62 = vpop.permute.xlu0 %5245  ;;  %17147 = vst [vmem:[#allocation146_spill] sm:$0xff] %v14866_v15  ;;  %17150 = vst [vmem:[#allocation144_spill] sm:$0xff] %v14876_v34  ;;  %v5433_v24 = vrot.slane %v5319_v39, 2  ;;  %v5434_v14 = vrot.slane %v5321_v42, 2  ;;  %v6023_v4 = vmul.f32 %v14577_v0, %v17153_v6 }
 0x971   : > { %17146 = vst [vmem:[#allocation9_spill] sm:$0xff] %v14864_v62  ;;  %6313 = vrot.lane.b32.xlu1 %v6276_v56, %s16746_s11  ;;  %v6975_v22 = vsel %vm4490_vm3, %v6973_v49, %v6974_v60  ;;  %v6025_v7 = vmul.f32 %v14586_v61, %v17153_v6  ;;  %v6978_v59 = vsel %vm4490_vm3, %v6976_v51, %v6977_v33  ;;  %v5436_v39 = vrot.slane %v5320_v20, 2  ;;  %v14901_v49 = vld [vmem:[%s16169_s5 + $0x18] ss:$0 sm:$0xff]  ;;  %v17157_v51 = vld [vmem:[#allocation173_spill] sm:$0xff] }
 0x972   : > { %6311 = vrot.lane.b32.xlu0 %v6273_v41, %s16746_s11  ;;  %v7074_v12 = vmax.f32 %v7066_v36, 0.0  ;;  %v8488_v41 = vld [vmem:[%s8754_s28 + $0x88] sm:$0xfc]  ;;  %v5437_v42 = vrot.slane %v5322_v43, 2  ;;  %v6026_v0 = vmul.f32 %v14593_v57, %v17153_v6  ;;  %v5282_v36 = vadd.f32 %v5266_v9, %v14690_v58  ;;  %17156 = vst [vmem:[#allocation68_spill] sm:$0xff] %v14901_v49  ;;  %v17158_v33 = vld [vmem:[#allocation95_spill] sm:$0xff] }
 0x973   : > { %v14887_v53 = vpop.permute.xlu1 %5951  ;;  %v6024_v56 = vmul.f32 %v8488_v41, %v17153_v6  ;;  %v4773_v61 = vmul.f32 %v14901_v49, %v14184_v55  ;;  %v4774_v60 = vmul.f32 %v14901_v49, %v14201_v48  ;;  %v5620_v57 = vsel %vm657_vm0, %v17158_v33, %v17157_v51  ;;  %v17159_v9 = vld [vmem:[#allocation113_spill] sm:$0xff]  ;;  %v17166_v33 = vld [vmem:[#allocation122_spill] sm:$0xff] }
 0x974   : > { %v14885_v62 = vpop.permute.xlu0 %5949  ;;  %17155 = vst [vmem:[#allocation212_spill] sm:$0xff] %v14887_v53  ;;  %v7082_v34 = vmin.f32 %v7074_v12, 6.0  ;;  %v4712_v58 = vsel %vm4490_vm3, %v4710_v21, %v4711_v31  ;;  %v5435_v20 = vsel %vm4490_vm3, %v5433_v24, %v5434_v14  ;;  %v6135_v43 = vrot.slane %v6023_v4, 2  ;;  %v17160_v4 = vld [vmem:[#allocation37_spill] sm:$0xff] }
 0x975   : > { %17154 = vst [vmem:[#allocation213_spill] sm:$0xff] %v14885_v62  ;;  %7017 = vrot.lane.b32.xlu1 %v6978_v59, %s16746_s11  ;;  %v6136_v48 = vrot.slane %v6025_v7, 2  ;;  %v6138_v17 = vrot.slane %v6024_v56, 2  ;;  %v6727_v12 = vmul.f32 %v14528_v35, %v17159_v9  ;;  %v5438_v41 = vsel %vm4490_vm3, %v5436_v39, %v5437_v42  ;;  %v17161_v59 = vld [vmem:[#allocation27_spill] sm:$0xff]  ;;  %v17162_v39 = vld [vmem:[#allocation48_spill] sm:$0xff] }
 0x976   : > { %7015 = vrot.lane.b32.xlu0 %v6975_v22, %s16746_s11  ;;  %7336 = vmatmul.mubr.f32.vlgmr.msra.gmra.mrb[0].mxu0 %v7082_v34  ;;  %v6729_v22 = vmul.f32 %v14533_v52, %v17159_v9  ;;  %v6139_v21 = vrot.slane %v6026_v0, 2  ;;  %v6730_v31 = vmul.f32 %v17159_v9, %v14274_v30  ;;  %v4864_v24 = vrot.slane %v4773_v61, 2  ;;  %v17165_v0 = vld [vmem:[#allocation172_spill] sm:$0xff] }
 0x977   : > { %7449 = vmatmul.mubr.f32.vlgmr.msra.gmra.mrb[0].mxu1 %v7082_v34  ;;  %v14916_v55 = vpop.permute.xlu1 %6655  ;;  %v6728_v34 = vmul.f32 %v17159_v9, %v14271_v18  ;;  %v4865_v14 = vrot.slane %v4774_v60, 2  ;;  %v5009_v7 = vmul.f32 %v14635_v3, %v17160_v4  ;;  %v5011_v56 = vmul.f32 %v14646_v29, %v17160_v4  ;;  %v17164_v18 = vld [vmem:[#allocation15_spill] sm:$0xff] }
 0x978   : > { %v14914_v45 = vpop.permute.xlu0 %6653  ;;  %v14936_v42 = vsel %vm657_vm0, %v17162_v39, %v17161_v59  ;;  %v5484_v30 = vsel %vm657_vm0, %v17165_v0, %v17164_v18  ;;  %v5010_v61 = vmul.f32 %v17160_v4, %v14640_v37  ;;  %v5012_v60 = vmul.f32 %v17160_v4, %v14643_v63  ;;  %v17171_v4 = vld [vmem:[#allocation14_spill] sm:$0xff] }
 0x979   : > { %5473 = vrot.lane.b32.xlu1 %v5438_v41, %s16966_s29  ;;  %17163 = vst [vmem:[#allocation66_spill] sm:$0xff] %v14936_v42  ;;  %v5636_v51 = vadd.f32 %v5620_v57, %v5282_v36  ;;  %v6837_v59 = vrot.slane %v6727_v12, 2  ;;  %v6838_v39 = vrot.slane %v6729_v22, 2  ;;  %v6137_v42 = vsel %vm4490_vm3, %v6135_v43, %v6136_v48  ;;  %v14957_v48 = vld [vmem:[%s8854_s12 + $0xe0] sm:$0xfc] }
 0x97a   : > { %5471 = vrot.lane.b32.xlu0 %v5435_v20, %s16966_s29  ;;  %v4736_v20 = vadd.f32 %v4712_v58, %v17166_v33  ;;  %v6140_v18 = vsel %vm4490_vm3, %v6138_v17, %v6139_v21  ;;  %v6840_v0 = vrot.slane %v6728_v34, 2  ;;  %v6841_v53 = vrot.slane %v6730_v31, 2  ;;  %v17169_v17 = vld [vmem:[#allocation71_spill] sm:$0xff]  ;;  %v14962_v34 = vld [vmem:[%s8854_s12 + $0xf0] sm:$0x3] }
 0x97b   : > { %v14948_v62 = vpop.permute.xlu1 %5815  ;;  %v5500_v36 = vadd.f32 %v5484_v30, %v14823_v27  ;;  %v4866_v57 = vsel %vm4490_vm3, %v4864_v24, %v4865_v14  ;;  %v5221_v58 = vrot.slane %v5009_v7, 2  ;;  %v5222_v12 = vrot.slane %v5011_v56, 2  ;;  %v14967_v31 = vld [vmem:[%s8854_s12 + $0xe8] sm:$0xfc]  ;;  %v14970_v24 = vld [vmem:[%s8854_s12 + $0xf8] sm:$0x3] }
 0x97c   : > { %v14946_v41 = vpop.permute.xlu0 %5813  ;;  %17168 = vst [vmem:[#allocation67_spill] sm:$0xff] %v14948_v62  ;;  %v5224_v22 = vrot.slane %v5010_v61, 2  ;;  %v5225_v43 = vrot.slane %v5012_v60, 2  ;;  %v5713_v21 = vmul.f32 %v14957_v48, %v17169_v17  ;;  %v5715_v27 = vmul.f32 %v14962_v34, %v17169_v17  ;;  %v14982_v61 = vld [vmem:[%s8854_s12 + $0xa0] sm:$0xfc] }
 0x97d   : > { %17167 = vst [vmem:[#allocation74_spill] sm:$0xff] %v14946_v41  ;;  %6177 = vrot.lane.b32.xlu1 %v6140_v18, %s16746_s11  ;;  %v6839_v56 = vsel %vm4490_vm3, %v6837_v59, %v6838_v39  ;;  %v5716_v30 = vmul.f32 %v17169_v17, %v14970_v24  ;;  %v6417_v60 = vmul.f32 %v14982_v61, %v17112_v2  ;;  %v14988_v18 = vld [vmem:[%s8854_s12 + $0xb0] sm:$0x3]  ;;  %v14993_v62 = vld [vmem:[%s8854_s12 + $0xa8] sm:$0xfc] }
 0x97e   : > { %6175 = vrot.lane.b32.xlu0 %v6137_v42, %s16746_s11  ;;  %v5714_v42 = vmul.f32 %v17169_v17, %v14967_v31  ;;  %v6842_v33 = vsel %vm4490_vm3, %v6840_v0, %v6841_v53  ;;  %v6419_v41 = vmul.f32 %v14988_v18, %v17112_v2  ;;  %v6418_v59 = vmul.f32 %v14993_v62, %v17112_v2  ;;  %v14998_v39 = vld [vmem:[%s8854_s12 + $0xb8] sm:$0x3]  ;;  %v17170_v17 = vld [vmem:[#allocation58_spill] sm:$0xff]  ;;  %v17173_v0 = vld [vmem:[#allocation56_spill] sm:$0xff] }
 0x97f   : > { %v14974_v7 = vpop.permute.xlu1 %6519  ;;  %v6420_v15 = vmul.f32 %v14998_v39, %v17112_v2  ;;  %v5267_v9 = vsel %vm657_vm0, %v17171_v4, %v17170_v17  ;;  %v17172_v53 = vld [vmem:[#allocation143_spill] sm:$0xff]  ;;  %v15008_v54 = vadd.f32 %v4866_v57, %v4736_v20  ;;  %v5223_v63 = vsel %vm4490_vm3, %v5221_v58, %v5222_v12  ;;  %v17177_v58 = vld [vmem:[#allocation57_spill] sm:$0xff] }
 0x980   : > { %v14972_v14 = vpop.permute.xlu0 %6517  ;;  %v5974_v6 = vsel %vm657_vm0, %v17173_v0, %v17172_v53  ;;  %v5226_v44 = vsel %vm4490_vm3, %v5224_v22, %v5225_v43  ;;  %v5923_v8 = vrot.slane %v5713_v21, 2  ;;  %v5924_v2 = vrot.slane %v5715_v27, 2 }
 0x981   : > { %17174 = vst [vmem:[#allocation119_spill] sm:$0xff] %v15008_v54  ;;  %6881 = vrot.lane.b32.xlu1 %v6842_v33, %s16746_s11  ;;  %v5838_v4 = vsel %vm657_vm0, %v14655_v11, %v14657_v40  ;;  %v5926_v20 = vrot.slane %v5714_v42, 2  ;;  %v5927_v57 = vrot.slane %v5716_v30, 2  ;;  %v6626_v53 = vrot.slane %v6419_v41, 2  ;;  %v17178_v11 = vld [vmem:[#allocation114_spill] sm:$0xff] }
 0x982   : > { %6879 = vrot.lane.b32.xlu0 %v6839_v56, %s16746_s11  ;;  %v6625_v56 = vrot.slane %v6417_v60, 2  ;;  %v6628_v33 = vrot.slane %v6418_v59, 2  ;;  %v6629_v0 = vrot.slane %v6420_v15, 2  ;;  %v4969_v12 = vmul.f32 %v14722_v46, %v17177_v58  ;;  %v15051_v42 = vld [vmem:[%s8754_s28 + $0xf0] sm:$0x3] }
 0x983   : > { %v15019_v37 = vpop.permute.xlu1 %5601  ;;  %v15024_v22 = vadd.f32 %v5267_v9, %v14754_v38  ;;  %v5990_v43 = vadd.f32 %v5974_v6, %v5636_v51  ;;  %v4971_v40 = vmul.f32 %v14736_v50, %v17177_v58  ;;  %v6328_v41 = vsel %vm1240_vm1, %v17178_v11, %v14746_v1  ;;  %v15038_v38 = vld [vmem:[%s8754_s28 + $0xe0] sm:$0xfc]  ;;  %v17179_v6 = vld [vmem:[#allocation89_spill] sm:$0xff] }
 0x984   : > { %v15017_v17 = vpop.permute.xlu0 %5599  ;;  %17176 = vst [vmem:[#allocation148_spill] sm:$0xff] %v15019_v37  ;;  %v4970_v15 = vmul.f32 %v17177_v58, %v14727_v25  ;;  %v4972_v21 = vmul.f32 %v17177_v58, %v14730_v23  ;;  %v5925_v1 = vsel %vm4490_vm3, %v5923_v8, %v5924_v2  ;;  %v5928_v27 = vsel %vm4490_vm3, %v5926_v20, %v5927_v57  ;;  %v15063_v8 = vld [vmem:[%s8754_s28 + $0xe8] sm:$0xfc] }
 0x985   : > { %17175 = vst [vmem:[#allocation110_spill] sm:$0xff] %v15017_v17  ;;  %5259 = vrot.lane.b32.xlu1 %v5226_v44, %s16966_s29  ;;  %v15042_v44 = vadd.f32 %v5838_v4, %v5500_v36  ;;  %v5675_v30 = vmul.f32 %v15051_v42, %v17179_v6  ;;  %v6682_v60 = vsel %vm1240_vm1, %v14914_v45, %v14916_v55  ;;  %v5085_v4 = vrot.slane %v4969_v12, 2  ;;  %v17184_v17 = vld [vmem:[#allocation115_spill] sm:$0xff]  ;;  %v17185_v37 = vld [vmem:[#allocation65_spill] sm:$0xff] }
 0x986   : > { %5257 = vrot.lane.b32.xlu0 %v5223_v63, %s16966_s29  ;;  %v5673_v63 = vmul.f32 %v15038_v38, %v17179_v6  ;;  %v6627_v36 = vsel %vm4490_vm3, %v6625_v56, %v6626_v53  ;;  %v6630_v59 = vsel %vm4490_vm3, %v6628_v33, %v6629_v0  ;;  %v6344_v11 = vadd.f32 %v6328_v41, %v5990_v43  ;;  %v15070_v53 = vld [vmem:[%s8754_s28 + $0xf8] sm:$0x3] }
 0x987   : > { %v15046_v51 = vpop.permute.xlu1 %6305  ;;  %v5086_v2 = vrot.slane %v4971_v40, 2  ;;  %17182 = vst [vmem:[#allocation178_spill] sm:$0xff] %v15063_v8  ;;  %v4621_v20 = vmul.f32 %v14982_v61, %v14854_v26  ;;  %v4622_v45 = vmul.f32 %v14988_v18, %v14854_v26  ;;  %v5088_v55 = vrot.slane %v4970_v15, 2  ;;  %17183 = vst [vmem:[#allocation216_spill] sm:$0xff] %v15070_v53 }
 0x988   : > { %v15044_v9 = vpop.permute.xlu0 %6303  ;;  %17181 = vst [vmem:[#allocation180_spill] sm:$0xff] %v15046_v51  ;;  %v5089_v57 = vrot.slane %v4972_v21, 2  ;;  %v5787_v56 = vrot.slane %v5673_v63, 2  ;;  %v5674_v33 = vmul.f32 %v17179_v6, %v15063_v8  ;;  %v6698_v0 = vadd.f32 %v6682_v60, %v6344_v11  ;;  %v15082_v21 = vld [vmem:[%s8754_s28 + $0xa8] sm:$0xfc] }
 0x989   : > { %17180 = vst [vmem:[#allocation145_spill] sm:$0xff] %v15044_v9  ;;  %5963 = vrot.lane.b32.xlu1 %v5928_v27, %s16966_s29  ;;  %v5788_v40 = vrot.slane %v5675_v30, 2  ;;  %v5676_v41 = vmul.f32 %v17179_v6, %v15070_v53  ;;  %v6379_v15 = vmul.f32 %v14533_v52, %v17128_v13  ;;  %v15086_v63 = vmul.f32 %v15082_v21, %v17128_v13  ;;  %v15106_v6 = vld [vmem:[%s8754_s28 + $0xb8] sm:$0x3] }
 0x98a   : > { %5961 = vrot.lane.b32.xlu0 %v5925_v1, %s16966_s29  ;;  %v6377_v1 = vmul.f32 %v14528_v35, %v17128_v13  ;;  %v4775_v30 = vmul.f32 %v14901_v49, %v14635_v3  ;;  %v4713_v11 = vrot.slane %v4621_v20, 2  ;;  %v5621_v54 = vsel %vm657_vm0, %v17185_v37, %v17184_v17 }
 0x98b   : > { %v7010_v43 = vpop.permute.xlu1 %7009  ;;  %v5087_v9 = vsel %vm4490_vm3, %v5085_v4, %v5086_v2  ;;  %v5090_v51 = vsel %vm4490_vm3, %v5088_v55, %v5089_v57  ;;  %v5790_v26 = vrot.slane %v5674_v33, 2  ;;  %v5791_v20 = vrot.slane %v5676_v41, 2 }
 0x98c   : > { %v7008_v12 = vpop.permute.xlu0 %7007  ;;  %v6380_v37 = vmul.f32 %v15106_v6, %v17128_v13  ;;  %v6492_v17 = vrot.slane %v15086_v63, 2  ;;  %v5363_v4 = vmul.f32 %v14957_v48, %v17129_v19  ;;  %v4867_v57 = vrot.slane %v4775_v30, 2 }
 0x98d   : > { %v7036_v27 = vsel %vm1240_vm1, %v7008_v12, %v7010_v43  ;;  %6667 = vrot.lane.b32.xlu1 %v6630_v59, %s16746_s11  ;;  %v4714_v12 = vrot.slane %v4622_v45, 2  ;;  %v4776_v43 = vmul.f32 %v14901_v49, %v14646_v29  ;;  %v5789_v59 = vsel %vm4490_vm3, %v5787_v56, %v5788_v40 }
 0x98e   : > { %v7052_v60 = vadd.f32 %v7036_v27, %v6698_v0  ;;  %6665 = vrot.lane.b32.xlu0 %v6627_v36, %s16746_s11  ;;  %v6489_v45 = vrot.slane %v6377_v1, 2  ;;  %v6490_v49 = vrot.slane %v6379_v15, 2  ;;  %v6192_v33 = vsel %vm1240_vm1, %v14811_v5, %v14813_v47 }
 0x98f   : > { %v15102_v27 = vpop.permute.xlu1 %5465  ;;  %v4715_v55 = vsel %vm4490_vm3, %v4713_v11, %v4714_v12  ;;  %v4868_v56 = vrot.slane %v4776_v43, 2  ;;  %v5365_v40 = vmul.f32 %v14962_v34, %v17129_v19  ;;  %v5364_v41 = vmul.f32 %v17129_v19, %v14967_v31  ;;  %v17188_v12 = vld [vmem:[#allocation121_spill] sm:$0xff] }
 0x990   : > { %v7098_v0 = vadd.f32 %v14772_v28, %v7052_v60  ;;  %v15100_v36 = vpop.permute.xlu0 %5463  ;;  %17187 = vst [vmem:[#allocation75_spill] sm:$0xff] %v15102_v27  ;;  %v5792_v15 = vsel %vm4490_vm3, %v5790_v26, %v5791_v20  ;;  %v6067_v30 = vmul.f32 %v14982_v61, %v17137_v32  ;;  %v6069_v5 = vmul.f32 %v14988_v18, %v17137_v32 }
 0x991   : > { %17186 = vst [vmem:[#allocation214_spill] sm:$0xff] %v15100_v36  ;;  %5123 = vrot.lane.b32.xlu1 %v5090_v51, %s16966_s29  ;;  %v6546_v47 = vsel %vm1240_vm1, %v14972_v14, %v14974_v7  ;;  %v6491_v60 = vsel %vm4490_vm3, %v6489_v45, %v6490_v49  ;;  %v6493_v11 = vrot.slane %v6380_v37, 2  ;;  %v4737_v43 = vadd.f32 %v4715_v55, %v17188_v12 }
 0x992   : > { %5121 = vrot.lane.b32.xlu0 %v5087_v9, %s16966_s29  ;;  %v7106_v2 = vmax.f32 %v7098_v0, 0.0  ;;  %v5366_v9 = vmul.f32 %v17129_v19, %v14970_v24  ;;  %v6208_v0 = vadd.f32 %v6192_v33, %v15042_v44  ;;  %v5575_v26 = vrot.slane %v5363_v4, 2 }
 0x993   : > { %v15127_v51 = vpop.permute.xlu1 %6169  ;;  %v6068_v61 = vmul.f32 %v14993_v62, %v17137_v32  ;;  %v6070_v18 = vmul.f32 %v14998_v39, %v17137_v32  ;;  %v4869_v49 = vsel %vm4490_vm3, %v4867_v57, %v4868_v56  ;;  %v5576_v14 = vrot.slane %v5365_v40, 2  ;;  %v17189_v62 = vld [vmem:[#allocation177_spill] sm:$0xff] }
 0x994   : > { %v15125_v1 = vpop.permute.xlu0 %6167  ;;  %v7114_v63 = vmin.f32 %v7106_v2, 6.0  ;;  %v5578_v7 = vrot.slane %v5364_v41, 2  ;;  %v5579_v20 = vrot.slane %v5366_v9, 2  ;;  %v6562_v45 = vadd.f32 %v6546_v47, %v6208_v0 }
 0x995   : > { %5827 = vrot.lane.b32.xlu1 %v5792_v15, %s16966_s29  ;;  %v6278_v2 = vrot.slane %v6069_v5, 2  ;;  %v6771_v4 = vmul.f32 %v14635_v3, %v17032_v16  ;;  %v5485_v55 = vsel %vm657_vm0, %v17189_v62, %v14793_v10  ;;  %v6494_v33 = vsel %vm4490_vm3, %v6492_v17, %v6493_v11  ;;  %v17191_v17 = vld [vmem:[#allocation175_spill] sm:$0xff] }
 0x996   : > { %5825 = vrot.lane.b32.xlu0 %v5789_v59, %s16966_s29  ;;  %7341 = vmatprep.mubr.f32.mxu0 %v7114_v63  ;;  %v6277_v59 = vrot.slane %v6067_v30, 2  ;;  %v6773_v57 = vmul.f32 %v14646_v29, %v17032_v16  ;;  %v15157_v56 = vadd.f32 %v5621_v54, %v15024_v22  ;;  %v6280_v41 = vrot.slane %v6068_v61, 2  ;;  %v17192_v5 = vld [vmem:[#allocation211_spill] sm:$0xff]  ;;  %v17193_v54 = vld [vmem:[#allocation176_spill] sm:$0xff]  ;;  %v17194_v61 = vld [vmem:[#allocation174_spill] sm:$0xff] }
 0x997   : > { %7454 = vmatprep.mubr.f32.mxu1 %v7114_v63  ;;  %v6874_v37 = vpop.permute.xlu1 %6873  ;;  %v6281_v9 = vrot.slane %v6070_v18, 2  ;;  %v15161_v15 = vadd.f32 %v4869_v49, %v4737_v43  ;;  %v5577_v10 = vsel %vm4490_vm3, %v5575_v26, %v5576_v14  ;;  %v5580_v63 = vsel %vm4490_vm3, %v5578_v7, %v5579_v20  ;;  %v17195_v18 = vld [vmem:[#allocation70_spill] sm:$0xff] }
 0x998   : > { %v6872_v44 = vpop.permute.xlu0 %6871  ;;  %v6772_v30 = vmul.f32 %v17032_v16, %v17191_v17  ;;  %v15168_v47 = vadd.f32 %v5485_v55, %v17192_v5  ;;  %v6279_v12 = vsel %vm4490_vm3, %v6277_v59, %v6278_v2  ;;  %v6979_v43 = vrot.slane %v6771_v4, 2 }
 0x999   : > { %v6900_v39 = vsel %vm1240_vm1, %v6872_v44, %v6874_v37  ;;  %6531 = vrot.lane.b32.xlu1 %v6494_v33, %s16746_s11  ;;  %17190 = vst [vmem:[#allocation61_spill] sm:$0xff] %v15161_v15  ;;  %v6980_v0 = vrot.slane %v6773_v57, 2  ;;  %v6774_v26 = vmul.f32 %v17032_v16, %v17194_v61  ;;  %v5323_v49 = vmul.f32 %v15038_v38, %v17195_v18  ;;  %v17196_v37 = vld [vmem:[#allocation97_spill] sm:$0xff] }
 0x99a   : > { %v6916_v40 = vadd.f32 %v6900_v39, %v6562_v45  ;;  %6529 = vrot.lane.b32.xlu0 %v6491_v60, %s16746_s11  ;;  %v5325_v14 = vmul.f32 %v15051_v42, %v17195_v18  ;;  %v6282_v7 = vsel %vm4490_vm3, %v6280_v41, %v6281_v9  ;;  %v5324_v45 = vmul.f32 %v17195_v18, %v15063_v8 }
 0x99b   : > { %v15173_v60 = vpop.permute.xlu1 %5251  ;;  %v5326_v44 = vmul.f32 %v17195_v18, %v15070_v53  ;;  %v6027_v59 = vmul.f32 %v14528_v35, %v17196_v37  ;;  %v6029_v2 = vmul.f32 %v14533_v52, %v17196_v37  ;;  %v6028_v4 = vmul.f32 %v15082_v21, %v17196_v37  ;;  %v17214_v18 = vld [vmem:[#allocation74_spill] sm:$0xff] }
 0x99c   : > { %v7067_v22 = vadd.f32 %v17193_v54, %v6916_v40  ;;  %v15171_v11 = vpop.permute.xlu0 %5249  ;;  %v6030_v62 = vmul.f32 %v15106_v6, %v17196_v37  ;;  %v6982_v57 = vrot.slane %v6772_v30, 2  ;;  %v17199_v40 = vld [vmem:[#allocation113_spill] sm:$0xff]  ;;  %v6981_v52 = vsel %vm4490_vm3, %v6979_v43, %v6980_v0  ;;  %v15255_v37 = vld [vmem:[%s8854_s12 + $0x118] sm:$0x3] }
 0x99d   : > { %5613 = vrot.lane.b32.xlu1 %v5580_v63, %s16966_s29  ;;  %v6731_v41 = vmul.f32 %v14722_v46, %v17199_v40  ;;  %v6733_v35 = vmul.f32 %v14736_v50, %v17199_v40  ;;  %v6983_v9 = vrot.slane %v6774_v26, 2  ;;  %v5440_v21 = vrot.slane %v5325_v14, 2 }
 0x99e   : > { %5611 = vrot.lane.b32.xlu0 %v5577_v10, %s16966_s29  ;;  %v7075_v20 = vmax.f32 %v7067_v22, 0.0  ;;  %v5439_v10 = vrot.slane %v5323_v49, 2  ;;  %v5442_v6 = vrot.slane %v5324_v45, 2  ;;  %v5443_v63 = vrot.slane %v5326_v44, 2 }
 0x99f   : > { %v15199_v39 = vpop.permute.xlu1 %5955  ;;  %v6732_v30 = vmul.f32 %v17199_v40, %v14727_v25  ;;  %v6734_v5 = vmul.f32 %v17199_v40, %v14730_v23  ;;  %v6141_v22 = vrot.slane %v6027_v59, 2  ;;  %v6142_v43 = vrot.slane %v6029_v2, 2 }
 0x9a0   : > { %v15197_v55 = vpop.permute.xlu0 %5953  ;;  %17198 = vst [vmem:[#allocation63_spill] sm:$0xff] %v15199_v39  ;;  %v7083_v33 = vmin.f32 %v7075_v20, 6.0  ;;  %v6144_v0 = vrot.slane %v6028_v4, 2  ;;  %v6145_v26 = vrot.slane %v6030_v62, 2  ;;  %v6843_v14 = vrot.slane %v6731_v41, 2  ;;  %v17200_v20 = vld [vmem:[#allocation37_spill] sm:$0xff] }
 0x9a1   : > { %17197 = vst [vmem:[#allocation77_spill] sm:$0xff] %v15197_v55  ;;  %6317 = vrot.lane.b32.xlu1 %v6282_v7, %s16746_s11  ;;  %v6844_v7 = vrot.slane %v6733_v35, 2  ;;  %v5013_v45 = vmul.f32 %v14957_v48, %v17200_v20  ;;  %v5015_v44 = vmul.f32 %v14962_v34, %v17200_v20  ;;  %v6984_v55 = vsel %vm4490_vm3, %v6982_v57, %v6983_v9  ;;  %v15227_v62 = vld [vmem:[%s8854_s12 + $0x100] sm:$0xfc]  ;;  %v15233_v35 = vld [vmem:[%s8854_s12 + $0x110] sm:$0x3] }
 0x9a2   : > { %6315 = vrot.lane.b32.xlu0 %v6279_v12, %s16746_s11  ;;  %7342 = vmatmul.mubr.f32.gmra.mrb[2].mxu0 %v7083_v33  ;;  %v5441_v59 = vsel %vm4490_vm3, %v5439_v10, %v5440_v21  ;;  %v5014_v2 = vmul.f32 %v17200_v20, %v14967_v31  ;;  %v5016_v4 = vmul.f32 %v17200_v20, %v14970_v24  ;;  %v6846_v41 = vrot.slane %v6732_v30, 2  ;;  %v17201_v9 = vld [vmem:[#allocation71_spill] sm:$0xff]  ;;  %v17202_v21 = vld [vmem:[#allocation146_spill] sm:$0xff]  ;;  %v17203_v39 = vld [vmem:[#allocation9_spill] sm:$0xff] }
 0x9a3   : > { %7455 = vmatmul.mubr.f32.gmra.mrb[2].mxu1 %v7083_v33  ;;  %v15214_v12 = vpop.permute.xlu1 %6659  ;;  %v5444_v33 = vsel %vm4490_vm3, %v5442_v6, %v5443_v63  ;;  %v6847_v57 = vrot.slane %v6734_v5, 2  ;;  %v5717_v10 = vmul.f32 %v17201_v9, %v15227_v62  ;;  %v15240_v20 = vsel %vm657_vm0, %v17203_v39, %v17202_v21  ;;  %v15247_v6 = vld [vmem:[%s8854_s12 + $0x108] sm:$0xfc] }
 0x9a4   : > { %v15212_v49 = vpop.permute.xlu0 %6657  ;;  %17204 = vst [vmem:[#allocation182_spill] sm:$0xff] %v15240_v20  ;;  %v6143_v36 = vsel %vm4490_vm3, %v6141_v22, %v6142_v43  ;;  %v6845_v5 = vsel %vm4490_vm3, %v6843_v14, %v6844_v7  ;;  %v5227_v27 = vrot.slane %v5013_v45, 2  ;;  %v5228_v40 = vrot.slane %v5015_v44, 2  ;;  %v17207_v22 = vld [vmem:[#allocation212_spill] sm:$0xff]  ;;  %v17208_v43 = vld [vmem:[#allocation213_spill] sm:$0xff]  ;;  %v17213_v20 = vld [vmem:[#allocation67_spill] sm:$0xff] }
 0x9a5   : > { %7021 = vrot.lane.b32.xlu1 %v6984_v55, %s16746_s11  ;;  %v5719_v55 = vmul.f32 %v17201_v9, %v15233_v35  ;;  %v5718_v39 = vmul.f32 %v17201_v9, %v15247_v6  ;;  %v5231_v21 = vrot.slane %v5016_v4, 2  ;;  %v6848_v14 = vsel %vm4490_vm3, %v6846_v41, %v6847_v57  ;;  %v17209_v45 = vld [vmem:[#allocation117_spill] sm:$0xff] }
 0x9a6   : > { %7019 = vrot.lane.b32.xlu0 %v6981_v52, %s16746_s11  ;;  %v6146_v52 = vsel %vm4490_vm3, %v6144_v0, %v6145_v26  ;;  %v5975_v0 = vsel %vm657_vm0, %v17208_v43, %v17207_v22  ;;  %v5230_v26 = vrot.slane %v5014_v2, 2  ;;  %v5929_v7 = vrot.slane %v5717_v10, 2 }
 0x9a7   : > { %v15251_v30 = vpop.permute.xlu1 %5819  ;;  %v6421_v44 = vmul.f32 %v14635_v3, %v17209_v45  ;;  %v5930_v2 = vrot.slane %v5719_v55, 2  ;;  %v6422_v4 = vmul.f32 %v17209_v45, %v17191_v17  ;;  %v5991_v41 = vadd.f32 %v5975_v0, %v15157_v56  ;;  %v15291_v56 = vld [vmem:[%s8754_s28 + $0x100] sm:$0xfc]  ;;  %v15294_v0 = vld [vmem:[%s8754_s28 + $0x110] sm:$0x3] }
 0x9a8   : > { %v15249_v63 = vpop.permute.xlu0 %5817  ;;  %17206 = vst [vmem:[#allocation218_spill] sm:$0xff] %v15251_v30  ;;  %v6423_v30 = vmul.f32 %v14646_v29, %v17209_v45  ;;  %v5229_v22 = vsel %vm4490_vm3, %v5227_v27, %v5228_v40  ;;  %v5932_v43 = vrot.slane %v5718_v39, 2  ;;  %v4975_v55 = vmul.f32 %v15051_v42, %v17177_v58  ;;  %17210 = vst [vmem:[#allocation215_spill] sm:$0xff] %v15291_v56 }
 0x9a9   : > { %17205 = vst [vmem:[#allocation179_spill] sm:$0xff] %v15249_v63  ;;  %v5720_v63 = vmul.f32 %v17201_v9, %v15255_v37  ;;  %5477 = vrot.lane.b32.xlu1 %v5444_v33, %s16966_s29  ;;  %v4973_v33 = vmul.f32 %v15038_v38, %v17177_v58  ;;  %v5232_v17 = vsel %vm4490_vm3, %v5230_v26, %v5231_v21  ;;  %17211 = vst [vmem:[#allocation44_spill] sm:$0xff] %v15294_v0 }
 0x9aa   : > { %5475 = vrot.lane.b32.xlu0 %v5441_v59, %s16966_s29  ;;  %v6424_v59 = vmul.f32 %v17209_v45, %v17194_v61  ;;  %v4974_v61 = vmul.f32 %v17177_v58, %v15063_v8  ;;  %v4976_v45 = vmul.f32 %v17177_v58, %v15070_v53  ;;  %v6631_v27 = vrot.slane %v6421_v44, 2  ;;  %v15311_v44 = vld [vmem:[%s8754_s28 + $0x108] sm:$0xfc] }
 0x9ab   : > { %v15280_v10 = vpop.permute.xlu1 %6523  ;;  %v5933_v9 = vrot.slane %v5720_v63, 2  ;;  %v6632_v40 = vrot.slane %v6423_v30, 2  ;;  %v17212_v63 = vld [vmem:[#allocation89_spill] sm:$0xff]  ;;  %v5931_v58 = vsel %vm4490_vm3, %v5929_v7, %v5930_v2  ;;  %v6634_v21 = vrot.slane %v6422_v4, 2  ;;  %17216 = vst [vmem:[#allocation73_spill] sm:$0xff] %v15311_v44 }
 0x9ac   : > { %v15278_v57 = vpop.permute.xlu0 %6521  ;;  %v5677_v39 = vmul.f32 %v17212_v63, %v15291_v56  ;;  %v5679_v26 = vmul.f32 %v17212_v63, %v15294_v0  ;;  %v6635_v53 = vrot.slane %v6424_v59, 2  ;;  %v5091_v8 = vrot.slane %v4973_v33, 2  ;;  %v15314_v56 = vld [vmem:[%s8754_s28 + $0x118] sm:$0x3]  ;;  %v17217_v0 = vld [vmem:[#allocation210_spill] sm:$0xff] }
 0x9ad   : > { %6181 = vrot.lane.b32.xlu1 %v6146_v52, %s16746_s11  ;;  %v5839_v54 = vsel %vm657_vm0, %v17214_v18, %v17213_v20  ;;  %v5092_v30 = vrot.slane %v4975_v55, 2  ;;  %v4623_v15 = vmul.f32 %v17217_v0, %v14635_v3  ;;  %v4624_v7 = vmul.f32 %v17217_v0, %v14646_v29  ;;  %v17219_v29 = vld [vmem:[#allocation145_spill] sm:$0xff] }
 0x9ae   : > { %6179 = vrot.lane.b32.xlu0 %v6143_v36, %s16746_s11  ;;  %v5094_v2 = vrot.slane %v4974_v61, 2  ;;  %v5095_v4 = vrot.slane %v4976_v45, 2  ;;  %v5678_v18 = vmul.f32 %v17212_v63, %v15311_v44  ;;  %v5680_v20 = vmul.f32 %v17212_v63, %v15314_v56  ;;  %v17220_v44 = vld [vmem:[#allocation68_spill] sm:$0xff] }
 0x9af   : > { %v15308_v52 = vpop.permute.xlu1 %5605  ;;  %v5934_v59 = vsel %vm4490_vm3, %v5932_v43, %v5933_v9  ;;  %v6633_v33 = vsel %vm4490_vm3, %v6631_v27, %v6632_v40  ;;  %v5793_v3 = vrot.slane %v5677_v39, 2  ;;  %v5794_v55 = vrot.slane %v5679_v26, 2 }
 0x9b0   : > { %v15306_v36 = vpop.permute.xlu0 %5603  ;;  %v6636_v61 = vsel %vm4490_vm3, %v6634_v21, %v6635_v53  ;;  %v4777_v0 = vmul.f32 %v14957_v48, %v17220_v44  ;;  %v15344_v27 = vsel %vm4490_vm3, %v5091_v8, %v5092_v30  ;;  %v4716_v40 = vrot.slane %v4623_v15, 2 }
 0x9b1   : > { %17215 = vst [vmem:[#allocation78_spill] sm:$0xff] %v15306_v36  ;;  %6885 = vrot.lane.b32.xlu1 %v6848_v14, %s16746_s11  ;;  %v17218_v36 = vld [vmem:[#allocation180_spill] sm:$0xff]  ;;  %v15337_v14 = vadd.f32 %v5839_v54, %v15168_v47  ;;  %v4717_v39 = vrot.slane %v4624_v7, 2  ;;  %v6683_v53 = vsel %vm1240_vm1, %v15212_v49, %v15214_v12  ;;  %v15350_v26 = vsel %vm4490_vm3, %v5094_v2, %v5095_v4 }
 0x9b2   : > { %6883 = vrot.lane.b32.xlu0 %v6845_v5, %s16746_s11  ;;  %v6329_v45 = vsel %vm1240_vm1, %v17219_v29, %v17218_v36  ;;  %v4778_v5 = vmul.f32 %v14962_v34, %v17220_v44  ;;  %v5796_v21 = vrot.slane %v5678_v18, 2  ;;  %v5797_v36 = vrot.slane %v5680_v20, 2 }
 0x9b3   : > { %v15341_v43 = vpop.permute.xlu1 %6309  ;;  %v6345_v47 = vadd.f32 %v6329_v45, %v5991_v41  ;;  %v15355_v54 = vsel %vm4490_vm3, %v5793_v3, %v5794_v55  ;;  %v6381_v8 = vmul.f32 %v14722_v46, %v17128_v13  ;;  %v4870_v15 = vrot.slane %v4777_v0, 2  ;;  %v15381_v55 = vld [vmem:[%s16167_s3 + $0xf] ss:$0 sm:$0xff] }
 0x9b4   : > { %v15339_v9 = vpop.permute.xlu0 %6307  ;;  %v4871_v30 = vrot.slane %v4778_v5, 2  ;;  %v6383_v49 = vmul.f32 %v14736_v50, %v17128_v13  ;;  %v6382_v12 = vmul.f32 %v17128_v13, %v14727_v25  ;;  %v5367_v4 = vmul.f32 %v17129_v19, %v15227_v62  ;;  %v17221_v5 = vld [vmem:[#allocation124_spill] sm:$0xff] }
 0x9b5   : > { %5263 = vrot.lane.b32.xlu1 %v5232_v17, %s16966_s29  ;;  %v6699_v7 = vadd.f32 %v6683_v53, %v6345_v47  ;;  %v6384_v17 = vmul.f32 %v17128_v13, %v14730_v23  ;;  %v15370_v18 = vsel %vm4490_vm3, %v5796_v21, %v5797_v36  ;;  %v5369_v20 = vmul.f32 %v17129_v19, %v15233_v35 }
 0x9b6   : > { %5261 = vrot.lane.b32.xlu0 %v5229_v22, %s16966_s29  ;;  %v4718_v22 = vsel %vm4490_vm3, %v4716_v40, %v4717_v39  ;;  %v5368_v25 = vmul.f32 %v17129_v19, %v15247_v6  ;;  %v6495_v23 = vrot.slane %v6381_v8, 2  ;;  %v4603_v29 = vmul.f32 %v15381_v55, %v14722_v46 }
 0x9b7   : > { %v7014_v2 = vpop.permute.xlu1 %7013  ;;  %v4604_v45 = vmul.f32 %v15381_v55, %v14736_v50  ;;  %v4738_v40 = vadd.f32 %v4718_v22, %v17221_v5  ;;  %v4872_v39 = vsel %vm4490_vm3, %v4870_v15, %v4871_v30  ;;  %v6498_v47 = vrot.slane %v6382_v12, 2  ;;  %v8501_v50 = vld [vmem:[%s8854_s12 + $0xc0] sm:$0xfc] }
 0x9b8   : > { %v7012_v41 = vpop.permute.xlu0 %7011  ;;  %v6499_v8 = vrot.slane %v6384_v17, 2  ;;  %v5581_v46 = vrot.slane %v5367_v4, 2  ;;  %v4660_v12 = vrot.slane %v4603_v29, 2  ;;  %v6193_v22 = vsel %vm1240_vm1, %v15125_v1, %v15127_v51  ;;  %v8503_v4 = vld [vmem:[%s8854_s12 + $0xd0] sm:$0x3] }
 0x9b9   : > { %v7037_v0 = vsel %vm1240_vm1, %v7012_v41, %v7014_v2  ;;  %5967 = vrot.lane.b32.xlu1 %v5934_v59, %s16966_s29  ;;  %v5370_v59 = vmul.f32 %v17129_v19, %v15255_v37  ;;  %v15398_v41 = vmul.f32 %v8501_v50, %v17137_v32  ;;  %v15403_v19 = vld [vmem:[%s16167_s3 + $0x18] ss:$0 sm:$0xff]  ;;  %v4661_v2 = vrot.slane %v4604_v45, 2 }
 0x9ba   : > { %v7053_v3 = vadd.f32 %v7037_v0, %v6699_v7  ;;  %5965 = vrot.lane.b32.xlu0 %v5931_v58, %s16966_s29  ;;  %v6496_v58 = vrot.slane %v6383_v49, 2  ;;  %v5582_v7 = vrot.slane %v5369_v20, 2  ;;  %17222 = vst [vmem:[#allocation39_spill] sm:$0xff] %v15403_v19  ;;  %v4758_v15 = vmul.f32 %v15403_v19, %v15051_v42  ;;  %v8504_v20 = vld [vmem:[%s8854_s12 + $0xc8] sm:$0xfc] }
 0x9bb   : > { %v15394_v36 = vpop.permute.xlu1 %5469  ;;  %v5584_v49 = vrot.slane %v5368_v25, 2  ;;  %v5585_v17 = vrot.slane %v5370_v59, 2  ;;  %v15416_v0 = vmul.f32 %v8503_v4, %v17137_v32  ;;  %v4892_v29 = vadd.f32 %v4872_v39, %v4738_v40  ;;  %v8505_v40 = vld [vmem:[%s8854_s12 + $0xd8] sm:$0x3]  ;;  %v15483_v4 = vld [vmem:[%s8854_s12 + $0x120] sm:$0xfc] }
 0x9bc   : > { %v7099_v53 = vadd.f32 %v14772_v28, %v7053_v3  ;;  %v15392_v21 = vpop.permute.xlu0 %5467  ;;  %v4757_v28 = vmul.f32 %v15403_v19, %v15038_v38  ;;  %v15420_v3 = vmul.f32 %v8504_v20, %v17137_v32  ;;  %v6497_v45 = vsel %vm4490_vm3, %v6495_v23, %v6496_v58  ;;  %v17225_v20 = vld [vmem:[#allocation210_spill] sm:$0xff]  ;;  %v17231_v23 = vld [vmem:[#allocation44_spill] sm:$0xff] }
 0x9bd   : > { %6671 = vrot.lane.b32.xlu1 %v6636_v61, %s16746_s11  ;;  %v6500_v1 = vsel %vm4490_vm3, %v6498_v47, %v6499_v8  ;;  %v6547_v51 = vsel %vm1240_vm1, %v15278_v57, %v15280_v10  ;;  %v15432_v5 = vsel %vm4490_vm3, %v5581_v46, %v5582_v7  ;;  %v6209_v50 = vadd.f32 %v6193_v22, %v15337_v14 }
 0x9be   : > { %6669 = vrot.lane.b32.xlu0 %v6633_v33, %s16746_s11  ;;  %v7107_v30 = vmax.f32 %v7099_v53, 0.0  ;;  %v4814_v59 = vrot.slane %v4757_v28, 2  ;;  %v4815_v53 = vrot.slane %v4758_v15, 2  ;;  %v15442_v39 = vmul.f32 %v8505_v40, %v17137_v32 }
 0x9bf   : > { %v15424_v61 = vpop.permute.xlu1 %6173  ;;  %v4662_v57 = vsel %vm4490_vm3, %v4660_v12, %v4661_v2  ;;  %v5586_v10 = vsel %vm4490_vm3, %v5584_v49, %v5585_v17  ;;  %v6563_v47 = vadd.f32 %v6547_v51, %v6209_v50  ;;  %v15457_v7 = vmul.f32 %v14962_v34, %v17032_v16  ;;  %v17226_v51 = vld [vmem:[#allocation61_spill] sm:$0xff] }
 0x9c0   : > { %v15422_v33 = vpop.permute.xlu0 %6171  ;;  %v7115_v25 = vmin.f32 %v7107_v30, 6.0  ;;  %v15461_v28 = vmul.f32 %v17032_v16, %v14967_v31  ;;  %v17223_v30 = vld [vmem:[#allocation203_spill] sm:$0xff]  ;;  %v15468_v12 = vsel %vm4490_vm3, %v4814_v59, %v4815_v53  ;;  %v6287_v17 = vrot.slane %v15442_v39, 2  ;;  %v15490_v53 = vld [vmem:[%s8854_s12 + $0x130] sm:$0x3] }
 0x9c1   : > { %5127 = vrot.lane.b32.xlu1 %v15350_v26, %s16966_s29  ;;  %v5269_v26 = vsel %vm657_vm0, %v15171_v11, %v15173_v60  ;;  %v15465_v49 = vadd.f32 %v4662_v57, %v17223_v30  ;;  %v15472_v11 = vmul.f32 %v17032_v16, %v14970_v24  ;;  %v17224_v60 = vld [vmem:[#allocation78_spill] sm:$0xff]  ;;  %v4628_v50 = vmul.f32 %v17225_v20, %v15233_v35 }
 0x9c2   : > { %5125 = vrot.lane.b32.xlu0 %v15344_v27, %s16966_s29  ;;  %7347 = vmatprep.mubr.f32.mxu0 %v7115_v25  ;;  %v15450_v27 = vmul.f32 %v14957_v48, %v17032_v16  ;;  %v5623_v2 = vsel %vm657_vm0, %v17224_v60, %v15308_v52  ;;  %v5285_v59 = vadd.f32 %v5269_v26, %v17226_v51  ;;  %v6988_v14 = vrot.slane %v15461_v28, 2 }
 0x9c3   : > { %7460 = vmatprep.mubr.f32.mxu1 %v7115_v25  ;;  %v6878_v46 = vpop.permute.xlu1 %6877  ;;  %v4627_v25 = vmul.f32 %v17225_v20, %v15227_v62  ;;  %v4723_v20 = vrot.slane %v4628_v50, 2 }
 0x9c4   : > { %v6876_v8 = vpop.permute.xlu0 %6875  ;;  %v5639_v30 = vadd.f32 %v5623_v2, %v5285_v59 }
 0x9c5   : > { %v6901_v15 = vsel %vm1240_vm1, %v6876_v8, %v6878_v46  ;;  %5831 = vrot.lane.b32.xlu1 %v15370_v18, %s16966_s29  ;;  %v17227_v18 = vld [vmem:[#allocation176_spill] sm:$0xff]  ;;  %v15502_v46 = vld [vmem:[%s8754_s28 + $0x130] sm:$0x3]  ;;  %v4722_v26 = vrot.slane %v4627_v25, 2 }
 0x9c6   : > { %v6917_v22 = vadd.f32 %v6901_v15, %v6563_v47  ;;  %5829 = vrot.lane.b32.xlu0 %v15355_v54, %s16966_s29  ;;  %v4781_v54 = vmul.f32 %v17220_v44, %v15483_v4  ;;  %v6986_v47 = vrot.slane %v15457_v7, 2  ;;  %v15499_v8 = vld [vmem:[%s8754_s28 + $0x120] sm:$0xfc]  ;;  %17229 = vst [vmem:[#allocation76_spill] sm:$0xff] %v15502_v46  ;;  %v4782_v15 = vmul.f32 %v17220_v44, %v15490_v53 }
 0x9c7   : > { %v5256_v57 = vpop.permute.xlu1 %5255  ;;  %17228 = vst [vmem:[#allocation84_spill] sm:$0xff] %v15499_v8  ;;  %v4724_v25 = vsel %vm4490_vm3, %v4722_v26, %v4723_v20  ;;  %v4608_v44 = vmul.f32 %v15381_v55, %v17231_v23  ;;  %v4761_v2 = vmul.f32 %v15403_v19, %v15499_v8 }
 0x9c8   : > { %v7068_v40 = vadd.f32 %v17227_v18, %v6917_v22  ;;  %v5254_v39 = vpop.permute.xlu0 %5253  ;;  %v4876_v51 = vrot.slane %v4781_v54, 2  ;;  %v4877_v22 = vrot.slane %v4782_v15, 2  ;;  %v17230_v18 = vld [vmem:[#allocation215_spill] sm:$0xff] }
 0x9c9   : > { %v5270_v60 = vsel %vm657_vm0, %v5254_v39, %v5256_v57  ;;  %6535 = vrot.lane.b32.xlu1 %v6500_v1, %s16746_s11  ;;  %v4607_v58 = vmul.f32 %v15381_v55, %v17230_v18  ;;  %v17232_v1 = vld [vmem:[#allocation128_spill] sm:$0xff]  ;;  %v4667_v26 = vrot.slane %v4608_v44, 2  ;;  %v4820_v15 = vrot.slane %v4761_v2, 2 }
 0x9ca   : > { %v15507_v52 = vadd.f32 %v5270_v60, %v4892_v29  ;;  %6533 = vrot.lane.b32.xlu0 %v6497_v45, %s16746_s11  ;;  %v7076_v7 = vmax.f32 %v7068_v40, 0.0  ;;  %v4762_v29 = vmul.f32 %v15403_v19, %v15502_v46  ;;  %v4740_v54 = vadd.f32 %v4724_v25, %v17232_v1  ;;  %v17248_v19 = vld [vmem:[#allocation110_spill] sm:$0xff] }
 0x9cb   : > { %v5960_v45 = vpop.permute.xlu1 %5959  ;;  %v4878_v40 = vsel %vm4490_vm3, %v4876_v51, %v4877_v22  ;;  %v4666_v39 = vrot.slane %v4607_v58, 2  ;;  %v6989_v58 = vrot.slane %v15472_v11, 2  ;;  %v17236_v22 = vld [vmem:[#allocation31_spill] sm:$0xff] }
 0x9cc   : > { %v5958_v59 = vpop.permute.xlu0 %5957  ;;  %v7084_v50 = vmin.f32 %v7076_v7, 6.0  ;;  %v4821_v60 = vrot.slane %v4762_v29, 2  ;;  %v17234_v7 = vld [vmem:[#allocation70_spill] sm:$0xff]  ;;  %v15531_v1 = vadd.f32 %v4878_v40, %v4740_v54  ;;  %v17238_v29 = vld [vmem:[#allocation73_spill] sm:$0xff]  ;;  %v17240_v54 = vld [vmem:[#allocation60_spill] sm:$0xff] }
 0x9cd   : > { %v5977_v57 = vsel %vm657_vm0, %v5958_v59, %v5960_v45  ;;  %5617 = vrot.lane.b32.xlu1 %v5586_v10, %s16966_s29  ;;  %v5327_v25 = vmul.f32 %v17234_v7, %v17230_v18  ;;  %v4668_v51 = vsel %vm4490_vm3, %v4666_v39, %v4667_v26  ;;  %v17237_v10 = vld [vmem:[#allocation144_spill] sm:$0xff]  ;;  %v5328_v59 = vmul.f32 %v17234_v7, %v17238_v29  ;;  %v17239_v45 = vld [vmem:[#allocation205_spill] sm:$0xff]  ;;  %v17241_v40 = vld [vmem:[#allocation66_spill] sm:$0xff] }
 0x9ce   : > { %v15523_v20 = vadd.f32 %v5977_v57, %v5639_v30  ;;  %5615 = vrot.lane.b32.xlu0 %v15432_v5, %s16966_s29  ;;  %17235 = vst [vmem:[#allocation79_spill] sm:$0xff] %v15531_v1  ;;  %7348 = vmatmul.mubr.f32.gmra.mrb[4].mxu0 %v7084_v50  ;;  %v5329_v30 = vmul.f32 %v17234_v7, %v17231_v23  ;;  %v17242_v57 = vld [vmem:[#allocation119_spill] sm:$0xff]  ;;  %v17243_v26 = vld [vmem:[#allocation182_spill] sm:$0xff]  ;;  %v17246_v1 = vrot.slane %v15420_v3, 2 }
 0x9cf   : > { %7461 = vmatmul.mubr.f32.gmra.mrb[4].mxu1 %v7084_v50  ;;  %v4822_v5 = vsel %vm4490_vm3, %v4820_v15, %v4821_v60  ;;  %v5148_v44 = vadd.f32 %v17237_v10, %v17236_v22  ;;  %v15542_v2 = vpop.permute.xlu1 %6663  ;;  %v5330_v11 = vmul.f32 %v17234_v7, %v15314_v56  ;;  %v4684_v50 = vadd.f32 %v4668_v51, %v17239_v45  ;;  %v17247_v7 = vld [vmem:[#allocation148_spill] sm:$0xff] }
 0x9d0   : > { %17233 = vst [vmem:[#allocation80_spill] sm:$0xff] %v15523_v20  ;;  %v15540_v28 = vpop.permute.xlu0 %6661  ;;  %v5149_v39 = vadd.f32 %v17241_v40, %v17240_v54  ;;  %v5284_v15 = vadd.f32 %v17243_v26, %v17242_v57  ;;  %v17244_v60 = vrot.slane %v15416_v0, 2  ;;  %v17245_v22 = vrot.slane %v15398_v41, 2 }
 0x9d1   : > { %v6288_v20 = vsel %vm4490_vm3, %v17246_v1, %v6287_v17  ;;  %v5622_v51 = vsel %vm657_vm0, %v17248_v19, %v17247_v7  ;;  %v4836_v0 = vadd.f32 %v15468_v12, %v15465_v49  ;;  %v15568_v41 = vadd.f32 %v4822_v5, %v4684_v50  ;;  %v8507_v49 = vld [vmem:[%s8754_s28 + $0xd0] sm:$0x3]  ;;  %v8508_v5 = vld [vmem:[%s8754_s28 + $0xc8] sm:$0xfc]  ;;  %v17253_v50 = vld [vmem:[#allocation75_spill] sm:$0xff] }
 0x9d2   : > { %v6285_v10 = vsel %vm4490_vm3, %v17245_v22, %v17244_v60  ;;  %6321 = vrot.lane.b32.xlu1 %v6288_v20, %s16746_s11  ;;  %v17250_v45 = vrot.slane %v15450_v27, 2  ;;  %v6990_v17 = vsel %vm4490_vm3, %v6988_v14, %v6989_v58  ;;  %v5445_v1 = vrot.slane %v5327_v25, 2  ;;  %v8506_v20 = vld [vmem:[%s8754_s28 + $0xc0] sm:$0xfc]  ;;  %v17251_v60 = vld [vmem:[#allocation97_spill] sm:$0xff] }
 0x9d3   : > { %6319 = vrot.lane.b32.xlu0 %v6285_v10, %s16746_s11  ;;  %17249 = vst [vmem:[#allocation86_spill] sm:$0xff] %v15568_v41  ;;  %v5446_v54 = vrot.slane %v5329_v30, 2  ;;  %v5120_v40 = vpop.permute.xlu1 %5119  ;;  %v5448_v57 = vrot.slane %v5328_v59, 2  ;;  %v5449_v26 = vrot.slane %v5330_v11, 2  ;;  %v6031_v22 = vmul.f32 %v8506_v20, %v17251_v60  ;;  %v8509_v25 = vld [vmem:[%s8754_s28 + $0xd8] sm:$0x3] }
 0x9d4   : > { %v6987_v3 = vsel %vm4490_vm3, %v17250_v45, %v6986_v47  ;;  %v5118_v19 = vpop.permute.xlu0 %5117  ;;  %v6033_v12 = vmul.f32 %v8507_v49, %v17251_v60  ;;  %v5487_v27 = vsel %vm657_vm0, %v15392_v21, %v15394_v36  ;;  %v6032_v14 = vmul.f32 %v8508_v5, %v17251_v60  ;;  %v17252_v59 = vld [vmem:[#allocation113_spill] sm:$0xff]  ;;  %v17254_v10 = vld [vmem:[#allocation214_spill] sm:$0xff] }
 0x9d5   : > { %v5134_v47 = vsel %vm657_vm0, %v5118_v19, %v5120_v40  ;;  %v6034_v58 = vmul.f32 %v8509_v25, %v17251_v60  ;;  %v6735_v11 = vmul.f32 %v15038_v38, %v17252_v59  ;;  %v6737_v21 = vmul.f32 %v15051_v42, %v17252_v59  ;;  %v17255_v45 = vld [vmem:[#allocation178_spill] sm:$0xff] }
 0x9d6   : > { %v15586_v30 = vadd.f32 %v5134_v47, %v4836_v0  ;;  %7025 = vrot.lane.b32.xlu1 %v6990_v17, %s16746_s11  ;;  %v15594_v36 = vadd.f32 %v5622_v51, %v5284_v15  ;;  %v5486_v7 = vsel %vm657_vm0, %v17254_v10, %v17253_v50  ;;  %v5447_v0 = vsel %vm4490_vm3, %v5445_v1, %v5446_v54  ;;  %v17256_v47 = vld [vmem:[#allocation216_spill] sm:$0xff]  ;;  %v15606_v15 = vld [vmem:[%s8854_s12 + $0x128] sm:$0xfc]  ;;  %v15610_v1 = vld [vmem:[%s8854_s12 + $0x138] sm:$0x3] }
 0x9d7   : > { %7023 = vrot.lane.b32.xlu0 %v6987_v3, %s16746_s11  ;;  %v6736_v3 = vmul.f32 %v17252_v59, %v17255_v45  ;;  %v5503_v19 = vadd.f32 %v5487_v27, %v5149_v39  ;;  %v5824_v40 = vpop.permute.xlu1 %5823  ;;  %v5450_v20 = vsel %vm4490_vm3, %v5448_v57, %v5449_v26  ;;  %v6147_v49 = vrot.slane %v6031_v22, 2  ;;  %17257 = vst [vmem:[#allocation81_spill] sm:$0xff] %v15610_v1  ;;  %v17259_v26 = vld [vmem:[#allocation71_spill] sm:$0xff] }
 0x9d8   : > { %v5822_v17 = vpop.permute.xlu0 %5821  ;;  %v6738_v5 = vmul.f32 %v17252_v59, %v17256_v47  ;;  %v6148_v25 = vrot.slane %v6033_v12, 2  ;;  %v6150_v50 = vrot.slane %v6032_v14, 2  ;;  %v6151_v10 = vrot.slane %v6034_v58, 2 }
 0x9d9   : > { %v5841_v51 = vsel %vm657_vm0, %v5822_v17, %v5824_v40  ;;  %v6849_v39 = vrot.slane %v6735_v11, 2  ;;  %v6850_v57 = vrot.slane %v6737_v21, 2  ;;  %v5721_v22 = vmul.f32 %v17259_v26, %v15483_v4  ;;  %v17260_v21 = vld [vmem:[#allocation117_spill] sm:$0xff] }
 0x9da   : > { %v15612_v54 = vadd.f32 %v5841_v51, %v5503_v19  ;;  %5481 = vrot.lane.b32.xlu1 %v5450_v20, %s16966_s29  ;;  %v15618_v27 = vadd.f32 %v5486_v7, %v5148_v44  ;;  %v6852_v12 = vrot.slane %v6736_v3, 2  ;;  %v5723_v14 = vmul.f32 %v17259_v26, %v15490_v53  ;;  %v15635_v7 = vld [vmem:[%s8754_s28 + $0x128] sm:$0xfc]  ;;  %v15638_v3 = vld [vmem:[%s8754_s28 + $0x138] sm:$0x3] }
 0x9db   : > { %5479 = vrot.lane.b32.xlu0 %v5447_v0, %s16966_s29  ;;  %v5722_v58 = vmul.f32 %v17259_v26, %v15606_v15  ;;  %v15626_v0 = vpop.permute.xlu1 %6527  ;;  %v6853_v17 = vrot.slane %v6738_v5, 2  ;;  %v5724_v11 = vmul.f32 %v17259_v26, %v15610_v1  ;;  %v6425_v40 = vmul.f32 %v14957_v48, %v17260_v21  ;;  %17261 = vst [vmem:[#allocation96_spill] sm:$0xff] %v15635_v7 }
 0x9dc   : > { %17258 = vst [vmem:[#allocation93_spill] sm:$0xff] %v15612_v54  ;;  %v15624_v19 = vpop.permute.xlu0 %6525  ;;  %v6427_v44 = vmul.f32 %v14962_v34, %v17260_v21  ;;  %v6149_v20 = vsel %vm4490_vm3, %v6147_v49, %v6148_v25  ;;  %v6152_v51 = vsel %vm4490_vm3, %v6150_v50, %v6151_v10  ;;  %v6426_v5 = vmul.f32 %v17260_v21, %v14967_v31  ;;  %v17262_v54 = vld [vmem:[#allocation63_spill] sm:$0xff] }
 0x9dd   : > { %v6428_v26 = vmul.f32 %v17260_v21, %v14970_v24  ;;  %v6851_v48 = vsel %vm4490_vm3, %v6849_v39, %v6850_v57  ;;  %v5935_v34 = vrot.slane %v5721_v22, 2  ;;  %v5681_v41 = vmul.f32 %v17212_v63, %v15499_v8  ;;  %v17263_v8 = vld [vmem:[#allocation77_spill] sm:$0xff] }
 0x9de   : > { %6185 = vrot.lane.b32.xlu1 %v6152_v51, %s16746_s11  ;;  %v5683_v49 = vmul.f32 %v17212_v63, %v15502_v46  ;;  %v5936_v25 = vrot.slane %v5723_v14, 2  ;;  %v5938_v50 = vrot.slane %v5722_v58, 2  ;;  %v5682_v31 = vmul.f32 %v17212_v63, %v15635_v7 }
 0x9df   : > { %6183 = vrot.lane.b32.xlu0 %v6149_v20, %s16746_s11  ;;  %v5684_v24 = vmul.f32 %v17212_v63, %v15638_v3  ;;  %v5610_v20 = vpop.permute.xlu1 %5609  ;;  %v6854_v51 = vsel %vm4490_vm3, %v6852_v12, %v6853_v17  ;;  %v5939_v39 = vrot.slane %v5724_v11, 2  ;;  %v6637_v57 = vrot.slane %v6425_v40, 2 }
 0x9e0   : > { %v5608_v10 = vpop.permute.xlu0 %5607  ;;  %v6638_v22 = vrot.slane %v6427_v44, 2  ;;  %v5976_v1 = vsel %vm657_vm0, %v17263_v8, %v17262_v54  ;;  %v6640_v58 = vrot.slane %v6426_v5, 2  ;;  %v6641_v46 = vrot.slane %v6428_v26, 2 }
 0x9e1   : > { %v5624_v14 = vsel %vm657_vm0, %v5608_v10, %v5610_v20  ;;  %v5799_v63 = vrot.slane %v5681_v41, 2  ;;  %v5800_v12 = vrot.slane %v5683_v49, 2  ;;  %v6385_v17 = vmul.f32 %v15038_v38, %v17128_v13  ;;  %v17264_v10 = vld [vmem:[#allocation218_spill] sm:$0xff]  ;;  %v17265_v20 = vld [vmem:[#allocation179_spill] sm:$0xff] }
 0x9e2   : > { %v15663_v7 = vadd.f32 %v5624_v14, %v15507_v52  ;;  %6889 = vrot.lane.b32.xlu1 %v6854_v51, %s16746_s11  ;;  %v6330_v8 = vsel %vm1240_vm1, %v15339_v9, %v15341_v43  ;;  %v5802_v54 = vrot.slane %v5682_v31, 2  ;;  %v5803_v11 = vrot.slane %v5684_v24, 2 }
 0x9e3   : > { %6887 = vrot.lane.b32.xlu0 %v6851_v48, %s16746_s11  ;;  %v6387_v52 = vmul.f32 %v15051_v42, %v17128_v13  ;;  %v5992_v40 = vadd.f32 %v5976_v1, %v15594_v36  ;;  %v15677_v5 = vpop.permute.xlu1 %6313  ;;  %v5937_v41 = vsel %vm4490_vm3, %v5935_v34, %v5936_v25  ;;  %v5940_v38 = vsel %vm4490_vm3, %v5938_v50, %v5939_v39  ;;  %v8510_v48 = vld [vmem:[%s8854_s12 + $0xe0] sm:$0xfc]  ;;  %v8511_v42 = vld [vmem:[%s16169_s5 + $0xf] ss:$0 sm:$0xff]  ;;  %v8512_v1 = vld [vmem:[%s8854_s12 + $0xf0] sm:$0x3] }
 0x9e4   : > { %v15675_v44 = vpop.permute.xlu0 %6311  ;;  %v6639_v26 = vsel %vm4490_vm3, %v6637_v57, %v6638_v22  ;;  %v6684_v9 = vsel %vm1240_vm1, %v15540_v28, %v15542_v2  ;;  %v6642_v43 = vsel %vm4490_vm3, %v6640_v58, %v6641_v46  ;;  %v4625_v36 = vmul.f32 %v8511_v42, %v8510_v48 }
 0x9e5   : > { %v4626_v49 = vmul.f32 %v8512_v1, %v8511_v42  ;;  %v6346_v31 = vadd.f32 %v6330_v8, %v5992_v40  ;;  %v5801_v34 = vsel %vm4490_vm3, %v5799_v63, %v5800_v12  ;;  %v6501_v25 = vrot.slane %v6385_v17, 2  ;;  %v8515_v40 = vld [vmem:[%s8854_s12 + $0xf8] sm:$0x3] }
 0x9e6   : > { %5971 = vrot.lane.b32.xlu1 %v5940_v38, %s16966_s29  ;;  %v6386_v28 = vmul.f32 %v17128_v13, %v17255_v45  ;;  %v5804_v46 = vsel %vm4490_vm3, %v5802_v54, %v5803_v11  ;;  %v6502_v2 = vrot.slane %v6387_v52, 2  ;;  %v6388_v50 = vmul.f32 %v17128_v13, %v17256_v47  ;;  %v8513_v45 = vld [vmem:[%s16169_s5 + $0x18] ss:$0 sm:$0xff]  ;;  %v8514_v11 = vld [vmem:[%s8854_s12 + $0xe8] sm:$0xfc] }
 0x9e7   : > { %5969 = vrot.lane.b32.xlu0 %v5937_v41, %s16966_s29  ;;  %v6075_v24 = vmul.f32 %v8510_v48, %v17137_v32  ;;  %v5840_v51 = vsel %vm657_vm0, %v17265_v20, %v17264_v10  ;;  %v6700_v39 = vadd.f32 %v6684_v9, %v6346_v31  ;;  %v7018_v22 = vpop.permute.xlu1 %7017  ;;  %v6077_v14 = vmul.f32 %v8512_v1, %v17137_v32 }
 0x9e8   : > { %v7016_v57 = vpop.permute.xlu0 %7015  ;;  %v4779_v58 = vmul.f32 %v8513_v45, %v15227_v62  ;;  %v4719_v63 = vrot.slane %v4625_v36, 2  ;;  %v4720_v12 = vrot.slane %v4626_v49, 2  ;;  %v4780_v17 = vmul.f32 %v8513_v45, %v15233_v35 }
 0x9e9   : > { %v7038_v47 = vsel %vm1240_vm1, %v7016_v57, %v7018_v22  ;;  %v6504_v54 = vrot.slane %v6386_v28, 2  ;;  %v6076_v52 = vmul.f32 %v8514_v11, %v17137_v32  ;;  %v6078_v41 = vmul.f32 %v8515_v40, %v17137_v32 }
 0x9ea   : > { %v7054_v8 = vadd.f32 %v7038_v47, %v6700_v39  ;;  %6675 = vrot.lane.b32.xlu1 %v6642_v43, %s16746_s11  ;;  %v6503_v38 = vsel %vm4490_vm3, %v6501_v25, %v6502_v2  ;;  %v6505_v9 = vrot.slane %v6388_v50, 2  ;;  %v6289_v48 = vrot.slane %v6075_v24, 2  ;;  %v8517_v47 = vld [vmem:[%s8754_s28 + $0xe0] sm:$0xfc] }
 0x9eb   : > { %6673 = vrot.lane.b32.xlu0 %v6639_v26, %s16746_s11  ;;  %v6779_v42 = vmul.f32 %v17032_v16, %v15227_v62  ;;  %v5856_v36 = vadd.f32 %v5840_v51, %v15618_v27  ;;  %v15723_v26 = vld [vmem:[%s16170_s6] ss:$0 sm:$0xff]  ;;  %v5474_v49 = vpop.permute.xlu1 %5473  ;;  %v6290_v31 = vrot.slane %v6077_v14, 2  ;;  %v6781_v32 = vmul.f32 %v17032_v16, %v15233_v35  ;;  %v17266_v14 = vld [vmem:[#allocation123_spill] sm:$0xff] }
 0x9ec   : > { %v7100_v43 = vadd.f32 %v15723_v26, %v7054_v8  ;;  %v5472_v1 = vpop.permute.xlu0 %5471  ;;  %v4721_v28 = vsel %vm4490_vm3, %v4719_v63, %v4720_v12  ;;  %v4873_v2 = vrot.slane %v4779_v58, 2  ;;  %v4874_v50 = vrot.slane %v4780_v17, 2  ;;  %v8518_v17 = vld [vmem:[%s8754_s28 + $0xf0] sm:$0x3] }
 0x9ed   : > { %v5488_v25 = vsel %vm657_vm0, %v5472_v1, %v5474_v49  ;;  %v6292_v10 = vrot.slane %v6076_v52, 2  ;;  %v6293_v20 = vrot.slane %v6078_v41, 2  ;;  %v6194_v51 = vsel %vm1240_vm1, %v15422_v33, %v15424_v61  ;;  %v8519_v41 = vld [vmem:[%s8754_s28 + $0xe8] sm:$0xfc] }
 0x9ee   : > { %v15731_v27 = vadd.f32 %v5488_v25, %v15586_v30  ;;  %5835 = vrot.lane.b32.xlu1 %v5804_v46, %s16966_s29  ;;  %v7108_v24 = vmax.f32 %v7100_v43, 0.0  ;;  %v6991_v39 = vrot.slane %v6779_v42, 2  ;;  %v6780_v57 = vmul.f32 %v17032_v16, %v15247_v6 }
 0x9ef   : > { %5833 = vrot.lane.b32.xlu0 %v5801_v34, %s16966_s29  ;;  %v6782_v30 = vmul.f32 %v17032_v16, %v15255_v37  ;;  %v15744_v34 = vpop.permute.xlu1 %6177  ;;  %v4739_v45 = vadd.f32 %v4721_v28, %v17266_v14  ;;  %v6992_v58 = vrot.slane %v6781_v32, 2  ;;  %v6035_v63 = vmul.f32 %v8517_v47, %v17251_v60  ;;  %v17267_v14 = vld [vmem:[#allocation39_spill] sm:$0xff]  ;;  %s16077_s29 = scalar_lea.hbm %s16174_s10, %s16301_s25 }
 0x9f0   : > { %v15742_v22 = vpop.permute.xlu0 %6175  ;;  %v7116_v46 = vmin.f32 %v7108_v24, 6.0  ;;  %v6548_v33 = vsel %vm1240_vm1, %v15624_v19, %v15626_v0  ;;  %v6506_v61 = vsel %vm4490_vm3, %v6504_v54, %v6505_v9  ;;  %v4875_v12 = vsel %vm4490_vm3, %v4873_v2, %v4874_v50  ;;  %v8520_v9 = vld [vmem:[%s8754_s28 + $0xf8] sm:$0x3]  ;;  %s7748_s28 = sshll.u32 %s15984_s1, 4  ;;  %s16079_s28 = int_to_ptr.vmem [resolvable:$true] %s7748_s28 }
 0x9f1   : > { %v6037_v8 = vmul.f32 %v8518_v17, %v17251_v60  ;;  %v6210_v11 = vadd.f32 %v6194_v51, %v5856_v36  ;;  %v6291_v52 = vsel %vm4490_vm3, %v6289_v48, %v6290_v31  ;;  %v6294_v40 = vsel %vm4490_vm3, %v6292_v10, %v6293_v20  ;;  %s8522_s21 = scalar_lea.vmem %s16079_s28, 1024 }
 0x9f2   : > { %6539 = vrot.lane.b32.xlu1 %v6506_v61, %s16746_s11  ;;  %7353 = vmatprep.mubr.f32.mxu0 %v7116_v46  ;;  %v6994_v19 = vrot.slane %v6780_v57, 2  ;;  %v6995_v0 = vrot.slane %v6782_v30, 2  ;;  %v6036_v54 = vmul.f32 %v8519_v41, %v17251_v60  ;;  %v6038_v42 = vmul.f32 %v8520_v9, %v17251_v60  ;;  %p8523_p11 = scmp.ne.s32.totalorder %s16079_s28, %s8522_s21 }
 0x9f3   : > { %6537 = vrot.lane.b32.xlu0 %v6503_v38, %s16746_s11  ;;  %7466 = vmatprep.mubr.f32.mxu1 %v7116_v46  ;;  %v6564_v43 = vadd.f32 %v6548_v33, %v6210_v11  ;;  %v6882_v1 = vpop.permute.xlu1 %6881  ;;  %v4893_v38 = vadd.f32 %v4875_v12, %v4739_v45  ;;  %v6993_v49 = vsel %vm4490_vm3, %v6991_v39, %v6992_v58  ;;  %v6153_v32 = vrot.slane %v6035_v63, 2 }
 0x9f4   : > { %v6880_v36 = vpop.permute.xlu0 %6879  ;;  %v6154_v31 = vrot.slane %v6037_v8, 2  ;;  %v4605_v25 = vmul.f32 %v8517_v47, %v15381_v55  ;;  %v4606_v28 = vmul.f32 %v8518_v17, %v15381_v55  ;;  %v6739_v60 = vmul.f32 %v17252_v59, %v17230_v18  ;;  %v15781_v55 = vld [vmem:[%s16168_s4] ss:$0 sm:$0xff]  ;;  %p8524_p12 = pnand %p8523_p11, %p8718_p5 }
 0x9f5   : > { %v6902_v48 = vsel %vm1240_vm1, %v6880_v36, %v6882_v1  ;;  %v6741_v50 = vmul.f32 %v17252_v59, %v17231_v23  ;;  %v6156_v24 = vrot.slane %v6036_v54, 2  ;;  %v6157_v10 = vrot.slane %v6038_v42, 2 }
 0x9f6   : > { %v6918_v2 = vadd.f32 %v6902_v48, %v6564_v43  ;;  %6325 = vrot.lane.b32.xlu1 %v6294_v40, %s16746_s11  ;;  %v6740_v20 = vmul.f32 %v17252_v59, %v17238_v29  ;;  %v6742_v51 = vmul.f32 %v17252_v59, %v15314_v56  ;;  %v6996_v46 = vsel %vm4490_vm3, %v6994_v19, %v6995_v0  ;;  %p8525_p13 = pneg %p8524_p12 }
 0x9f7   : > { %6323 = vrot.lane.b32.xlu0 %v6291_v52, %s16746_s11  ;;  %v5260_v30 = vpop.permute.xlu1 %5259  ;;  %v4759_v45 = vmul.f32 %v17267_v14, %v17230_v18  ;;  %v4760_v58 = vmul.f32 %v17267_v14, %v17231_v23  ;;  %v6155_v63 = vsel %vm4490_vm3, %v6153_v32, %v6154_v31  ;;  %v4663_v33 = vrot.slane %v4605_v25, 2 }
 0x9f8   : > { %v7069_v39 = vadd.f32 %v15781_v55, %v6918_v2  ;;  %v5258_v57 = vpop.permute.xlu0 %5257  ;;  %v4664_v61 = vrot.slane %v4606_v28, 2  ;;  %v6855_v8 = vrot.slane %v6739_v60, 2  ;;  %v6856_v11 = vrot.slane %v6741_v50, 2 }
 0x9f9   : > { %v5271_v47 = vsel %vm657_vm0, %v5258_v57, %v5260_v30  ;;  %v6158_v52 = vsel %vm4490_vm3, %v6156_v24, %v6157_v10  ;;  %v6858_v40 = vrot.slane %v6740_v20, 2  ;;  %v6859_v19 = vrot.slane %v6742_v51, 2 }
 0x9fa   : > { %v15791_v12 = vadd.f32 %v5271_v47, %v4893_v38  ;;  %7029 = vrot.lane.b32.xlu1 %v6996_v46, %s16746_s11  ;;  %v7077_v17 = vmax.f32 %v7069_v39, 0.0  ;;  %v6429_v0 = vmul.f32 %v17260_v21, %v15227_v62  ;;  %v4817_v42 = vrot.slane %v4759_v45, 2  ;;  %v17269_v47 = vld [vmem:[#allocation81_spill] sm:$0xff] }
 0x9fb   : > { %7027 = vrot.lane.b32.xlu0 %v6993_v49, %s16746_s11  ;;  %v5964_v54 = vpop.permute.xlu1 %5963  ;;  %v4818_v43 = vrot.slane %v4760_v58, 2  ;;  %v6431_v36 = vmul.f32 %v17260_v21, %v15233_v35  ;;  %v4665_v38 = vsel %vm4490_vm3, %v4663_v33, %v4664_v61  ;;  %v6430_v49 = vmul.f32 %v17260_v21, %v15247_v6 }
 0x9fc   : > { %v5962_v41 = vpop.permute.xlu0 %5961  ;;  %v7085_v9 = vmin.f32 %v7077_v17, 6.0  ;;  %v6432_v32 = vmul.f32 %v17260_v21, %v15255_v37  ;;  %v6857_v48 = vsel %vm4490_vm3, %v6855_v8, %v6856_v11  ;;  %v6860_v35 = vsel %vm4490_vm3, %v6858_v40, %v6859_v19  ;;  %v17271_v19 = vld [vmem:[#allocation76_spill] sm:$0xff] }
 0x9fd   : > { %v5978_v1 = vsel %vm657_vm0, %v5962_v41, %v5964_v54  ;;  %v6389_v31 = vmul.f32 %v17128_v13, %v17230_v18  ;;  %v6391_v6 = vmul.f32 %v17128_v13, %v17231_v23  ;;  %v6643_v28 = vrot.slane %v6429_v0, 2  ;;  %v17272_v54 = vld [vmem:[#allocation96_spill] sm:$0xff] }
 0x9fe   : > { %v15807_v62 = vadd.f32 %v5978_v1, %v15663_v7  ;;  %6189 = vrot.lane.b32.xlu1 %v6158_v52, %s16746_s11  ;;  %7354 = vmatmul.mubr.f32.gmra.mrb[6].mxu0 %v7085_v9  ;;  %v17268_v7 = vld [vmem:[#allocation204_spill] sm:$0xff]  ;;  %v6390_v2 = vmul.f32 %v17128_v13, %v17238_v29  ;;  %v6392_v60 = vmul.f32 %v17128_v13, %v15314_v56  ;;  %v6644_v24 = vrot.slane %v6431_v36, 2 }
 0x9ff   : > { %6187 = vrot.lane.b32.xlu0 %v6155_v63, %s16746_s11  ;;  %7467 = vmatmul.mubr.f32.gmra.mrb[6].mxu1 %v7085_v9  ;;  %v15819_v21 = vpop.permute.xlu1 %6667  ;;  %v4683_v25 = vadd.f32 %v4665_v38, %v17268_v7  ;;  %v4819_v50 = vsel %vm4490_vm3, %v4817_v42, %v4818_v43  ;;  %v6646_v18 = vrot.slane %v6430_v49, 2  ;;  %v6647_v10 = vrot.slane %v6432_v32, 2  ;;  %v17270_v52 = vld [vmem:[#allocation84_spill] sm:$0xff] }
 0xa00   : > { %v15817_v37 = vpop.permute.xlu0 %6665  ;;  %v6507_v23 = vrot.slane %v6389_v31, 2  ;;  %v6508_v20 = vrot.slane %v6391_v6, 2  ;;  %v6783_v51 = vmul.f32 %v17032_v16, %v15483_v4  ;;  %v6785_v29 = vmul.f32 %v17032_v16, %v15490_v53 }
 0xa01   : > { %v4837_v57 = vadd.f32 %v4819_v50, %v4683_v25  ;;  %v6510_v56 = vrot.slane %v6390_v2, 2  ;;  %v6511_v30 = vrot.slane %v6392_v60, 2  ;;  %v6784_v46 = vmul.f32 %v17032_v16, %v15606_v15 }
 0xa02   : > { %6893 = vrot.lane.b32.xlu1 %v6860_v35, %s16746_s11  ;;  %v6645_v45 = vsel %vm4490_vm3, %v6643_v28, %v6644_v24  ;;  %v6648_v58 = vsel %vm4490_vm3, %v6646_v18, %v6647_v10  ;;  %v6786_v4 = vmul.f32 %v17032_v16, %v17269_v47  ;;  %v6509_v53 = vsel %vm4490_vm3, %v6507_v23, %v6508_v20  ;;  %v17273_v24 = vld [vmem:[#allocation80_spill] sm:$0xff] }
 0xa03   : > { %6891 = vrot.lane.b32.xlu0 %v6857_v48, %s16746_s11  ;;  %v5124_v13 = vpop.permute.xlu1 %5123  ;;  %v6997_v33 = vrot.slane %v6783_v51, 2  ;;  %v6998_v61 = vrot.slane %v6785_v29, 2  ;;  %v6512_v8 = vsel %vm4490_vm3, %v6510_v56, %v6511_v30  ;;  %v7000_v11 = vrot.slane %v6784_v46, 2 }
 0xa04   : > { %v5122_v39 = vpop.permute.xlu0 %5121  ;;  %v6743_v40 = vmul.f32 %v17252_v59, %v17270_v52  ;;  %v6745_v16 = vmul.f32 %v17252_v59, %v17271_v19  ;;  %v7001_v41 = vrot.slane %v6786_v4, 2  ;;  %v6744_v9 = vmul.f32 %v17252_v59, %v17272_v54 }
 0xa05   : > { %v5135_v14 = vsel %vm657_vm0, %v5122_v39, %v5124_v13  ;;  %v6746_v42 = vmul.f32 %v17252_v59, %v15638_v3  ;;  %v6999_v38 = vsel %vm4490_vm3, %v6997_v33, %v6998_v61  ;;  %v6331_v28 = vsel %vm1240_vm1, %v15675_v44, %v15677_v5 }
 0xa06   : > { %v5151_v63 = vadd.f32 %v5135_v14, %v4837_v57  ;;  %6679 = vrot.lane.b32.xlu1 %v6648_v58, %s16746_s11  ;;  %v6861_v49 = vrot.slane %v6743_v40, 2  ;;  %v7002_v32 = vsel %vm4490_vm3, %v7000_v11, %v7001_v41  ;;  %v6862_v48 = vrot.slane %v6745_v16, 2  ;;  %v17274_v14 = vld [vmem:[#allocation93_spill] sm:$0xff] }
 0xa07   : > { %6677 = vrot.lane.b32.xlu0 %v6645_v45, %s16746_s11  ;;  %v5828_v15 = vpop.permute.xlu1 %5827  ;;  %v6864_v35 = vrot.slane %v6744_v9, 2  ;;  %v6865_v31 = vrot.slane %v6746_v42, 2  ;;  %v6685_v50 = vsel %vm1240_vm1, %v15817_v37, %v15819_v21  ;;  %v6347_v18 = vadd.f32 %v6331_v28, %v17273_v24  ;;  %v17276_v9 = vld [vmem:[#allocation86_spill] sm:$0xff] }
 0xa08   : > { %v5826_v17 = vpop.permute.xlu0 %5825  ;;  %v6863_v6 = vsel %vm4490_vm3, %v6861_v49, %v6862_v48  ;;  %v6195_v37 = vsel %vm1240_vm1, %v15742_v22, %v15744_v34 }
 0xa09   : > { %v5842_v0 = vsel %vm657_vm0, %v5826_v17, %v5828_v15  ;;  %v6866_v7 = vsel %vm4490_vm3, %v6864_v35, %v6865_v31  ;;  %v6701_v10 = vadd.f32 %v6685_v50, %v6347_v18  ;;  %v6211_v45 = vadd.f32 %v6195_v37, %v17274_v14  ;;  %v17275_v17 = vld [vmem:[#allocation79_spill] sm:$0xff] }
 0xa0a   : > { %v15854_v43 = vadd.f32 %v5842_v0, %v15731_v27  ;;  %6543 = vrot.lane.b32.xlu1 %v6512_v8, %s16746_s11 }
 0xa0b   : > { %6541 = vrot.lane.b32.xlu0 %v6509_v53, %s16746_s11  ;;  %v6532_v1 = vpop.permute.xlu1 %6531 }
 0xa0c   : > { %v6530_v36 = vpop.permute.xlu0 %6529 }
 0xa0d   : > { %v6549_v46 = vsel %vm1240_vm1, %v6530_v36, %v6532_v1 }
 0xa0e   : > { %7033 = vrot.lane.b32.xlu1 %v7002_v32, %s16746_s11  ;;  %v6565_v58 = vadd.f32 %v6549_v46, %v6211_v45 }
 0xa0f   : > { %7031 = vrot.lane.b32.xlu0 %v6999_v38, %s16746_s11  ;;  %v5614_v3 = vpop.permute.xlu1 %5613  ;;  %v7251_v38 = vlaneseq }
 0xa10   : > { %v5612_v59 = vpop.permute.xlu0 %5611 }
 0xa11   : > { %v5625_v27 = vsel %vm657_vm0, %v5612_v59, %v5614_v3  ;;  %v7252_v48 = vshrl.u32 %v7251_v38, 7 }
 0xa12   : > { %v15866_v25 = vadd.f32 %v5625_v27, %v15791_v12  ;;  %6897 = vrot.lane.b32.xlu1 %v6866_v7, %s16746_s11  ;;  %v7249_v7 = vld [vmem:[%s16172_s8] sm:$0xf] }
 0xa13   : > { %6895 = vrot.lane.b32.xlu0 %v6863_v6, %s16746_s11  ;;  %v6318_v60 = vpop.permute.xlu1 %6317  ;;  %v7253_v3 = vsub.s32 0, %v7252_v48  ;;  %v7257_v28 = vsub.s32 1, %v7252_v48 }
 0xa14   : > { %v6316_v2 = vpop.permute.xlu0 %6315 }
 0xa15   : > { %v6332_v59 = vsel %vm1240_vm1, %v6316_v2, %v6318_v60  ;;  %v15923_v18 = vrot.slane %v7249_v7, %v7253_v3  ;;  %v15925_v2 = vrot.slane %v7249_v7, %v7257_v28 }
 0xa16   : > { %v6348_v24 = vadd.f32 %v6332_v59, %v15807_v62 }
 0xa17   : > { %v7022_v12 = vpop.permute.xlu1 %7021 }
 0xa18   : > { %v7020_v23 = vpop.permute.xlu0 %7019 }
 0xa19   : > { %v7039_v20 = vsel %vm1240_vm1, %v7020_v23, %v7022_v12 }
 0xa1a   : > { %v7055_v51 = vadd.f32 %v7039_v20, %v6701_v10 }
 0xa1b   : > { %v5478_v57 = vpop.permute.xlu1 %5477 }
 0xa1c   : > { %v7101_v29 = vadd.f32 %v15723_v26, %v7055_v51  ;;  %v5476_v39 = vpop.permute.xlu0 %5475 }
 0xa1d   : > { %v5489_v44 = vsel %vm657_vm0, %v5476_v39, %v5478_v57  ;;  %v7261_v57 = vsub.s32 2, %v7252_v48 }
 0xa1e   : > { %v15880_v5 = vadd.f32 %v5489_v44, %v5151_v63  ;;  %v7109_v13 = vmax.f32 %v7101_v29, 0.0 }
 0xa1f   : > { %v15887_v56 = vpop.permute.xlu1 %6181 }
 0xa20   : > { %v15885_v21 = vpop.permute.xlu0 %6179  ;;  %v7117_v30 = vmin.f32 %v7109_v13, 6.0 }
 0xa22   : > { %7359 = vmatprep.mubr.f32.mxu0 %v7117_v30  ;;  %7472 = vmatprep.mubr.f32.mxu1 %v7117_v30 }
 0xa23   : > { %v6886_v4 = vpop.permute.xlu1 %6885 }
 0xa24   : > { %v6884_v47 = vpop.permute.xlu0 %6883 }
 0xa25   : > { %v6903_v63 = vsel %vm1240_vm1, %v6884_v47, %v6886_v4  ;;  %v6196_v4 = vsel %vm1240_vm1, %v15885_v21, %v15887_v56 }
 0xa26   : > { %v6919_v53 = vadd.f32 %v6903_v63, %v6565_v58  ;;  %v7265_v58 = vsub.s32 3, %v7252_v48  ;;  %v15938_v63 = vrot.slane %v7249_v7, %v7261_v57 }
 0xa27   : > { %v5264_v34 = vpop.permute.xlu1 %5263 }
 0xa28   : > { %v7070_v33 = vadd.f32 %v15781_v55, %v6919_v53  ;;  %v5262_v22 = vpop.permute.xlu0 %5261 }
 0xa29   : > { %v5272_v61 = vsel %vm657_vm0, %v5262_v22, %v5264_v34 }
 0xa2a   : > { %v15895_v15 = vadd.f32 %v5272_v61, %v17275_v17  ;;  %v7078_v8 = vmax.f32 %v7070_v33, 0.0  ;;  %v6212_v61 = vadd.f32 %v6196_v4, %v15854_v43  ;;  %v15946_v17 = vrot.slane %v7249_v7, %v7265_v58 }
 0xa2b   : > { %v15899_v52 = vpop.permute.xlu1 %5967 }
 0xa2c   : > { %v15897_v11 = vpop.permute.xlu0 %5965  ;;  %v7086_v40 = vmin.f32 %v7078_v8, 6.0 }
 0xa2e   : > { %7360 = vmatmul.mubr.f32.gmra.mrb[8].mxu0 %v7086_v40  ;;  %7473 = vmatmul.mubr.f32.gmra.mrb[8].mxu1 %v7086_v40 }
 0xa2f   : > { %v6672_v16 = vpop.permute.xlu1 %6671 }
 0xa30   : > { %v6670_v19 = vpop.permute.xlu0 %6669 }
 0xa31   : > { %v6686_v50 = vsel %vm1240_vm1, %v6670_v19, %v6672_v16 }
 0xa32   : > { %v6702_v10 = vadd.f32 %v6686_v50, %v6348_v24 }
 0xa33   : > { %v5128_v41 = vpop.permute.xlu1 %5127 }
 0xa34   : > { %v5126_v0 = vpop.permute.xlu0 %5125 }
 0xa35   : > { %v5136_v54 = vsel %vm657_vm0, %v5126_v0, %v5128_v41 }
 0xa36   : > { %v15903_v42 = vadd.f32 %v5136_v54, %v17276_v9 }
 0xa37   : > { %v15907_v1 = vpop.permute.xlu1 %5831 }
 0xa38   : > { %v15905_v36 = vpop.permute.xlu0 %5829 }
 0xa3b   : > { %v6536_v32 = vpop.permute.xlu1 %6535 }
 0xa3c   : > { %v6534_v49 = vpop.permute.xlu0 %6533 }
 0xa3d   : > { %v6550_v34 = vsel %vm1240_vm1, %v6534_v49, %v6536_v32 }
 0xa3e   : > { %v6566_v21 = vadd.f32 %v6550_v34, %v6212_v61 }
 0xa3f   : > { %v15911_v31 = vpop.permute.xlu1 %5617 }
 0xa40   : > { %v15909_v35 = vpop.permute.xlu0 %5615 }
 0xa44   : > { %v15916_v6 = vpop.permute.xlu1 %6321 }
 0xa45   : > { %v15914_v27 = vpop.permute.xlu0 %6319 }
 0xa48   : > { %v7026_v12 = vpop.permute.xlu1 %7025 }
 0xa49   : > { %v7024_v23 = vpop.permute.xlu0 %7023  ;;  %v7337_v51 = vpop.f32.mrb[0].mxu0 }
 0xa4a   : > { %v7040_v60 = vsel %vm1240_vm1, %v7024_v23, %v7026_v12  ;;  %v7450_v29 = vpop.f32.mrb[0].mxu1  ;;  %v7338_v39 = vadd.f32 %v7337_v51, %v15923_v18  ;;  %v7339_v44 = vpop.f32.mrb[1].mxu0 }
 0xa4b   : > { %v7056_v20 = vadd.f32 %v7040_v60, %v6702_v10  ;;  %v7452_v13 = vpop.f32.mrb[1].mxu1  ;;  %v7340_v62 = vadd.f32 %v7339_v44, %v15925_v2  ;;  %v7451_v8 = vadd.f32 %v7450_v29, %v15938_v63  ;;  %v7649_v29 = vld [vmem:[%s15964_s26] sm:$0xff] }
 0xa4c   : > { %v15933_v46 = vpop.permute.xlu1 %5481  ;;  %v7932_v14 = vmul.f32 -1.442695, %v7338_v39  ;;  %v7453_v16 = vadd.f32 %v7452_v13, %v15946_v17  ;;  %v6333_v39 = vsel %vm1240_vm1, %v15914_v27, %v15916_v6  ;;  %v5843_v27 = vsel %vm657_vm0, %v15905_v36, %v15907_v1 }
 0xa4d   : > { %v7102_v37 = vadd.f32 %v15723_v26, %v7056_v20  ;;  %v15931_v30 = vpop.permute.xlu0 %5479  ;;  %v7940_v45 = vmul.f32 -1.442695, %v7340_v62  ;;  %v7948_v41 = vmul.f32 -1.442695, %v7451_v8  ;;  %v5979_v20 = vsel %vm657_vm0, %v15897_v11, %v15899_v52 }
 0xa4e   : > { %8145 = vpow2.f32 %v7932_v14  ;;  %v5995_v13 = vadd.f32 %v5979_v20, %v15866_v25  ;;  %v5859_v61 = vadd.f32 %v5843_v27, %v15880_v5 }
 0xa4f   : > { %v7110_v47 = vmax.f32 %v7102_v37, 0.0  ;;  %8147 = vpow2.f32 %v7940_v45 }
 0xa50   : > { %v15942_v33 = vpop.permute.xlu1 %6185  ;;  %8149 = vtanh.f32 %v7453_v16 }
 0xa51   : > { %v15940_v53 = vpop.permute.xlu0 %6183  ;;  %v7118_v22 = vmin.f32 %v7110_v47, 6.0  ;;  %8151 = vpow2.f32 %v7948_v41  ;;  %v6349_v47 = vadd.f32 %v6333_v39, %v5995_v13 }
 0xa52   : > { %v6197_v34 = vsel %vm1240_vm1, %v15940_v53, %v15942_v33  ;;  %v5626_v33 = vsel %vm657_vm0, %v15909_v35, %v15911_v31 }
 0xa53   : > { %7365 = vmatprep.mubr.f32.mxu0 %v7118_v22  ;;  %7478 = vmatprep.mubr.f32.mxu1 %v7118_v22  ;;  %v6213_v1 = vadd.f32 %v6197_v34, %v5859_v61 }
 0xa54   : > { %v6890_v40 = vpop.permute.xlu1 %6889 }
 0xa55   : > { %v6888_v56 = vpop.permute.xlu0 %6887 }
 0xa56   : > { %v6904_v19 = vsel %vm1240_vm1, %v6888_v56, %v6890_v40 }
 0xa57   : > { %v6920_v0 = vadd.f32 %v6904_v19, %v6566_v21 }
 0xa58   : > { %v15954_v43 = vpop.permute.xlu1 %5971  ;;  %v8146_v38 = vpop.eup %8145 }
 0xa59   : > { %v7071_v54 = vadd.f32 %v15781_v55, %v6920_v0  ;;  %v15952_v9 = vpop.permute.xlu0 %5969  ;;  %v7521_v49 = vadd.f32 1.0, %v8146_v38  ;;  %v8148_v48 = vpop.eup %8147 }
 0xa5a   : > { %v7569_v59 = vadd.f32 1.0, %v8148_v48  ;;  %v8150_v10 = vpop.eup %8149 }
 0xa5b   : > { %v7079_v32 = vmax.f32 %v7071_v54, 0.0  ;;  %8153 = vrcp.f32 %v7521_v49  ;;  %v8152_v60 = vpop.eup %8151 }
 0xa5c   : > { %v6676_v7 = vpop.permute.xlu1 %6675  ;;  %8155 = vrcp.f32 %v7569_v59  ;;  %v7617_v37 = vadd.f32 1.0, %v8152_v60  ;;  %v5980_v60 = vsel %vm657_vm0, %v15952_v9, %v15954_v43 }
 0xa5d   : > { %v6674_v3 = vpop.permute.xlu0 %6673  ;;  %v7087_v28 = vmin.f32 %v7079_v32, 6.0 }
 0xa5e   : > { %v6687_v58 = vsel %vm1240_vm1, %v6674_v3, %v6676_v7  ;;  %8157 = vrcp.f32 %v7617_v37 }
 0xa5f   : > { %7366 = vmatmul.mubr.f32.gmra.mrb[10].mxu0 %v7087_v28  ;;  %7479 = vmatmul.mubr.f32.gmra.mrb[10].mxu1 %v7087_v28  ;;  %v6703_v52 = vadd.f32 %v6687_v58, %v6349_v47 }
 0xa60   : > { %v15959_v24 = vpop.permute.xlu1 %5835 }
 0xa61   : > { %v15957_v50 = vpop.permute.xlu0 %5833 }
 0xa64   : > { %v6540_v12 = vpop.permute.xlu1 %6539 }
 0xa65   : > { %v6538_v23 = vpop.permute.xlu0 %6537  ;;  %v8154_v51 = vpop.eup %8153 }
 0xa66   : > { %v7665_v57 = vmul.f32 %v8154_v51, %v8150_v10  ;;  %v8156_v44 = vpop.eup %8155  ;;  %v6551_v36 = vsel %vm1240_vm1, %v6538_v23, %v6540_v12  ;;  %v5642_v51 = vadd.f32 %v5626_v33, %v15895_v15  ;;  %v5844_v15 = vsel %vm657_vm0, %v15957_v50, %v15959_v24 }
 0xa67   : > { %v7657_v45 = vmul.f32 %v8156_v44, %v7649_v29  ;;  %v6567_v19 = vadd.f32 %v6551_v36, %v6213_v1  ;;  %v5490_v29 = vsel %vm657_vm0, %v15931_v30, %v15933_v46 }
 0xa68   : > { %v6326_v14 = vpop.permute.xlu1 %6325  ;;  %v8158_v38 = vpop.eup %8157  ;;  %v5506_v37 = vadd.f32 %v5490_v29, %v15903_v42 }
 0xa69   : > { %v6324_v62 = vpop.permute.xlu0 %6323  ;;  %v7673_v11 = vadd.f32 %v7665_v57, %v7657_v45  ;;  %v5996_v57 = vadd.f32 %v5980_v60, %v5642_v51 }
 0xa6a   : > { %v6334_v39 = vsel %vm1240_vm1, %v6324_v62, %v6326_v14  ;;  %v5860_v62 = vadd.f32 %v5844_v15, %v5506_v37 }
 0xa6b   : > { %8159 = vtanh.f32 %v7673_v11  ;;  %7705 = vst [vmem:[%s15984_s1] sm:$0xff] %v7673_v11  ;;  %v6350_v45 = vadd.f32 %v6334_v39, %v5996_v57 }
 0xa6c   : > { %v7030_v22 = vpop.permute.xlu1 %7029 }
 0xa6d   : > { %v7028_v4 = vpop.permute.xlu0 %7027 }
 0xa6e   : > { %v7041_v25 = vsel %vm1240_vm1, %v7028_v4, %v7030_v22 }
 0xa6f   : > { %v7057_v6 = vadd.f32 %v7041_v25, %v6703_v52 }
 0xa70   : > { %v6190_v56 = vpop.permute.xlu1 %6189 }
 0xa71   : > { %v7103_v8 = vadd.f32 %v15723_v26, %v7057_v6  ;;  %v6188_v21 = vpop.permute.xlu0 %6187 }
 0xa72   : > { %v6198_v30 = vsel %vm1240_vm1, %v6188_v21, %v6190_v56 }
 0xa73   : > { %v7111_v40 = vmax.f32 %v7103_v8, 0.0  ;;  %v6214_v24 = vadd.f32 %v6198_v30, %v5860_v62 }
 0xa74   : > { %v6894_v0 = vpop.permute.xlu1 %6893 }
 0xa75   : > { %v6892_v16 = vpop.permute.xlu0 %6891  ;;  %v7119_v41 = vmin.f32 %v7111_v40, 6.0  ;;  %v7343_v32 = vpop.f32.mrb[2].mxu0 }
 0xa76   : > { %v6905_v54 = vsel %vm1240_vm1, %v6892_v16, %v6894_v0  ;;  %v7456_v53 = vpop.f32.mrb[2].mxu1  ;;  %v8160_v5 = vpop.eup %8159  ;;  %v7344_v48 = vadd.f32 %v7343_v32, %v15923_v18 }
 0xa77   : > { %v6921_v49 = vadd.f32 %v6905_v54, %v6567_v19  ;;  %7371 = vmatprep.mubr.f32.mxu0 %v7119_v41  ;;  %7484 = vmatprep.mubr.f32.mxu1 %v7119_v41  ;;  %v7345_v59 = vpop.f32.mrb[3].mxu0  ;;  %v7458_v3 = vpop.f32.mrb[3].mxu1  ;;  %v7689_v7 = vmul.f32 %v8160_v5, %v8158_v38  ;;  %v7457_v46 = vadd.f32 %v7456_v53, %v15938_v63  ;;  %v7650_v38 = vld [vmem:[%s15964_s26 + $0x8] sm:$0xff] }
 0xa78   : > { %v7346_v10 = vadd.f32 %v7345_v59, %v15925_v2  ;;  %v6680_v12 = vpop.permute.xlu1 %6679  ;;  %v7933_v20 = vmul.f32 -1.442695, %v7344_v48  ;;  %v7459_v52 = vadd.f32 %v7458_v3, %v15946_v17 }
 0xa79   : > { %v7072_v28 = vadd.f32 %v15781_v55, %v6921_v49  ;;  %v6678_v23 = vpop.permute.xlu0 %6677  ;;  %7697 = vst [vmem:[%s16007_s30] sm:$0xff] %v7689_v7  ;;  %v7949_v42 = vmul.f32 -1.442695, %v7457_v46 }
 0xa7a   : > { %v7941_v35 = vmul.f32 -1.442695, %v7346_v10  ;;  %8161 = vpow2.f32 %v7933_v20  ;;  %v6688_v13 = vsel %vm1240_vm1, %v6678_v23, %v6680_v12 }
 0xa7b   : > { %v7080_v31 = vmax.f32 %v7072_v28, 0.0  ;;  %v6704_v14 = vadd.f32 %v6688_v13, %v6350_v45  ;;  %v7651_v13 = vld [vmem:[%s15964_s26 + $0x10] sm:$0xff] }
 0xa7c   : > { %v6544_v9 = vpop.permute.xlu1 %6543  ;;  %8163 = vpow2.f32 %v7941_v35 }
 0xa7d   : > { %v6542_v44 = vpop.permute.xlu0 %6541  ;;  %v7088_v43 = vmin.f32 %v7080_v31, 6.0  ;;  %8165 = vtanh.f32 %v7459_v52 }
 0xa7e   : > { %v6552_v11 = vsel %vm1240_vm1, %v6542_v44, %v6544_v9  ;;  %8167 = vpow2.f32 %v7949_v42 }
 0xa7f   : > { %7372 = vmatmul.mubr.f32.gmra.mrb[12].mxu0 %v7088_v43  ;;  %7485 = vmatmul.mubr.f32.gmra.mrb[12].mxu1 %v7088_v43  ;;  %v6568_v22 = vadd.f32 %v6552_v11, %v6214_v24 }
 0xa80   : > { %v7034_v47 = vpop.permute.xlu1 %7033 }
 0xa81   : > { %v7032_v58 = vpop.permute.xlu0 %7031 }
 0xa82   : > { %v7042_v50 = vsel %vm1240_vm1, %v7032_v58, %v7034_v47 }
 0xa83   : > { %v7058_v4 = vadd.f32 %v7042_v50, %v6704_v14 }
 0xa84   : > { %v6898_v6 = vpop.permute.xlu1 %6897  ;;  %v8162_v34 = vpop.eup %8161 }
 0xa85   : > { %v7104_v27 = vadd.f32 %v15723_v26, %v7058_v4  ;;  %v6896_v25 = vpop.permute.xlu0 %6895  ;;  %v7522_v8 = vadd.f32 1.0, %v8162_v34 }
 0xa86   : > { %v6906_v61 = vsel %vm1240_vm1, %v6896_v25, %v6898_v6  ;;  %v8164_v36 = vpop.eup %8163 }
 0xa87   : > { %v6922_v21 = vadd.f32 %v6906_v61, %v6568_v22  ;;  %v7112_v56 = vmax.f32 %v7104_v27, 0.0  ;;  %8169 = vrcp.f32 %v7522_v8  ;;  %v7570_v1 = vadd.f32 1.0, %v8164_v36  ;;  %v8166_v0 = vpop.eup %8165 }
 0xa88   : > { %v8168_v41 = vpop.eup %8167 }
 0xa89   : > { %v7073_v40 = vadd.f32 %v15781_v55, %v6922_v21  ;;  %v7120_v19 = vmin.f32 %v7112_v56, 6.0  ;;  %8171 = vrcp.f32 %v7570_v1  ;;  %v7618_v53 = vadd.f32 1.0, %v8168_v41 }
 0xa8b   : > { %7377 = vmatprep.mubr.f32.mxu0 %v7120_v19  ;;  %7490 = vmatprep.mubr.f32.mxu1 %v7120_v19  ;;  %v7081_v26 = vmax.f32 %v7073_v40, 0.0  ;;  %8173 = vrcp.f32 %v7618_v53  ;;  %v7652_v19 = vld [vmem:[%s15964_s26 + $0x18] sm:$0xff] }
 0xa8d   : > { %v7089_v16 = vmin.f32 %v7081_v26, 6.0 }
 0xa8f   : > { %7378 = vmatmul.mubr.f32.gmra.mrb[14].mxu0 %v7089_v16  ;;  %7491 = vmatmul.mubr.f32.gmra.mrb[14].mxu1 %v7089_v16 }
 0xa91   : > { %v8170_v54 = vpop.eup %8169 }
 0xa92   : > { %v7666_v49 = vmul.f32 %v8170_v54, %v8166_v0 }
 0xa93   : > { %v8172_v32 = vpop.eup %8171 }
 0xa94   : > { %v7658_v5 = vmul.f32 %v8172_v32, %v7650_v38 }
 0xa95   : > { %v8174_v55 = vpop.eup %8173 }
 0xa96   : > { %v7674_v33 = vadd.f32 %v7666_v49, %v7658_v5 }
 0xa98   : > { %8175 = vtanh.f32 %v7674_v33  ;;  %7706 = vst [vmem:[%s15984_s1 + $0x8] sm:$0xff] %v7674_v33 }
 0xaa1   : > { %v7349_v48 = vpop.f32.mrb[4].mxu0 }
 0xaa2   : > { %v7462_v59 = vpop.f32.mrb[4].mxu1  ;;  %v8176_v3 = vpop.eup %8175  ;;  %v7350_v7 = vadd.f32 %v7349_v48, %v15923_v18 }
 0xaa3   : > { %v7351_v28 = vpop.f32.mrb[5].mxu0  ;;  %v7464_v10 = vpop.f32.mrb[5].mxu1  ;;  %v7690_v23 = vmul.f32 %v8176_v3, %v8174_v55  ;;  %v7463_v51 = vadd.f32 %v7462_v59, %v15938_v63 }
 0xaa4   : > { %v7352_v12 = vadd.f32 %v7351_v28, %v15925_v2  ;;  %v7934_v60 = vmul.f32 -1.442695, %v7350_v7  ;;  %v7465_v35 = vadd.f32 %v7464_v10, %v15946_v17 }
 0xaa5   : > { %7698 = vst [vmem:[%s16007_s30 + $0x8] sm:$0xff] %v7690_v23  ;;  %v7950_v31 = vmul.f32 -1.442695, %v7463_v51 }
 0xaa6   : > { %v7942_v20 = vmul.f32 -1.442695, %v7352_v12  ;;  %8177 = vpow2.f32 %v7934_v60 }
 0xaa8   : > { %8179 = vpow2.f32 %v7942_v20 }
 0xaa9   : > { %8181 = vtanh.f32 %v7465_v35 }
 0xaaa   : > { %8183 = vpow2.f32 %v7950_v31 }
 0xab0   : > { %v8178_v29 = vpop.eup %8177 }
 0xab1   : > { %v7523_v39 = vadd.f32 1.0, %v8178_v29 }
 0xab2   : > { %v8180_v57 = vpop.eup %8179 }
 0xab3   : > { %8185 = vrcp.f32 %v7523_v39  ;;  %v7571_v44 = vadd.f32 1.0, %v8180_v57  ;;  %v8182_v9 = vpop.eup %8181  ;;  %v7653_v39 = vld [vmem:[%s15964_s26 + $0x20] sm:$0xff] }
 0xab4   : > { %v8184_v43 = vpop.eup %8183 }
 0xab5   : > { %8187 = vrcp.f32 %v7571_v44  ;;  %v7619_v30 = vadd.f32 1.0, %v8184_v43 }
 0xab7   : > { %8189 = vrcp.f32 %v7619_v30 }
 0xabd   : > { %v8186_v15 = vpop.eup %8185 }
 0xabe   : > { %v7667_v37 = vmul.f32 %v8186_v15, %v8182_v9 }
 0xabf   : > { %v8188_v45 = vpop.eup %8187 }
 0xac0   : > { %v7659_v46 = vmul.f32 %v8188_v45, %v7651_v13 }
 0xac1   : > { %v8190_v14 = vpop.eup %8189 }
 0xac2   : > { %v7675_v62 = vadd.f32 %v7667_v37, %v7659_v46 }
 0xac4   : > { %8191 = vtanh.f32 %v7675_v62  ;;  %7707 = vst [vmem:[%s15984_s1 + $0x10] sm:$0xff] %v7675_v62 }
 0xace   : > { %v8192_v58 = vpop.eup %8191 }
 0xacf   : > { %v7691_v47 = vmul.f32 %v8192_v58, %v8190_v14 }
 0xad1   : > { %7699 = vst [vmem:[%s16007_s30 + $0x10] sm:$0xff] %v7691_v47  ;;  %v7355_v11 = vpop.f32.mrb[6].mxu0 }
 0xad2   : > { %v7468_v50 = vpop.f32.mrb[6].mxu1  ;;  %v7356_v24 = vadd.f32 %v7355_v11, %v15923_v18  ;;  %v7357_v52 = vpop.f32.mrb[7].mxu0 }
 0xad3   : > { %v7470_v4 = vpop.f32.mrb[7].mxu1  ;;  %v7358_v42 = vadd.f32 %v7357_v52, %v15925_v2  ;;  %v7469_v25 = vadd.f32 %v7468_v50, %v15938_v63 }
 0xad4   : > { %v7935_v22 = vmul.f32 -1.442695, %v7356_v24  ;;  %v7471_v6 = vadd.f32 %v7470_v4, %v15946_v17 }
 0xad5   : > { %v7943_v27 = vmul.f32 -1.442695, %v7358_v42  ;;  %v7951_v34 = vmul.f32 -1.442695, %v7469_v25 }
 0xad6   : > { %8193 = vpow2.f32 %v7935_v22 }
 0xad7   : > { %8195 = vpow2.f32 %v7943_v27 }
 0xad8   : > { %8197 = vtanh.f32 %v7471_v6 }
 0xad9   : > { %8199 = vpow2.f32 %v7951_v34 }
 0xae0   : > { %v8194_v61 = vpop.eup %8193 }
 0xae1   : > { %v7524_v8 = vadd.f32 1.0, %v8194_v61  ;;  %v8196_v21 = vpop.eup %8195 }
 0xae2   : > { %v7572_v56 = vadd.f32 1.0, %v8196_v21  ;;  %v8198_v36 = vpop.eup %8197 }
 0xae3   : > { %8201 = vrcp.f32 %v7524_v8  ;;  %v8200_v1 = vpop.eup %8199  ;;  %v7654_v8 = vld [vmem:[%s15964_s26 + $0x28] sm:$0xff] }
 0xae4   : > { %8203 = vrcp.f32 %v7572_v56  ;;  %v7620_v0 = vadd.f32 1.0, %v8200_v1 }
 0xae6   : > { %8205 = vrcp.f32 %v7620_v0 }
 0xaed   : > { %v8202_v40 = vpop.eup %8201 }
 0xaee   : > { %v7668_v26 = vmul.f32 %v8202_v40, %v8198_v36  ;;  %v8204_v16 = vpop.eup %8203 }
 0xaef   : > { %v7660_v41 = vmul.f32 %v8204_v16, %v7652_v19 }
 0xaf0   : > { %v8206_v38 = vpop.eup %8205 }
 0xaf1   : > { %v7676_v54 = vadd.f32 %v7668_v26, %v7660_v41 }
 0xaf3   : > { %8207 = vtanh.f32 %v7676_v54  ;;  %7708 = vst [vmem:[%s15984_s1 + $0x18] sm:$0xff] %v7676_v54 }
 0xafd   : > { %v8208_v49 = vpop.eup %8207 }
 0xafe   : > { %v7692_v32 = vmul.f32 %v8208_v49, %v8206_v38 }
 0xb00   : > { %7700 = vst [vmem:[%s16007_s30 + $0x18] sm:$0xff] %v7692_v32 }
 0xb01   : > { %v7361_v53 = vpop.f32.mrb[8].mxu0  ;;  %v7474_v5 = vpop.f32.mrb[8].mxu1 }
 0xb02   : > { %v7362_v33 = vadd.f32 %v7361_v53, %v15923_v18  ;;  %v7363_v55 = vpop.f32.mrb[9].mxu0  ;;  %v7476_v48 = vpop.f32.mrb[9].mxu1  ;;  %v7475_v28 = vadd.f32 %v7474_v5, %v15938_v63 }
 0xb03   : > { %v7364_v59 = vadd.f32 %v7363_v55, %v15925_v2  ;;  %v7477_v10 = vadd.f32 %v7476_v48, %v15946_v17 }
 0xb04   : > { %v7936_v3 = vmul.f32 -1.442695, %v7362_v33  ;;  %v7952_v23 = vmul.f32 -1.442695, %v7475_v28 }
 0xb05   : > { %v7944_v7 = vmul.f32 -1.442695, %v7364_v59 }
 0xb06   : > { %8209 = vpow2.f32 %v7936_v3 }
 0xb07   : > { %8211 = vpow2.f32 %v7944_v7 }
 0xb08   : > { %8213 = vtanh.f32 %v7477_v10 }
 0xb09   : > { %8215 = vpow2.f32 %v7952_v23 }
 0xb10   : > { %v8210_v12 = vpop.eup %8209 }
 0xb11   : > { %v7525_v60 = vadd.f32 1.0, %v8210_v12  ;;  %v8212_v20 = vpop.eup %8211 }
 0xb12   : > { %v7573_v51 = vadd.f32 1.0, %v8212_v20  ;;  %v8214_v35 = vpop.eup %8213 }
 0xb13   : > { %8217 = vrcp.f32 %v7525_v60  ;;  %v8216_v31 = vpop.eup %8215 }
 0xb14   : > { %8219 = vrcp.f32 %v7573_v51  ;;  %v7621_v9 = vadd.f32 1.0, %v8216_v31 }
 0xb16   : > { %8221 = vrcp.f32 %v7621_v9 }
 0xb1d   : > { %v8218_v29 = vpop.eup %8217 }
 0xb1e   : > { %v7669_v57 = vmul.f32 %v8218_v29, %v8214_v35  ;;  %v8220_v44 = vpop.eup %8219 }
 0xb1f   : > { %v7661_v43 = vmul.f32 %v8220_v44, %v7653_v39 }
 0xb20   : > { %v8222_v13 = vpop.eup %8221 }
 0xb21   : > { %v7677_v15 = vadd.f32 %v7669_v57, %v7661_v43  ;;  %v7655_v43 = vld [vmem:[%s15964_s26 + $0x30] sm:$0xff] }
 0xb23   : > { %8223 = vtanh.f32 %v7677_v15  ;;  %7709 = vst [vmem:[%s15984_s1 + $0x20] sm:$0xff] %v7677_v15 }
 0xb2d   : > { %v8224_v37 = vpop.eup %8223 }
 0xb2e   : > { %v7693_v45 = vmul.f32 %v8224_v37, %v8222_v13 }
 0xb30   : > { %7701 = vst [vmem:[%s16007_s30 + $0x20] sm:$0xff] %v7693_v45 }
 0xb32   : > { %v7367_v30 = vpop.f32.mrb[10].mxu0  ;;  %v7480_v46 = vpop.f32.mrb[10].mxu1 }
 0xb33   : > { %v7368_v62 = vadd.f32 %v7367_v30, %v15923_v18  ;;  %v7369_v14 = vpop.f32.mrb[11].mxu0  ;;  %v7482_v58 = vpop.f32.mrb[11].mxu1  ;;  %v7481_v24 = vadd.f32 %v7480_v46, %v15938_v63 }
 0xb34   : > { %v7370_v47 = vadd.f32 %v7369_v14, %v15925_v2  ;;  %v7483_v52 = vadd.f32 %v7482_v58, %v15946_v17 }
 0xb35   : > { %v7937_v11 = vmul.f32 -1.442695, %v7368_v62  ;;  %v7953_v4 = vmul.f32 -1.442695, %v7481_v24 }
 0xb36   : > { %v7945_v50 = vmul.f32 -1.442695, %v7370_v47 }
 0xb37   : > { %8225 = vpow2.f32 %v7937_v11 }
 0xb38   : > { %8227 = vpow2.f32 %v7945_v50  ;;  %v7656_v50 = vld [vmem:[%s15964_s26 + $0x38] sm:$0xff]  ;;  %s8526_s26 = sshll.u32 %s8622_s18, 4  ;;  %s8527_s26 = int_to_ptr.vmem [resolvable:$false] %s8526_s26 }
 0xb39   : > { %8229 = vtanh.f32 %v7483_v52  ;;  %s8528_s20 = scalar_lea.vmem %s8527_s26, 2048  ;;  %p8529_p0 = scmp.lt.s32.totalorder %s16079_s28, %s8527_s26 }
 0xb3a   : > { %8231 = vpow2.f32 %v7953_v4  ;;  %p8530_p1 = scmp.lt.s32.totalorder %s8528_s20, %s8522_s21 }
 0xb3c   : > { %p8531_p2 = por %p8530_p1, %p8529_p0 }
 0xb3e   : > { %p8532_p3 = pnand %p8531_p2, %p8525_p13 }
 0xb41   : > { %v8226_v42 = vpop.eup %8225 }
 0xb42   : > { %v7526_v22 = vadd.f32 1.0, %v8226_v42  ;;  %v8228_v27 = vpop.eup %8227 }
 0xb43   : > { %v7574_v25 = vadd.f32 1.0, %v8228_v27  ;;  %v8230_v6 = vpop.eup %8229 }
 0xb44   : > { %8233 = vrcp.f32 %v7526_v22  ;;  %v8232_v34 = vpop.eup %8231 }
 0xb45   : > { %8235 = vrcp.f32 %v7574_v25  ;;  %v7622_v36 = vadd.f32 1.0, %v8232_v34 }
 0xb47   : > { %8237 = vrcp.f32 %v7622_v36 }
 0xb4e   : > { %v8234_v61 = vpop.eup %8233 }
 0xb4f   : > { %v7670_v21 = vmul.f32 %v8234_v61, %v8230_v6  ;;  %v8236_v56 = vpop.eup %8235 }
 0xb50   : > { %v7662_v1 = vmul.f32 %v8236_v56, %v7654_v8 }
 0xb51   : > { %v8238_v5 = vpop.eup %8237 }
 0xb52   : > { %v7373_v40 = vpop.f32.mrb[12].mxu0  ;;  %v7486_v19 = vpop.f32.mrb[12].mxu1  ;;  %v7678_v26 = vadd.f32 %v7670_v21, %v7662_v1 }
 0xb53   : > { %v7374_v16 = vadd.f32 %v7373_v40, %v15923_v18  ;;  %v7375_v0 = vpop.f32.mrb[13].mxu0  ;;  %v7488_v41 = vpop.f32.mrb[13].mxu1  ;;  %v7487_v32 = vadd.f32 %v7486_v19, %v15938_v63 }
 0xb54   : > { %v7376_v54 = vadd.f32 %v7375_v0, %v15925_v2  ;;  %8239 = vtanh.f32 %v7678_v26  ;;  %7710 = vst [vmem:[%s15984_s1 + $0x28] sm:$0xff] %v7678_v26  ;;  %v7489_v55 = vadd.f32 %v7488_v41, %v15946_v17 }
 0xb55   : > { %v7938_v38 = vmul.f32 -1.442695, %v7374_v16  ;;  %v7954_v53 = vmul.f32 -1.442695, %v7487_v32 }
 0xb56   : > { %v7946_v49 = vmul.f32 -1.442695, %v7376_v54 }
 0xb57   : > { %8241 = vpow2.f32 %v7938_v38 }
 0xb58   : > { %8243 = vpow2.f32 %v7946_v49 }
 0xb59   : > { %8245 = vpow2.f32 %v7954_v53 }
 0xb5a   : > { %8247 = vtanh.f32 %v7489_v55 }
 0xb5e   : > { %v8240_v33 = vpop.eup %8239 }
 0xb5f   : > { %v7694_v48 = vmul.f32 %v8240_v33, %v8238_v5 }
 0xb61   : > { %v8242_v59 = vpop.eup %8241  ;;  %7702 = vst [vmem:[%s16007_s30 + $0x28] sm:$0xff] %v7694_v48 }
 0xb62   : > { %v7527_v3 = vadd.f32 1.0, %v8242_v59  ;;  %v7379_v7 = vpop.f32.mrb[14].mxu0  ;;  %v7492_v28 = vpop.f32.mrb[14].mxu1 }
 0xb63   : > { %v8244_v10 = vpop.eup %8243  ;;  %v7380_v23 = vadd.f32 %v7379_v7, %v15923_v18  ;;  %v7381_v12 = vpop.f32.mrb[15].mxu0  ;;  %v7493_v39 = vadd.f32 %v7492_v28, %v15938_v63 }
 0xb64   : > { %v7494_v60 = vpop.f32.mrb[15].mxu1  ;;  %8249 = vrcp.f32 %v7527_v3  ;;  %v7575_v20 = vadd.f32 1.0, %v8244_v10  ;;  %v7382_v51 = vadd.f32 %v7381_v12, %v15925_v2  ;;  %v8246_v29 = vpop.eup %8245 }
 0xb65   : > { %v7939_v35 = vmul.f32 -1.442695, %v7380_v23  ;;  %v8248_v57 = vpop.eup %8247  ;;  %v7623_v44 = vadd.f32 1.0, %v8246_v29  ;;  %v7955_v18 = vmul.f32 -1.442695, %v7493_v39  ;;  %v7495_v13 = vadd.f32 %v7494_v60, %v15946_v17 }
 0xb66   : > { %8251 = vrcp.f32 %v7575_v20  ;;  %v7947_v31 = vmul.f32 -1.442695, %v7382_v51 }
 0xb67   : > { %8253 = vpow2.f32 %v7939_v35 }
 0xb68   : > { %8255 = vpow2.f32 %v7947_v31 }
 0xb69   : > { %8257 = vrcp.f32 %v7623_v44 }
 0xb6a   : > { %8259 = vpow2.f32 %v7955_v18 }
 0xb6b   : > { %8261 = vtanh.f32 %v7495_v13 }
 0xb6e   : > { %v8250_v9 = vpop.eup %8249 }
 0xb6f   : > { %v7671_v15 = vmul.f32 %v8250_v9, %v8248_v57 }
 0xb70   : > { %v8252_v37 = vpop.eup %8251 }
 0xb71   : > { %v8254_v45 = vpop.eup %8253  ;;  %v7663_v2 = vmul.f32 %v8252_v37, %v7655_v43 }
 0xb72   : > { %v7528_v30 = vadd.f32 1.0, %v8254_v45  ;;  %v8256_v46 = vpop.eup %8255 }
 0xb73   : > { %v7679_v62 = vadd.f32 %v7671_v15, %v7663_v2  ;;  %v7576_v63 = vadd.f32 1.0, %v8256_v46  ;;  %v8258_v17 = vpop.eup %8257 }
 0xb74   : > { %8263 = vrcp.f32 %v7528_v30  ;;  %v8260_v14 = vpop.eup %8259 }
 0xb75   : > { %8265 = vtanh.f32 %v7679_v62  ;;  %7711 = vst [vmem:[%s15984_s1 + $0x30] sm:$0xff] %v7679_v62  ;;  %v8262_v58 = vpop.eup %8261  ;;  %v7624_v42 = vadd.f32 1.0, %v8260_v14 }
 0xb76   : > { %8267 = vrcp.f32 %v7576_v63 }
 0xb77   : > { %8269 = vrcp.f32 %v7624_v42 }
 0xb7e   : > { %v8264_v47 = vpop.eup %8263 }
 0xb7f   : > { %v8266_v11 = vpop.eup %8265  ;;  %v7672_v24 = vmul.f32 %v8264_v47, %v8262_v58 }
 0xb80   : > { %v7695_v52 = vmul.f32 %v8266_v11, %v8258_v17  ;;  %v8268_v4 = vpop.eup %8267 }
 0xb81   : > { %v7664_v22 = vmul.f32 %v8268_v4, %v7656_v50 }
 0xb82   : > { %7703 = vst [vmem:[%s16007_s30 + $0x30] sm:$0xff] %v7695_v52 }
 0xb83   : > { %v7680_v27 = vadd.f32 %v7672_v24, %v7664_v22 }
 0xb85   : > { %8271 = vtanh.f32 %v7680_v27  ;;  %7712 = vst [vmem:[%s15984_s1 + $0x38] sm:$0xff] %v7680_v27 }
 0xb86   : > { %8535 = shalt.err (!%p8532_p3)
}
 0xb87   : > { %s8536_s1 = scalar_lea.hbm %s16077_s29, 1024  ;;  %s8540_s18 = scalar_lea.hbm %s16174_s10, 2048 }
 0xb88   : > { %p8537_p4 = scmp.ne.s32.totalorder %s16077_s29, %s8536_s1  ;;  %p8541_p9 = scmp.lt.u32.totalorder %s16077_s29, %s16174_s10 }
 0xb89   : > { %p8542_p10 = scmp.lt.u32.totalorder %s8540_s18, %s8536_s1  ;;  %p8544_p12 = scmp.lt.u32.totalorder %s8536_s1, %s16077_s29 }
 0xb8a   : > { %p8538_p7 = pnand %p8537_p4, %p8718_p5 }
 0xb8b   : > { %p8543_p11 = por %p8542_p10, %p8541_p9 }
 0xb8c   : > { %p8539_p8 = pneg %p8538_p7 }
 0xb8d   : > { %p8545_p13 = por %p8544_p12, %p8543_p11 }
 0xb8f   : > { %p8546_p0 = pnand %p8545_p13, %p8539_p8 }
 0xb91   : > { %8549 = shalt.err (!%p8546_p0)
}
 0xb92   : > { %s8623_s21 = smov 128   ;;  %s17278_s20 = smov 8   ;;  %v8270_v25 = vpop.eup %8269 }
 0xb93   : > { %8097 = dma.vmem_to_hbm [thread:$0]  (%p8718_p5), %s16079_s28, 1024, %s16077_s29, %s7719_s27, %s8623_s21, %s8623_s21, %s17278_s20   ;;  %v8272_v6 = vpop.eup %8271 }
 0xb94   : > { %s7732_s25 = sshll.u32 %s16007_s30, 4  ;;  %v7696_v34 = vmul.f32 %v8272_v6, %v8270_v25  ;;  %s17279_s1 = sshll.u32 %s8701_s17, 10  ;;  %s16117_s25 = int_to_ptr.vmem [resolvable:$true] %s7732_s25 }
 0xb95   : > { %s16115_s18 = scalar_lea.hbm %s16173_s9, %s17279_s1  ;;  %s7714_s26 = scalar_lea.sflag [#allocation3], %s15967_s0 }
 0xb96   : > { %7704 = vst [vmem:[%s16007_s30 + $0x38] sm:$0xff] %v7696_v34  ;;  %s8550_s2 = scalar_lea.vmem %s16117_s25, 1024  ;;  %s8624_s28 = smov [#allocation2]  }
 0xb97   : > { %p8551_p1 = scmp.ne.s32.totalorder %s16117_s25, %s8550_s2  ;;  %s8554_s29 = sshll.u32 %s8624_s28, 4  ;;  %s8555_s29 = int_to_ptr.vmem [resolvable:$false] %s8554_s29 }
 0xb98   : > { %s8556_s17 = scalar_lea.vmem %s8555_s29, 2048  ;;  %p8557_p4 = scmp.lt.s32.totalorder %s16117_s25, %s8555_s29 }
 0xb99   : > { %p8552_p2 = pnand %p8551_p1, %p8718_p5  ;;  %p8558_p7 = scmp.lt.s32.totalorder %s8556_s17, %s8550_s2 }
 0xb9b   : > { %p8553_p3 = pneg %p8552_p2  ;;  %p8559_p8 = por %p8558_p7, %p8557_p4 }
 0xb9d   : > { %p8560_p9 = pnand %p8559_p8, %p8553_p3 }
 0xb9f   : > { %8563 = shalt.err (!%p8560_p9)
}
 0xba0   : > { %s8564_s30 = scalar_lea.hbm %s16115_s18, 1024  ;;  %s8568_s12 = scalar_lea.hbm %s16173_s9, 2048 }
 0xba1   : > { %p8565_p10 = scmp.ne.s32.totalorder %s16115_s18, %s8564_s30  ;;  %p8569_p13 = scmp.lt.u32.totalorder %s16115_s18, %s16173_s9 }
 0xba2   : > { %p8570_p0 = scmp.lt.u32.totalorder %s8568_s12, %s8564_s30  ;;  %p8572_p2 = scmp.lt.u32.totalorder %s8564_s30, %s16115_s18 }
 0xba3   : > { %p8566_p11 = pnand %p8565_p10, %p8718_p5 }
 0xba4   : > { %p8571_p1 = por %p8570_p0, %p8569_p13 }
 0xba5   : > { %p8567_p12 = pneg %p8566_p11 }
 0xba6   : > { %p8573_p3 = por %p8572_p2, %p8571_p1 }
 0xba8   : > { %p8574_p4 = pnand %p8573_p3, %p8567_p12 }
 0xbaa   : > { %8577 = shalt.err (!%p8574_p4)
}
 0xbab   : > { %8096 = dma.vmem_to_hbm [thread:$0]  (%p8718_p5), %s16117_s25, 1024, %s16115_s18, %s7714_s26, %s8623_s21, %s8623_s21, %s17278_s20  }
 0xbac PF: > { %p8107_p7 = scmp.ge.s32.totalorder %s8616_s16, 2  ;;  %s7763_s2 = sand.u32 1, %s8604_s13  }
 0xbad   : > { %s7764_s29 = scalar_lea.sflag [#allocation3], %s7763_s2 }
 0xbae   : > { %p8101_p8 = pnand %p8107_p7, %p8722_p6 }
 0xbb0   : > { %8595 = dma.done.wait (!%p8101_p8), %s7764_s29, 1024  }
 0xbb1   : > { %8597 = vsyncadd (!%p8101_p8), %s7764_s29, 4294966272  ;;  %s7773_s23 = scalar_lea.sflag [#allocation5], %s7763_s2 }
 0xbb2   : > { %8599 = dma.done.wait (!%p8101_p8), %s7773_s23, 1024  }
 0xbb3   : > { %8601 = vsyncadd (!%p8101_p8), %s7773_s23, 4294966272  ;;  %p24_p5 = scmp.ge.s32.totalorder %s8705_s19, 4   ;;  %s17280_s13 = smov %s8608_s14 }
 0xbb4   : > { %s17281_s14 = smov %s8612_s15  ;;  %s17282_s15 = smov %s8716_s22 }
 0xbb5   : > { %s17283_s16 = smov %s8705_s19  ;;  %26 = sbr.rel (!%p24_p5) target bundleno = 9 (0x9), region = 114 }
 0xbbc   :  { %7778 = vsyncpa [#allocation3], 1 }
 0xbbd   :  { %7780 = vsyncpa [#allocation3 + $0x1], 1 }
 0xbbe   :  { %7781 = vsyncpa [#allocation5], 1 }
 0xbbf   :  { %7783 = vsyncpa [#allocation5 + $0x1], 1 }

</bundles_post_ra>
